<compile_context>
chip_gen: v6e
topology: v6e:2x2x1
jax: 0.10.0
libtpu: 0.0.40
codegen_flags: <defaults>
</compile_context>

<pallas_src>
import functools

import jax
import jax.numpy as jnp
from jax import lax
from jax.experimental import pallas as pl
from jax.experimental.pallas import tpu as pltpu


# ----------------------------------------------------------------------------
# Shared conv body: 3x3 valid conv + bias + ReLU, optional fused 2x2 max-pool.
# Works on any (H, W, Cin) ref (pipelined input block or VMEM scratch).
# ----------------------------------------------------------------------------
def _conv_body(x_ref, w_ref, b_ref, o_ref, row_ref, *, pool):
    # x_ref : (H, W, Cin)          bf16/f32 ref
    # w_ref : (3, 3*Cin, Cout)     bf16 ref, (dy, dx*Cin+cin, cout) order
    # b_ref : (1, Cout)            f32 ref
    # o_ref : (Ho//2, Wo//2, Cout) if pool else (Ho, Wo, Cout)
    # row_ref: (Wo, Cout) f32 VMEM scratch (H-pooled conv row; pool path only)
    H, W, _ = x_ref.shape
    Cout = o_ref.shape[-1]
    Ho, Wo = H - 2, W - 2

    def conv_row(r):
        # One conv output row: the 3 dx taps are folded into one K=3*Cin
        # matmul per dy (3 MXU calls per row instead of 9).
        acc = jnp.zeros((Wo, Cout), jnp.float32)
        for dy in range(3):
            row = x_ref[r + dy].astype(jnp.float32)          # one load per dy
            lhs = jnp.concatenate(                           # (Wo, 3*Cin)
                [row[0:Wo], row[1:Wo + 1], row[2:Wo + 2]], axis=-1)
            acc = acc + jnp.dot(lhs.astype(jnp.bfloat16), w_ref[dy],
                                preferred_element_type=jnp.float32)
        return acc

    if pool:
        Hp, Wp, _ = o_ref.shape
        bias = jnp.broadcast_to(b_ref[...], (Wp, Cout))      # hoisted

        def body(p, carry):
            r = 2 * p
            # H-pool: max of the two conv rows (via scratch to limit vregs).
            row_ref[...] = conv_row(r)
            row_ref[...] = jnp.maximum(row_ref[...], conv_row(r + 1))
            # W-pool: stride-2 reads of the scratch row (pure VPU max).
            even = row_ref[pl.ds(0, Wp, stride=2), :]
            odd = row_ref[pl.ds(1, Wp, stride=2), :]
            # relu(max(.) + b) == pool(relu(. + b)): bias is per-channel
            # uniform over the window and relu / +const are monotone.
            o_ref[p] = jnp.maximum(jnp.maximum(even, odd) + bias,
                                   0.0).astype(o_ref.dtype)
            return carry

        lax.fori_loop(0, Hp, body, 0)
    else:
        bias = jnp.broadcast_to(b_ref[...], (Wo, Cout))      # hoisted

        def body(t, carry):
            r = 2 * t
            o_ref[r] = jnp.maximum(conv_row(r) + bias, 0.0).astype(o_ref.dtype)
            o_ref[r + 1] = jnp.maximum(conv_row(r + 1) + bias,
                                       0.0).astype(o_ref.dtype)
            return carry

        lax.fori_loop(0, Ho // 2, body, 0)
        if Ho % 2:                                    # static tail (unused)
            o_ref[Ho - 1] = jnp.maximum(conv_row(Ho - 1) + bias,
                                        0.0).astype(o_ref.dtype)


# ----------------------------------------------------------------------------
# Single conv layer (used for conv2): conv + ReLU (+ fused max-pool)
# ----------------------------------------------------------------------------
def _conv3x3_kernel(x_ref, w_ref, b_ref, o_ref, row_ref, *, pool):
    _conv_body(x_ref, w_ref, b_ref, o_ref, row_ref, pool=pool)


def conv3x3(x, w, b, *, pool):
    """x: (N,H,W,Cin) bf16, w: (3,3*Cin,Cout) bf16, b: (1,Cout) f32."""
    N, H, W, Cin = x.shape
    Cout = w.shape[-1]
    Ho, Wo = H - 2, W - 2
    if pool:
        assert Ho % 2 == 0 and Wo % 2 == 0, (Ho, Wo)
        Hout, Wout = Ho // 2, Wo // 2
    else:
        Hout, Wout = Ho, Wo
    return pl.pallas_call(
        functools.partial(_conv3x3_kernel, pool=pool),
        out_shape=jax.ShapeDtypeStruct((N, Hout, Wout, Cout), jnp.bfloat16),
        grid_spec=pltpu.PrefetchScalarGridSpec(
            num_scalar_prefetch=0,
            grid=(N,),
            in_specs=[
                pl.BlockSpec((None, H, W, Cin), lambda n: (n, 0, 0, 0)),
                pl.BlockSpec((3, 3 * Cin, Cout), lambda n: (0, 0, 0)),
                pl.BlockSpec((1, Cout), lambda n: (0, 0)),
            ],
            out_specs=pl.BlockSpec((None, Hout, Wout, Cout),
                                   lambda n: (n, 0, 0, 0)),
            scratch_shapes=[pltpu.VMEM((Wo, Cout), jnp.float32)],
        ),
        compiler_params=pltpu.CompilerParams(
            dimension_semantics=("parallel",),
            vmem_limit_bytes=16 * 1024 * 1024,
        ),
    )(x, w, b)


# ----------------------------------------------------------------------------
# Fused conv pair (conv3+conv4, conv5+conv6): conv+ReLU -> conv+ReLU+maxpool2
# with the full-resolution intermediate held in VMEM (never touches HBM).
# ----------------------------------------------------------------------------
def _conv_pair_kernel(x_ref, w1_ref, b1_ref, w2_ref, b2_ref, o_ref,
                      mid_ref, row_ref):
    _conv_body(x_ref, w1_ref, b1_ref, mid_ref, None, pool=False)
    _conv_body(mid_ref, w2_ref, b2_ref, o_ref, row_ref, pool=True)


def conv3x3_pair(x, w1, b1, w2, b2):
    N, H, W, Cin = x.shape
    Cmid = w1.shape[-1]
    Cout = w2.shape[-1]
    H1, W1 = H - 2, W - 2            # intermediate (full-res) activation
    H2, W2 = H1 - 2, W1 - 2          # pre-pool output of the second conv
    assert H2 % 2 == 0 and W2 % 2 == 0, (H2, W2)
    Hp, Wp = H2 // 2, W2 // 2
    return pl.pallas_call(
        _conv_pair_kernel,
        out_shape=jax.ShapeDtypeStruct((N, Hp, Wp, Cout), jnp.bfloat16),
        grid_spec=pltpu.PrefetchScalarGridSpec(
            num_scalar_prefetch=0,
            grid=(N,),
            in_specs=[
                pl.BlockSpec((None, H, W, Cin), lambda n: (n, 0, 0, 0)),
                pl.BlockSpec((3, 3 * Cin, Cmid), lambda n: (0, 0, 0)),
                pl.BlockSpec((1, Cmid), lambda n: (0, 0)),
                pl.BlockSpec((3, 3 * Cmid, Cout), lambda n: (0, 0, 0)),
                pl.BlockSpec((1, Cout), lambda n: (0, 0)),
            ],
            out_specs=pl.BlockSpec((None, Hp, Wp, Cout),
                                   lambda n: (n, 0, 0, 0)),
            scratch_shapes=[
                pltpu.VMEM((H1, W1, Cmid), jnp.float32),   # intermediate act
                pltpu.VMEM((W2, Cout), jnp.float32),       # pooled conv row
            ],
        ),
        compiler_params=pltpu.CompilerParams(
            dimension_semantics=("parallel",),
            vmem_limit_bytes=16 * 1024 * 1024,
        ),
    )(x, w1, b1, w2, b2)


# ----------------------------------------------------------------------------
# conv1: wrapper-side 9-tap im2col (K=27) + one matmul per conv row, fused
# ReLU + 2x2 max-pool.  Avoids the Cin=3 lane-padding blow-up entirely.
# ----------------------------------------------------------------------------
def _conv1_kernel(x_ref, w_ref, b_ref, o_ref, row_ref):
    # x_ref : (2*HpB, Wo, 27) bf16   im2col conv rows for this block
    # w_ref : (27, Cout) bf16 ; b_ref: (1, Cout) f32
    # o_ref : (HpB, Wp, Cout) bf16 ; row_ref: (Wo, Cout) f32
    HpB, Wp, Cout = o_ref.shape
    bias = jnp.broadcast_to(b_ref[...], (Wp, Cout))

    def body(p, carry):
        r = 2 * p
        row_ref[...] = jnp.dot(x_ref[r], w_ref[...],
                               preferred_element_type=jnp.float32)
        row_ref[...] = jnp.maximum(
            row_ref[...], jnp.dot(x_ref[r + 1], w_ref[...],
                                  preferred_element_type=jnp.float32))
        even = row_ref[pl.ds(0, Wp, stride=2), :]
        odd = row_ref[pl.ds(1, Wp, stride=2), :]
        o_ref[p] = jnp.maximum(jnp.maximum(even, odd) + bias,
                               0.0).astype(o_ref.dtype)
        return carry

    lax.fori_loop(0, HpB, body, 0)


def conv1_pool(x, w, b, *, row_blocks=2):
    """x: (N,H,W,3) f32, w: (27,Cout) bf16, b: (1,Cout) f32."""
    N, H, W, C = x.shape
    Ho, Wo = H - 2, W - 2
    assert Ho % 2 == 0 and Wo % 2 == 0, (Ho, Wo)
    Hp, Wp = Ho // 2, Wo // 2
    Cout = w.shape[-1]
    # 9-tap im2col in plain JAX: channel order (dy*3+dx)*C + c matches w.
    xb = x.astype(jnp.bfloat16)
    cols = jnp.concatenate(
        [xb[:, dy:dy + Ho, dx:dx + Wo, :]
         for dy in range(3) for dx in range(3)], axis=-1)     # (N,Ho,Wo,27)
    assert Hp % row_blocks == 0
    hb = Hp // row_blocks
    return pl.pallas_call(
        _conv1_kernel,
        out_shape=jax.ShapeDtypeStruct((N, Hp, Wp, Cout), jnp.bfloat16),
        grid_spec=pltpu.PrefetchScalarGridSpec(
            num_scalar_prefetch=0,
            grid=(N, row_blocks),
            in_specs=[
                pl.BlockSpec((None, 2 * hb, Wo, 9 * C),
                             lambda n, h: (n, h, 0, 0)),
                pl.BlockSpec((9 * C, Cout), lambda n, h: (0, 0)),
                pl.BlockSpec((1, Cout), lambda n, h: (0, 0)),
            ],
            out_specs=pl.BlockSpec((None, hb, Wp, Cout),
                                   lambda n, h: (n, h, 0, 0)),
            scratch_shapes=[pltpu.VMEM((Wo, Cout), jnp.float32)],
        ),
        compiler_params=pltpu.CompilerParams(
            dimension_semantics=("parallel", "parallel"),
            vmem_limit_bytes=24 * 1024 * 1024,
        ),
    )(cols, w, b)


# ----------------------------------------------------------------------------
# Fused MLP head: fc1 (K-tiled, bf16 weights) -> ReLU -> fc2 (VPU) -> sigmoid
# ----------------------------------------------------------------------------
_FC1_TILE_K = 2304   # 4608 / 2: two big K tiles instead of nine small ones


def _mlp_head_kernel(x_ref, w1_ref, b1_ref, w2_ref, b2_ref, o_ref, acc_ref):
    k = pl.program_id(0)

    @pl.when(k == 0)
    def _():
        acc_ref[...] = jnp.zeros_like(acc_ref)

    acc_ref[...] += jnp.dot(x_ref[...], w1_ref[...],
                            preferred_element_type=jnp.float32)

    @pl.when(k == pl.num_programs(0) - 1)
    def _():
        h = jnp.maximum(acc_ref[...] + b1_ref[...], 0.0)        # fc1 + ReLU
        # fc2 as a lane-friendly VPU multiply + lane reduce (w2 is (1, 512)).
        y = jnp.sum(h * w2_ref[...], axis=-1, keepdims=True) + b2_ref[...]
        o_ref[...] = 1.0 / (1.0 + jnp.exp(-y))                  # sigmoid


def mlp_head(xf, w1, b1, w2, b2):
    """xf: (N,K) bf16, w1: (K,H1) bf16, b1: (1,H1) f32,
       w2: (1,H1) f32, b2: (1,1) f32  ->  (N,1) f32."""
    N, K = xf.shape
    H1 = w1.shape[1]
    assert K % _FC1_TILE_K == 0
    nk = K // _FC1_TILE_K
    return pl.pallas_call(
        _mlp_head_kernel,
        out_shape=jax.ShapeDtypeStruct((N, 1), jnp.float32),
        grid_spec=pltpu.PrefetchScalarGridSpec(
            num_scalar_prefetch=0,
            grid=(nk,),
            in_specs=[
                pl.BlockSpec((N, _FC1_TILE_K), lambda k: (0, k)),
                pl.BlockSpec((_FC1_TILE_K, H1), lambda k: (k, 0)),
                pl.BlockSpec((1, H1), lambda k: (0, 0)),
                pl.BlockSpec((1, H1), lambda k: (0, 0)),
                pl.BlockSpec((1, 1), lambda k: (0, 0)),
            ],
            out_specs=pl.BlockSpec((N, 1), lambda k: (0, 0)),
            scratch_shapes=[pltpu.VMEM((N, H1), jnp.float32)],
        ),
        compiler_params=pltpu.CompilerParams(
            dimension_semantics=("arbitrary",),
            vmem_limit_bytes=16 * 1024 * 1024,
        ),
    )(xf, w1, b1, w2, b2)


# ----------------------------------------------------------------------------
# Parameters (deterministic, PyTorch-default-style uniform init)
# ----------------------------------------------------------------------------
def init_params(key):
    def conv_p(k, cin, cout, *, fold_all=False):
        kw, kb = jax.random.split(k)
        bound = 1.0 / (cin * 9) ** 0.5
        w = jax.random.uniform(kw, (3, 3, cin, cout), jnp.float32, -bound, bound)
        b = jax.random.uniform(kb, (1, cout), jnp.float32, -bound, bound)
        if fold_all:                      # conv1: all 9 taps folded (K=27)
            w = w.reshape(9 * cin, cout)
        else:                             # conv2-6: per-dy fold (K=3*Cin)
            w = w.reshape(3, 3 * cin, cout)
        return w.astype(jnp.bfloat16), b

    def fc1_p(k, fin, fout):
        kw, kb = jax.random.split(k)
        bound = 1.0 / fin ** 0.5
        w = jax.random.uniform(kw, (fin, fout), jnp.float32, -bound, bound)
        b = jax.random.uniform(kb, (1, fout), jnp.float32, -bound, bound)
        return w.astype(jnp.bfloat16), b

    def fc2_p(k, fin):
        kw, kb = jax.random.split(k)
        bound = 1.0 / fin ** 0.5
        w = jax.random.uniform(kw, (1, fin), jnp.float32, -bound, bound)
        b = jax.random.uniform(kb, (1, 1), jnp.float32, -bound, bound)
        return w, b                       # f32 row vector (VPU reduce in-kernel)

    ks = jax.random.split(key, 8)
    return {
        "conv1": conv_p(ks[0], 3, 32, fold_all=True),
        "conv2": conv_p(ks[1], 32, 64),
        "conv3": conv_p(ks[2], 64, 64),
        "conv4": conv_p(ks[3], 64, 64),
        "conv5": conv_p(ks[4], 64, 128),
        "conv6": conv_p(ks[5], 128, 128),
        "fc1": fc1_p(ks[6], 4608, 512),
        "fc2": fc2_p(ks[7], 512),
    }


# ----------------------------------------------------------------------------
# Full forward pass (mirrors ConvNet.forward)
# ----------------------------------------------------------------------------
def convnet_forward(params, x_nchw):
    # NCHW (PyTorch) -> NHWC (kernel layout)
    x = jnp.transpose(x_nchw, (0, 2, 3, 1)).astype(jnp.float32)
    x = conv1_pool(x, *params["conv1"])                      # 150->148->74, C=32
    x = conv3x3(x, *params["conv2"], pool=True)              # 74->72->36,  C=64
    x = conv3x3_pair(x, *params["conv3"], *params["conv4"])  # 36->34->32->16, C=64
    x = conv3x3_pair(x, *params["conv5"], *params["conv6"])  # 16->14->12->6,  C=128
    n = x.shape[0]
    # Flatten in PyTorch's NCHW (C,H,W) order to match x.view(in_size, -1).
    xf = jnp.transpose(x, (0, 3, 1, 2)).reshape(n, -1)       # (N, 4608) bf16
    return mlp_head(xf, *params["fc1"], *params["fc2"])      # (N, 1) f32


if __name__ == "__main__":
    key = jax.random.PRNGKey(0)
    kx, kp = jax.random.split(key)
    # 150x150 input is implied by fc1.in_features = 4608 = 128*6*6.
    x = jax.random.normal(kx, (2, 3, 150, 150), dtype=jnp.float32)
    params = init_params(kp)
    out = jax.jit(convnet_forward)(params, x)
    out = jax.block_until_ready(out)
    assert out.shape == (2, 1), out.shape
    assert bool(jnp.all((out >= 0.0) & (out <= 1.0)))
    print("KERNEL_OK")
</pallas_src>

<mosaic_0001>
module attributes {stable_mosaic.version = 11 : i64} {
  func.func @_conv1_kernel(%arg0: i32, %arg1: i32, %arg2: memref<1x74x148x27xbf16, #tpu.memory_space<vmem>>, %arg3: memref<27x32xbf16, #tpu.memory_space<vmem>>, %arg4: memref<1x32xf32, #tpu.memory_space<vmem>>, %arg5: memref<1x37x74x32xbf16, #tpu.memory_space<vmem>>, %arg6: memref<148x32xf32, #tpu.memory_space<vmem>>) attributes {dimension_semantics = [#tpu.dimension_semantics<parallel>, #tpu.dimension_semantics<parallel>], iteration_bounds = array<i64: 2, 2>, scalar_prefetch = 0 : i64, scratch_operands = 1 : i64, tpu.core_type = #tpu.core_type<tc>, window_params = [{transform_indices = @transform_0, window_bounds = array<i64: 1, 74, 148, 27>}, {pipeline_mode = #tpu.pipeline_mode<synchronous>, transform_indices = @transform_1, window_bounds = array<i64: 27, 32>}, {pipeline_mode = #tpu.pipeline_mode<synchronous>, transform_indices = @transform_2, window_bounds = array<i64: 1, 32>}, {transform_indices = @transform_3, window_bounds = array<i64: 1, 37, 74, 32>}]} {
    %c0 = arith.constant 0 : index
    %c0_0 = arith.constant 0 : index
    %0 = vector.load %arg4[%c0, %c0_0] : memref<1x32xf32, #tpu.memory_space<vmem>>, vector<1x32xf32>
    %1 = vector.shape_cast %0 : vector<1x32xf32> to vector<1x32xf32>
    %2 = vector.broadcast %1 : vector<1x32xf32> to vector<74x32xf32>
    %c0_i32 = arith.constant 0 : i32
    %c37_i32 = arith.constant 37 : i32
    %3 = arith.addi %c0_i32, %c37_i32 : i32
    %c1_i32 = arith.constant 1 : i32
    scf.for %arg7 = %c0_i32 to %3 step %c1_i32  : i32 {
      %c2_i32 = arith.constant 2 : i32
      %4 = arith.muli %c2_i32, %arg7 : i32
      %c0_2 = arith.constant 0 : index
      %5 = arith.index_cast %4 : i32 to index
      %c0_3 = arith.constant 0 : index
      %c0_4 = arith.constant 0 : index
      %6 = vector.load %arg2[%c0_2, %5, %c0_3, %c0_4] : memref<1x74x148x27xbf16, #tpu.memory_space<vmem>>, vector<1x1x148x27xbf16>
      %7 = vector.shape_cast %6 : vector<1x1x148x27xbf16> to vector<148x27xbf16>
      %c0_5 = arith.constant 0 : index
      %c0_6 = arith.constant 0 : index
      %8 = vector.load %arg3[%c0_5, %c0_6] : memref<27x32xbf16, #tpu.memory_space<vmem>>, vector<27x32xbf16>
      %cst = arith.constant dense<0.000000e+00> : vector<148x32xf32>
      %9 = tpu.matmul %7, %8, %cst {dimension_numbers = #tpu.dot_dimension_numbers<[1], [0], [0], [1], [0, 0, 1, 1], [], []>} : vector<148x27xbf16>, vector<27x32xbf16>, vector<148x32xf32> -> vector<148x32xf32>
      %c0_7 = arith.constant 0 : index
      %c0_8 = arith.constant 0 : index
      %10 = vector.load %arg6[%c0_7, %c0_8] : memref<148x32xf32, #tpu.memory_space<vmem>>, vector<148x32xf32>
      tpu.vector_store %arg6[%c0_7, %c0_8], %9 {strides = array<i32>} : memref<148x32xf32, #tpu.memory_space<vmem>>, vector<148x32xf32>,
      %c0_9 = arith.constant 0 : index
      %c0_10 = arith.constant 0 : index
      %11 = vector.load %arg6[%c0_9, %c0_10] : memref<148x32xf32, #tpu.memory_space<vmem>>, vector<148x32xf32>
      %c1_i32_11 = arith.constant 1 : i32
      %12 = arith.addi %4, %c1_i32_11 : i32
      %c0_12 = arith.constant 0 : index
      %13 = arith.index_cast %12 : i32 to index
      %c0_13 = arith.constant 0 : index
      %c0_14 = arith.constant 0 : index
      %14 = vector.load %arg2[%c0_12, %13, %c0_13, %c0_14] : memref<1x74x148x27xbf16, #tpu.memory_space<vmem>>, vector<1x1x148x27xbf16>
      %15 = vector.shape_cast %14 : vector<1x1x148x27xbf16> to vector<148x27xbf16>
      %c0_15 = arith.constant 0 : index
      %c0_16 = arith.constant 0 : index
      %16 = vector.load %arg3[%c0_15, %c0_16] : memref<27x32xbf16, #tpu.memory_space<vmem>>, vector<27x32xbf16>
      %cst_17 = arith.constant dense<0.000000e+00> : vector<148x32xf32>
      %17 = tpu.matmul %15, %16, %cst_17 {dimension_numbers = #tpu.dot_dimension_numbers<[1], [0], [0], [1], [0, 0, 1, 1], [], []>} : vector<148x27xbf16>, vector<27x32xbf16>, vector<148x32xf32> -> vector<148x32xf32>
      %18 = arith.maximumf %11, %17 : vector<148x32xf32>
      %c0_18 = arith.constant 0 : index
      %c0_19 = arith.constant 0 : index
      %19 = vector.load %arg6[%c0_18, %c0_19] : memref<148x32xf32, #tpu.memory_space<vmem>>, vector<148x32xf32>
      tpu.vector_store %arg6[%c0_18, %c0_19], %18 {strides = array<i32>} : memref<148x32xf32, #tpu.memory_space<vmem>>, vector<148x32xf32>,
      %c0_20 = arith.constant 0 : index
      %c0_21 = arith.constant 0 : index
      %20 = tpu.strided_load %arg6[%c0_20, %c0_21] {strides = array<i32: 2, 1>} : memref<148x32xf32, #tpu.memory_space<vmem>>, vector<74x32xf32>
      %c1 = arith.constant 1 : index
      %c0_22 = arith.constant 0 : index
      %21 = tpu.strided_load %arg6[%c1, %c0_22] {strides = array<i32: 2, 1>} : memref<148x32xf32, #tpu.memory_space<vmem>>, vector<74x32xf32>
      %22 = arith.maximumf %20, %21 : vector<74x32xf32>
      %23 = arith.addf %22, %2 : vector<74x32xf32>
      %cst_23 = arith.constant 0.000000e+00 : f32
      %24 = vector.broadcast %cst_23 : f32 to vector<74x32xf32>
      %25 = arith.maximumf %23, %24 : vector<74x32xf32>
      %26 = arith.truncf %25 : vector<74x32xf32> to vector<74x32xbf16>
      %c0_24 = arith.constant 0 : index
      %27 = arith.index_cast %arg7 : i32 to index
      %c0_25 = arith.constant 0 : index
      %c0_26 = arith.constant 0 : index
      %28 = vector.load %arg5[%c0_24, %27, %c0_25, %c0_26] : memref<1x37x74x32xbf16, #tpu.memory_space<vmem>>, vector<1x1x74x32xbf16>
      %29 = vector.shape_cast %28 : vector<1x1x74x32xbf16> to vector<74x32xbf16>
      %30 = vector.shape_cast %26 : vector<74x32xbf16> to vector<1x1x74x32xbf16>
      tpu.vector_store %arg5[%c0_24, %27, %c0_25, %c0_26], %30 {strides = array<i32>} : memref<1x37x74x32xbf16, #tpu.memory_space<vmem>>, vector<1x1x74x32xbf16>,
    }
    %c37_i32_1 = arith.constant 37 : i32
    return
  }
  func.func @transform_0(%arg0: i32, %arg1: i32) -> (i32, i32, i32, i32) {
    %c0_i32 = arith.constant 0 : i32
    %c0_i32_0 = arith.constant 0 : i32
    %c0_i32_1 = arith.constant 0 : i32
    return %arg0, %arg1, %c0_i32, %c0_i32_0 : i32, i32, i32, i32
  }
  func.func @transform_1(%arg0: i32, %arg1: i32) -> (i32, i32) {
    %c0_i32 = arith.constant 0 : i32
    %c0_i32_0 = arith.constant 0 : i32
    %c0_i32_1 = arith.constant 0 : i32
    return %c0_i32, %c0_i32_0 : i32, i32
  }
  func.func @transform_2(%arg0: i32, %arg1: i32) -> (i32, i32) {
    %c0_i32 = arith.constant 0 : i32
    %c0_i32_0 = arith.constant 0 : i32
    %c0_i32_1 = arith.constant 0 : i32
    return %c0_i32, %c0_i32_0 : i32, i32
  }
  func.func @transform_3(%arg0: i32, %arg1: i32) -> (i32, i32, i32, i32) {
    %c0_i32 = arith.constant 0 : i32
    %c0_i32_0 = arith.constant 0 : i32
    %c0_i32_1 = arith.constant 0 : i32
    return %arg0, %arg1, %c0_i32, %c0_i32_0 : i32, i32, i32, i32
  }
}

module attributes {stable_mosaic.version = 11 : i64} {
  func.func @_conv3x3_kernel(%arg0: i32, %arg1: memref<1x74x74x32xbf16, #tpu.memory_space<vmem>>, %arg2: memref<3x96x64xbf16, #tpu.memory_space<vmem>>, %arg3: memref<1x64xf32, #tpu.memory_space<vmem>>, %arg4: memref<1x36x36x64xbf16, #tpu.memory_space<vmem>>, %arg5: memref<72x64xf32, #tpu.memory_space<vmem>>) attributes {dimension_semantics = [#tpu.dimension_semantics<parallel>], iteration_bounds = array<i64: 2>, scalar_prefetch = 0 : i64, scratch_operands = 1 : i64, tpu.core_type = #tpu.core_type<tc>, window_params = [{transform_indices = @transform_0, window_bounds = array<i64: 1, 74, 74, 32>}, {pipeline_mode = #tpu.pipeline_mode<synchronous>, transform_indices = @transform_1, window_bounds = array<i64: 3, 96, 64>}, {pipeline_mode = #tpu.pipeline_mode<synchronous>, transform_indices = @transform_2, window_bounds = array<i64: 1, 64>}, {transform_indices = @transform_3, window_bounds = array<i64: 1, 36, 36, 64>}]} {
    %c0 = arith.constant 0 : index
    %c0_0 = arith.constant 0 : index
    %0 = vector.load %arg3[%c0, %c0_0] : memref<1x64xf32, #tpu.memory_space<vmem>>, vector<1x64xf32>
    %1 = vector.shape_cast %0 : vector<1x64xf32> to vector<1x64xf32>
    %2 = vector.broadcast %1 : vector<1x64xf32> to vector<36x64xf32>
    %c0_i32 = arith.constant 0 : i32
    %c36_i32 = arith.constant 36 : i32
    %3 = arith.addi %c0_i32, %c36_i32 : i32
    %c1_i32 = arith.constant 1 : i32
    scf.for %arg6 = %c0_i32 to %3 step %c1_i32  : i32 {
      %c2_i32 = arith.constant 2 : i32
      %4 = arith.muli %c2_i32, %arg6 : i32
      %cst = arith.constant 0.000000e+00 : f32
      %5 = vector.broadcast %cst : f32 to vector<72x64xf32>
      %c0_i32_2 = arith.constant 0 : i32
      %6 = arith.addi %4, %c0_i32_2 : i32
      %c0_3 = arith.constant 0 : index
      %7 = arith.index_cast %6 : i32 to index
      %c0_4 = arith.constant 0 : index
      %c0_5 = arith.constant 0 : index
      %8 = vector.load %arg1[%c0_3, %7, %c0_4, %c0_5] : memref<1x74x74x32xbf16, #tpu.memory_space<vmem>>, vector<1x1x74x32xbf16>
      %9 = vector.shape_cast %8 : vector<1x1x74x32xbf16> to vector<74x32xbf16>
      %10 = arith.extf %9 : vector<74x32xbf16> to vector<74x32xf32>
      %11 = vector.extract_strided_slice %10 {offsets = [0, 0], sizes = [72, 32], strides = [1, 1]} : vector<74x32xf32> to vector<72x32xf32>
      %12 = vector.extract_strided_slice %10 {offsets = [1, 0], sizes = [72, 32], strides = [1, 1]} : vector<74x32xf32> to vector<72x32xf32>
      %13 = vector.extract_strided_slice %10 {offsets = [2, 0], sizes = [72, 32], strides = [1, 1]} : vector<74x32xf32> to vector<72x32xf32>
      %14 = tpu.concatenate %11, %12, %13 in 1 : vector<72x32xf32>, vector<72x32xf32>, vector<72x32xf32> -> vector<72x96xf32>
      %15 = arith.truncf %14 : vector<72x96xf32> to vector<72x96xbf16>
      %c0_6 = arith.constant 0 : index
      %c0_7 = arith.constant 0 : index
      %c0_8 = arith.constant 0 : index
      %16 = vector.load %arg2[%c0_6, %c0_7, %c0_8] : memref<3x96x64xbf16, #tpu.memory_space<vmem>>, vector<1x96x64xbf16>
      %17 = vector.shape_cast %16 : vector<1x96x64xbf16> to vector<96x64xbf16>
      %cst_9 = arith.constant dense<0.000000e+00> : vector<72x64xf32>
      %18 = tpu.matmul %15, %17, %cst_9 {dimension_numbers = #tpu.dot_dimension_numbers<[1], [0], [0], [1], [0, 0, 1, 1], [], []>} : vector<72x96xbf16>, vector<96x64xbf16>, vector<72x64xf32> -> vector<72x64xf32>
      %19 = arith.addf %5, %18 : vector<72x64xf32>
      %c1_i32_10 = arith.constant 1 : i32
      %20 = arith.addi %4, %c1_i32_10 : i32
      %c0_11 = arith.constant 0 : index
      %21 = arith.index_cast %20 : i32 to index
      %c0_12 = arith.constant 0 : index
      %c0_13 = arith.constant 0 : index
      %22 = vector.load %arg1[%c0_11, %21, %c0_12, %c0_13] : memref<1x74x74x32xbf16, #tpu.memory_space<vmem>>, vector<1x1x74x32xbf16>
      %23 = vector.shape_cast %22 : vector<1x1x74x32xbf16> to vector<74x32xbf16>
      %24 = arith.extf %23 : vector<74x32xbf16> to vector<74x32xf32>
      %25 = vector.extract_strided_slice %24 {offsets = [0, 0], sizes = [72, 32], strides = [1, 1]} : vector<74x32xf32> to vector<72x32xf32>
      %26 = vector.extract_strided_slice %24 {offsets = [1, 0], sizes = [72, 32], strides = [1, 1]} : vector<74x32xf32> to vector<72x32xf32>
      %27 = vector.extract_strided_slice %24 {offsets = [2, 0], sizes = [72, 32], strides = [1, 1]} : vector<74x32xf32> to vector<72x32xf32>
      %28 = tpu.concatenate %25, %26, %27 in 1 : vector<72x32xf32>, vector<72x32xf32>, vector<72x32xf32> -> vector<72x96xf32>
      %29 = arith.truncf %28 : vector<72x96xf32> to vector<72x96xbf16>
      %c1 = arith.constant 1 : index
      %c0_14 = arith.constant 0 : index
      %c0_15 = arith.constant 0 : index
      %30 = vector.load %arg2[%c1, %c0_14, %c0_15] : memref<3x96x64xbf16, #tpu.memory_space<vmem>>, vector<1x96x64xbf16>
      %31 = vector.shape_cast %30 : vector<1x96x64xbf16> to vector<96x64xbf16>
      %cst_16 = arith.constant dense<0.000000e+00> : vector<72x64xf32>
      %32 = tpu.matmul %29, %31, %cst_16 {dimension_numbers = #tpu.dot_dimension_numbers<[1], [0], [0], [1], [0, 0, 1, 1], [], []>} : vector<72x96xbf16>, vector<96x64xbf16>, vector<72x64xf32> -> vector<72x64xf32>
      %33 = arith.addf %19, %32 : vector<72x64xf32>
      %c2_i32_17 = arith.constant 2 : i32
      %34 = arith.addi %4, %c2_i32_17 : i32
      %c0_18 = arith.constant 0 : index
      %35 = arith.index_cast %34 : i32 to index
      %c0_19 = arith.constant 0 : index
      %c0_20 = arith.constant 0 : index
      %36 = vector.load %arg1[%c0_18, %35, %c0_19, %c0_20] : memref<1x74x74x32xbf16, #tpu.memory_space<vmem>>, vector<1x1x74x32xbf16>
      %37 = vector.shape_cast %36 : vector<1x1x74x32xbf16> to vector<74x32xbf16>
      %38 = arith.extf %37 : vector<74x32xbf16> to vector<74x32xf32>
      %39 = vector.extract_strided_slice %38 {offsets = [0, 0], sizes = [72, 32], strides = [1, 1]} : vector<74x32xf32> to vector<72x32xf32>
      %40 = vector.extract_strided_slice %38 {offsets = [1, 0], sizes = [72, 32], strides = [1, 1]} : vector<74x32xf32> to vector<72x32xf32>
      %41 = vector.extract_strided_slice %38 {offsets = [2, 0], sizes = [72, 32], strides = [1, 1]} : vector<74x32xf32> to vector<72x32xf32>
      %42 = tpu.concatenate %39, %40, %41 in 1 : vector<72x32xf32>, vector<72x32xf32>, vector<72x32xf32> -> vector<72x96xf32>
      %43 = arith.truncf %42 : vector<72x96xf32> to vector<72x96xbf16>
      %c2 = arith.constant 2 : index
      %c0_21 = arith.constant 0 : index
      %c0_22 = arith.constant 0 : index
      %44 = vector.load %arg2[%c2, %c0_21, %c0_22] : memref<3x96x64xbf16, #tpu.memory_space<vmem>>, vector<1x96x64xbf16>
      %45 = vector.shape_cast %44 : vector<1x96x64xbf16> to vector<96x64xbf16>
      %cst_23 = arith.constant dense<0.000000e+00> : vector<72x64xf32>
      %46 = tpu.matmul %43, %45, %cst_23 {dimension_numbers = #tpu.dot_dimension_numbers<[1], [0], [0], [1], [0, 0, 1, 1], [], []>} : vector<72x96xbf16>, vector<96x64xbf16>, vector<72x64xf32> -> vector<72x64xf32>
      %47 = arith.addf %33, %46 : vector<72x64xf32>
      %c0_24 = arith.constant 0 : index
      %c0_25 = arith.constant 0 : index
      %48 = vector.load %arg5[%c0_24, %c0_25] : memref<72x64xf32, #tpu.memory_space<vmem>>, vector<72x64xf32>
      tpu.vector_store %arg5[%c0_24, %c0_25], %47 {strides = array<i32>} : memref<72x64xf32, #tpu.memory_space<vmem>>, vector<72x64xf32>,
      %c0_26 = arith.constant 0 : index
      %c0_27 = arith.constant 0 : index
      %49 = vector.load %arg5[%c0_26, %c0_27] : memref<72x64xf32, #tpu.memory_space<vmem>>, vector<72x64xf32>
      %c1_i32_28 = arith.constant 1 : i32
      %50 = arith.addi %4, %c1_i32_28 : i32
      %cst_29 = arith.constant 0.000000e+00 : f32
      %51 = vector.broadcast %cst_29 : f32 to vector<72x64xf32>
      %c0_i32_30 = arith.constant 0 : i32
      %52 = arith.addi %50, %c0_i32_30 : i32
      %c0_31 = arith.constant 0 : index
      %53 = arith.index_cast %52 : i32 to index
      %c0_32 = arith.constant 0 : index
      %c0_33 = arith.constant 0 : index
      %54 = vector.load %arg1[%c0_31, %53, %c0_32, %c0_33] : memref<1x74x74x32xbf16, #tpu.memory_space<vmem>>, vector<1x1x74x32xbf16>
      %55 = vector.shape_cast %54 : vector<1x1x74x32xbf16> to vector<74x32xbf16>
      %56 = arith.extf %55 : vector<74x32xbf16> to vector<74x32xf32>
      %57 = vector.extract_strided_slice %56 {offsets = [0, 0], sizes = [72, 32], strides = [1, 1]} : vector<74x32xf32> to vector<72x32xf32>
      %58 = vector.extract_strided_slice %56 {offsets = [1, 0], sizes = [72, 32], strides = [1, 1]} : vector<74x32xf32> to vector<72x32xf32>
      %59 = vector.extract_strided_slice %56 {offsets = [2, 0], sizes = [72, 32], strides = [1, 1]} : vector<74x32xf32> to vector<72x32xf32>
      %60 = tpu.concatenate %57, %58, %59 in 1 : vector<72x32xf32>, vector<72x32xf32>, vector<72x32xf32> -> vector<72x96xf32>
      %61 = arith.truncf %60 : vector<72x96xf32> to vector<72x96xbf16>
      %c0_34 = arith.constant 0 : index
      %c0_35 = arith.constant 0 : index
      %c0_36 = arith.constant 0 : index
      %62 = vector.load %arg2[%c0_34, %c0_35, %c0_36] : memref<3x96x64xbf16, #tpu.memory_space<vmem>>, vector<1x96x64xbf16>
      %63 = vector.shape_cast %62 : vector<1x96x64xbf16> to vector<96x64xbf16>
      %cst_37 = arith.constant dense<0.000000e+00> : vector<72x64xf32>
      %64 = tpu.matmul %61, %63, %cst_37 {dimension_numbers = #tpu.dot_dimension_numbers<[1], [0], [0], [1], [0, 0, 1, 1], [], []>} : vector<72x96xbf16>, vector<96x64xbf16>, vector<72x64xf32> -> vector<72x64xf32>
      %65 = arith.addf %51, %64 : vector<72x64xf32>
      %c1_i32_38 = arith.constant 1 : i32
      %66 = arith.addi %50, %c1_i32_38 : i32
      %c0_39 = arith.constant 0 : index
      %67 = arith.index_cast %66 : i32 to index
      %c0_40 = arith.constant 0 : index
      %c0_41 = arith.constant 0 : index
      %68 = vector.load %arg1[%c0_39, %67, %c0_40, %c0_41] : memref<1x74x74x32xbf16, #tpu.memory_space<vmem>>, vector<1x1x74x32xbf16>
      %69 = vector.shape_cast %68 : vector<1x1x74x32xbf16> to vector<74x32xbf16>
      %70 = arith.extf %69 : vector<74x32xbf16> to vector<74x32xf32>
      %71 = vector.extract_strided_slice %70 {offsets = [0, 0], sizes = [72, 32], strides = [1, 1]} : vector<74x32xf32> to vector<72x32xf32>
      %72 = vector.extract_strided_slice %70 {offsets = [1, 0], sizes = [72, 32], strides = [1, 1]} : vector<74x32xf32> to vector<72x32xf32>
      %73 = vector.extract_strided_slice %70 {offsets = [2, 0], sizes = [72, 32], strides = [1, 1]} : vector<74x32xf32> to vector<72x32xf32>
      %74 = tpu.concatenate %71, %72, %73 in 1 : vector<72x32xf32>, vector<72x32xf32>, vector<72x32xf32> -> vector<72x96xf32>
      %75 = arith.truncf %74 : vector<72x96xf32> to vector<72x96xbf16>
      %c1_42 = arith.constant 1 : index
      %c0_43 = arith.constant 0 : index
      %c0_44 = arith.constant 0 : index
      %76 = vector.load %arg2[%c1_42, %c0_43, %c0_44] : memref<3x96x64xbf16, #tpu.memory_space<vmem>>, vector<1x96x64xbf16>
      %77 = vector.shape_cast %76 : vector<1x96x64xbf16> to vector<96x64xbf16>
      %cst_45 = arith.constant dense<0.000000e+00> : vector<72x64xf32>
      %78 = tpu.matmul %75, %77, %cst_45 {dimension_numbers = #tpu.dot_dimension_numbers<[1], [0], [0], [1], [0, 0, 1, 1], [], []>} : vector<72x96xbf16>, vector<96x64xbf16>, vector<72x64xf32> -> vector<72x64xf32>
      %79 = arith.addf %65, %78 : vector<72x64xf32>
      %c2_i32_46 = arith.constant 2 : i32
      %80 = arith.addi %50, %c2_i32_46 : i32
      %c0_47 = arith.constant 0 : index
      %81 = arith.index_cast %80 : i32 to index
      %c0_48 = arith.constant 0 : index
      %c0_49 = arith.constant 0 : index
      %82 = vector.load %arg1[%c0_47, %81, %c0_48, %c0_49] : memref<1x74x74x32xbf16, #tpu.memory_space<vmem>>, vector<1x1x74x32xbf16>
      %83 = vector.shape_cast %82 : vector<1x1x74x32xbf16> to vector<74x32xbf16>
      %84 = arith.extf %83 : vector<74x32xbf16> to vector<74x32xf32>
      %85 = vector.extract_strided_slice %84 {offsets = [0, 0], sizes = [72, 32], strides = [1, 1]} : vector<74x32xf32> to vector<72x32xf32>
      %86 = vector.extract_strided_slice %84 {offsets = [1, 0], sizes = [72, 32], strides = [1, 1]} : vector<74x32xf32> to vector<72x32xf32>
      %87 = vector.extract_strided_slice %84 {offsets = [2, 0], sizes = [72, 32], strides = [1, 1]} : vector<74x32xf32> to vector<72x32xf32>
      %88 = tpu.concatenate %85, %86, %87 in 1 : vector<72x32xf32>, vector<72x32xf32>, vector<72x32xf32> -> vector<72x96xf32>
      %89 = arith.truncf %88 : vector<72x96xf32> to vector<72x96xbf16>
      %c2_50 = arith.constant 2 : index
      %c0_51 = arith.constant 0 : index
      %c0_52 = arith.constant 0 : index
      %90 = vector.load %arg2[%c2_50, %c0_51, %c0_52] : memref<3x96x64xbf16, #tpu.memory_space<vmem>>, vector<1x96x64xbf16>
      %91 = vector.shape_cast %90 : vector<1x96x64xbf16> to vector<96x64xbf16>
      %cst_53 = arith.constant dense<0.000000e+00> : vector<72x64xf32>
      %92 = tpu.matmul %89, %91, %cst_53 {dimension_numbers = #tpu.dot_dimension_numbers<[1], [0], [0], [1], [0, 0, 1, 1], [], []>} : vector<72x96xbf16>, vector<96x64xbf16>, vector<72x64xf32> -> vector<72x64xf32>
      %93 = arith.addf %79, %92 : vector<72x64xf32>
      %94 = arith.maximumf %49, %93 : vector<72x64xf32>
      %c0_54 = arith.constant 0 : index
      %c0_55 = arith.constant 0 : index
      %95 = vector.load %arg5[%c0_54, %c0_55] : memref<72x64xf32, #tpu.memory_space<vmem>>, vector<72x64xf32>
      tpu.vector_store %arg5[%c0_54, %c0_55], %94 {strides = array<i32>} : memref<72x64xf32, #tpu.memory_space<vmem>>, vector<72x64xf32>,
      %c0_56 = arith.constant 0 : index
      %c0_57 = arith.constant 0 : index
      %96 = tpu.strided_load %arg5[%c0_56, %c0_57] {strides = array<i32: 2, 1>} : memref<72x64xf32, #tpu.memory_space<vmem>>, vector<36x64xf32>
      %c1_58 = arith.constant 1 : index
      %c0_59 = arith.constant 0 : index
      %97 = tpu.strided_load %arg5[%c1_58, %c0_59] {strides = array<i32: 2, 1>} : memref<72x64xf32, #tpu.memory_space<vmem>>, vector<36x64xf32>
      %98 = arith.maximumf %96, %97 : vector<36x64xf32>
      %99 = arith.addf %98, %2 : vector<36x64xf32>
      %cst_60 = arith.constant 0.000000e+00 : f32
      %100 = vector.broadcast %cst_60 : f32 to vector<36x64xf32>
      %101 = arith.maximumf %99, %100 : vector<36x64xf32>
      %102 = arith.truncf %101 : vector<36x64xf32> to vector<36x64xbf16>
      %c0_61 = arith.constant 0 : index
      %103 = arith.index_cast %arg6 : i32 to index
      %c0_62 = arith.constant 0 : index
      %c0_63 = arith.constant 0 : index
      %104 = vector.load %arg4[%c0_61, %103, %c0_62, %c0_63] : memref<1x36x36x64xbf16, #tpu.memory_space<vmem>>, vector<1x1x36x64xbf16>
      %105 = vector.shape_cast %104 : vector<1x1x36x64xbf16> to vector<36x64xbf16>
      %106 = vector.shape_cast %102 : vector<36x64xbf16> to vector<1x1x36x64xbf16>
      tpu.vector_store %arg4[%c0_61, %103, %c0_62, %c0_63], %106 {strides = array<i32>} : memref<1x36x36x64xbf16, #tpu.memory_space<vmem>>, vector<1x1x36x64xbf16>,
    }
    %c36_i32_1 = arith.constant 36 : i32
    return
  }
  func.func @transform_0(%arg0: i32) -> (i32, i32, i32, i32) {
    %c0_i32 = arith.constant 0 : i32
    %c0_i32_0 = arith.constant 0 : i32
    %c0_i32_1 = arith.constant 0 : i32
    %c0_i32_2 = arith.constant 0 : i32
    return %arg0, %c0_i32, %c0_i32_0, %c0_i32_1 : i32, i32, i32, i32
  }
  func.func @transform_1(%arg0: i32) -> (i32, i32, i32) {
    %c0_i32 = arith.constant 0 : i32
    %c0_i32_0 = arith.constant 0 : i32
    %c0_i32_1 = arith.constant 0 : i32
    %c0_i32_2 = arith.constant 0 : i32
    return %c0_i32, %c0_i32_0, %c0_i32_1 : i32, i32, i32
  }
  func.func @transform_2(%arg0: i32) -> (i32, i32) {
    %c0_i32 = arith.constant 0 : i32
    %c0_i32_0 = arith.constant 0 : i32
    %c0_i32_1 = arith.constant 0 : i32
    return %c0_i32, %c0_i32_0 : i32, i32
  }
  func.func @transform_3(%arg0: i32) -> (i32, i32, i32, i32) {
    %c0_i32 = arith.constant 0 : i32
    %c0_i32_0 = arith.constant 0 : i32
    %c0_i32_1 = arith.constant 0 : i32
    %c0_i32_2 = arith.constant 0 : i32
    return %arg0, %c0_i32, %c0_i32_0, %c0_i32_1 : i32, i32, i32, i32
  }
}

module attributes {stable_mosaic.version = 11 : i64} {
  func.func @_conv_pair_kernel(%arg0: i32, %arg1: memref<1x36x36x64xbf16, #tpu.memory_space<vmem>>, %arg2: memref<3x192x64xbf16, #tpu.memory_space<vmem>>, %arg3: memref<1x64xf32, #tpu.memory_space<vmem>>, %arg4: memref<3x192x64xbf16, #tpu.memory_space<vmem>>, %arg5: memref<1x64xf32, #tpu.memory_space<vmem>>, %arg6: memref<1x16x16x64xbf16, #tpu.memory_space<vmem>>, %arg7: memref<34x34x64xf32, #tpu.memory_space<vmem>>, %arg8: memref<32x64xf32, #tpu.memory_space<vmem>>) attributes {dimension_semantics = [#tpu.dimension_semantics<parallel>], iteration_bounds = array<i64: 2>, scalar_prefetch = 0 : i64, scratch_operands = 2 : i64, tpu.core_type = #tpu.core_type<tc>, window_params = [{transform_indices = @transform_0, window_bounds = array<i64: 1, 36, 36, 64>}, {pipeline_mode = #tpu.pipeline_mode<synchronous>, transform_indices = @transform_1, window_bounds = array<i64: 3, 192, 64>}, {pipeline_mode = #tpu.pipeline_mode<synchronous>, transform_indices = @transform_2, window_bounds = array<i64: 1, 64>}, {pipeline_mode = #tpu.pipeline_mode<synchronous>, transform_indices = @transform_3, window_bounds = array<i64: 3, 192, 64>}, {pipeline_mode = #tpu.pipeline_mode<synchronous>, transform_indices = @transform_4, window_bounds = array<i64: 1, 64>}, {transform_indices = @transform_5, window_bounds = array<i64: 1, 16, 16, 64>}]} {
    %c0 = arith.constant 0 : index
    %c0_0 = arith.constant 0 : index
    %0 = vector.load %arg3[%c0, %c0_0] : memref<1x64xf32, #tpu.memory_space<vmem>>, vector<1x64xf32>
    %1 = vector.shape_cast %0 : vector<1x64xf32> to vector<1x64xf32>
    %2 = vector.broadcast %1 : vector<1x64xf32> to vector<34x64xf32>
    %c0_i32 = arith.constant 0 : i32
    %c17_i32 = arith.constant 17 : i32
    %3 = arith.addi %c0_i32, %c17_i32 : i32
    %c1_i32 = arith.constant 1 : i32
    scf.for %arg9 = %c0_i32 to %3 step %c1_i32  : i32 {
      %c2_i32 = arith.constant 2 : i32
      %8 = arith.muli %c2_i32, %arg9 : i32
      %cst = arith.constant 0.000000e+00 : f32
      %9 = vector.broadcast %cst : f32 to vector<34x64xf32>
      %c0_i32_7 = arith.constant 0 : i32
      %10 = arith.addi %8, %c0_i32_7 : i32
      %c0_8 = arith.constant 0 : index
      %11 = arith.index_cast %10 : i32 to index
      %c0_9 = arith.constant 0 : index
      %c0_10 = arith.constant 0 : index
      %12 = vector.load %arg1[%c0_8, %11, %c0_9, %c0_10] : memref<1x36x36x64xbf16, #tpu.memory_space<vmem>>, vector<1x1x36x64xbf16>
      %13 = vector.shape_cast %12 : vector<1x1x36x64xbf16> to vector<36x64xbf16>
      %14 = arith.extf %13 : vector<36x64xbf16> to vector<36x64xf32>
      %15 = vector.extract_strided_slice %14 {offsets = [0, 0], sizes = [34, 64], strides = [1, 1]} : vector<36x64xf32> to vector<34x64xf32>
      %16 = vector.extract_strided_slice %14 {offsets = [1, 0], sizes = [34, 64], strides = [1, 1]} : vector<36x64xf32> to vector<34x64xf32>
      %17 = vector.extract_strided_slice %14 {offsets = [2, 0], sizes = [34, 64], strides = [1, 1]} : vector<36x64xf32> to vector<34x64xf32>
      %18 = tpu.concatenate %15, %16, %17 in 1 : vector<34x64xf32>, vector<34x64xf32>, vector<34x64xf32> -> vector<34x192xf32>
      %19 = arith.truncf %18 : vector<34x192xf32> to vector<34x192xbf16>
      %c0_11 = arith.constant 0 : index
      %c0_12 = arith.constant 0 : index
      %c0_13 = arith.constant 0 : index
      %20 = vector.load %arg2[%c0_11, %c0_12, %c0_13] : memref<3x192x64xbf16, #tpu.memory_space<vmem>>, vector<1x192x64xbf16>
      %21 = vector.shape_cast %20 : vector<1x192x64xbf16> to vector<192x64xbf16>
      %cst_14 = arith.constant dense<0.000000e+00> : vector<34x64xf32>
      %22 = tpu.matmul %19, %21, %cst_14 {dimension_numbers = #tpu.dot_dimension_numbers<[1], [0], [0], [1], [0, 0, 1, 1], [], []>} : vector<34x192xbf16>, vector<192x64xbf16>, vector<34x64xf32> -> vector<34x64xf32>
      %23 = arith.addf %9, %22 : vector<34x64xf32>
      %c1_i32_15 = arith.constant 1 : i32
      %24 = arith.addi %8, %c1_i32_15 : i32
      %c0_16 = arith.constant 0 : index
      %25 = arith.index_cast %24 : i32 to index
      %c0_17 = arith.constant 0 : index
      %c0_18 = arith.constant 0 : index
      %26 = vector.load %arg1[%c0_16, %25, %c0_17, %c0_18] : memref<1x36x36x64xbf16, #tpu.memory_space<vmem>>, vector<1x1x36x64xbf16>
      %27 = vector.shape_cast %26 : vector<1x1x36x64xbf16> to vector<36x64xbf16>
      %28 = arith.extf %27 : vector<36x64xbf16> to vector<36x64xf32>
      %29 = vector.extract_strided_slice %28 {offsets = [0, 0], sizes = [34, 64], strides = [1, 1]} : vector<36x64xf32> to vector<34x64xf32>
      %30 = vector.extract_strided_slice %28 {offsets = [1, 0], sizes = [34, 64], strides = [1, 1]} : vector<36x64xf32> to vector<34x64xf32>
      %31 = vector.extract_strided_slice %28 {offsets = [2, 0], sizes = [34, 64], strides = [1, 1]} : vector<36x64xf32> to vector<34x64xf32>
      %32 = tpu.concatenate %29, %30, %31 in 1 : vector<34x64xf32>, vector<34x64xf32>, vector<34x64xf32> -> vector<34x192xf32>
      %33 = arith.truncf %32 : vector<34x192xf32> to vector<34x192xbf16>
      %c1 = arith.constant 1 : index
      %c0_19 = arith.constant 0 : index
      %c0_20 = arith.constant 0 : index
      %34 = vector.load %arg2[%c1, %c0_19, %c0_20] : memref<3x192x64xbf16, #tpu.memory_space<vmem>>, vector<1x192x64xbf16>
      %35 = vector.shape_cast %34 : vector<1x192x64xbf16> to vector<192x64xbf16>
      %cst_21 = arith.constant dense<0.000000e+00> : vector<34x64xf32>
      %36 = tpu.matmul %33, %35, %cst_21 {dimension_numbers = #tpu.dot_dimension_numbers<[1], [0], [0], [1], [0, 0, 1, 1], [], []>} : vector<34x192xbf16>, vector<192x64xbf16>, vector<34x64xf32> -> vector<34x64xf32>
      %37 = arith.addf %23, %36 : vector<34x64xf32>
      %c2_i32_22 = arith.constant 2 : i32
      %38 = arith.addi %8, %c2_i32_22 : i32
      %c0_23 = arith.constant 0 : index
      %39 = arith.index_cast %38 : i32 to index
      %c0_24 = arith.constant 0 : index
      %c0_25 = arith.constant 0 : index
      %40 = vector.load %arg1[%c0_23, %39, %c0_24, %c0_25] : memref<1x36x36x64xbf16, #tpu.memory_space<vmem>>, vector<1x1x36x64xbf16>
      %41 = vector.shape_cast %40 : vector<1x1x36x64xbf16> to vector<36x64xbf16>
      %42 = arith.extf %41 : vector<36x64xbf16> to vector<36x64xf32>
      %43 = vector.extract_strided_slice %42 {offsets = [0, 0], sizes = [34, 64], strides = [1, 1]} : vector<36x64xf32> to vector<34x64xf32>
      %44 = vector.extract_strided_slice %42 {offsets = [1, 0], sizes = [34, 64], strides = [1, 1]} : vector<36x64xf32> to vector<34x64xf32>
      %45 = vector.extract_strided_slice %42 {offsets = [2, 0], sizes = [34, 64], strides = [1, 1]} : vector<36x64xf32> to vector<34x64xf32>
      %46 = tpu.concatenate %43, %44, %45 in 1 : vector<34x64xf32>, vector<34x64xf32>, vector<34x64xf32> -> vector<34x192xf32>
      %47 = arith.truncf %46 : vector<34x192xf32> to vector<34x192xbf16>
      %c2 = arith.constant 2 : index
      %c0_26 = arith.constant 0 : index
      %c0_27 = arith.constant 0 : index
      %48 = vector.load %arg2[%c2, %c0_26, %c0_27] : memref<3x192x64xbf16, #tpu.memory_space<vmem>>, vector<1x192x64xbf16>
      %49 = vector.shape_cast %48 : vector<1x192x64xbf16> to vector<192x64xbf16>
      %cst_28 = arith.constant dense<0.000000e+00> : vector<34x64xf32>
      %50 = tpu.matmul %47, %49, %cst_28 {dimension_numbers = #tpu.dot_dimension_numbers<[1], [0], [0], [1], [0, 0, 1, 1], [], []>} : vector<34x192xbf16>, vector<192x64xbf16>, vector<34x64xf32> -> vector<34x64xf32>
      %51 = arith.addf %37, %50 : vector<34x64xf32>
      %52 = arith.addf %51, %2 : vector<34x64xf32>
      %cst_29 = arith.constant 0.000000e+00 : f32
      %53 = vector.broadcast %cst_29 : f32 to vector<34x64xf32>
      %54 = arith.maximumf %52, %53 : vector<34x64xf32>
      %55 = arith.index_cast %8 : i32 to index
      %c0_30 = arith.constant 0 : index
      %c0_31 = arith.constant 0 : index
      %56 = vector.load %arg7[%55, %c0_30, %c0_31] : memref<34x34x64xf32, #tpu.memory_space<vmem>>, vector<1x34x64xf32>
      %57 = vector.shape_cast %56 : vector<1x34x64xf32> to vector<34x64xf32>
      %58 = vector.shape_cast %54 : vector<34x64xf32> to vector<1x34x64xf32>
      tpu.vector_store %arg7[%55, %c0_30, %c0_31], %58 {strides = array<i32>} : memref<34x34x64xf32, #tpu.memory_space<vmem>>, vector<1x34x64xf32>,
      %c1_i32_32 = arith.constant 1 : i32
      %59 = arith.addi %8, %c1_i32_32 : i32
      %cst_33 = arith.constant 0.000000e+00 : f32
      %60 = vector.broadcast %cst_33 : f32 to vector<34x64xf32>
      %c0_i32_34 = arith.constant 0 : i32
      %61 = arith.addi %59, %c0_i32_34 : i32
      %c0_35 = arith.constant 0 : index
      %62 = arith.index_cast %61 : i32 to index
      %c0_36 = arith.constant 0 : index
      %c0_37 = arith.constant 0 : index
      %63 = vector.load %arg1[%c0_35, %62, %c0_36, %c0_37] : memref<1x36x36x64xbf16, #tpu.memory_space<vmem>>, vector<1x1x36x64xbf16>
      %64 = vector.shape_cast %63 : vector<1x1x36x64xbf16> to vector<36x64xbf16>
      %65 = arith.extf %64 : vector<36x64xbf16> to vector<36x64xf32>
      %66 = vector.extract_strided_slice %65 {offsets = [0, 0], sizes = [34, 64], strides = [1, 1]} : vector<36x64xf32> to vector<34x64xf32>
      %67 = vector.extract_strided_slice %65 {offsets = [1, 0], sizes = [34, 64], strides = [1, 1]} : vector<36x64xf32> to vector<34x64xf32>
      %68 = vector.extract_strided_slice %65 {offsets = [2, 0], sizes = [34, 64], strides = [1, 1]} : vector<36x64xf32> to vector<34x64xf32>
      %69 = tpu.concatenate %66, %67, %68 in 1 : vector<34x64xf32>, vector<34x64xf32>, vector<34x64xf32> -> vector<34x192xf32>
      %70 = arith.truncf %69 : vector<34x192xf32> to vector<34x192xbf16>
      %c0_38 = arith.constant 0 : index
      %c0_39 = arith.constant 0 : index
      %c0_40 = arith.constant 0 : index
      %71 = vector.load %arg2[%c0_38, %c0_39, %c0_40] : memref<3x192x64xbf16, #tpu.memory_space<vmem>>, vector<1x192x64xbf16>
      %72 = vector.shape_cast %71 : vector<1x192x64xbf16> to vector<192x64xbf16>
      %cst_41 = arith.constant dense<0.000000e+00> : vector<34x64xf32>
      %73 = tpu.matmul %70, %72, %cst_41 {dimension_numbers = #tpu.dot_dimension_numbers<[1], [0], [0], [1], [0, 0, 1, 1], [], []>} : vector<34x192xbf16>, vector<192x64xbf16>, vector<34x64xf32> -> vector<34x64xf32>
      %74 = arith.addf %60, %73 : vector<34x64xf32>
      %c1_i32_42 = arith.constant 1 : i32
      %75 = arith.addi %59, %c1_i32_42 : i32
      %c0_43 = arith.constant 0 : index
      %76 = arith.index_cast %75 : i32 to index
      %c0_44 = arith.constant 0 : index
      %c0_45 = arith.constant 0 : index
      %77 = vector.load %arg1[%c0_43, %76, %c0_44, %c0_45] : memref<1x36x36x64xbf16, #tpu.memory_space<vmem>>, vector<1x1x36x64xbf16>
      %78 = vector.shape_cast %77 : vector<1x1x36x64xbf16> to vector<36x64xbf16>
      %79 = arith.extf %78 : vector<36x64xbf16> to vector<36x64xf32>
      %80 = vector.extract_strided_slice %79 {offsets = [0, 0], sizes = [34, 64], strides = [1, 1]} : vector<36x64xf32> to vector<34x64xf32>
      %81 = vector.extract_strided_slice %79 {offsets = [1, 0], sizes = [34, 64], strides = [1, 1]} : vector<36x64xf32> to vector<34x64xf32>
      %82 = vector.extract_strided_slice %79 {offsets = [2, 0], sizes = [34, 64], strides = [1, 1]} : vector<36x64xf32> to vector<34x64xf32>
      %83 = tpu.concatenate %80, %81, %82 in 1 : vector<34x64xf32>, vector<34x64xf32>, vector<34x64xf32> -> vector<34x192xf32>
      %84 = arith.truncf %83 : vector<34x192xf32> to vector<34x192xbf16>
      %c1_46 = arith.constant 1 : index
      %c0_47 = arith.constant 0 : index
      %c0_48 = arith.constant 0 : index
      %85 = vector.load %arg2[%c1_46, %c0_47, %c0_48] : memref<3x192x64xbf16, #tpu.memory_space<vmem>>, vector<1x192x64xbf16>
      %86 = vector.shape_cast %85 : vector<1x192x64xbf16> to vector<192x64xbf16>
      %cst_49 = arith.constant dense<0.000000e+00> : vector<34x64xf32>
      %87 = tpu.matmul %84, %86, %cst_49 {dimension_numbers = #tpu.dot_dimension_numbers<[1], [0], [0], [1], [0, 0, 1, 1], [], []>} : vector<34x192xbf16>, vector<192x64xbf16>, vector<34x64xf32> -> vector<34x64xf32>
      %88 = arith.addf %74, %87 : vector<34x64xf32>
      %c2_i32_50 = arith.constant 2 : i32
      %89 = arith.addi %59, %c2_i32_50 : i32
      %c0_51 = arith.constant 0 : index
      %90 = arith.index_cast %89 : i32 to index
      %c0_52 = arith.constant 0 : index
      %c0_53 = arith.constant 0 : index
      %91 = vector.load %arg1[%c0_51, %90, %c0_52, %c0_53] : memref<1x36x36x64xbf16, #tpu.memory_space<vmem>>, vector<1x1x36x64xbf16>
      %92 = vector.shape_cast %91 : vector<1x1x36x64xbf16> to vector<36x64xbf16>
      %93 = arith.extf %92 : vector<36x64xbf16> to vector<36x64xf32>
      %94 = vector.extract_strided_slice %93 {offsets = [0, 0], sizes = [34, 64], strides = [1, 1]} : vector<36x64xf32> to vector<34x64xf32>
      %95 = vector.extract_strided_slice %93 {offsets = [1, 0], sizes = [34, 64], strides = [1, 1]} : vector<36x64xf32> to vector<34x64xf32>
      %96 = vector.extract_strided_slice %93 {offsets = [2, 0], sizes = [34, 64], strides = [1, 1]} : vector<36x64xf32> to vector<34x64xf32>
      %97 = tpu.concatenate %94, %95, %96 in 1 : vector<34x64xf32>, vector<34x64xf32>, vector<34x64xf32> -> vector<34x192xf32>
      %98 = arith.truncf %97 : vector<34x192xf32> to vector<34x192xbf16>
      %c2_54 = arith.constant 2 : index
      %c0_55 = arith.constant 0 : index
      %c0_56 = arith.constant 0 : index
      %99 = vector.load %arg2[%c2_54, %c0_55, %c0_56] : memref<3x192x64xbf16, #tpu.memory_space<vmem>>, vector<1x192x64xbf16>
      %100 = vector.shape_cast %99 : vector<1x192x64xbf16> to vector<192x64xbf16>
      %cst_57 = arith.constant dense<0.000000e+00> : vector<34x64xf32>
      %101 = tpu.matmul %98, %100, %cst_57 {dimension_numbers = #tpu.dot_dimension_numbers<[1], [0], [0], [1], [0, 0, 1, 1], [], []>} : vector<34x192xbf16>, vector<192x64xbf16>, vector<34x64xf32> -> vector<34x64xf32>
      %102 = arith.addf %88, %101 : vector<34x64xf32>
      %103 = arith.addf %102, %2 : vector<34x64xf32>
      %cst_58 = arith.constant 0.000000e+00 : f32
      %104 = vector.broadcast %cst_58 : f32 to vector<34x64xf32>
      %105 = arith.maximumf %103, %104 : vector<34x64xf32>
      %c1_i32_59 = arith.constant 1 : i32
      %106 = arith.addi %8, %c1_i32_59 : i32
      %107 = arith.index_cast %106 : i32 to index
      %c0_60 = arith.constant 0 : index
      %c0_61 = arith.constant 0 : index
      %108 = vector.load %arg7[%107, %c0_60, %c0_61] : memref<34x34x64xf32, #tpu.memory_space<vmem>>, vector<1x34x64xf32>
      %109 = vector.shape_cast %108 : vector<1x34x64xf32> to vector<34x64xf32>
      %110 = vector.shape_cast %105 : vector<34x64xf32> to vector<1x34x64xf32>
      tpu.vector_store %arg7[%107, %c0_60, %c0_61], %110 {strides = array<i32>} : memref<34x34x64xf32, #tpu.memory_space<vmem>>, vector<1x34x64xf32>,
    }
    %c17_i32_1 = arith.constant 17 : i32
    %c0_2 = arith.constant 0 : index
    %c0_3 = arith.constant 0 : index
    %4 = vector.load %arg5[%c0_2, %c0_3] : memref<1x64xf32, #tpu.memory_space<vmem>>, vector<1x64xf32>
    %5 = vector.shape_cast %4 : vector<1x64xf32> to vector<1x64xf32>
    %6 = vector.broadcast %5 : vector<1x64xf32> to vector<16x64xf32>
    %c0_i32_4 = arith.constant 0 : i32
    %c16_i32 = arith.constant 16 : i32
    %7 = arith.addi %c0_i32_4, %c16_i32 : i32
    %c1_i32_5 = arith.constant 1 : i32
    scf.for %arg9 = %c0_i32_4 to %7 step %c1_i32_5  : i32 {
      %c2_i32 = arith.constant 2 : i32
      %8 = arith.muli %c2_i32, %arg9 : i32
      %cst = arith.constant 0.000000e+00 : f32
      %9 = vector.broadcast %cst : f32 to vector<32x64xf32>
      %c0_i32_7 = arith.constant 0 : i32
      %10 = arith.addi %8, %c0_i32_7 : i32
      %11 = arith.index_cast %10 : i32 to index
      %c0_8 = arith.constant 0 : index
      %c0_9 = arith.constant 0 : index
      %12 = vector.load %arg7[%11, %c0_8, %c0_9] : memref<34x34x64xf32, #tpu.memory_space<vmem>>, vector<1x34x64xf32>
      %13 = vector.shape_cast %12 : vector<1x34x64xf32> to vector<34x64xf32>
      %14 = vector.extract_strided_slice %13 {offsets = [0, 0], sizes = [32, 64], strides = [1, 1]} : vector<34x64xf32> to vector<32x64xf32>
      %15 = vector.extract_strided_slice %13 {offsets = [1, 0], sizes = [32, 64], strides = [1, 1]} : vector<34x64xf32> to vector<32x64xf32>
      %16 = vector.extract_strided_slice %13 {offsets = [2, 0], sizes = [32, 64], strides = [1, 1]} : vector<34x64xf32> to vector<32x64xf32>
      %17 = tpu.concatenate %14, %15, %16 in 1 : vector<32x64xf32>, vector<32x64xf32>, vector<32x64xf32> -> vector<32x192xf32>
      %18 = arith.truncf %17 : vector<32x192xf32> to vector<32x192xbf16>
      %c0_10 = arith.constant 0 : index
      %c0_11 = arith.constant 0 : index
      %c0_12 = arith.constant 0 : index
      %19 = vector.load %arg4[%c0_10, %c0_11, %c0_12] : memref<3x192x64xbf16, #tpu.memory_space<vmem>>, vector<1x192x64xbf16>
      %20 = vector.shape_cast %19 : vector<1x192x64xbf16> to vector<192x64xbf16>
      %cst_13 = arith.constant dense<0.000000e+00> : vector<32x64xf32>
      %21 = tpu.matmul %18, %20, %cst_13 {dimension_numbers = #tpu.dot_dimension_numbers<[1], [0], [0], [1], [0, 0, 1, 1], [], []>} : vector<32x192xbf16>, vector<192x64xbf16>, vector<32x64xf32> -> vector<32x64xf32>
      %22 = arith.addf %9, %21 : vector<32x64xf32>
      %c1_i32_14 = arith.constant 1 : i32
      %23 = arith.addi %8, %c1_i32_14 : i32
      %24 = arith.index_cast %23 : i32 to index
      %c0_15 = arith.constant 0 : index
      %c0_16 = arith.constant 0 : index
      %25 = vector.load %arg7[%24, %c0_15, %c0_16] : memref<34x34x64xf32, #tpu.memory_space<vmem>>, vector<1x34x64xf32>
      %26 = vector.shape_cast %25 : vector<1x34x64xf32> to vector<34x64xf32>
      %27 = vector.extract_strided_slice %26 {offsets = [0, 0], sizes = [32, 64], strides = [1, 1]} : vector<34x64xf32> to vector<32x64xf32>
      %28 = vector.extract_strided_slice %26 {offsets = [1, 0], sizes = [32, 64], strides = [1, 1]} : vector<34x64xf32> to vector<32x64xf32>
      %29 = vector.extract_strided_slice %26 {offsets = [2, 0], sizes = [32, 64], strides = [1, 1]} : vector<34x64xf32> to vector<32x64xf32>
      %30 = tpu.concatenate %27, %28, %29 in 1 : vector<32x64xf32>, vector<32x64xf32>, vector<32x64xf32> -> vector<32x192xf32>
      %31 = arith.truncf %30 : vector<32x192xf32> to vector<32x192xbf16>
      %c1 = arith.constant 1 : index
      %c0_17 = arith.constant 0 : index
      %c0_18 = arith.constant 0 : index
      %32 = vector.load %arg4[%c1, %c0_17, %c0_18] : memref<3x192x64xbf16, #tpu.memory_space<vmem>>, vector<1x192x64xbf16>
      %33 = vector.shape_cast %32 : vector<1x192x64xbf16> to vector<192x64xbf16>
      %cst_19 = arith.constant dense<0.000000e+00> : vector<32x64xf32>
      %34 = tpu.matmul %31, %33, %cst_19 {dimension_numbers = #tpu.dot_dimension_numbers<[1], [0], [0], [1], [0, 0, 1, 1], [], []>} : vector<32x192xbf16>, vector<192x64xbf16>, vector<32x64xf32> -> vector<32x64xf32>
      %35 = arith.addf %22, %34 : vector<32x64xf32>
      %c2_i32_20 = arith.constant 2 : i32
      %36 = arith.addi %8, %c2_i32_20 : i32
      %37 = arith.index_cast %36 : i32 to index
      %c0_21 = arith.constant 0 : index
      %c0_22 = arith.constant 0 : index
      %38 = vector.load %arg7[%37, %c0_21, %c0_22] : memref<34x34x64xf32, #tpu.memory_space<vmem>>, vector<1x34x64xf32>
      %39 = vector.shape_cast %38 : vector<1x34x64xf32> to vector<34x64xf32>
      %40 = vector.extract_strided_slice %39 {offsets = [0, 0], sizes = [32, 64], strides = [1, 1]} : vector<34x64xf32> to vector<32x64xf32>
      %41 = vector.extract_strided_slice %39 {offsets = [1, 0], sizes = [32, 64], strides = [1, 1]} : vector<34x64xf32> to vector<32x64xf32>
      %42 = vector.extract_strided_slice %39 {offsets = [2, 0], sizes = [32, 64], strides = [1, 1]} : vector<34x64xf32> to vector<32x64xf32>
      %43 = tpu.concatenate %40, %41, %42 in 1 : vector<32x64xf32>, vector<32x64xf32>, vector<32x64xf32> -> vector<32x192xf32>
      %44 = arith.truncf %43 : vector<32x192xf32> to vector<32x192xbf16>
      %c2 = arith.constant 2 : index
      %c0_23 = arith.constant 0 : index
      %c0_24 = arith.constant 0 : index
      %45 = vector.load %arg4[%c2, %c0_23, %c0_24] : memref<3x192x64xbf16, #tpu.memory_space<vmem>>, vector<1x192x64xbf16>
      %46 = vector.shape_cast %45 : vector<1x192x64xbf16> to vector<192x64xbf16>
      %cst_25 = arith.constant dense<0.000000e+00> : vector<32x64xf32>
      %47 = tpu.matmul %44, %46, %cst_25 {dimension_numbers = #tpu.dot_dimension_numbers<[1], [0], [0], [1], [0, 0, 1, 1], [], []>} : vector<32x192xbf16>, vector<192x64xbf16>, vector<32x64xf32> -> vector<32x64xf32>
      %48 = arith.addf %35, %47 : vector<32x64xf32>
      %c0_26 = arith.constant 0 : index
      %c0_27 = arith.constant 0 : index
      %49 = vector.load %arg8[%c0_26, %c0_27] : memref<32x64xf32, #tpu.memory_space<vmem>>, vector<32x64xf32>
      tpu.vector_store %arg8[%c0_26, %c0_27], %48 {strides = array<i32>} : memref<32x64xf32, #tpu.memory_space<vmem>>, vector<32x64xf32>,
      %c0_28 = arith.constant 0 : index
      %c0_29 = arith.constant 0 : index
      %50 = vector.load %arg8[%c0_28, %c0_29] : memref<32x64xf32, #tpu.memory_space<vmem>>, vector<32x64xf32>
      %c1_i32_30 = arith.constant 1 : i32
      %51 = arith.addi %8, %c1_i32_30 : i32
      %cst_31 = arith.constant 0.000000e+00 : f32
      %52 = vector.broadcast %cst_31 : f32 to vector<32x64xf32>
      %c0_i32_32 = arith.constant 0 : i32
      %53 = arith.addi %51, %c0_i32_32 : i32
      %54 = arith.index_cast %53 : i32 to index
      %c0_33 = arith.constant 0 : index
      %c0_34 = arith.constant 0 : index
      %55 = vector.load %arg7[%54, %c0_33, %c0_34] : memref<34x34x64xf32, #tpu.memory_space<vmem>>, vector<1x34x64xf32>
      %56 = vector.shape_cast %55 : vector<1x34x64xf32> to vector<34x64xf32>
      %57 = vector.extract_strided_slice %56 {offsets = [0, 0], sizes = [32, 64], strides = [1, 1]} : vector<34x64xf32> to vector<32x64xf32>
      %58 = vector.extract_strided_slice %56 {offsets = [1, 0], sizes = [32, 64], strides = [1, 1]} : vector<34x64xf32> to vector<32x64xf32>
      %59 = vector.extract_strided_slice %56 {offsets = [2, 0], sizes = [32, 64], strides = [1, 1]} : vector<34x64xf32> to vector<32x64xf32>
      %60 = tpu.concatenate %57, %58, %59 in 1 : vector<32x64xf32>, vector<32x64xf32>, vector<32x64xf32> -> vector<32x192xf32>
      %61 = arith.truncf %60 : vector<32x192xf32> to vector<32x192xbf16>
      %c0_35 = arith.constant 0 : index
      %c0_36 = arith.constant 0 : index
      %c0_37 = arith.constant 0 : index
      %62 = vector.load %arg4[%c0_35, %c0_36, %c0_37] : memref<3x192x64xbf16, #tpu.memory_space<vmem>>, vector<1x192x64xbf16>
      %63 = vector.shape_cast %62 : vector<1x192x64xbf16> to vector<192x64xbf16>
      %cst_38 = arith.constant dense<0.000000e+00> : vector<32x64xf32>
      %64 = tpu.matmul %61, %63, %cst_38 {dimension_numbers = #tpu.dot_dimension_numbers<[1], [0], [0], [1], [0, 0, 1, 1], [], []>} : vector<32x192xbf16>, vector<192x64xbf16>, vector<32x64xf32> -> vector<32x64xf32>
      %65 = arith.addf %52, %64 : vector<32x64xf32>
      %c1_i32_39 = arith.constant 1 : i32
      %66 = arith.addi %51, %c1_i32_39 : i32
      %67 = arith.index_cast %66 : i32 to index
      %c0_40 = arith.constant 0 : index
      %c0_41 = arith.constant 0 : index
      %68 = vector.load %arg7[%67, %c0_40, %c0_41] : memref<34x34x64xf32, #tpu.memory_space<vmem>>, vector<1x34x64xf32>
      %69 = vector.shape_cast %68 : vector<1x34x64xf32> to vector<34x64xf32>
      %70 = vector.extract_strided_slice %69 {offsets = [0, 0], sizes = [32, 64], strides = [1, 1]} : vector<34x64xf32> to vector<32x64xf32>
      %71 = vector.extract_strided_slice %69 {offsets = [1, 0], sizes = [32, 64], strides = [1, 1]} : vector<34x64xf32> to vector<32x64xf32>
      %72 = vector.extract_strided_slice %69 {offsets = [2, 0], sizes = [32, 64], strides = [1, 1]} : vector<34x64xf32> to vector<32x64xf32>
      %73 = tpu.concatenate %70, %71, %72 in 1 : vector<32x64xf32>, vector<32x64xf32>, vector<32x64xf32> -> vector<32x192xf32>
      %74 = arith.truncf %73 : vector<32x192xf32> to vector<32x192xbf16>
      %c1_42 = arith.constant 1 : index
      %c0_43 = arith.constant 0 : index
      %c0_44 = arith.constant 0 : index
      %75 = vector.load %arg4[%c1_42, %c0_43, %c0_44] : memref<3x192x64xbf16, #tpu.memory_space<vmem>>, vector<1x192x64xbf16>
      %76 = vector.shape_cast %75 : vector<1x192x64xbf16> to vector<192x64xbf16>
      %cst_45 = arith.constant dense<0.000000e+00> : vector<32x64xf32>
      %77 = tpu.matmul %74, %76, %cst_45 {dimension_numbers = #tpu.dot_dimension_numbers<[1], [0], [0], [1], [0, 0, 1, 1], [], []>} : vector<32x192xbf16>, vector<192x64xbf16>, vector<32x64xf32> -> vector<32x64xf32>
      %78 = arith.addf %65, %77 : vector<32x64xf32>
      %c2_i32_46 = arith.constant 2 : i32
      %79 = arith.addi %51, %c2_i32_46 : i32
      %80 = arith.index_cast %79 : i32 to index
      %c0_47 = arith.constant 0 : index
      %c0_48 = arith.constant 0 : index
      %81 = vector.load %arg7[%80, %c0_47, %c0_48] : memref<34x34x64xf32, #tpu.memory_space<vmem>>, vector<1x34x64xf32>
      %82 = vector.shape_cast %81 : vector<1x34x64xf32> to vector<34x64xf32>
      %83 = vector.extract_strided_slice %82 {offsets = [0, 0], sizes = [32, 64], strides = [1, 1]} : vector<34x64xf32> to vector<32x64xf32>
      %84 = vector.extract_strided_slice %82 {offsets = [1, 0], sizes = [32, 64], strides = [1, 1]} : vector<34x64xf32> to vector<32x64xf32>
      %85 = vector.extract_strided_slice %82 {offsets = [2, 0], sizes = [32, 64], strides = [1, 1]} : vector<34x64xf32> to vector<32x64xf32>
      %86 = tpu.concatenate %83, %84, %85 in 1 : vector<32x64xf32>, vector<32x64xf32>, vector<32x64xf32> -> vector<32x192xf32>
      %87 = arith.truncf %86 : vector<32x192xf32> to vector<32x192xbf16>
      %c2_49 = arith.constant 2 : index
      %c0_50 = arith.constant 0 : index
      %c0_51 = arith.constant 0 : index
      %88 = vector.load %arg4[%c2_49, %c0_50, %c0_51] : memref<3x192x64xbf16, #tpu.memory_space<vmem>>, vector<1x192x64xbf16>
      %89 = vector.shape_cast %88 : vector<1x192x64xbf16> to vector<192x64xbf16>
      %cst_52 = arith.constant dense<0.000000e+00> : vector<32x64xf32>
      %90 = tpu.matmul %87, %89, %cst_52 {dimension_numbers = #tpu.dot_dimension_numbers<[1], [0], [0], [1], [0, 0, 1, 1], [], []>} : vector<32x192xbf16>, vector<192x64xbf16>, vector<32x64xf32> -> vector<32x64xf32>
      %91 = arith.addf %78, %90 : vector<32x64xf32>
      %92 = arith.maximumf %50, %91 : vector<32x64xf32>
      %c0_53 = arith.constant 0 : index
      %c0_54 = arith.constant 0 : index
      %93 = vector.load %arg8[%c0_53, %c0_54] : memref<32x64xf32, #tpu.memory_space<vmem>>, vector<32x64xf32>
      tpu.vector_store %arg8[%c0_53, %c0_54], %92 {strides = array<i32>} : memref<32x64xf32, #tpu.memory_space<vmem>>, vector<32x64xf32>,
      %c0_55 = arith.constant 0 : index
      %c0_56 = arith.constant 0 : index
      %94 = tpu.strided_load %arg8[%c0_55, %c0_56] {strides = array<i32: 2, 1>} : memref<32x64xf32, #tpu.memory_space<vmem>>, vector<16x64xf32>
      %c1_57 = arith.constant 1 : index
      %c0_58 = arith.constant 0 : index
      %95 = tpu.strided_load %arg8[%c1_57, %c0_58] {strides = array<i32: 2, 1>} : memref<32x64xf32, #tpu.memory_space<vmem>>, vector<16x64xf32>
      %96 = arith.maximumf %94, %95 : vector<16x64xf32>
      %97 = arith.addf %96, %6 : vector<16x64xf32>
      %cst_59 = arith.constant 0.000000e+00 : f32
      %98 = vector.broadcast %cst_59 : f32 to vector<16x64xf32>
      %99 = arith.maximumf %97, %98 : vector<16x64xf32>
      %100 = arith.truncf %99 : vector<16x64xf32> to vector<16x64xbf16>
      %c0_60 = arith.constant 0 : index
      %101 = arith.index_cast %arg9 : i32 to index
      %c0_61 = arith.constant 0 : index
      %c0_62 = arith.constant 0 : index
      %102 = vector.load %arg6[%c0_60, %101, %c0_61, %c0_62] : memref<1x16x16x64xbf16, #tpu.memory_space<vmem>>, vector<1x1x16x64xbf16>
      %103 = vector.shape_cast %102 : vector<1x1x16x64xbf16> to vector<16x64xbf16>
      %104 = vector.shape_cast %100 : vector<16x64xbf16> to vector<1x1x16x64xbf16>
      tpu.vector_store %arg6[%c0_60, %101, %c0_61, %c0_62], %104 {strides = array<i32>} : memref<1x16x16x64xbf16, #tpu.memory_space<vmem>>, vector<1x1x16x64xbf16>,
    }
    %c16_i32_6 = arith.constant 16 : i32
    return
  }
  func.func @transform_0(%arg0: i32) -> (i32, i32, i32, i32) {
    %c0_i32 = arith.constant 0 : i32
    %c0_i32_0 = arith.constant 0 : i32
    %c0_i32_1 = arith.constant 0 : i32
    %c0_i32_2 = arith.constant 0 : i32
    return %arg0, %c0_i32, %c0_i32_0, %c0_i32_1 : i32, i32, i32, i32
  }
  func.func @transform_1(%arg0: i32) -> (i32, i32, i32) {
    %c0_i32 = arith.constant 0 : i32
    %c0_i32_0 = arith.constant 0 : i32
    %c0_i32_1 = arith.constant 0 : i32
    %c0_i32_2 = arith.constant 0 : i32
    return %c0_i32, %c0_i32_0, %c0_i32_1 : i32, i32, i32
  }
  func.func @transform_2(%arg0: i32) -> (i32, i32) {
    %c0_i32 = arith.constant 0 : i32
    %c0_i32_0 = arith.constant 0 : i32
    %c0_i32_1 = arith.constant 0 : i32
    return %c0_i32, %c0_i32_0 : i32, i32
  }
  func.func @transform_3(%arg0: i32) -> (i32, i32, i32) {
    %c0_i32 = arith.constant 0 : i32
    %c0_i32_0 = arith.constant 0 : i32
    %c0_i32_1 = arith.constant 0 : i32
    %c0_i32_2 = arith.constant 0 : i32
    return %c0_i32, %c0_i32_0, %c0_i32_1 : i32, i32, i32
  }
  func.func @transform_4(%arg0: i32) -> (i32, i32) {
    %c0_i32 = arith.constant 0 : i32
    %c0_i32_0 = arith.constant 0 : i32
    %c0_i32_1 = arith.constant 0 : i32
    return %c0_i32, %c0_i32_0 : i32, i32
  }
  func.func @transform_5(%arg0: i32) -> (i32, i32, i32, i32) {
    %c0_i32 = arith.constant 0 : i32
    %c0_i32_0 = arith.constant 0 : i32
    %c0_i32_1 = arith.constant 0 : i32
    %c0_i32_2 = arith.constant 0 : i32
    return %arg0, %c0_i32, %c0_i32_0, %c0_i32_1 : i32, i32, i32, i32
  }
}

module attributes {stable_mosaic.version = 11 : i64} {
  func.func @_conv_pair_kernel(%arg0: i32, %arg1: memref<1x16x16x64xbf16, #tpu.memory_space<vmem>>, %arg2: memref<3x192x128xbf16, #tpu.memory_space<vmem>>, %arg3: memref<1x128xf32, #tpu.memory_space<vmem>>, %arg4: memref<3x384x128xbf16, #tpu.memory_space<vmem>>, %arg5: memref<1x128xf32, #tpu.memory_space<vmem>>, %arg6: memref<1x6x6x128xbf16, #tpu.memory_space<vmem>>, %arg7: memref<14x14x128xf32, #tpu.memory_space<vmem>>, %arg8: memref<12x128xf32, #tpu.memory_space<vmem>>) attributes {dimension_semantics = [#tpu.dimension_semantics<parallel>], iteration_bounds = array<i64: 2>, scalar_prefetch = 0 : i64, scratch_operands = 2 : i64, tpu.core_type = #tpu.core_type<tc>, window_params = [{transform_indices = @transform_0, window_bounds = array<i64: 1, 16, 16, 64>}, {pipeline_mode = #tpu.pipeline_mode<synchronous>, transform_indices = @transform_1, window_bounds = array<i64: 3, 192, 128>}, {pipeline_mode = #tpu.pipeline_mode<synchronous>, transform_indices = @transform_2, window_bounds = array<i64: 1, 128>}, {pipeline_mode = #tpu.pipeline_mode<synchronous>, transform_indices = @transform_3, window_bounds = array<i64: 3, 384, 128>}, {pipeline_mode = #tpu.pipeline_mode<synchronous>, transform_indices = @transform_4, window_bounds = array<i64: 1, 128>}, {transform_indices = @transform_5, window_bounds = array<i64: 1, 6, 6, 128>}]} {
    %c0 = arith.constant 0 : index
    %c0_0 = arith.constant 0 : index
    %0 = vector.load %arg3[%c0, %c0_0] : memref<1x128xf32, #tpu.memory_space<vmem>>, vector<1x128xf32>
    %1 = vector.shape_cast %0 : vector<1x128xf32> to vector<1x128xf32>
    %2 = vector.broadcast %1 : vector<1x128xf32> to vector<14x128xf32>
    %c0_i32 = arith.constant 0 : i32
    %c7_i32 = arith.constant 7 : i32
    %3 = arith.addi %c0_i32, %c7_i32 : i32
    %c1_i32 = arith.constant 1 : i32
    scf.for %arg9 = %c0_i32 to %3 step %c1_i32  : i32 {
      %c2_i32 = arith.constant 2 : i32
      %8 = arith.muli %c2_i32, %arg9 : i32
      %cst = arith.constant 0.000000e+00 : f32
      %9 = vector.broadcast %cst : f32 to vector<14x128xf32>
      %c0_i32_7 = arith.constant 0 : i32
      %10 = arith.addi %8, %c0_i32_7 : i32
      %c0_8 = arith.constant 0 : index
      %11 = arith.index_cast %10 : i32 to index
      %c0_9 = arith.constant 0 : index
      %c0_10 = arith.constant 0 : index
      %12 = vector.load %arg1[%c0_8, %11, %c0_9, %c0_10] : memref<1x16x16x64xbf16, #tpu.memory_space<vmem>>, vector<1x1x16x64xbf16>
      %13 = vector.shape_cast %12 : vector<1x1x16x64xbf16> to vector<16x64xbf16>
      %14 = arith.extf %13 : vector<16x64xbf16> to vector<16x64xf32>
      %15 = vector.extract_strided_slice %14 {offsets = [0, 0], sizes = [14, 64], strides = [1, 1]} : vector<16x64xf32> to vector<14x64xf32>
      %16 = vector.extract_strided_slice %14 {offsets = [1, 0], sizes = [14, 64], strides = [1, 1]} : vector<16x64xf32> to vector<14x64xf32>
      %17 = vector.extract_strided_slice %14 {offsets = [2, 0], sizes = [14, 64], strides = [1, 1]} : vector<16x64xf32> to vector<14x64xf32>
      %18 = tpu.concatenate %15, %16, %17 in 1 : vector<14x64xf32>, vector<14x64xf32>, vector<14x64xf32> -> vector<14x192xf32>
      %19 = arith.truncf %18 : vector<14x192xf32> to vector<14x192xbf16>
      %c0_11 = arith.constant 0 : index
      %c0_12 = arith.constant 0 : index
      %c0_13 = arith.constant 0 : index
      %20 = vector.load %arg2[%c0_11, %c0_12, %c0_13] : memref<3x192x128xbf16, #tpu.memory_space<vmem>>, vector<1x192x128xbf16>
      %21 = vector.shape_cast %20 : vector<1x192x128xbf16> to vector<192x128xbf16>
      %cst_14 = arith.constant dense<0.000000e+00> : vector<14x128xf32>
      %22 = tpu.matmul %19, %21, %cst_14 {dimension_numbers = #tpu.dot_dimension_numbers<[1], [0], [0], [1], [0, 0, 1, 1], [], []>} : vector<14x192xbf16>, vector<192x128xbf16>, vector<14x128xf32> -> vector<14x128xf32>
      %23 = arith.addf %9, %22 : vector<14x128xf32>
      %c1_i32_15 = arith.constant 1 : i32
      %24 = arith.addi %8, %c1_i32_15 : i32
      %c0_16 = arith.constant 0 : index
      %25 = arith.index_cast %24 : i32 to index
      %c0_17 = arith.constant 0 : index
      %c0_18 = arith.constant 0 : index
      %26 = vector.load %arg1[%c0_16, %25, %c0_17, %c0_18] : memref<1x16x16x64xbf16, #tpu.memory_space<vmem>>, vector<1x1x16x64xbf16>
      %27 = vector.shape_cast %26 : vector<1x1x16x64xbf16> to vector<16x64xbf16>
      %28 = arith.extf %27 : vector<16x64xbf16> to vector<16x64xf32>
      %29 = vector.extract_strided_slice %28 {offsets = [0, 0], sizes = [14, 64], strides = [1, 1]} : vector<16x64xf32> to vector<14x64xf32>
      %30 = vector.extract_strided_slice %28 {offsets = [1, 0], sizes = [14, 64], strides = [1, 1]} : vector<16x64xf32> to vector<14x64xf32>
      %31 = vector.extract_strided_slice %28 {offsets = [2, 0], sizes = [14, 64], strides = [1, 1]} : vector<16x64xf32> to vector<14x64xf32>
      %32 = tpu.concatenate %29, %30, %31 in 1 : vector<14x64xf32>, vector<14x64xf32>, vector<14x64xf32> -> vector<14x192xf32>
      %33 = arith.truncf %32 : vector<14x192xf32> to vector<14x192xbf16>
      %c1 = arith.constant 1 : index
      %c0_19 = arith.constant 0 : index
      %c0_20 = arith.constant 0 : index
      %34 = vector.load %arg2[%c1, %c0_19, %c0_20] : memref<3x192x128xbf16, #tpu.memory_space<vmem>>, vector<1x192x128xbf16>
      %35 = vector.shape_cast %34 : vector<1x192x128xbf16> to vector<192x128xbf16>
      %cst_21 = arith.constant dense<0.000000e+00> : vector<14x128xf32>
      %36 = tpu.matmul %33, %35, %cst_21 {dimension_numbers = #tpu.dot_dimension_numbers<[1], [0], [0], [1], [0, 0, 1, 1], [], []>} : vector<14x192xbf16>, vector<192x128xbf16>, vector<14x128xf32> -> vector<14x128xf32>
      %37 = arith.addf %23, %36 : vector<14x128xf32>
      %c2_i32_22 = arith.constant 2 : i32
      %38 = arith.addi %8, %c2_i32_22 : i32
      %c0_23 = arith.constant 0 : index
      %39 = arith.index_cast %38 : i32 to index
      %c0_24 = arith.constant 0 : index
      %c0_25 = arith.constant 0 : index
      %40 = vector.load %arg1[%c0_23, %39, %c0_24, %c0_25] : memref<1x16x16x64xbf16, #tpu.memory_space<vmem>>, vector<1x1x16x64xbf16>
      %41 = vector.shape_cast %40 : vector<1x1x16x64xbf16> to vector<16x64xbf16>
      %42 = arith.extf %41 : vector<16x64xbf16> to vector<16x64xf32>
      %43 = vector.extract_strided_slice %42 {offsets = [0, 0], sizes = [14, 64], strides = [1, 1]} : vector<16x64xf32> to vector<14x64xf32>
      %44 = vector.extract_strided_slice %42 {offsets = [1, 0], sizes = [14, 64], strides = [1, 1]} : vector<16x64xf32> to vector<14x64xf32>
      %45 = vector.extract_strided_slice %42 {offsets = [2, 0], sizes = [14, 64], strides = [1, 1]} : vector<16x64xf32> to vector<14x64xf32>
      %46 = tpu.concatenate %43, %44, %45 in 1 : vector<14x64xf32>, vector<14x64xf32>, vector<14x64xf32> -> vector<14x192xf32>
      %47 = arith.truncf %46 : vector<14x192xf32> to vector<14x192xbf16>
      %c2 = arith.constant 2 : index
      %c0_26 = arith.constant 0 : index
      %c0_27 = arith.constant 0 : index
      %48 = vector.load %arg2[%c2, %c0_26, %c0_27] : memref<3x192x128xbf16, #tpu.memory_space<vmem>>, vector<1x192x128xbf16>
      %49 = vector.shape_cast %48 : vector<1x192x128xbf16> to vector<192x128xbf16>
      %cst_28 = arith.constant dense<0.000000e+00> : vector<14x128xf32>
      %50 = tpu.matmul %47, %49, %cst_28 {dimension_numbers = #tpu.dot_dimension_numbers<[1], [0], [0], [1], [0, 0, 1, 1], [], []>} : vector<14x192xbf16>, vector<192x128xbf16>, vector<14x128xf32> -> vector<14x128xf32>
      %51 = arith.addf %37, %50 : vector<14x128xf32>
      %52 = arith.addf %51, %2 : vector<14x128xf32>
      %cst_29 = arith.constant 0.000000e+00 : f32
      %53 = vector.broadcast %cst_29 : f32 to vector<14x128xf32>
      %54 = arith.maximumf %52, %53 : vector<14x128xf32>
      %55 = arith.index_cast %8 : i32 to index
      %c0_30 = arith.constant 0 : index
      %c0_31 = arith.constant 0 : index
      %56 = vector.load %arg7[%55, %c0_30, %c0_31] : memref<14x14x128xf32, #tpu.memory_space<vmem>>, vector<1x14x128xf32>
      %57 = vector.shape_cast %56 : vector<1x14x128xf32> to vector<14x128xf32>
      %58 = vector.shape_cast %54 : vector<14x128xf32> to vector<1x14x128xf32>
      tpu.vector_store %arg7[%55, %c0_30, %c0_31], %58 {strides = array<i32>} : memref<14x14x128xf32, #tpu.memory_space<vmem>>, vector<1x14x128xf32>,
      %c1_i32_32 = arith.constant 1 : i32
      %59 = arith.addi %8, %c1_i32_32 : i32
      %cst_33 = arith.constant 0.000000e+00 : f32
      %60 = vector.broadcast %cst_33 : f32 to vector<14x128xf32>
      %c0_i32_34 = arith.constant 0 : i32
      %61 = arith.addi %59, %c0_i32_34 : i32
      %c0_35 = arith.constant 0 : index
      %62 = arith.index_cast %61 : i32 to index
      %c0_36 = arith.constant 0 : index
      %c0_37 = arith.constant 0 : index
      %63 = vector.load %arg1[%c0_35, %62, %c0_36, %c0_37] : memref<1x16x16x64xbf16, #tpu.memory_space<vmem>>, vector<1x1x16x64xbf16>
      %64 = vector.shape_cast %63 : vector<1x1x16x64xbf16> to vector<16x64xbf16>
      %65 = arith.extf %64 : vector<16x64xbf16> to vector<16x64xf32>
      %66 = vector.extract_strided_slice %65 {offsets = [0, 0], sizes = [14, 64], strides = [1, 1]} : vector<16x64xf32> to vector<14x64xf32>
      %67 = vector.extract_strided_slice %65 {offsets = [1, 0], sizes = [14, 64], strides = [1, 1]} : vector<16x64xf32> to vector<14x64xf32>
      %68 = vector.extract_strided_slice %65 {offsets = [2, 0], sizes = [14, 64], strides = [1, 1]} : vector<16x64xf32> to vector<14x64xf32>
      %69 = tpu.concatenate %66, %67, %68 in 1 : vector<14x64xf32>, vector<14x64xf32>, vector<14x64xf32> -> vector<14x192xf32>
      %70 = arith.truncf %69 : vector<14x192xf32> to vector<14x192xbf16>
      %c0_38 = arith.constant 0 : index
      %c0_39 = arith.constant 0 : index
      %c0_40 = arith.constant 0 : index
      %71 = vector.load %arg2[%c0_38, %c0_39, %c0_40] : memref<3x192x128xbf16, #tpu.memory_space<vmem>>, vector<1x192x128xbf16>
      %72 = vector.shape_cast %71 : vector<1x192x128xbf16> to vector<192x128xbf16>
      %cst_41 = arith.constant dense<0.000000e+00> : vector<14x128xf32>
      %73 = tpu.matmul %70, %72, %cst_41 {dimension_numbers = #tpu.dot_dimension_numbers<[1], [0], [0], [1], [0, 0, 1, 1], [], []>} : vector<14x192xbf16>, vector<192x128xbf16>, vector<14x128xf32> -> vector<14x128xf32>
      %74 = arith.addf %60, %73 : vector<14x128xf32>
      %c1_i32_42 = arith.constant 1 : i32
      %75 = arith.addi %59, %c1_i32_42 : i32
      %c0_43 = arith.constant 0 : index
      %76 = arith.index_cast %75 : i32 to index
      %c0_44 = arith.constant 0 : index
      %c0_45 = arith.constant 0 : index
      %77 = vector.load %arg1[%c0_43, %76, %c0_44, %c0_45] : memref<1x16x16x64xbf16, #tpu.memory_space<vmem>>, vector<1x1x16x64xbf16>
      %78 = vector.shape_cast %77 : vector<1x1x16x64xbf16> to vector<16x64xbf16>
      %79 = arith.extf %78 : vector<16x64xbf16> to vector<16x64xf32>
      %80 = vector.extract_strided_slice %79 {offsets = [0, 0], sizes = [14, 64], strides = [1, 1]} : vector<16x64xf32> to vector<14x64xf32>
      %81 = vector.extract_strided_slice %79 {offsets = [1, 0], sizes = [14, 64], strides = [1, 1]} : vector<16x64xf32> to vector<14x64xf32>
      %82 = vector.extract_strided_slice %79 {offsets = [2, 0], sizes = [14, 64], strides = [1, 1]} : vector<16x64xf32> to vector<14x64xf32>
      %83 = tpu.concatenate %80, %81, %82 in 1 : vector<14x64xf32>, vector<14x64xf32>, vector<14x64xf32> -> vector<14x192xf32>
      %84 = arith.truncf %83 : vector<14x192xf32> to vector<14x192xbf16>
      %c1_46 = arith.constant 1 : index
      %c0_47 = arith.constant 0 : index
      %c0_48 = arith.constant 0 : index
      %85 = vector.load %arg2[%c1_46, %c0_47, %c0_48] : memref<3x192x128xbf16, #tpu.memory_space<vmem>>, vector<1x192x128xbf16>
      %86 = vector.shape_cast %85 : vector<1x192x128xbf16> to vector<192x128xbf16>
      %cst_49 = arith.constant dense<0.000000e+00> : vector<14x128xf32>
      %87 = tpu.matmul %84, %86, %cst_49 {dimension_numbers = #tpu.dot_dimension_numbers<[1], [0], [0], [1], [0, 0, 1, 1], [], []>} : vector<14x192xbf16>, vector<192x128xbf16>, vector<14x128xf32> -> vector<14x128xf32>
      %88 = arith.addf %74, %87 : vector<14x128xf32>
      %c2_i32_50 = arith.constant 2 : i32
      %89 = arith.addi %59, %c2_i32_50 : i32
      %c0_51 = arith.constant 0 : index
      %90 = arith.index_cast %89 : i32 to index
      %c0_52 = arith.constant 0 : index
      %c0_53 = arith.constant 0 : index
      %91 = vector.load %arg1[%c0_51, %90, %c0_52, %c0_53] : memref<1x16x16x64xbf16, #tpu.memory_space<vmem>>, vector<1x1x16x64xbf16>
      %92 = vector.shape_cast %91 : vector<1x1x16x64xbf16> to vector<16x64xbf16>
      %93 = arith.extf %92 : vector<16x64xbf16> to vector<16x64xf32>
      %94 = vector.extract_strided_slice %93 {offsets = [0, 0], sizes = [14, 64], strides = [1, 1]} : vector<16x64xf32> to vector<14x64xf32>
      %95 = vector.extract_strided_slice %93 {offsets = [1, 0], sizes = [14, 64], strides = [1, 1]} : vector<16x64xf32> to vector<14x64xf32>
      %96 = vector.extract_strided_slice %93 {offsets = [2, 0], sizes = [14, 64], strides = [1, 1]} : vector<16x64xf32> to vector<14x64xf32>
      %97 = tpu.concatenate %94, %95, %96 in 1 : vector<14x64xf32>, vector<14x64xf32>, vector<14x64xf32> -> vector<14x192xf32>
      %98 = arith.truncf %97 : vector<14x192xf32> to vector<14x192xbf16>
      %c2_54 = arith.constant 2 : index
      %c0_55 = arith.constant 0 : index
      %c0_56 = arith.constant 0 : index
      %99 = vector.load %arg2[%c2_54, %c0_55, %c0_56] : memref<3x192x128xbf16, #tpu.memory_space<vmem>>, vector<1x192x128xbf16>
      %100 = vector.shape_cast %99 : vector<1x192x128xbf16> to vector<192x128xbf16>
      %cst_57 = arith.constant dense<0.000000e+00> : vector<14x128xf32>
      %101 = tpu.matmul %98, %100, %cst_57 {dimension_numbers = #tpu.dot_dimension_numbers<[1], [0], [0], [1], [0, 0, 1, 1], [], []>} : vector<14x192xbf16>, vector<192x128xbf16>, vector<14x128xf32> -> vector<14x128xf32>
      %102 = arith.addf %88, %101 : vector<14x128xf32>
      %103 = arith.addf %102, %2 : vector<14x128xf32>
      %cst_58 = arith.constant 0.000000e+00 : f32
      %104 = vector.broadcast %cst_58 : f32 to vector<14x128xf32>
      %105 = arith.maximumf %103, %104 : vector<14x128xf32>
      %c1_i32_59 = arith.constant 1 : i32
      %106 = arith.addi %8, %c1_i32_59 : i32
      %107 = arith.index_cast %106 : i32 to index
      %c0_60 = arith.constant 0 : index
      %c0_61 = arith.constant 0 : index
      %108 = vector.load %arg7[%107, %c0_60, %c0_61] : memref<14x14x128xf32, #tpu.memory_space<vmem>>, vector<1x14x128xf32>
      %109 = vector.shape_cast %108 : vector<1x14x128xf32> to vector<14x128xf32>
      %110 = vector.shape_cast %105 : vector<14x128xf32> to vector<1x14x128xf32>
      tpu.vector_store %arg7[%107, %c0_60, %c0_61], %110 {strides = array<i32>} : memref<14x14x128xf32, #tpu.memory_space<vmem>>, vector<1x14x128xf32>,
    }
    %c7_i32_1 = arith.constant 7 : i32
    %c0_2 = arith.constant 0 : index
    %c0_3 = arith.constant 0 : index
    %4 = vector.load %arg5[%c0_2, %c0_3] : memref<1x128xf32, #tpu.memory_space<vmem>>, vector<1x128xf32>
    %5 = vector.shape_cast %4 : vector<1x128xf32> to vector<1x128xf32>
    %6 = vector.broadcast %5 : vector<1x128xf32> to vector<6x128xf32>
    %c0_i32_4 = arith.constant 0 : i32
    %c6_i32 = arith.constant 6 : i32
    %7 = arith.addi %c0_i32_4, %c6_i32 : i32
    %c1_i32_5 = arith.constant 1 : i32
    scf.for %arg9 = %c0_i32_4 to %7 step %c1_i32_5  : i32 {
      %c2_i32 = arith.constant 2 : i32
      %8 = arith.muli %c2_i32, %arg9 : i32
      %cst = arith.constant 0.000000e+00 : f32
      %9 = vector.broadcast %cst : f32 to vector<12x128xf32>
      %c0_i32_7 = arith.constant 0 : i32
      %10 = arith.addi %8, %c0_i32_7 : i32
      %11 = arith.index_cast %10 : i32 to index
      %c0_8 = arith.constant 0 : index
      %c0_9 = arith.constant 0 : index
      %12 = vector.load %arg7[%11, %c0_8, %c0_9] : memref<14x14x128xf32, #tpu.memory_space<vmem>>, vector<1x14x128xf32>
      %13 = vector.shape_cast %12 : vector<1x14x128xf32> to vector<14x128xf32>
      %14 = vector.extract_strided_slice %13 {offsets = [0, 0], sizes = [12, 128], strides = [1, 1]} : vector<14x128xf32> to vector<12x128xf32>
      %15 = vector.extract_strided_slice %13 {offsets = [1, 0], sizes = [12, 128], strides = [1, 1]} : vector<14x128xf32> to vector<12x128xf32>
      %16 = vector.extract_strided_slice %13 {offsets = [2, 0], sizes = [12, 128], strides = [1, 1]} : vector<14x128xf32> to vector<12x128xf32>
      %17 = tpu.concatenate %14, %15, %16 in 1 : vector<12x128xf32>, vector<12x128xf32>, vector<12x128xf32> -> vector<12x384xf32>
      %18 = arith.truncf %17 : vector<12x384xf32> to vector<12x384xbf16>
      %c0_10 = arith.constant 0 : index
      %c0_11 = arith.constant 0 : index
      %c0_12 = arith.constant 0 : index
      %19 = vector.load %arg4[%c0_10, %c0_11, %c0_12] : memref<3x384x128xbf16, #tpu.memory_space<vmem>>, vector<1x384x128xbf16>
      %20 = vector.shape_cast %19 : vector<1x384x128xbf16> to vector<384x128xbf16>
      %cst_13 = arith.constant dense<0.000000e+00> : vector<12x128xf32>
      %21 = tpu.matmul %18, %20, %cst_13 {dimension_numbers = #tpu.dot_dimension_numbers<[1], [0], [0], [1], [0, 0, 1, 1], [], []>} : vector<12x384xbf16>, vector<384x128xbf16>, vector<12x128xf32> -> vector<12x128xf32>
      %22 = arith.addf %9, %21 : vector<12x128xf32>
      %c1_i32_14 = arith.constant 1 : i32
      %23 = arith.addi %8, %c1_i32_14 : i32
      %24 = arith.index_cast %23 : i32 to index
      %c0_15 = arith.constant 0 : index
      %c0_16 = arith.constant 0 : index
      %25 = vector.load %arg7[%24, %c0_15, %c0_16] : memref<14x14x128xf32, #tpu.memory_space<vmem>>, vector<1x14x128xf32>
      %26 = vector.shape_cast %25 : vector<1x14x128xf32> to vector<14x128xf32>
      %27 = vector.extract_strided_slice %26 {offsets = [0, 0], sizes = [12, 128], strides = [1, 1]} : vector<14x128xf32> to vector<12x128xf32>
      %28 = vector.extract_strided_slice %26 {offsets = [1, 0], sizes = [12, 128], strides = [1, 1]} : vector<14x128xf32> to vector<12x128xf32>
      %29 = vector.extract_strided_slice %26 {offsets = [2, 0], sizes = [12, 128], strides = [1, 1]} : vector<14x128xf32> to vector<12x128xf32>
      %30 = tpu.concatenate %27, %28, %29 in 1 : vector<12x128xf32>, vector<12x128xf32>, vector<12x128xf32> -> vector<12x384xf32>
      %31 = arith.truncf %30 : vector<12x384xf32> to vector<12x384xbf16>
      %c1 = arith.constant 1 : index
      %c0_17 = arith.constant 0 : index
      %c0_18 = arith.constant 0 : index
      %32 = vector.load %arg4[%c1, %c0_17, %c0_18] : memref<3x384x128xbf16, #tpu.memory_space<vmem>>, vector<1x384x128xbf16>
      %33 = vector.shape_cast %32 : vector<1x384x128xbf16> to vector<384x128xbf16>
      %cst_19 = arith.constant dense<0.000000e+00> : vector<12x128xf32>
      %34 = tpu.matmul %31, %33, %cst_19 {dimension_numbers = #tpu.dot_dimension_numbers<[1], [0], [0], [1], [0, 0, 1, 1], [], []>} : vector<12x384xbf16>, vector<384x128xbf16>, vector<12x128xf32> -> vector<12x128xf32>
      %35 = arith.addf %22, %34 : vector<12x128xf32>
      %c2_i32_20 = arith.constant 2 : i32
      %36 = arith.addi %8, %c2_i32_20 : i32
      %37 = arith.index_cast %36 : i32 to index
      %c0_21 = arith.constant 0 : index
      %c0_22 = arith.constant 0 : index
      %38 = vector.load %arg7[%37, %c0_21, %c0_22] : memref<14x14x128xf32, #tpu.memory_space<vmem>>, vector<1x14x128xf32>
      %39 = vector.shape_cast %38 : vector<1x14x128xf32> to vector<14x128xf32>
      %40 = vector.extract_strided_slice %39 {offsets = [0, 0], sizes = [12, 128], strides = [1, 1]} : vector<14x128xf32> to vector<12x128xf32>
      %41 = vector.extract_strided_slice %39 {offsets = [1, 0], sizes = [12, 128], strides = [1, 1]} : vector<14x128xf32> to vector<12x128xf32>
      %42 = vector.extract_strided_slice %39 {offsets = [2, 0], sizes = [12, 128], strides = [1, 1]} : vector<14x128xf32> to vector<12x128xf32>
      %43 = tpu.concatenate %40, %41, %42 in 1 : vector<12x128xf32>, vector<12x128xf32>, vector<12x128xf32> -> vector<12x384xf32>
      %44 = arith.truncf %43 : vector<12x384xf32> to vector<12x384xbf16>
      %c2 = arith.constant 2 : index
      %c0_23 = arith.constant 0 : index
      %c0_24 = arith.constant 0 : index
      %45 = vector.load %arg4[%c2, %c0_23, %c0_24] : memref<3x384x128xbf16, #tpu.memory_space<vmem>>, vector<1x384x128xbf16>
      %46 = vector.shape_cast %45 : vector<1x384x128xbf16> to vector<384x128xbf16>
      %cst_25 = arith.constant dense<0.000000e+00> : vector<12x128xf32>
      %47 = tpu.matmul %44, %46, %cst_25 {dimension_numbers = #tpu.dot_dimension_numbers<[1], [0], [0], [1], [0, 0, 1, 1], [], []>} : vector<12x384xbf16>, vector<384x128xbf16>, vector<12x128xf32> -> vector<12x128xf32>
      %48 = arith.addf %35, %47 : vector<12x128xf32>
      %c0_26 = arith.constant 0 : index
      %c0_27 = arith.constant 0 : index
      %49 = vector.load %arg8[%c0_26, %c0_27] : memref<12x128xf32, #tpu.memory_space<vmem>>, vector<12x128xf32>
      tpu.vector_store %arg8[%c0_26, %c0_27], %48 {strides = array<i32>} : memref<12x128xf32, #tpu.memory_space<vmem>>, vector<12x128xf32>,
      %c0_28 = arith.constant 0 : index
      %c0_29 = arith.constant 0 : index
      %50 = vector.load %arg8[%c0_28, %c0_29] : memref<12x128xf32, #tpu.memory_space<vmem>>, vector<12x128xf32>
      %c1_i32_30 = arith.constant 1 : i32
      %51 = arith.addi %8, %c1_i32_30 : i32
      %cst_31 = arith.constant 0.000000e+00 : f32
      %52 = vector.broadcast %cst_31 : f32 to vector<12x128xf32>
      %c0_i32_32 = arith.constant 0 : i32
      %53 = arith.addi %51, %c0_i32_32 : i32
      %54 = arith.index_cast %53 : i32 to index
      %c0_33 = arith.constant 0 : index
      %c0_34 = arith.constant 0 : index
      %55 = vector.load %arg7[%54, %c0_33, %c0_34] : memref<14x14x128xf32, #tpu.memory_space<vmem>>, vector<1x14x128xf32>
      %56 = vector.shape_cast %55 : vector<1x14x128xf32> to vector<14x128xf32>
      %57 = vector.extract_strided_slice %56 {offsets = [0, 0], sizes = [12, 128], strides = [1, 1]} : vector<14x128xf32> to vector<12x128xf32>
      %58 = vector.extract_strided_slice %56 {offsets = [1, 0], sizes = [12, 128], strides = [1, 1]} : vector<14x128xf32> to vector<12x128xf32>
      %59 = vector.extract_strided_slice %56 {offsets = [2, 0], sizes = [12, 128], strides = [1, 1]} : vector<14x128xf32> to vector<12x128xf32>
      %60 = tpu.concatenate %57, %58, %59 in 1 : vector<12x128xf32>, vector<12x128xf32>, vector<12x128xf32> -> vector<12x384xf32>
      %61 = arith.truncf %60 : vector<12x384xf32> to vector<12x384xbf16>
      %c0_35 = arith.constant 0 : index
      %c0_36 = arith.constant 0 : index
      %c0_37 = arith.constant 0 : index
      %62 = vector.load %arg4[%c0_35, %c0_36, %c0_37] : memref<3x384x128xbf16, #tpu.memory_space<vmem>>, vector<1x384x128xbf16>
      %63 = vector.shape_cast %62 : vector<1x384x128xbf16> to vector<384x128xbf16>
      %cst_38 = arith.constant dense<0.000000e+00> : vector<12x128xf32>
      %64 = tpu.matmul %61, %63, %cst_38 {dimension_numbers = #tpu.dot_dimension_numbers<[1], [0], [0], [1], [0, 0, 1, 1], [], []>} : vector<12x384xbf16>, vector<384x128xbf16>, vector<12x128xf32> -> vector<12x128xf32>
      %65 = arith.addf %52, %64 : vector<12x128xf32>
      %c1_i32_39 = arith.constant 1 : i32
      %66 = arith.addi %51, %c1_i32_39 : i32
      %67 = arith.index_cast %66 : i32 to index
      %c0_40 = arith.constant 0 : index
      %c0_41 = arith.constant 0 : index
      %68 = vector.load %arg7[%67, %c0_40, %c0_41] : memref<14x14x128xf32, #tpu.memory_space<vmem>>, vector<1x14x128xf32>
      %69 = vector.shape_cast %68 : vector<1x14x128xf32> to vector<14x128xf32>
      %70 = vector.extract_strided_slice %69 {offsets = [0, 0], sizes = [12, 128], strides = [1, 1]} : vector<14x128xf32> to vector<12x128xf32>
      %71 = vector.extract_strided_slice %69 {offsets = [1, 0], sizes = [12, 128], strides = [1, 1]} : vector<14x128xf32> to vector<12x128xf32>
      %72 = vector.extract_strided_slice %69 {offsets = [2, 0], sizes = [12, 128], strides = [1, 1]} : vector<14x128xf32> to vector<12x128xf32>
      %73 = tpu.concatenate %70, %71, %72 in 1 : vector<12x128xf32>, vector<12x128xf32>, vector<12x128xf32> -> vector<12x384xf32>
      %74 = arith.truncf %73 : vector<12x384xf32> to vector<12x384xbf16>
      %c1_42 = arith.constant 1 : index
      %c0_43 = arith.constant 0 : index
      %c0_44 = arith.constant 0 : index
      %75 = vector.load %arg4[%c1_42, %c0_43, %c0_44] : memref<3x384x128xbf16, #tpu.memory_space<vmem>>, vector<1x384x128xbf16>
      %76 = vector.shape_cast %75 : vector<1x384x128xbf16> to vector<384x128xbf16>
      %cst_45 = arith.constant dense<0.000000e+00> : vector<12x128xf32>
      %77 = tpu.matmul %74, %76, %cst_45 {dimension_numbers = #tpu.dot_dimension_numbers<[1], [0], [0], [1], [0, 0, 1, 1], [], []>} : vector<12x384xbf16>, vector<384x128xbf16>, vector<12x128xf32> -> vector<12x128xf32>
      %78 = arith.addf %65, %77 : vector<12x128xf32>
      %c2_i32_46 = arith.constant 2 : i32
      %79 = arith.addi %51, %c2_i32_46 : i32
      %80 = arith.index_cast %79 : i32 to index
      %c0_47 = arith.constant 0 : index
      %c0_48 = arith.constant 0 : index
      %81 = vector.load %arg7[%80, %c0_47, %c0_48] : memref<14x14x128xf32, #tpu.memory_space<vmem>>, vector<1x14x128xf32>
      %82 = vector.shape_cast %81 : vector<1x14x128xf32> to vector<14x128xf32>
      %83 = vector.extract_strided_slice %82 {offsets = [0, 0], sizes = [12, 128], strides = [1, 1]} : vector<14x128xf32> to vector<12x128xf32>
      %84 = vector.extract_strided_slice %82 {offsets = [1, 0], sizes = [12, 128], strides = [1, 1]} : vector<14x128xf32> to vector<12x128xf32>
      %85 = vector.extract_strided_slice %82 {offsets = [2, 0], sizes = [12, 128], strides = [1, 1]} : vector<14x128xf32> to vector<12x128xf32>
      %86 = tpu.concatenate %83, %84, %85 in 1 : vector<12x128xf32>, vector<12x128xf32>, vector<12x128xf32> -> vector<12x384xf32>
      %87 = arith.truncf %86 : vector<12x384xf32> to vector<12x384xbf16>
      %c2_49 = arith.constant 2 : index
      %c0_50 = arith.constant 0 : index
      %c0_51 = arith.constant 0 : index
      %88 = vector.load %arg4[%c2_49, %c0_50, %c0_51] : memref<3x384x128xbf16, #tpu.memory_space<vmem>>, vector<1x384x128xbf16>
      %89 = vector.shape_cast %88 : vector<1x384x128xbf16> to vector<384x128xbf16>
      %cst_52 = arith.constant dense<0.000000e+00> : vector<12x128xf32>
      %90 = tpu.matmul %87, %89, %cst_52 {dimension_numbers = #tpu.dot_dimension_numbers<[1], [0], [0], [1], [0, 0, 1, 1], [], []>} : vector<12x384xbf16>, vector<384x128xbf16>, vector<12x128xf32> -> vector<12x128xf32>
      %91 = arith.addf %78, %90 : vector<12x128xf32>
      %92 = arith.maximumf %50, %91 : vector<12x128xf32>
      %c0_53 = arith.constant 0 : index
      %c0_54 = arith.constant 0 : index
      %93 = vector.load %arg8[%c0_53, %c0_54] : memref<12x128xf32, #tpu.memory_space<vmem>>, vector<12x128xf32>
      tpu.vector_store %arg8[%c0_53, %c0_54], %92 {strides = array<i32>} : memref<12x128xf32, #tpu.memory_space<vmem>>, vector<12x128xf32>,
      %c0_55 = arith.constant 0 : index
      %c0_56 = arith.constant 0 : index
      %94 = tpu.strided_load %arg8[%c0_55, %c0_56] {strides = array<i32: 2, 1>} : memref<12x128xf32, #tpu.memory_space<vmem>>, vector<6x128xf32>
      %c1_57 = arith.constant 1 : index
      %c0_58 = arith.constant 0 : index
      %95 = tpu.strided_load %arg8[%c1_57, %c0_58] {strides = array<i32: 2, 1>} : memref<12x128xf32, #tpu.memory_space<vmem>>, vector<6x128xf32>
      %96 = arith.maximumf %94, %95 : vector<6x128xf32>
      %97 = arith.addf %96, %6 : vector<6x128xf32>
      %cst_59 = arith.constant 0.000000e+00 : f32
      %98 = vector.broadcast %cst_59 : f32 to vector<6x128xf32>
      %99 = arith.maximumf %97, %98 : vector<6x128xf32>
      %100 = arith.truncf %99 : vector<6x128xf32> to vector<6x128xbf16>
      %c0_60 = arith.constant 0 : index
      %101 = arith.index_cast %arg9 : i32 to index
      %c0_61 = arith.constant 0 : index
      %c0_62 = arith.constant 0 : index
      %102 = vector.load %arg6[%c0_60, %101, %c0_61, %c0_62] : memref<1x6x6x128xbf16, #tpu.memory_space<vmem>>, vector<1x1x6x128xbf16>
      %103 = vector.shape_cast %102 : vector<1x1x6x128xbf16> to vector<6x128xbf16>
      %104 = vector.shape_cast %100 : vector<6x128xbf16> to vector<1x1x6x128xbf16>
      tpu.vector_store %arg6[%c0_60, %101, %c0_61, %c0_62], %104 {strides = array<i32>} : memref<1x6x6x128xbf16, #tpu.memory_space<vmem>>, vector<1x1x6x128xbf16>,
    }
    %c6_i32_6 = arith.constant 6 : i32
    return
  }
  func.func @transform_0(%arg0: i32) -> (i32, i32, i32, i32) {
    %c0_i32 = arith.constant 0 : i32
    %c0_i32_0 = arith.constant 0 : i32
    %c0_i32_1 = arith.constant 0 : i32
    %c0_i32_2 = arith.constant 0 : i32
    return %arg0, %c0_i32, %c0_i32_0, %c0_i32_1 : i32, i32, i32, i32
  }
  func.func @transform_1(%arg0: i32) -> (i32, i32, i32) {
    %c0_i32 = arith.constant 0 : i32
    %c0_i32_0 = arith.constant 0 : i32
    %c0_i32_1 = arith.constant 0 : i32
    %c0_i32_2 = arith.constant 0 : i32
    return %c0_i32, %c0_i32_0, %c0_i32_1 : i32, i32, i32
  }
  func.func @transform_2(%arg0: i32) -> (i32, i32) {
    %c0_i32 = arith.constant 0 : i32
    %c0_i32_0 = arith.constant 0 : i32
    %c0_i32_1 = arith.constant 0 : i32
    return %c0_i32, %c0_i32_0 : i32, i32
  }
  func.func @transform_3(%arg0: i32) -> (i32, i32, i32) {
    %c0_i32 = arith.constant 0 : i32
    %c0_i32_0 = arith.constant 0 : i32
    %c0_i32_1 = arith.constant 0 : i32
    %c0_i32_2 = arith.constant 0 : i32
    return %c0_i32, %c0_i32_0, %c0_i32_1 : i32, i32, i32
  }
  func.func @transform_4(%arg0: i32) -> (i32, i32) {
    %c0_i32 = arith.constant 0 : i32
    %c0_i32_0 = arith.constant 0 : i32
    %c0_i32_1 = arith.constant 0 : i32
    return %c0_i32, %c0_i32_0 : i32, i32
  }
  func.func @transform_5(%arg0: i32) -> (i32, i32, i32, i32) {
    %c0_i32 = arith.constant 0 : i32
    %c0_i32_0 = arith.constant 0 : i32
    %c0_i32_1 = arith.constant 0 : i32
    %c0_i32_2 = arith.constant 0 : i32
    return %arg0, %c0_i32, %c0_i32_0, %c0_i32_1 : i32, i32, i32, i32
  }
}

module attributes {stable_mosaic.version = 11 : i64} {
  func.func @_mlp_head_kernel(%arg0: i32, %arg1: memref<2x2304xbf16, #tpu.memory_space<vmem>>, %arg2: memref<2304x512xbf16, #tpu.memory_space<vmem>>, %arg3: memref<1x512xf32, #tpu.memory_space<vmem>>, %arg4: memref<1x512xf32, #tpu.memory_space<vmem>>, %arg5: memref<1x1xf32, #tpu.memory_space<vmem>>, %arg6: memref<2x1xf32, #tpu.memory_space<vmem>>, %arg7: memref<2x512xf32, #tpu.memory_space<vmem>>) attributes {dimension_semantics = [#tpu.dimension_semantics<arbitrary>], iteration_bounds = array<i64: 2>, scalar_prefetch = 0 : i64, scratch_operands = 1 : i64, tpu.core_type = #tpu.core_type<tc>, window_params = [{transform_indices = @transform_0, window_bounds = array<i64: 2, 2304>}, {transform_indices = @transform_1, window_bounds = array<i64: 2304, 512>}, {pipeline_mode = #tpu.pipeline_mode<synchronous>, transform_indices = @transform_2, window_bounds = array<i64: 1, 512>}, {pipeline_mode = #tpu.pipeline_mode<synchronous>, transform_indices = @transform_3, window_bounds = array<i64: 1, 512>}, {pipeline_mode = #tpu.pipeline_mode<synchronous>, transform_indices = @transform_4, window_bounds = array<i64: 1, 1>}, {pipeline_mode = #tpu.pipeline_mode<synchronous>, transform_indices = @transform_5, window_bounds = array<i64: 2, 1>}]} {
    %c0_i32 = arith.constant 0 : i32
    %0 = arith.cmpi eq, %arg0, %c0_i32 : i32
    %1 = arith.extui %0 : i1 to i32
    %c0_i32_0 = arith.constant 0 : i32
    %2 = arith.cmpi ne, %1, %c0_i32_0 : i32
    scf.if %2 {
      %cst_9 = arith.constant 0.000000e+00 : f32
      %12 = vector.broadcast %cst_9 : f32 to vector<2x512xf32>
      %c0_10 = arith.constant 0 : index
      %c0_11 = arith.constant 0 : index
      %13 = vector.load %arg7[%c0_10, %c0_11] : memref<2x512xf32, #tpu.memory_space<vmem>>, vector<2x512xf32>
      tpu.vector_store %arg7[%c0_10, %c0_11], %12 {strides = array<i32>} : memref<2x512xf32, #tpu.memory_space<vmem>>, vector<2x512xf32>,
    } else {
    }
    %c0 = arith.constant 0 : index
    %c0_1 = arith.constant 0 : index
    %3 = vector.load %arg7[%c0, %c0_1] : memref<2x512xf32, #tpu.memory_space<vmem>>, vector<2x512xf32>
    %c0_2 = arith.constant 0 : index
    %c0_3 = arith.constant 0 : index
    %4 = vector.load %arg1[%c0_2, %c0_3] : memref<2x2304xbf16, #tpu.memory_space<vmem>>, vector<2x2304xbf16>
    %c0_4 = arith.constant 0 : index
    %c0_5 = arith.constant 0 : index
    %5 = vector.load %arg2[%c0_4, %c0_5] : memref<2304x512xbf16, #tpu.memory_space<vmem>>, vector<2304x512xbf16>
    %cst = arith.constant dense<0.000000e+00> : vector<2x512xf32>
    %6 = tpu.matmul %4, %5, %cst {dimension_numbers = #tpu.dot_dimension_numbers<[1], [0], [0], [1], [0, 0, 1, 1], [], []>} : vector<2x2304xbf16>, vector<2304x512xbf16>, vector<2x512xf32> -> vector<2x512xf32>
    %7 = arith.addf %3, %6 : vector<2x512xf32>
    %c0_6 = arith.constant 0 : index
    %c0_7 = arith.constant 0 : index
    %8 = vector.load %arg7[%c0_6, %c0_7] : memref<2x512xf32, #tpu.memory_space<vmem>>, vector<2x512xf32>
    tpu.vector_store %arg7[%c0_6, %c0_7], %7 {strides = array<i32>} : memref<2x512xf32, #tpu.memory_space<vmem>>, vector<2x512xf32>,
    %c1_i32 = arith.constant 1 : i32
    %9 = arith.cmpi eq, %arg0, %c1_i32 : i32
    %10 = arith.extui %9 : i1 to i32
    %c0_i32_8 = arith.constant 0 : i32
    %11 = arith.cmpi ne, %10, %c0_i32_8 : i32
    scf.if %11 {
      %c0_9 = arith.constant 0 : index
      %c0_10 = arith.constant 0 : index
      %12 = vector.load %arg7[%c0_9, %c0_10] : memref<2x512xf32, #tpu.memory_space<vmem>>, vector<2x512xf32>
      %c0_11 = arith.constant 0 : index
      %c0_12 = arith.constant 0 : index
      %13 = vector.load %arg3[%c0_11, %c0_12] : memref<1x512xf32, #tpu.memory_space<vmem>>, vector<1x512xf32>
      %14 = vector.broadcast %13 : vector<1x512xf32> to vector<2x512xf32>
      %15 = arith.addf %12, %14 : vector<2x512xf32>
      %cst_13 = arith.constant 0.000000e+00 : f32
      %16 = vector.broadcast %cst_13 : f32 to vector<2x512xf32>
      %17 = arith.maximumf %15, %16 : vector<2x512xf32>
      %c0_14 = arith.constant 0 : index
      %c0_15 = arith.constant 0 : index
      %18 = vector.load %arg4[%c0_14, %c0_15] : memref<1x512xf32, #tpu.memory_space<vmem>>, vector<1x512xf32>
      %19 = vector.broadcast %18 : vector<1x512xf32> to vector<2x512xf32>
      %20 = arith.mulf %17, %19 : vector<2x512xf32>
      %cst_16 = arith.constant dense<0.000000e+00> : vector<2xf32>
      %21 = vector.multi_reduction <add>, %20, %cst_16 [1] : vector<2x512xf32> to vector<2xf32>
      %22 = vector.shape_cast %21 : vector<2xf32> to vector<2x1xf32>
      %c0_17 = arith.constant 0 : index
      %c0_18 = arith.constant 0 : index
      %23 = vector.load %arg5[%c0_17, %c0_18] : memref<1x1xf32, #tpu.memory_space<vmem>>, vector<1x1xf32>
      %24 = vector.broadcast %23 : vector<1x1xf32> to vector<2x1xf32>
      %25 = arith.addf %22, %24 : vector<2x1xf32>
      %cst_19 = arith.constant 0.000000e+00 : f32
      %26 = vector.broadcast %cst_19 : f32 to vector<2x1xf32>
      %27 = arith.subf %26, %25 : vector<2x1xf32>
      %28 = math.exp %27 : vector<2x1xf32>
      %cst_20 = arith.constant 1.000000e+00 : f32
      %29 = vector.broadcast %cst_20 : f32 to vector<2x1xf32>
      %30 = arith.addf %29, %28 : vector<2x1xf32>
      %cst_21 = arith.constant 1.000000e+00 : f32
      %31 = vector.broadcast %cst_21 : f32 to vector<2x1xf32>
      %32 = arith.divf %31, %30 : vector<2x1xf32>
      %c0_22 = arith.constant 0 : index
      %c0_23 = arith.constant 0 : index
      %33 = vector.load %arg6[%c0_22, %c0_23] : memref<2x1xf32, #tpu.memory_space<vmem>>, vector<2x1xf32>
      tpu.vector_store %arg6[%c0_22, %c0_23], %32 {strides = array<i32>} : memref<2x1xf32, #tpu.memory_space<vmem>>, vector<2x1xf32>,
    } else {
    }
    return
  }
  func.func @transform_0(%arg0: i32) -> (i32, i32) {
    %c0_i32 = arith.constant 0 : i32
    %c0_i32_0 = arith.constant 0 : i32
    return %c0_i32, %arg0 : i32, i32
  }
  func.func @transform_1(%arg0: i32) -> (i32, i32) {
    %c0_i32 = arith.constant 0 : i32
    %c0_i32_0 = arith.constant 0 : i32
    return %arg0, %c0_i32 : i32, i32
  }
  func.func @transform_2(%arg0: i32) -> (i32, i32) {
    %c0_i32 = arith.constant 0 : i32
    %c0_i32_0 = arith.constant 0 : i32
    %c0_i32_1 = arith.constant 0 : i32
    return %c0_i32, %c0_i32_0 : i32, i32
  }
  func.func @transform_3(%arg0: i32) -> (i32, i32) {
    %c0_i32 = arith.constant 0 : i32
    %c0_i32_0 = arith.constant 0 : i32
    %c0_i32_1 = arith.constant 0 : i32
    return %c0_i32, %c0_i32_0 : i32, i32
  }
  func.func @transform_4(%arg0: i32) -> (i32, i32) {
    %c0_i32 = arith.constant 0 : i32
    %c0_i32_0 = arith.constant 0 : i32
    %c0_i32_1 = arith.constant 0 : i32
    return %c0_i32, %c0_i32_0 : i32, i32
  }
  func.func @transform_5(%arg0: i32) -> (i32, i32) {
    %c0_i32 = arith.constant 0 : i32
    %c0_i32_0 = arith.constant 0 : i32
    %c0_i32_1 = arith.constant 0 : i32
    return %c0_i32, %c0_i32_0 : i32, i32
  }
}

</mosaic_0001>

<bundles_post_ra>
// kernel: convnet_forward.5
= control target key start
LH: loop header
LB: loop body
LE: loop exit
PB: predicated region body
PF: predicated region fallthrough
CT: control target
= control target key end

     0   :  { %s1328_s12 = smov 0   ;;  %s1330_s13 = smov 0   ;;  %s1523_s0 = inlined_call_operand.vmem [shape: bf16[2,148,148,27], index: 0, kind: input, shape index: {}]   ;;  %s1524_s1 = inlined_call_operand.vmem [shape: bf16[27,32], index: 1, kind: input, shape index: {}]   ;;  %s1525_s2 = inlined_call_operand.vmem [shape: f32[1,32], index: 2, kind: input, shape index: {}]   ;;  %s1526_s3 = inlined_call_operand.vmem [shape: bf16[2,74,74,32], index: 3, kind: output, shape index: {}]  }
   0x1   :  { %s1332_s14 = smov 0   ;;  %s1334_s15 = smov 0  }
   0x2   :  { %s1336_s16 = smov 0  }
   0x3 LB: > { %s22_s17 = sadd.s32 1, %s1293_s14  ;;  %s25_s18 = sadd.s32 1, %s1297_s15  ;;  %s1301_s16 = sphi %s1336_s16, %s13_s16   ;;  %s1297_s15 = sphi %s1334_s15, %s1530_s15   ;;  %s1293_s14 = sphi %s1332_s14, %s1529_s14   ;;  %s1289_s13 = sphi %s1330_s13, %s1528_s13   ;;  %s1285_s12 = sphi %s1328_s12, %s1527_s12  }
   0x4   : > { %p23_p0 = scmp.ge.s32.totalorder %s22_s17, 2  ;;  %p1013_p1 = scmp.ge.s32.totalorder %s1301_s16, 1 }
   0x5   : > { %p159_p2 = scmp.lt.s32.totalorder %s1301_s16, 5 }
   0x6   : > { %s1532_s17 = smov (%p23_p0, %s22_s17), 0  ;;  %s1534_s18 = smov (!%p23_p0, %s25_s18), %s1297_s15 }
   0x7   : > { %p160_p3 = pnand %p1013_p1, %p159_p2  ;;  %p27_p4 = scmp.ge.s32.totalorder %s1534_s18, 2 }
   0x8   : > { %s193_s19 = smul.u32 (!%p160_p3), 74, %s1285_s12  ;;  %p194_p5 = scmp.lt.s32.totalorder (!%p160_p3), %s1289_s13, 1 }
   0x9   : > { %s1536_s18 = smov (%p27_p4, %s1534_s18), 0  ;;  %163 = sbr.rel (%p160_p3) target bundleno = 295 (0x127), region = 32 }
   0xa   : > { %s204_s22 = smul.u32 (!%p160_p3), 37, %s1285_s12  ;;  %p196_p6 = scmp.lt.s32.totalorder (!%p160_p3), %s193_s19, 147 }
   0xb   : > { %s1373_s10 = smov (!%p160_p3), 0  }
   0xc   : > { %p207_p7 = scmp.lt.s32.totalorder (!%p160_p3), %s204_s22, 73 }
   0xe   : > { %v1361_v0 = vld [vmem:[%s1525_s2] ss:$0 sm:$0xff]  ;;  %s1538_s13 = smov (!%p194_p5, %s1289_s13), 1  ;;  %s1540_s19 = smov (!%p196_p6, %s193_s19), 147 }
   0xf   : > { %s1183_s23 = smul.u32 2812, %s1538_s13  ;;  %s1542_s22 = smov (!%p207_p7, %s204_s22), 73 }
  0x10   : > { %s1182_s24 = smul.u32 19, %s1540_s19 }
  0x11   : > { %s1184_s25 = smul.u32 10, %s1542_s22 }
  0x12   : > { %s200_s26 = sadd.s32 %s1183_s23, %s1182_s24  ;;  %s1185_s27 = smul.u32 740, %s1538_s13 }
  0x13   : > { %s1014_s28 = sshll.u32 %s200_s26, 2 }
  0x14   : > { %s1366_s4 = scalar_lea.vmem %s1523_s0, %s1014_s28  ;;  %s211_s5 = sadd.s32 %s1185_s27, %s1184_s25 }
  0x15   : > { %s1015_s6 = sshll.u32 %s211_s5, 2 }
  0x16   : > { %s1371_s9 = scalar_lea.vmem %s1526_s3, %s1015_s6 }
  0x17 LB: >> { %v1235_v1 = vld [vmem:[%s1524_s1 + $0x8] sm:$0x3f]   ;;  %vm346_vm0 = vcmask 1044480   ;;  %vm347_vm1 = vcmask 1045504   ;;  %v1307_v2 = vmov 65535   ;;  %v1237_v5 = vld [vmem:[%s1524_s1] sm:$0xff]   ;;  %s1305_s10 = sphi %s1373_s10, %s228_s10  }
  0x18   : >> { %v348_v3 = vsel %vm346_vm0, 4294967295, %v1307_v2  ;;  %v1236_v4 = vld [vmem:[%s1524_s1 + $0x8] sm:$0x3f]   ;;  %s1098_s22 = smul.u32 152, %s1305_s10  ;;  %v1238_v9 = vld [vmem:[%s1524_s1] sm:$0xff]   ;;  %vm315_vm2 = vcmask 220160  }
  0x19   : >> { %v349_v6 = vsel %vm347_vm1, %v348_v3, 0  ;;  %vm465_vm3 = vcmask 261120   ;;  %s1109_s26 = smul.u32 40, %s1305_s10  ;;  %vm484_vm4 = vcmask 257024   ;;  %vm895_vm5 = vcmask 253952   ;;  %s228_s10 = sadd.s32 1, %s1305_s10  }
  0x1a   : >> { %v351_v7 = vand.u32 %v1235_v1, %v349_v6  ;;  %v622_v8 = vand.u32 %v1236_v4, %v349_v6  ;;  %s1392_s25 = scalar_lea.vmem %s1366_s4, %s1098_s22  ;;  %p225_p8 = scmp.ge.s32.totalorder %s228_s10, 37  }
  0x1b   : >> { %v1239_v10 = vld [vmem:[%s1392_s25] sm:$0xff]   ;;  %v1241_v11 = vld [vmem:[%s1392_s25 + $0x4c] sm:$0xff]   ;;  %v1242_v13 = vld [vmem:[%s1392_s25 + $0x54] sm:$0xff]   ;;  %s1461_s27 = scalar_lea.vmem %s1371_s9, %s1109_s26 }
  0x1c   : >> { %1134 = vmatprep.subr.bf16.mxu0 %v351_v7  ;;  %1158 = vmatprep.subr.bf16.mxu1 %v622_v8  ;;  %v1240_v12 = vld [vmem:[%s1392_s25 + $0x8] sm:$0xff]   ;;  %v1243_v14 = vld [vmem:[%s1392_s25 + $0x10] sm:$0xff]   ;;  %v1245_v15 = vld [vmem:[%s1392_s25 + $0x5c] sm:$0xff]  }
  0x1d   : >> { %1135 = vmatpush3.bf16.msra.mxu0 %v351_v7  ;;  %1159 = vmatpush3.bf16.msra.mxu1 %v622_v8  ;;  %v1244_v16 = vld [vmem:[%s1392_s25 + $0x18] sm:$0xff]   ;;  %v1246_v17 = vld [vmem:[%s1392_s25 + $0x64] sm:$0xff]   ;;  %v1249_v19 = vld [vmem:[%s1392_s25 + $0x6c] sm:$0xff]  }
  0x1e   : >> { %1136 = vmatprep.subr.bf16.mxu0 %v1237_v5  ;;  %1160 = vmatprep.subr.bf16.mxu1 %v1238_v9  ;;  %v1247_v18 = vld [vmem:[%s1392_s25 + $0x20] sm:$0xff]   ;;  %v1248_v20 = vld [vmem:[%s1392_s25 + $0x28] sm:$0xff]   ;;  %v1250_v21 = vld [vmem:[%s1392_s25 + $0x74] sm:$0xff]  }
  0x1f   : >> { %1138 = vmatprep.mubr.msk.bf16.mxu0 %vm315_vm2, %v1239_v10  ;;  %1162 = vmatprep.mubr.msk.bf16.mxu1 %vm315_vm2, %v1241_v11  ;;  %v1251_v22 = vld [vmem:[%s1392_s25 + $0x30] sm:$0xff]   ;;  %v1253_v23 = vld [vmem:[%s1392_s25 + $0x7c] sm:$0xff]   ;;  %v1254_v25 = vld [vmem:[%s1392_s25 + $0x84] sm:$0xff]  }
  0x20   : >> { %v1252_v24 = vld [vmem:[%s1392_s25 + $0x38] sm:$0xff]   ;;  %v1255_v26 = vld [vmem:[%s1392_s25 + $0x40] sm:$0xff]   ;;  %v1257_v27 = vld [vmem:[%s1392_s25 + $0x8c] sm:$0xff]  }
  0x21   : >> { %1137 = vmatpush3.bf16.msra.mxu0 %v1237_v5  ;;  %1161 = vmatpush3.bf16.msra.mxu1 %v1238_v9  ;;  %v1256_v28 = vld [vmem:[%s1392_s25 + $0x48] ss:$0 sps:$4 sm:$0x33]   ;;  %v1258_v29 = vld [vmem:[%s1392_s25 + $0x94] ss:$0 sps:$4 sm:$0x33]  }
  0x24   : >> { %1139 = vmatmul.mubr.msk.bf16.vlgmr.msra.gmra.mxu0 %vm315_vm2, %v1240_v12  ;;  %1163 = vmatmul.mubr.msk.bf16.vlgmr.msra.gmra.mxu1 %vm315_vm2, %v1242_v13 }
  0x25   : >> { %1142 = vmatprep.mubr.msk.bf16.mxu0 %vm315_vm2, %v1243_v14  ;;  %1166 = vmatprep.mubr.msk.bf16.mxu1 %vm315_vm2, %v1245_v15 }
  0x2c   : >> { %1143 = vmatmul.mubr.msk.bf16.gmra.mxu0 %vm315_vm2, %v1244_v16  ;;  %1167 = vmatmul.mubr.msk.bf16.gmra.mxu1 %vm315_vm2, %v1246_v17 }
  0x2d   : >> { %1146 = vmatprep.mubr.msk.bf16.mxu0 %vm315_vm2, %v1247_v18  ;;  %1170 = vmatprep.mubr.msk.bf16.mxu1 %vm315_vm2, %v1249_v19 }
  0x34   : >> { %1147 = vmatmul.mubr.msk.bf16.gmra.mxu0 %vm315_vm2, %v1248_v20  ;;  %1171 = vmatmul.mubr.msk.bf16.gmra.mxu1 %vm315_vm2, %v1250_v21 }
  0x35   : >> { %1150 = vmatprep.mubr.msk.bf16.mxu0 %vm315_vm2, %v1251_v22  ;;  %1174 = vmatprep.mubr.msk.bf16.mxu1 %vm315_vm2, %v1253_v23 }
  0x3c   : >> { %1151 = vmatmul.mubr.msk.bf16.gmra.mxu0 %vm315_vm2, %v1252_v24  ;;  %1175 = vmatmul.mubr.msk.bf16.gmra.mxu1 %vm315_vm2, %v1254_v25 }
  0x3d   : >> { %1154 = vmatprep.mubr.msk.bf16.mxu0 %vm315_vm2, %v1255_v26  ;;  %1178 = vmatprep.mubr.msk.bf16.mxu1 %vm315_vm2, %v1257_v27 }
  0x44   : >> { %1155 = vmatmul.mubr.msk.bf16.gmra.mxu0 %vm315_vm2, %v1256_v28  ;;  %1179 = vmatmul.mubr.msk.bf16.gmra.mxu1 %vm315_vm2, %v1258_v29 }
  0xe4   : >> { %v1140_v30 = vpop.f32.mrf.mxu0  ;;  %v1164_v31 = vpop.f32.mrf.mxu1 }
  0xe5   : >> { %468 = vst.msk [vmem:[#allocation2 + $0x10] sm:$0xff] %vm465_vm3, %v1140_v30 }
  0xe6   : >> { %v387_v32 = vpop.f32.mrf.mxu0  ;;  %v658_v33 = vpop.f32.mrf.mxu1 }
  0xe7   : >> { %466 = vst.msk [vmem:[#allocation2] sm:$0xff] %vm465_vm3, %v387_v32 }
  0xe8   : >> { %v1141_v34 = vpop.f32.mrf.mxu0  ;;  %v1165_v35 = vpop.f32.mrf.mxu1 }
  0xe9   : >> { %469 = vst.msk [vmem:[#allocation2 + $0x18] sm:$0xff] %vm465_vm3, %v1141_v34 }
  0xea   : >> { %v390_v36 = vpop.f32.mrf.mxu0  ;;  %v661_v37 = vpop.f32.mrf.mxu1 }
  0xeb   : >> { %467 = vst.msk [vmem:[#allocation2 + $0x8] sm:$0xff] %vm465_vm3, %v390_v36 }
  0xec   : >> { %v488_v38 = vld [vmem:[#allocation2 + $0x10] sm:$0xff]  ;;  %v1144_v39 = vpop.f32.mrf.mxu0  ;;  %v1168_v40 = vpop.f32.mrf.mxu1 }
  0xed   : >> { %v738_v41 = vmax.f32 %v488_v38, %v1164_v31  ;;  %472 = vst.msk [vmem:[#allocation2 + $0x30] sm:$0xff] %vm465_vm3, %v1144_v39 }
  0xee   : >> { %v486_v42 = vld [vmem:[#allocation2] sm:$0xff]  ;;  %v403_v43 = vpop.f32.mrf.mxu0  ;;  %v674_v44 = vpop.f32.mrf.mxu1 }
  0xef   : >> { %757 = vst.msk [vmem:[#allocation2 + $0x10] sm:$0xff] %vm465_vm3, %v738_v41  ;;  %v736_v45 = vmax.f32 %v486_v42, %v658_v33  ;;  %470 = vst.msk [vmem:[#allocation2 + $0x20] sm:$0xff] %vm465_vm3, %v403_v43 }
  0xf0   : >> { %v489_v46 = vld [vmem:[#allocation2 + $0x18] sm:$0xff]  ;;  %v1145_v47 = vpop.f32.mrf.mxu0  ;;  %v1169_v48 = vpop.f32.mrf.mxu1 }
  0xf1   : >> { %755 = vst.msk [vmem:[#allocation2] sm:$0xff] %vm465_vm3, %v736_v45  ;;  %v739_v49 = vmax.f32 %v489_v46, %v1165_v35  ;;  %473 = vst.msk [vmem:[#allocation2 + $0x38] sm:$0xff] %vm465_vm3, %v1145_v47 }
  0xf2   : >> { %v487_v50 = vld [vmem:[#allocation2 + $0x8] sm:$0xff]  ;;  %v406_v51 = vpop.f32.mrf.mxu0  ;;  %v677_v52 = vpop.f32.mrf.mxu1 }
  0xf3   : >> { %758 = vst.msk [vmem:[#allocation2 + $0x18] sm:$0xff] %vm465_vm3, %v739_v49  ;;  %v737_v53 = vmax.f32 %v487_v50, %v661_v37  ;;  %471 = vst.msk [vmem:[#allocation2 + $0x28] sm:$0xff] %vm465_vm3, %v406_v51 }
  0xf4   : >> { %v492_v54 = vld [vmem:[#allocation2 + $0x30] sm:$0xff]  ;;  %v1148_v55 = vpop.f32.mrf.mxu0  ;;  %v1172_v56 = vpop.f32.mrf.mxu1 }
  0xf5   : >> { %756 = vst.msk [vmem:[#allocation2 + $0x8] sm:$0xff] %vm465_vm3, %v737_v53  ;;  %v742_v57 = vmax.f32 %v492_v54, %v1168_v40  ;;  %476 = vst.msk [vmem:[#allocation2 + $0x50] sm:$0xff] %vm465_vm3, %v1148_v55 }
  0xf6   : >> { %v490_v58 = vld [vmem:[#allocation2 + $0x20] sm:$0xff]  ;;  %v419_v59 = vpop.f32.mrf.mxu0  ;;  %v690_v60 = vpop.f32.mrf.mxu1 }
  0xf7   : >> { %761 = vst.msk [vmem:[#allocation2 + $0x30] sm:$0xff] %vm465_vm3, %v742_v57  ;;  %v740_v61 = vmax.f32 %v490_v58, %v674_v44  ;;  %474 = vst.msk [vmem:[#allocation2 + $0x40] sm:$0xff] %vm465_vm3, %v419_v59 }
  0xf8   : >> { %v493_v62 = vld [vmem:[#allocation2 + $0x38] sm:$0xff]  ;;  %v1149_v63 = vpop.f32.mrf.mxu0  ;;  %v1173_v1 = vpop.f32.mrf.mxu1 }
  0xf9   : >> { %759 = vst.msk [vmem:[#allocation2 + $0x20] sm:$0xff] %vm465_vm3, %v740_v61  ;;  %v743_v2 = vmax.f32 %v493_v62, %v1169_v48  ;;  %477 = vst.msk [vmem:[#allocation2 + $0x58] sm:$0xff] %vm465_vm3, %v1149_v63 }
  0xfa   : >> { %v776_v3 = vld [vmem:[#allocation2 + $0x10] ss:$2 sm:$0xff]  ;;  %v796_v4 = vld [vmem:[#allocation2 + $0x11] ss:$2 sm:$0xff]  ;;  %v491_v5 = vld [vmem:[#allocation2 + $0x28] sm:$0xff]  ;;  %v422_v6 = vpop.f32.mrf.mxu0  ;;  %v693_v7 = vpop.f32.mrf.mxu1 }
  0xfb   : >> { %v814_v8 = vmax.f32 %v776_v3, %v796_v4  ;;  %762 = vst.msk [vmem:[#allocation2 + $0x38] sm:$0xff] %vm465_vm3, %v743_v2  ;;  %v741_v9 = vmax.f32 %v491_v5, %v677_v52  ;;  %475 = vst.msk [vmem:[#allocation2 + $0x48] sm:$0xff] %vm465_vm3, %v422_v6 }
  0xfc   : >> { %v774_v10 = vld [vmem:[#allocation2] ss:$2 sm:$0xff]  ;;  %v794_v11 = vld [vmem:[#allocation2 + $0x1] ss:$2 sm:$0xff]  ;;  %v496_v12 = vld [vmem:[#allocation2 + $0x50] sm:$0xff]  ;;  %v1152_v13 = vpop.f32.mrf.mxu0  ;;  %v1176_v14 = vpop.f32.mrf.mxu1 }
  0xfd   : >> { %v824_v15 = vadd.f32 %v1361_v0, %v814_v8  ;;  %v813_v16 = vmax.f32 %v774_v10, %v794_v11  ;;  %760 = vst.msk [vmem:[#allocation2 + $0x28] sm:$0xff] %vm465_vm3, %v741_v9  ;;  %v746_v17 = vmax.f32 %v496_v12, %v1172_v56  ;;  %480 = vst.msk [vmem:[#allocation2 + $0x70] sm:$0xff] %vm465_vm3, %v1152_v13 }
  0xfe   : >> { %v494_v18 = vld [vmem:[#allocation2 + $0x40] sm:$0xff]  ;;  %v435_v19 = vpop.f32.mrf.mxu0  ;;  %v706_v20 = vpop.f32.mrf.mxu1 }
  0xff   : >> { %v834_v21 = vmax.f32 %v824_v15, 0.0  ;;  %v823_v22 = vadd.f32 %v1361_v0, %v813_v16  ;;  %765 = vst.msk [vmem:[#allocation2 + $0x50] sm:$0xff] %vm465_vm3, %v746_v17  ;;  %v744_v23 = vmax.f32 %v494_v18, %v690_v60  ;;  %478 = vst.msk [vmem:[#allocation2 + $0x60] sm:$0xff] %vm465_vm3, %v435_v19 }
 0x100   : >> { %v497_v24 = vld [vmem:[#allocation2 + $0x58] sm:$0xff]  ;;  %v1153_v25 = vpop.f32.mrf.mxu0  ;;  %v1177_v26 = vpop.f32.mrf.mxu1 }
 0x101   : >> { %v1100_v27 = vpack.c.bf16 %v834_v21, %v834_v21  ;;  %v833_v28 = vmax.f32 %v823_v22, 0.0  ;;  %763 = vst.msk [vmem:[#allocation2 + $0x40] sm:$0xff] %vm465_vm3, %v744_v23  ;;  %v747_v29 = vmax.f32 %v497_v24, %v1173_v1  ;;  %481 = vst.msk [vmem:[#allocation2 + $0x78] sm:$0xff] %vm465_vm3, %v1153_v25 }
 0x102   : >> { %v780_v30 = vld [vmem:[#allocation2 + $0x30] ss:$2 sm:$0xff]  ;;  %v800_v31 = vld [vmem:[#allocation2 + $0x31] ss:$2 sm:$0xff]  ;;  %v495_v32 = vld [vmem:[#allocation2 + $0x48] sm:$0xff]  ;;  %v438_v33 = vpop.f32.mrf.mxu0  ;;  %v709_v34 = vpop.f32.mrf.mxu1 }
 0x103   : >> { %v1099_v35 = vpack.c.bf16 %v833_v28, %v833_v28  ;;  %v816_v36 = vmax.f32 %v780_v30, %v800_v31  ;;  %766 = vst.msk [vmem:[#allocation2 + $0x58] sm:$0xff] %vm465_vm3, %v747_v29  ;;  %v745_v37 = vmax.f32 %v495_v32, %v693_v7  ;;  %479 = vst.msk [vmem:[#allocation2 + $0x68] sm:$0xff] %vm465_vm3, %v438_v33 }
 0x104   : >> { %887 = vst.msk [vmem:[%s1461_s27 + $0x4] sm:$0xf] %vm484_vm4, %v1100_v27  ;;  %v778_v38 = vld [vmem:[#allocation2 + $0x20] ss:$2 sm:$0xff]  ;;  %v798_v39 = vld [vmem:[#allocation2 + $0x21] ss:$2 sm:$0xff]  ;;  %v1156_v41 = vpop.f32.mrf.mxu0  ;;  %v1180_v42 = vpop.f32.mrf.mxu1 }
 0x105   : >> { %v500_v40 = vld [vmem:[#allocation2 + $0x70] sm:$0xff]  ;;  %v826_v43 = vadd.f32 %v1361_v0, %v816_v36  ;;  %v815_v44 = vmax.f32 %v778_v38, %v798_v39  ;;  %764 = vst.msk [vmem:[#allocation2 + $0x48] sm:$0xff] %vm465_vm3, %v745_v37 }
 0x106   : >> { %v750_v45 = vmax.f32 %v500_v40, %v1176_v14  ;;  %485 = vst.msk [vmem:[#allocation2 + $0x90] sm:$0xf] %vm484_vm4, %v1156_v41  ;;  %886 = vst.msk [vmem:[%s1461_s27] sm:$0xf] %vm484_vm4, %v1099_v35  ;;  %v498_v46 = vld [vmem:[#allocation2 + $0x60] sm:$0xff]  ;;  %v451_v47 = vpop.f32.mrf.mxu0  ;;  %v722_v48 = vpop.f32.mrf.mxu1 }
 0x107   : >> { %v836_v49 = vmax.f32 %v826_v43, 0.0  ;;  %v825_v50 = vadd.f32 %v1361_v0, %v815_v44  ;;  %v748_v51 = vmax.f32 %v498_v46, %v706_v20  ;;  %482 = vst.msk [vmem:[#allocation2 + $0x80] sm:$0xff] %vm465_vm3, %v451_v47 }
 0x108   : >> { %769 = vst.msk [vmem:[#allocation2 + $0x70] sm:$0xff] %vm465_vm3, %v750_v45  ;;  %v501_v52 = vld [vmem:[#allocation2 + $0x78] sm:$0xff]  ;;  %v1157_v53 = vpop.f32.mrf.mxu0  ;;  %v1181_v54 = vpop.f32.mrf.mxu1 }
 0x109   : >> { %v1102_v55 = vpack.c.bf16 %v836_v49, %v836_v49  ;;  %v835_v56 = vmax.f32 %v825_v50, 0.0  ;;  %767 = vst.msk [vmem:[#allocation2 + $0x60] sm:$0xff] %vm465_vm3, %v748_v51  ;;  %v751_v57 = vmax.f32 %v501_v52, %v1177_v26 }
 0x10a   : >> { %v784_v58 = vld [vmem:[#allocation2 + $0x50] ss:$2 sm:$0xff]  ;;  %v804_v59 = vld [vmem:[#allocation2 + $0x51] ss:$2 sm:$0xff]  ;;  %v499_v60 = vld [vmem:[#allocation2 + $0x68] sm:$0xff]  ;;  %v454_v61 = vpop.f32.mrf.mxu0  ;;  %v725_v17 = vpop.f32.mrf.mxu1 }
 0x10b   : >> { %v1101_v62 = vpack.c.bf16 %v835_v56, %v835_v56  ;;  %v818_v63 = vmax.f32 %v784_v58, %v804_v59  ;;  %770 = vst.msk [vmem:[#allocation2 + $0x78] sm:$0xff] %vm465_vm3, %v751_v57  ;;  %v749_v1 = vmax.f32 %v499_v60, %v709_v34  ;;  %483 = vst.msk [vmem:[#allocation2 + $0x88] sm:$0xff] %vm465_vm3, %v454_v61 }
 0x10c   : >> { %889 = vst.msk [vmem:[%s1461_s27 + $0xc] sm:$0xf] %vm484_vm4, %v1102_v55  ;;  %v782_v2 = vld [vmem:[#allocation2 + $0x40] ss:$2 sm:$0xff]  ;;  %v802_v3 = vld [vmem:[#allocation2 + $0x41] ss:$2 sm:$0xff] }
 0x10d   : >> { %v504_v4 = vld [vmem:[#allocation2 + $0x90] sm:$0xf]  ;;  %v828_v5 = vadd.f32 %v1361_v0, %v818_v63  ;;  %v817_v6 = vmax.f32 %v782_v2, %v802_v3  ;;  %888 = vst.msk [vmem:[%s1461_s27 + $0x8] sm:$0xf] %vm484_vm4, %v1101_v62 }
 0x10e   : >> { %768 = vst.msk [vmem:[#allocation2 + $0x68] sm:$0xff] %vm465_vm3, %v749_v1  ;;  %v754_v7 = vmax.f32 %v504_v4, %v1180_v42  ;;  %v502_v8 = vld [vmem:[#allocation2 + $0x80] sm:$0xff] }
 0x10f   : >> { %v838_v9 = vmax.f32 %v828_v5, 0.0  ;;  %v827_v10 = vadd.f32 %v1361_v0, %v817_v6  ;;  %v752_v11 = vmax.f32 %v502_v8, %v722_v48 }
 0x110   : >> { %773 = vst.msk [vmem:[#allocation2 + $0x90] sm:$0xf] %vm484_vm4, %v754_v7 }
 0x111   : >> { %v1104_v12 = vpack.c.bf16 %v838_v9, %v838_v9  ;;  %v837_v13 = vmax.f32 %v827_v10, 0.0  ;;  %771 = vst.msk [vmem:[#allocation2 + $0x80] sm:$0xff] %vm465_vm3, %v752_v11 }
 0x112   : >> { %v788_v14 = vld [vmem:[#allocation2 + $0x70] ss:$2 sm:$0xff]  ;;  %v808_v15 = vld [vmem:[#allocation2 + $0x71] ss:$2 sm:$0xff]  ;;  %v503_v16 = vld [vmem:[#allocation2 + $0x88] sm:$0xff] }
 0x113   : >> { %v1103_v18 = vpack.c.bf16 %v837_v13, %v837_v13  ;;  %v820_v19 = vmax.f32 %v788_v14, %v808_v15  ;;  %891 = vst.msk [vmem:[%s1461_s27 + $0x14] sm:$0xf] %vm484_vm4, %v1104_v12  ;;  %v753_v20 = vmax.f32 %v503_v16, %v725_v17 }
 0x115   : >> { %v786_v21 = vld [vmem:[#allocation2 + $0x60] ss:$2 sm:$0xff]  ;;  %v806_v22 = vld [vmem:[#allocation2 + $0x61] ss:$2 sm:$0xff]  ;;  %v830_v23 = vadd.f32 %v1361_v0, %v820_v19  ;;  %890 = vst.msk [vmem:[%s1461_s27 + $0x10] sm:$0xf] %vm484_vm4, %v1103_v18 }
 0x116   : >> { %v819_v24 = vmax.f32 %v786_v21, %v806_v22  ;;  %772 = vst.msk [vmem:[#allocation2 + $0x88] sm:$0xff] %vm465_vm3, %v753_v20 }
 0x117   : >> { %v792_v25 = vld [vmem:[#allocation2 + $0x90] ss:$2 sm:$0x3]  ;;  %v812_v26 = vld [vmem:[#allocation2 + $0x91] ss:$2 sm:$0x3] }
 0x118   : >> { %v840_v27 = vmax.f32 %v830_v23, 0.0  ;;  %v829_v28 = vadd.f32 %v1361_v0, %v819_v24  ;;  %v822_v29 = vmax.f32 %v792_v25, %v812_v26 }
 0x11a   : >> { %v1106_v30 = vpack.c.bf16 %v840_v27, %v840_v27  ;;  %v839_v31 = vmax.f32 %v829_v28, 0.0  ;;  %v832_v32 = vadd.f32 %v1361_v0, %v822_v29 }
 0x11c   : >> { %893 = vst.msk [vmem:[%s1461_s27 + $0x1c] sm:$0xf] %vm484_vm4, %v1106_v30  ;;  %v1105_v33 = vpack.c.bf16 %v839_v31, %v839_v31  ;;  %v842_v34 = vmax.f32 %v832_v32, 0.0 }
 0x11d   : >> { %v790_v35 = vld [vmem:[#allocation2 + $0x80] ss:$2 sm:$0xff]  ;;  %v810_v36 = vld [vmem:[#allocation2 + $0x81] ss:$2 sm:$0xff] }
 0x11e   : >> { %892 = vst.msk [vmem:[%s1461_s27 + $0x18] sm:$0xf] %vm484_vm4, %v1105_v33  ;;  %v1108_v37 = vpack.c.bf16 %v842_v34, %v842_v34  ;;  %v821_v38 = vmax.f32 %v790_v35, %v810_v36 }
 0x120   : >> { %896 = vst.msk [vmem:[%s1461_s27 + $0x24] sm:$0x1] %vm895_vm5, %v1108_v37  ;;  %v831_v39 = vadd.f32 %v1361_v0, %v821_v38 }
 0x122   : >> { %v841_v40 = vmax.f32 %v831_v39, 0.0  ;;  %227 = sbr.rel (!%p225_p8) target bundleno = 23 (0x17), region = 91 }
 0x124   : >> { %v1107_v41 = vpack.c.bf16 %v841_v40, %v841_v40 }
 0x126   : >> { %894 = vst.msk [vmem:[%s1461_s27 + $0x20] sm:$0xf] %vm484_vm4, %v1107_v41 }
 0x127 PF: > { %s13_s16 = sadd.s32 1, %s1301_s16   ;;  %s1527_s12 = smov %s1293_s14 }
 0x128   : > { %p10_p9 = scmp.ge.s32.totalorder %s13_s16, 6   ;;  %s1528_s13 = smov %s1297_s15 }
 0x129   : > { %s1529_s14 = smov %s1532_s17  ;;  %s1530_s15 = smov %s1536_s18 }
 0x12a   :  { %12 = sbr.rel (!%p10_p9) target bundleno = 3 (0x3), region = 102 }

// kernel: convnet_forward.6
= control target key start
LH: loop header
LB: loop body
LE: loop exit
PB: predicated region body
PF: predicated region fallthrough
CT: control target
= control target key end

     0   :  { %s3019_s12 = smov 0   ;;  %s3935_s0 = inlined_call_operand.vmem [shape: bf16[2,74,74,32], index: 0, kind: input, shape index: {}]   ;;  %s3936_s1 = inlined_call_operand.vmem [shape: bf16[3,96,64], index: 1, kind: input, shape index: {}]   ;;  %s3937_s2 = inlined_call_operand.vmem [shape: f32[1,64], index: 2, kind: input, shape index: {}]   ;;  %s3938_s3 = inlined_call_operand.vmem [shape: bf16[2,36,36,64], index: 3, kind: output, shape index: {}]  }
   0x1 LB: > { %s2083_s13 = sadd.s32 4294967295, %s2989_s12   ;;  %p2087_p0 = scmp.ge.s32.totalorder %s2989_s12, 1  ;;  %s2989_s12 = sphi %s3019_s12, %s13_s12  }
   0x2   : > { %p137_p1 = scmp.lt.s32.totalorder %s2989_s12, 3 }
   0x4   : > { %p138_p2 = pnand %p2087_p0, %p137_p1 }
   0x5   : > { %p161_p3 = scmp.lt.s32.totalorder (!%p138_p2), %s2083_s13, 1  ;;  %s3042_s24 = smov (!%p138_p2), 0  }
   0x6   : > { %141 = sbr.rel (%p138_p2) target bundleno = 479 (0x1df), region = 32 }
   0xb   : > { %v3030_v0 = vld [vmem:[%s3937_s2] ss:$0 sm:$0xff]  ;;  %s3972_s13 = smov (!%p161_p3, %s2083_s13), 1 }
   0xc   : > { %3951 = vst [vmem:[#allocation3_spill] sm:$0xff] %v3030_v0  ;;  %s2656_s16 = smul.u32 2960, %s3972_s13 }
   0xd   : > { %s2657_s17 = smul.u32 720, %s3972_s13 }
   0xe   : > { %s3035_s20 = scalar_lea.vmem %s3935_s0, %s2656_s16 }
   0xf   : > { %s3040_s23 = scalar_lea.vmem %s3938_s3, %s2657_s17 }
  0x10 LB: >> { %v3939_v1 = vmov 0.0   ;;  %v2943_v2 = vld [vmem:[%s3936_s1 + $0x58] sm:$0xff]   ;;  %s2272_s27 = smul.u32 80, %s2993_s24  ;;  %v2944_v3 = vld [vmem:[%s3936_s1 + $0x28] sm:$0xff]   ;;  %v2945_v4 = vld [vmem:[%s3936_s1 + $0x50] sm:$0xff]   ;;  %vm219_vm0 = vcmask 1046528   ;;  %s2993_s24 = sphi %s3042_s24, %s184_s24  }
  0x11   : >> { %2464 = vmatprep.subr.bf16.mxu0 %v3939_v1  ;;  %2496 = vmatprep.subr.bf16.mxu1 %v3939_v1  ;;  %v2946_v5 = vld [vmem:[%s3936_s1 + $0x20] sm:$0xff]   ;;  %vm266_vm1 = vcmask 1045504   ;;  %s2996_s8 = smov 32   ;;  %v2947_v49 = vld [vmem:[%s3936_s1 + $0x48] sm:$0xff]   ;;  %v2948_v54 = vld [vmem:[%s3936_s1 + $0x18] sm:$0xff]   ;;  %s2997_s16 = smov 64  }
  0x12   : >> { %2465 = vmatpush3.bf16.msra.mxu0 %v2943_v2  ;;  %s3060_s5 = scalar_lea.vmem %s3035_s20, %s2272_s27  ;;  %2497 = vmatpush3.bf16.msra.mxu1 %v2944_v3  ;;  %v2949_v59 = vld [vmem:[%s3936_s1 + $0x40] sm:$0xff]   ;;  %v2950_v2 = vld [vmem:[%s3936_s1 + $0x10] sm:$0xff]   ;;  %vm2998_vm2 = vmmov 0   ;;  %vm313_vm3 = vcmask 261120   ;;  %vm323_vm4 = vcmask 523264   ;;  %vm548_vm5 = vcmask 785408  }
  0x13   : >> { %2466 = vmatprep.subr.bf16.mxu0 %v3939_v1  ;;  %v2378_v6 = vld [vmem:[%s3060_s5 + $0x28] sm:$0xff]   ;;  %v2379_v7 = vld [vmem:[%s3060_s5 + $0x30] sm:$0xff]   ;;  %v2280_v8 = vld [vmem:[%s3060_s5] sm:$0xff]   ;;  %2498 = vmatprep.subr.bf16.mxu1 %v3939_v1  ;;  %vm2000_vm6 = vcmask 519168   ;;  %vm2005_vm7 = vcmask 517120  }
  0x14   : >> { %v3070_v9 = vunpack.c.l.bf16 %v2378_v6  ;;  %v3072_v10 = vunpack.c.h.bf16 %v2378_v6  ;;  %v3074_v11 = vunpack.c.l.bf16 %v2379_v7  ;;  %v3076_v12 = vunpack.c.h.bf16 %v2379_v7  ;;  %v2375_v13 = vld [vmem:[%s3060_s5 + $0x8] sm:$0xff]   ;;  %v2380_v30 = vld [vmem:[%s3060_s5 + $0x38] sm:$0xff]   ;;  %v2376_v35 = vld [vmem:[%s3060_s5 + $0x10] sm:$0xff]  }
  0x15   : >> { %v3079_v14 = vunpack.c.l.bf16 %v2280_v8  ;;  %v3081_v15 = vunpack.c.h.bf16 %v2280_v8  ;;  %v3083_v16 = vunpack.c.l.bf16 %v2375_v13  ;;  %v3085_v17 = vunpack.c.h.bf16 %v2375_v13  ;;  %v2381_v48 = vld [vmem:[%s3060_s5 + $0x40] sm:$0xff]   ;;  %v2377_v6 = vld [vmem:[%s3060_s5 + $0x18] sm:$0xff]  }
  0x16   : >> { %2467 = vmatpush3.bf16.msra.mxu0 %v2945_v4  ;;  %v384_v18 = vrot.slane %v3070_v9, 1  ;;  %v385_v19 = vrot.slane %v3072_v10, 1  ;;  %v387_v20 = vrot.slane %v3074_v11, 1  ;;  %v430_v21 = vrot.slane %v3070_v9, 2  ;;  %2499 = vmatpush3.bf16.msra.mxu1 %v2946_v5  ;;  %v2104_v7 = vld [vmem:[%s3060_s5 + $0x20] ss:$40 sps:$4 sm:$0xff]  }
  0x17   : >> { %2468 = vmatprep.subr.bf16.mxu0 %v3939_v1  ;;  %v220_v22 = vrot.slane %v3079_v14, 1  ;;  %v221_v23 = vrot.slane %v3081_v15, 1  ;;  %v223_v24 = vrot.slane %v3083_v16, 1  ;;  %v431_v25 = vrot.slane %v3072_v10, 2  ;;  %2500 = vmatprep.subr.bf16.mxu1 %v3939_v1 }
  0x18   : >> { %v386_v26 = vsel %vm219_vm0, %v384_v18, %v385_v19  ;;  %v388_v27 = vsel %vm219_vm0, %v385_v19, %v387_v20  ;;  %v433_v28 = vrot.slane %v3074_v11, 2  ;;  %v267_v29 = vrot.slane %v3079_v14, 2 }
  0x19   : >> { %v3102_v31 = vpack.i.bf16 %v388_v27, %v386_v26  ;;  %v222_v32 = vsel %vm219_vm0, %v220_v22, %v221_v23  ;;  %v224_v33 = vsel %vm219_vm0, %v221_v23, %v223_v24  ;;  %v432_v34 = vsel %vm266_vm1, %v430_v21, %v431_v25 }
  0x1a   : >> { %v2688_v36 = vpack.i.bf16 %v224_v33, %v222_v32  ;;  %v434_v37 = vsel %vm266_vm1, %v431_v25, %v433_v28  ;;  %v268_v38 = vrot.slane %v3081_v15, 2  ;;  %v270_v39 = vrot.slane %v3083_v16, 2  ;;  %2469 = vmatpush3.bf16.msra.mxu0 %v2947_v49  ;;  %2501 = vmatpush3.bf16.msra.mxu1 %v2948_v54  ;;  %v2952_v25 = vld [vmem:[%s3936_s1 + $0x8] sm:$0xff]  }
  0x1b   : >> { %2679 = vrot.lane.b32.xlu0 %v3102_v31, %s2996_s8  ;;  %v3113_v40 = vpack.i.bf16 %v434_v37, %v432_v34  ;;  %v3115_v41 = vunpack.c.l.bf16 %v2380_v30  ;;  %v389_v42 = vrot.slane %v3076_v12, 1  ;;  %v435_v43 = vrot.slane %v3076_v12, 2  ;;  %2470 = vmatprep.subr.bf16.mxu0 %v3939_v1 }
  0x1c   : >> { %2689 = vrot.lane.b32.xlu1 %v2688_v36, %s2996_s8  ;;  %v269_v44 = vsel %vm266_vm1, %v267_v29, %v268_v38  ;;  %v271_v45 = vsel %vm266_vm1, %v268_v38, %v270_v39  ;;  %v3122_v46 = vunpack.c.l.bf16 %v2376_v35  ;;  %v225_v47 = vrot.slane %v3085_v17, 1  ;;  %2502 = vmatprep.subr.bf16.mxu1 %v3939_v1 }
  0x1d   : >> { %v2693_v50 = vpack.i.bf16 %v271_v45, %v269_v44  ;;  %v390_v51 = vsel %vm219_vm0, %v387_v20, %v389_v42  ;;  %v391_v52 = vrot.slane %v3115_v41, 1  ;;  %v436_v53 = vsel %vm266_vm1, %v433_v28, %v435_v43  ;;  %v2951_v20 = vld [vmem:[%s3936_s1 + $0x38] sm:$0xff]  }
  0x1e   : >> { %v437_v55 = vrot.slane %v3115_v41, 2  ;;  %v226_v56 = vsel %vm219_vm0, %v223_v24, %v225_v47  ;;  %v227_v57 = vrot.slane %v3122_v46, 1  ;;  %v272_v58 = vrot.slane %v3085_v17, 2  ;;  %2471 = vmatpush3.bf16.msra.mxu0 %v2949_v59  ;;  %2503 = vmatpush3.bf16.msra.mxu1 %v2950_v2 }
  0x1f   : >> { %2684 = vrot.lane.b32.xlu0 %v3113_v40, %s2997_s16  ;;  %v392_v60 = vsel %vm219_vm0, %v389_v42, %v391_v52  ;;  %v274_v61 = vrot.slane %v3122_v46, 2  ;;  %v3146_v62 = vunpack.c.h.bf16 %v2380_v30  ;;  %v3148_v63 = vunpack.c.l.bf16 %v2381_v48  ;;  %2472 = vmatprep.subr.bf16.mxu0 %v3939_v1  ;;  %v2954_v42 = vld [vmem:[%s3936_s1] sm:$0xff]  }
  0x20   : >> { %2694 = vrot.lane.b32.xlu1 %v2693_v50, %s2997_s16  ;;  %v3154_v3 = vpack.i.bf16 %v392_v60, %v390_v51  ;;  %v438_v4 = vsel %vm266_vm1, %v435_v43, %v437_v55  ;;  %v228_v5 = vsel %vm219_vm0, %v225_v47, %v227_v57  ;;  %v273_v13 = vsel %vm266_vm1, %v270_v39, %v272_v58  ;;  %v2953_v39 = vld [vmem:[%s3936_s1 + $0x30] sm:$0xff]  }
  0x21   : >> { %v3160_v8 = vpack.i.bf16 %v438_v4, %v436_v53  ;;  %v275_v18 = vsel %vm266_vm1, %v272_v58, %v274_v61  ;;  %v393_v19 = vrot.slane %v3146_v62, 1  ;;  %v2708_v21 = vpack.i.bf16 %v228_v5, %v226_v56  ;;  %2504 = vmatprep.subr.bf16.mxu1 %v3939_v1  ;;  %v2105_v56 = vld [vmem:[%s3060_s5 + $0x4c] sm:$0x1] }
  0x22   : >> { %v395_v22 = vrot.slane %v3148_v63, 1  ;;  %v439_v23 = vrot.slane %v3146_v62, 2  ;;  %v441_v24 = vrot.slane %v3148_v63, 2  ;;  %v3179_v27 = vunpack.c.h.bf16 %v2376_v35  ;;  %2473 = vmatpush3.bf16.msra.mxu0 %v2951_v20  ;;  %2505 = vmatpush3.bf16.msra.mxu1 %v2952_v25 }
  0x23   : >> { %2699 = vrot.lane.b32.xlu0 %v3154_v3, %s2996_s8  ;;  %v394_v26 = vsel %vm219_vm0, %v391_v52, %v393_v19  ;;  %v3181_v28 = vunpack.c.l.bf16 %v2377_v6  ;;  %v3183_v29 = vunpack.c.h.bf16 %v2381_v48  ;;  %v2713_v30 = vpack.i.bf16 %v275_v18, %v273_v13  ;;  %v198_v48 = vld [vmem:[%s3060_s5 + $0x24] sm:$0x1]  ;;  %2474 = vmatprep.subr.bf16.mxu0 %v3939_v1 }
  0x24   : >> { %2704 = vrot.lane.b32.xlu1 %v3160_v8, %s2997_s16  ;;  %v396_v32 = vsel %vm219_vm0, %v393_v19, %v395_v22  ;;  %v440_v33 = vsel %vm266_vm1, %v437_v55, %v439_v23  ;;  %v3189_v34 = vunpack.c.h.bf16 %v2104_v7  ;;  %v442_v36 = vsel %vm266_vm1, %v439_v23, %v441_v24  ;;  %2506 = vmatprep.subr.bf16.mxu1 %v3939_v1 }
  0x25   : >> { %v3192_v35 = vpack.i.bf16 %v396_v32, %v394_v26  ;;  %v229_v37 = vrot.slane %v3179_v27, 1  ;;  %v231_v38 = vrot.slane %v3181_v28, 1  ;;  %v276_v43 = vrot.slane %v3179_v27, 2 }
  0x26   : >> { %v278_v44 = vrot.slane %v3181_v28, 2  ;;  %v3207_v45 = vrot.slane %v3183_v29, 1  ;;  %v399_v47 = vrot.slane %v3189_v34, 1  ;;  %v3215_v51 = vrot.slane %v3183_v29, 2  ;;  %2475 = vmatpush3.bf16.msra.mxu0 %v2953_v39  ;;  %2507 = vmatpush3.bf16.msra.mxu1 %v2954_v42 }
  0x27   : >> { %2709 = vrot.lane.b32.xlu0 %v2708_v21, %s2996_s8  ;;  %v230_v49 = vsel %vm219_vm0, %v227_v57, %v229_v37  ;;  %v232_v50 = vsel %vm219_vm0, %v229_v37, %v231_v38  ;;  %v445_v52 = vrot.slane %v3189_v34, 2  ;;  %v3219_v53 = vpack.i.bf16 %v442_v36, %v440_v33  ;;  %2528 = vmatprep.subr.bf16.mxu0 %v3939_v1 }
  0x28   : >> { %2714 = vrot.lane.b32.xlu1 %v2713_v30, %s2997_s16  ;;  %v277_v54 = vsel %vm266_vm1, %v274_v61, %v276_v43  ;;  %v279_v55 = vsel %vm266_vm1, %v276_v43, %v278_v44  ;;  %v2728_v58 = vpack.i.bf16 %v232_v50, %v230_v49  ;;  %v3226_v57 = vsel %vm219_vm0, %v395_v22, %v3207_v45  ;;  %v2383_v22 = vld [vmem:[%s3060_s5 + $0x58] sm:$0xff]  }
  0x29   : >> { %v2733_v59 = vpack.i.bf16 %v279_v55, %v277_v54  ;;  %v400_v60 = vsel %vm219_vm0, %v3207_v45, %v399_v47  ;;  %v3231_v2 = vunpack.c.h.bf16 %v2377_v6  ;;  %v3233_v4 = vunpack.c.l.bf16 %v2104_v7  ;;  %v2382_v6 = vld [vmem:[%s3060_s5 + $0x50] sm:$0xff]   ;;  %2560 = vmatprep.subr.bf16.mxu1 %v3939_v1 }
  0x2a   : >> { %v3240_v61 = vsel %vm266_vm1, %v441_v24, %v3215_v51  ;;  %v446_v5 = vsel %vm266_vm1, %v3215_v51, %v445_v52  ;;  %v208_v13 = vunpack.c.l.bf16 %v198_v48  ;;  %v373_v18 = vunpack.c.l.bf16 %v2105_v56 }
  0x2b   : >> { %2719 = vrot.lane.b32.xlu0 %v3192_v35, %s2996_s8  ;;  %v233_v7 = vrot.slane %v3231_v2, 1  ;;  %v235_v19 = vrot.slane %v3233_v4, 1  ;;  %v280_v20 = vrot.slane %v3231_v2, 2  ;;  %v282_v21 = vrot.slane %v3233_v4, 2 }
  0x2c   : >> { %2724 = vrot.lane.b32.xlu1 %v3219_v53, %s2997_s16  ;;  %v2738_v23 = vpack.i.bf16 %v400_v60, %v3226_v57  ;;  %v3255_v24 = vunpack.c.l.bf16 %v2382_v6  ;;  %v3257_v25 = vunpack.c.h.bf16 %v2382_v6  ;;  %v2743_v26 = vpack.i.bf16 %v446_v5, %v3240_v61 }
  0x2d   : >> { %v234_v30 = vsel %vm219_vm0, %v231_v38, %v233_v7  ;;  %v237_v32 = vrot.slane %v208_v13, 1  ;;  %v401_v33 = vrot.slane %v373_v18, 1  ;;  %v236_v36 = vsel %vm219_vm0, %v233_v7, %v235_v19  ;;  %v2384_v38 = vld [vmem:[%s3060_s5 + $0x60] sm:$0xff]   ;;  %v2150_v7 = vld [vmem:[%s3060_s5 + $0x48] ss:$40 sps:$4 sm:$0xff]  }
  0x2e   : >> { %v281_v37 = vsel %vm266_vm1, %v278_v44, %v280_v20  ;;  %v283_v39 = vsel %vm266_vm1, %v280_v20, %v282_v21  ;;  %v3266_v42 = vunpack.c.l.bf16 %v2383_v22  ;;  %v284_v43 = vrot.slane %v208_v13, 2  ;;  %v3287_v20 = vld [vmem:[%s3060_s5 + $0x70] ss:$40 sps:$4 sm:$0xff]  }
  0x2f   : >> { %2729 = vrot.lane.b32.xlu0 %v2728_v58, %s2996_s8  ;;  %v447_v48 = vrot.slane %v373_v18, 2  ;;  %v793_v49 = vrot.slane %v3255_v24, 1  ;;  %v794_v50 = vrot.slane %v3257_v25, 1  ;;  %v2748_v54 = vpack.i.bf16 %v236_v36, %v234_v30 }
  0x30   : >> { %2734 = vrot.lane.b32.xlu1 %v2733_v59, %s2997_s16  ;;  %v2753_v55 = vpack.i.bf16 %v283_v39, %v281_v37  ;;  %v238_v44 = vsel %vm219_vm0, %v235_v19, %v237_v32  ;;  %v402_v56 = vsel %vm219_vm0, %v399_v47, %v401_v33  ;;  %v796_v58 = vrot.slane %v3266_v42, 1  ;;  %v2151_v47 = vld [vmem:[%s3060_s5 + $0x74] sm:$0x1] }
  0x31   : >> { %v839_v59 = vrot.slane %v3255_v24, 2  ;;  %v3277_v60 = vunpack.c.h.bf16 %v2383_v22  ;;  %v285_v5 = vsel %vm266_vm1, %v282_v21, %v284_v43  ;;  %v448_v13 = vsel %vm266_vm1, %v445_v52, %v447_v48 }
  0x32   : >> { %v840_v18 = vrot.slane %v3257_v25, 2  ;;  %v842_v6 = vrot.slane %v3266_v42, 2  ;;  %v3284_v19 = vunpack.c.l.bf16 %v2384_v38  ;;  %v2763_v22 = vpack.i.bf16 %v285_v5, %v448_v13 }
  0x33   : >> { %2739 = vrot.lane.b32.xlu0 %v2738_v23, %s2996_s8  ;;  %v2758_v23 = vpack.i.bf16 %v238_v44, %v402_v56  ;;  %v795_v21 = vsel %vm219_vm0, %v793_v49, %v794_v50  ;;  %v797_v52 = vsel %vm219_vm0, %v794_v50, %v796_v58  ;;  %v798_v30 = vrot.slane %v3277_v60, 1  ;;  %v2385_v44 = vld [vmem:[%s3060_s5 + $0x68] sm:$0xff]  }
  0x34   : >> { %2744 = vrot.lane.b32.xlu1 %v2743_v26, %s2997_s16  ;;  %v2194_v26 = vld [vmem:[%s3060_s5 + $0x74] sm:$0x1]  ;;  %v841_v32 = vsel %vm266_vm1, %v839_v59, %v840_v18  ;;  %v843_v33 = vsel %vm266_vm1, %v840_v18, %v842_v6  ;;  %v800_v36 = vrot.slane %v3284_v19, 1  ;;  %v844_v37 = vrot.slane %v3277_v60, 2 }
  0x35   : >> { %v3300_v39 = vunpack.c.h.bf16 %v2150_v7  ;;  %v3303_v43 = vunpack.c.l.bf16 %v3287_v20  ;;  %v2768_v48 = vpack.i.bf16 %v797_v52, %v795_v21  ;;  %v782_v49 = vunpack.c.l.bf16 %v2151_v47 }
  0x36   : >> { %v1247_v50 = vunpack.c.l.bf16 %v2194_v26  ;;  %v3311_v18 = vunpack.c.h.bf16 %v2384_v38  ;;  %v801_v47 = vsel %vm219_vm0, %v798_v30, %v800_v36  ;;  %v845_v26 = vsel %vm266_vm1, %v842_v6, %v844_v37 }
  0x37   : >> { %2749 = vrot.lane.b32.xlu0 %v2748_v54, %s2996_s8  ;;  %3952 = vst [vmem:[#allocation4_spill] sm:$0xff] %v3300_v39  ;;  %v2773_v54 = vpack.i.bf16 %v843_v33, %v841_v32  ;;  %v808_v56 = vrot.slane %v3300_v39, 1  ;;  %v3941_v59 = vrot.slane %v3303_v43, 1  ;;  %v810_v5 = vrot.slane %v782_v49, 1 }
  0x38   : >> { %2754 = vrot.lane.b32.xlu1 %v2753_v55, %s2997_s16  ;;  %v846_v55 = vrot.slane %v3284_v19, 2  ;;  %v1275_v13 = vrot.slane %v1247_v50, 1  ;;  %v854_v52 = vrot.slane %v3300_v39, 2  ;;  %v1321_v33 = vrot.slane %v1247_v50, 2  ;;  %v2240_v39 = vld [vmem:[%s3060_s5 + $0x9c] sm:$0x1] }
  0x39   : >> { %v3323_v32 = vsel %vm219_vm0, %v808_v56, %v810_v5  ;;  %v848_v50 = vrot.slane %v3311_v18, 2 }
  0x3a   : >> { %v847_v21 = vsel %vm266_vm1, %v844_v37, %v846_v55  ;;  %v3328_v38 = vsel %vm219_vm0, %v3941_v59, %v1275_v13  ;;  %v802_v59 = vrot.slane %v3311_v18, 1 }
  0x3b   : >> { %2759 = vrot.lane.b32.xlu0 %v2758_v23, %s2996_s8  ;;  %v799_v23 = vsel %vm219_vm0, %v796_v58, %v798_v30  ;;  %v3942_v58 = vrot.slane %v3303_v43, 2  ;;  %v856_v30 = vrot.slane %v782_v49, 2  ;;  %v2793_v13 = vpack.i.bf16 %v847_v21, %v845_v26 }
  0x3c   : >> { %2764 = vrot.lane.b32.xlu1 %v2763_v22, %s2997_s16  ;;  %v3317_v22 = vunpack.c.l.bf16 %v2385_v44  ;;  %v2788_v37 = vpack.i.bf16 %v801_v47, %v799_v23  ;;  %v3350_v47 = vunpack.c.h.bf16 %v2385_v44  ;;  %v3355_v21 = vunpack.c.l.bf16 %v2150_v7 }
  0x3d   : >> { %v3335_v1 = vsel %vm266_vm1, %v854_v52, %v856_v30  ;;  %v3340_v5 = vsel %vm266_vm1, %v3942_v58, %v1321_v33  ;;  %v849_v30 = vsel %vm266_vm1, %v846_v55, %v848_v50 }
  0x3e   : >> { %3953 = vst [vmem:[#allocation5_spill] sm:$0xff] %v3317_v22  ;;  %v804_v49 = vrot.slane %v3317_v22, 1  ;;  %v850_v23 = vrot.slane %v3317_v22, 2  ;;  %3954 = vst [vmem:[#allocation6_spill] sm:$0xff] %v3355_v21  ;;  %v806_v44 = vrot.slane %v3350_v47, 1  ;;  %v1116_v58 = vrot.slane %v3355_v21, 1 }
  0x3f   : >> { %2769 = vrot.lane.b32.xlu0 %v2768_v48, %s2996_s8  ;;  %v1162_v0 = vrot.slane %v3355_v21, 2  ;;  %v852_v7 = vrot.slane %v3350_v47, 2 }
  0x40   : >> { %2774 = vrot.lane.b32.xlu1 %v2773_v54, %s2997_s16  ;;  %v805_v26 = vsel %vm219_vm0, %v802_v59, %v804_v49  ;;  %v851_v33 = vsel %vm266_vm1, %v848_v50, %v850_v23  ;;  %v3369_v55 = vsel %vm219_vm0, %v3207_v45, %v1116_v58  ;;  %v3376_v50 = vunpack.c.h.bf16 %v3287_v20 }
  0x41   : >> { %v1654_v45 = vunpack.c.l.bf16 %v2240_v39 }
  0x42   : >> { %v3948_v39 = vrot.slane %v3376_v50, 2 }
  0x43   : >> { %2779 = vrot.lane.b32.xlu0 %v2768_v48, %s2996_s8  ;;  %v2184_v48 = vld [vmem:[%s3060_s5 + $0x4c] sm:$0x1] }
  0x44   : >> { %2784 = vrot.lane.b32.xlu1 %v2773_v54, %s2997_s16  ;;  %v803_v54 = vsel %vm219_vm0, %v800_v36, %v802_v59  ;;  %v2813_v36 = vpack.i.bf16 %v851_v33, %v849_v30  ;;  %v1090_v59 = vunpack.c.l.bf16 %v2184_v48  ;;  %v807_v48 = vsel %vm219_vm0, %v804_v49, %v806_v44 }
  0x45   : >> { %v2808_v6 = vpack.i.bf16 %v805_v26, %v803_v54  ;;  %v853_v30 = vsel %vm266_vm1, %v850_v23, %v852_v7  ;;  %v855_v33 = vsel %vm266_vm1, %v852_v7, %v854_v52  ;;  %v3949_v54 = vrot.slane %v3376_v50, 1 }
  0x46   : >> { %v1118_v26 = vrot.slane %v1090_v59, 1  ;;  %v1164_v20 = vrot.slane %v1090_v59, 2  ;;  %v3955_v49 = vmov 0.0   ;;  %v2833_v59 = vpack.i.bf16 %v855_v33, %v853_v30 }
  0x47   : >> { %2789 = vrot.lane.b32.xlu0 %v2788_v37, %s2996_s8  ;;  %2476 = vmatprep.mubr.msk.bf16.mxu0 %vm2998_vm2, %v3955_v49 }
  0x48   : >> { %2794 = vrot.lane.b32.xlu1 %v2793_v13, %s2997_s16  ;;  %v3390_v21 = vsel %vm219_vm0, %v1116_v58, %v1118_v26  ;;  %2508 = vmatprep.mubr.msk.bf16.mxu1 %vm2998_vm2, %v3955_v49  ;;  %v3398_v52 = vsel %vm266_vm1, %v1162_v0, %v1164_v20  ;;  %v3956_v26 = vrot.slane %v3303_v43, 1  ;;  %v2395_v20 = vld [vmem:[%s3060_s5 + $0x80] sm:$0xff]  }
  0x4a   : >> { %v1274_v22 = vsel %vm219_vm0, %v806_v44, %v3956_v26 }
  0x4b   : >> { %2799 = vrot.lane.b32.xlu0 %v2788_v37, %s2996_s8  ;;  %v3373_v37 = vsel %vm266_vm1, %v3215_v51, %v1162_v0  ;;  %v809_v51 = vsel %vm219_vm0, %v806_v44, %v808_v56  ;;  %v1728_v56 = vrot.slane %v1654_v45, 2 }
  0x4c   : >> { %2804 = vrot.lane.b32.xlu1 %v2793_v13, %s2997_s16  ;;  %v1682_v13 = vrot.slane %v1654_v45, 1  ;;  %v2828_v58 = vpack.i.bf16 %v809_v51, %v807_v48  ;;  %v2394_v51 = vld [vmem:[%s3060_s5 + $0x78] sm:$0xff]   ;;  %v3428_v45 = vunpack.c.l.bf16 %v2395_v20 }
  0x4d   : >> { %v3415_v0 = vsel %vm266_vm1, %v3948_v39, %v1728_v56  ;;  %v3424_v33 = vunpack.c.l.bf16 %v2394_v51  ;;  %v3426_v26 = vunpack.c.h.bf16 %v2394_v51 }
  0x4e   : >> { %v3404_v23 = vsel %vm219_vm0, %v3949_v54, %v1682_v13  ;;  %3958 = vst [vmem:[#allocation7_spill] sm:$0xff] %v3428_v45 }
  0x4f   : >> { %2809 = vrot.lane.b32.xlu0 %v2808_v6, %s2996_s8  ;;  %v1666_v56 = vrot.slane %v3426_v26, 1 }
  0x50   : >> { %2814 = vrot.lane.b32.xlu1 %v2813_v36, %s2997_s16 }
  0x53   : >> { %2819 = vrot.lane.b32.xlu0 %v2808_v6, %s2996_s8  ;;  %v3957_v6 = vrot.slane %v3303_v43, 2 }
  0x54   : >> { %2824 = vrot.lane.b32.xlu1 %v2813_v36, %s2997_s16  ;;  %v2838_v36 = vpack.i.bf16 %v1274_v22, %v807_v48  ;;  %v1711_v22 = vrot.slane %v3424_v33, 2  ;;  %v1712_v48 = vrot.slane %v3426_v26, 2 }
  0x55   : >> { %v1320_v13 = vsel %vm266_vm1, %v852_v7, %v3957_v6  ;;  %v1665_v7 = vrot.slane %v3424_v33, 1  ;;  %v3959_v6 = vpack.i.bf16 %v3328_v38, %v3323_v32 }
  0x56   : >> { %v2843_v44 = vpack.i.bf16 %v1320_v13, %v853_v30  ;;  %v1714_v30 = vrot.slane %v3428_v45, 2  ;;  %v3960_v13 = vpack.i.bf16 %v3340_v5, %v3335_v1  ;;  %v1713_v54 = vsel %vm266_vm1, %v1711_v22, %v1712_v48 }
  0x57   : >> { %2829 = vrot.lane.b32.xlu0 %v2828_v58, %s2996_s8  ;;  %v1668_v58 = vrot.slane %v3428_v45, 1  ;;  %v1667_v51 = vsel %vm219_vm0, %v1665_v7, %v1666_v56 }
  0x58   : >> { %2834 = vrot.lane.b32.xlu1 %v2833_v59, %s2997_s16  ;;  %v2396_v59 = vld [vmem:[%s3060_s5 + $0x88] sm:$0xff]   ;;  %v1715_v45 = vsel %vm266_vm1, %v1712_v48, %v1714_v30 }
  0x59   : >> { %v3451_v39 = vunpack.c.l.bf16 %v2396_v59  ;;  %v2873_v1 = vpack.i.bf16 %v1715_v45, %v1713_v54  ;;  %v3468_v48 = vunpack.c.h.bf16 %v2396_v59 }
  0x5b   : >> { %2839 = vrot.lane.b32.xlu0 %v2838_v36, %s2996_s8  ;;  %v1669_v36 = vsel %vm219_vm0, %v1666_v56, %v1668_v58  ;;  %v1672_v5 = vrot.slane %v3451_v39, 1  ;;  %v1718_v7 = vrot.slane %v3451_v39, 2  ;;  %v2397_v56 = vld [vmem:[%s3060_s5 + $0x90] sm:$0xff]   ;;  %v1720_v59 = vrot.slane %v3468_v48, 2  ;;  %s2278_s5 = smul.u32 20, %s2993_s24  ;;  %s184_s24 = sadd.s32 1, %s2993_s24  }
  0x5c   : >> { %2844 = vrot.lane.b32.xlu1 %v2843_v44, %s2997_s16  ;;  %v3449_v44 = vunpack.c.h.bf16 %v2395_v20  ;;  %v2868_v32 = vpack.i.bf16 %v1669_v36, %v1667_v51  ;;  %p181_p4 = scmp.ge.s32.totalorder %s184_s24, 36  }
  0x5d   : >> { %s3907_s6 = scalar_lea.vmem %s3040_s23, %s2278_s5 }
  0x5e   : >> { %v1670_v38 = vrot.slane %v3449_v44, 1  ;;  %v1716_v20 = vrot.slane %v3449_v44, 2 }
  0x5f   : >> { %2849 = vrot.lane.b32.xlu0 %v3959_v6, %s2996_s8 }
  0x60   : >> { %2854 = vrot.lane.b32.xlu1 %v3960_v13, %s2997_s16  ;;  %v1673_v22 = vsel %vm219_vm0, %v1670_v38, %v1672_v5  ;;  %v1717_v54 = vsel %vm266_vm1, %v1714_v30, %v1716_v20  ;;  %v1719_v45 = vsel %vm266_vm1, %v1716_v20, %v1718_v7 }
  0x61   : >> { %v2893_v13 = vpack.i.bf16 %v1719_v45, %v1717_v54  ;;  %v3962_v54 = vrot.slane %v3376_v50, 2  ;;  %v3963_v45 = vpack.i.bf16 %v3369_v55, %v3226_v57 }
  0x63   : >> { %2859 = vrot.lane.b32.xlu0 %v3102_v31, %s2996_s8  ;;  %v1671_v31 = vsel %vm219_vm0, %v1668_v58, %v1670_v38  ;;  %v1674_v58 = vrot.slane %v3468_v48, 1 }
  0x64   : >> { %2864 = vrot.lane.b32.xlu1 %v3113_v40, %s2997_s16  ;;  %v3470_v40 = vunpack.c.l.bf16 %v2397_v56  ;;  %v2888_v6 = vpack.i.bf16 %v1673_v22, %v1671_v31 }
  0x65   : >> { %v1675_v30 = vsel %vm219_vm0, %v1672_v5, %v1674_v58 }
  0x66   : >> { %v1676_v51 = vrot.slane %v3470_v40, 1  ;;  %v1722_v36 = vrot.slane %v3470_v40, 2 }
  0x67   : >> { %2869 = vrot.lane.b32.xlu0 %v2868_v32, %s2996_s8  ;;  %v3486_v32 = vunpack.c.h.bf16 %v2397_v56  ;;  %v3961_v56 = vrot.slane %v3376_v50, 1 }
  0x68   : >> { %2874 = vrot.lane.b32.xlu1 %v2873_v1, %s2997_s16  ;;  %v1723_v1 = vsel %vm266_vm1, %v1720_v59, %v1722_v36 }
  0x69   : >> { %v1678_v31 = vrot.slane %v3486_v32, 1  ;;  %v1724_v5 = vrot.slane %v3486_v32, 2 }
  0x6b   : >> { %2879 = vrot.lane.b32.xlu0 %v3154_v3, %s2996_s8  ;;  %v1677_v3 = vsel %vm219_vm0, %v1674_v58, %v1676_v51  ;;  %v1681_v22 = vsel %vm219_vm0, %v1678_v31, %v3961_v56 }
  0x6c   : >> { %2884 = vrot.lane.b32.xlu1 %v3160_v8, %s2997_s16  ;;  %v1721_v8 = vsel %vm266_vm1, %v1718_v7, %v1720_v59  ;;  %v2908_v38 = vpack.i.bf16 %v1677_v3, %v1675_v30  ;;  %v1679_v7 = vsel %vm219_vm0, %v1676_v51, %v1678_v31  ;;  %v3965_v51 = vpack.i.bf16 %v3404_v23, %v3390_v21 }
  0x6d   : >> { %v2913_v20 = vpack.i.bf16 %v1723_v1, %v1721_v8 }
  0x6f   : >> { %2889 = vrot.lane.b32.xlu0 %v2888_v6, %s2996_s8  ;;  %v2928_v6 = vpack.i.bf16 %v1681_v22, %v1679_v7 }
  0x70   : >> { %2894 = vrot.lane.b32.xlu1 %v2893_v13, %s2997_s16  ;;  %v3964_v13 = vpack.i.bf16 %v3373_v37, %v3240_v61 }
  0x73   : >> { %2899 = vrot.lane.b32.xlu0 %v3192_v35, %s2996_s8  ;;  %v1725_v35 = vsel %vm266_vm1, %v1722_v36, %v1724_v5 }
  0x74   : >> { %2904 = vrot.lane.b32.xlu1 %v3219_v53, %s2997_s16  ;;  %v1727_v53 = vsel %vm266_vm1, %v1724_v5, %v3962_v54 }
  0x75   : >> { %v2933_v58 = vpack.i.bf16 %v1727_v53, %v1725_v35  ;;  %v2956_v35 = vld [vmem:[%s3936_s1 + $0x58] sm:$0xff]  }
  0x77   : >> { %2909 = vrot.lane.b32.xlu0 %v2908_v38, %s2996_s8 }
  0x78   : >> { %2914 = vrot.lane.b32.xlu1 %v2913_v20, %s2997_s16 }
  0x7b   : >> { %2919 = vrot.lane.b32.xlu0 %v3963_v45, %s2996_s8 }
  0x7c   : >> { %2924 = vrot.lane.b32.xlu1 %v3964_v13, %s2997_s16 }
  0x7f   : >> { %2929 = vrot.lane.b32.xlu0 %v2928_v6, %s2996_s8 }
  0x80   : >> { %2934 = vrot.lane.b32.xlu1 %v2933_v58, %s2997_s16 }
  0x83   : >> { %2939 = vrot.lane.b32.xlu0 %v3965_v51, %s2996_s8 }
  0x84   : >> { %1182 = vrot.lane.b32.xlu1 %v3398_v52, %s2997_s16 }
  0x87   : >> { %1746 = vrot.lane.b32.xlu0 %v3415_v0, %s2997_s16 }
  0x8d   : >> { %v2680_v57 = vpop.permute.xlu0 %2679 }
  0x8e   : >> { %v2690_v55 = vpop.permute.xlu1 %2689  ;;  %v2682_v61 = vunpack.i.h.bf16 %v2680_v57  ;;  %v2681_v37 = vunpack.i.l.bf16 %v2680_v57 }
  0x8f   : >> { %v2692_v59 = vunpack.i.h.bf16 %v2690_v55  ;;  %v2691_v36 = vunpack.i.l.bf16 %v2690_v55  ;;  %v2957_v55 = vld [vmem:[%s3936_s1 + $0x80] sm:$0xff]  }
  0x90   : >> { %v477_v0 = vsel %vm313_vm3, %v3072_v10, %v2682_v61  ;;  %v476_v1 = vsel %vm313_vm3, %v3070_v9, %v2681_v37  ;;  %v2958_v37 = vld [vmem:[%s3936_s1 + $0x50] sm:$0xff]  }
  0x91   : >> { %v2685_v30 = vpop.permute.xlu0 %2684  ;;  %v315_v3 = vsel %vm313_vm3, %v3081_v15, %v2692_v59  ;;  %v314_v21 = vsel %vm313_vm3, %v3079_v14, %v2691_v36  ;;  %v2955_v14 = vld [vmem:[%s3936_s1 + $0x88] sm:$0xff]  }
  0x92   : >> { %v2687_v23 = vunpack.i.h.bf16 %v2685_v30  ;;  %v2686_v52 = vunpack.i.l.bf16 %v2685_v30  ;;  %v2695_v8 = vpop.permute.xlu1 %2694 }
  0x93   : >> { %v2697_v38 = vunpack.i.h.bf16 %v2695_v8  ;;  %v2696_v20 = vunpack.i.l.bf16 %v2695_v8 }
  0x94   : >> { %v485_v31 = vsel %vm323_vm4, %v476_v1, %v2686_v52  ;;  %v486_v5 = vsel %vm323_vm4, %v477_v0, %v2687_v23  ;;  %v2959_v1 = vld [vmem:[%s3936_s1 + $0x78] sm:$0xff]  }
  0x95   : >> { %v494_v15 = vpack.c.bf16 %v486_v5, %v485_v31  ;;  %v324_v7 = vsel %vm323_vm4, %v314_v21, %v2696_v20  ;;  %v325_v56 = vsel %vm323_vm4, %v315_v3, %v2697_v38  ;;  %v2700_v22 = vpop.permute.xlu0 %2699 }
  0x96   : >> { %v333_v54 = vpack.c.bf16 %v325_v56, %v324_v7  ;;  %v2702_v53 = vunpack.i.h.bf16 %v2700_v22  ;;  %v2701_v45 = vunpack.i.l.bf16 %v2700_v22  ;;  %v2705_v6 = vpop.permute.xlu1 %2704 }
  0x97   : >> { %v2707_v13 = vunpack.i.h.bf16 %v2705_v6  ;;  %v2706_v58 = vunpack.i.l.bf16 %v2705_v6  ;;  %2477 = vmatmul.mubr.msk.bf16.vlgmr.msra.gmra.mxu0 %vm548_vm5, %v494_v15 }
  0x98   : >> { %v479_v51 = vsel %vm313_vm3, %v3076_v12, %v2702_v53  ;;  %v478_v57 = vsel %vm313_vm3, %v3074_v11, %v2701_v45  ;;  %2509 = vmatmul.mubr.msk.bf16.vlgmr.msra.gmra.mxu1 %vm548_vm5, %v333_v54  ;;  %2529 = vmatpush3.bf16.msra.mxu0 %v2955_v14  ;;  %v2961_v53 = vld [vmem:[%s3936_s1 + $0x70] sm:$0xff]  }
  0x99   : >> { %v2710_v61 = vpop.permute.xlu0 %2709  ;;  %2561 = vmatpush3.bf16.msra.mxu1 %v2956_v35  ;;  %2530 = vmatprep.subr.bf16.mxu0 %v3955_v49  ;;  %v488_v59 = vsel %vm323_vm4, %v479_v51, %v2707_v13  ;;  %v487_v36 = vsel %vm323_vm4, %v478_v57, %v2706_v58 }
  0x9a   : >> { %v2712_v30 = vunpack.i.h.bf16 %v2710_v61  ;;  %v2711_v3 = vunpack.i.l.bf16 %v2710_v61  ;;  %v2715_v21 = vpop.permute.xlu1 %2714  ;;  %2480 = vmatprep.mubr.msk.bf16.mxu0 %vm2998_vm2, %v3955_v49  ;;  %2512 = vmatprep.mubr.msk.bf16.mxu1 %vm2998_vm2, %v3955_v49  ;;  %v495_v38 = vpack.c.bf16 %v488_v59, %v487_v36 }
  0x9b   : >> { %v2717_v23 = vunpack.i.h.bf16 %v2715_v21  ;;  %v2716_v52 = vunpack.i.l.bf16 %v2715_v21  ;;  %2562 = vmatprep.subr.bf16.mxu1 %v3955_v49 }
  0x9c   : >> { %v317_v8 = vsel %vm313_vm3, %v3085_v17, %v2712_v30  ;;  %v316_v0 = vsel %vm313_vm3, %v3083_v16, %v2711_v3  ;;  %2531 = vmatpush3.bf16.msra.mxu0 %v2957_v55  ;;  %v2960_v16 = vld [vmem:[%s3936_s1 + $0x48] sm:$0xff]   ;;  %v2962_v55 = vld [vmem:[%s3936_s1 + $0x40] sm:$0xff]  }
  0x9d   : >> { %v327_v20 = vsel %vm323_vm4, %v317_v8, %v2717_v23  ;;  %v326_v31 = vsel %vm323_vm4, %v316_v0, %v2716_v52  ;;  %v2720_v5 = vpop.permute.xlu0 %2719  ;;  %2563 = vmatpush3.bf16.msra.mxu1 %v2958_v37  ;;  %2532 = vmatprep.subr.bf16.mxu0 %v3955_v49  ;;  %v2963_v52 = vld [vmem:[%s3936_s1 + $0x68] sm:$0xff]  }
  0x9e   : >> { %v334_v14 = vpack.c.bf16 %v327_v20, %v326_v31  ;;  %v2722_v15 = vunpack.i.h.bf16 %v2720_v5  ;;  %v2721_v17 = vunpack.i.l.bf16 %v2720_v5  ;;  %v2725_v7 = vpop.permute.xlu1 %2724  ;;  %2564 = vmatprep.subr.bf16.mxu1 %v3955_v49 }
  0x9f   : >> { %v2727_v56 = vunpack.i.h.bf16 %v2725_v7  ;;  %v2726_v22 = vunpack.i.l.bf16 %v2725_v7  ;;  %2481 = vmatmul.mubr.msk.bf16.gmra.mxu0 %vm548_vm5, %v495_v38 }
  0xa0   : >> { %v481_v35 = vsel %vm313_vm3, %v3146_v62, %v2722_v15  ;;  %v480_v54 = vsel %vm313_vm3, %v3115_v41, %v2721_v17  ;;  %2513 = vmatmul.mubr.msk.bf16.gmra.mxu1 %vm548_vm5, %v334_v14  ;;  %2533 = vmatpush3.bf16.msra.mxu0 %v2959_v1  ;;  %v2965_v15 = vld [vmem:[%s3936_s1 + $0x60] sm:$0xff]  }
  0xa1   : >> { %v2730_v45 = vpop.permute.xlu0 %2729  ;;  %2484 = vmatprep.mubr.msk.bf16.mxu0 %vm2998_vm2, %v3955_v49  ;;  %2516 = vmatprep.mubr.msk.bf16.mxu1 %vm2998_vm2, %v3955_v49  ;;  %v490_v6 = vsel %vm323_vm4, %v481_v35, %v2727_v56  ;;  %v489_v13 = vsel %vm323_vm4, %v480_v54, %v2726_v22  ;;  %v2966_v35 = vld [vmem:[%s3936_s1 + $0x30] sm:$0xff]  }
  0xa2   : >> { %v2732_v58 = vunpack.i.h.bf16 %v2730_v45  ;;  %v2731_v51 = vunpack.i.l.bf16 %v2730_v45  ;;  %v2735_v57 = vpop.permute.xlu1 %2734  ;;  %2565 = vmatpush3.bf16.msra.mxu1 %v2960_v16  ;;  %2534 = vmatprep.subr.bf16.mxu0 %v3955_v49  ;;  %v496_v30 = vpack.c.bf16 %v490_v6, %v489_v13 }
  0xa3   : >> { %v2737_v61 = vunpack.i.h.bf16 %v2735_v57  ;;  %v2736_v37 = vunpack.i.l.bf16 %v2735_v57  ;;  %2566 = vmatprep.subr.bf16.mxu1 %v3955_v49 }
  0xa4   : >> { %v319_v59 = vsel %vm313_vm3, %v3179_v27, %v2732_v58  ;;  %v318_v36 = vsel %vm313_vm3, %v3122_v46, %v2731_v51  ;;  %2535 = vmatpush3.bf16.msra.mxu0 %v2961_v53  ;;  %v2964_v46 = vld [vmem:[%s3936_s1 + $0x38] sm:$0xff]  }
  0xa5   : >> { %v329_v3 = vsel %vm323_vm4, %v319_v59, %v2737_v61  ;;  %v328_v21 = vsel %vm323_vm4, %v318_v36, %v2736_v37  ;;  %v2740_v23 = vpop.permute.xlu0 %2739  ;;  %2536 = vmatprep.subr.bf16.mxu0 %v3955_v49 }
  0xa6   : >> { %v335_v8 = vpack.c.bf16 %v329_v3, %v328_v21  ;;  %v2742_v0 = vunpack.i.h.bf16 %v2740_v23  ;;  %v2741_v1 = vunpack.i.l.bf16 %v2740_v23  ;;  %v2745_v27 = vpop.permute.xlu1 %2744  ;;  %2567 = vmatpush3.bf16.msra.mxu1 %v2962_v55 }
  0xa7   : >> { %v2747_v38 = vunpack.i.h.bf16 %v2745_v27  ;;  %v2746_v20 = vunpack.i.l.bf16 %v2745_v27  ;;  %2485 = vmatmul.mubr.msk.bf16.gmra.mxu0 %vm548_vm5, %v496_v30  ;;  %2568 = vmatprep.subr.bf16.mxu1 %v3955_v49 }
  0xa8   : >> { %v483_v31 = vsel %vm313_vm3, %v3183_v29, %v2742_v0  ;;  %v482_v5 = vsel %vm313_vm3, %v3148_v63, %v2741_v1  ;;  %2517 = vmatmul.mubr.msk.bf16.gmra.mxu1 %vm548_vm5, %v335_v8  ;;  %2488 = vmatprep.mubr.msk.bf16.mxu0 %vm2998_vm2, %v3955_v49 }
  0xa9   : >> { %v2750_v14 = vpop.permute.xlu0 %2749  ;;  %2520 = vmatprep.mubr.msk.bf16.mxu1 %vm2998_vm2, %v3955_v49  ;;  %2537 = vmatpush3.bf16.msra.mxu0 %v2963_v52  ;;  %v492_v17 = vsel %vm323_vm4, %v483_v31, %v2747_v38  ;;  %v491_v7 = vsel %vm323_vm4, %v482_v5, %v2746_v20 }
  0xaa   : >> { %v2752_v16 = vunpack.i.h.bf16 %v2750_v14  ;;  %v2751_v56 = vunpack.i.l.bf16 %v2750_v14  ;;  %v2755_v22 = vpop.permute.xlu1 %2754  ;;  %2569 = vmatpush3.bf16.msra.mxu1 %v2964_v46  ;;  %2538 = vmatprep.subr.bf16.mxu0 %v3955_v49  ;;  %v497_v13 = vpack.c.bf16 %v492_v17, %v491_v7 }
  0xab   : >> { %v2757_v54 = vunpack.i.h.bf16 %v2755_v22  ;;  %v2756_v53 = vunpack.i.l.bf16 %v2755_v22  ;;  %2570 = vmatprep.subr.bf16.mxu1 %v3955_v49 }
  0xac   : >> { %v321_v45 = vsel %vm313_vm3, %v3231_v2, %v2752_v16  ;;  %v320_v6 = vsel %vm313_vm3, %v3181_v28, %v2751_v56 }
  0xad   : >> { %v331_v58 = vsel %vm323_vm4, %v321_v45, %v2757_v54  ;;  %v330_v51 = vsel %vm323_vm4, %v320_v6, %v2756_v53  ;;  %v2760_v57 = vpop.permute.xlu0 %2759  ;;  %2539 = vmatpush3.bf16.msra.mxu0 %v2965_v15 }
  0xae   : >> { %v336_v55 = vpack.c.bf16 %v331_v58, %v330_v51  ;;  %v2762_v61 = vunpack.i.h.bf16 %v2760_v57  ;;  %v2761_v37 = vunpack.i.l.bf16 %v2760_v57  ;;  %v2765_v59 = vpop.permute.xlu1 %2764  ;;  %2571 = vmatpush3.bf16.msra.mxu1 %v2966_v35  ;;  %2592 = vmatprep.subr.bf16.mxu0 %v3955_v49  ;;  %v2968_v57 = vld [vmem:[%s3936_s1 + $0x88] sm:$0xff]  }
  0xaf   : >> { %2489 = vmatmul.mubr.msk.bf16.gmra.mxu0 %vm548_vm5, %v497_v13  ;;  %v2767_v2 = vunpack.i.h.bf16 %v2765_v59  ;;  %v2766_v36 = vunpack.i.l.bf16 %v2765_v59  ;;  %2624 = vmatprep.subr.bf16.mxu1 %v3955_v49 }
  0xb0   : >> { %v322_v28 = vsel %vm313_vm3, %v3233_v4, %v2762_v61  ;;  %v484_v30 = vsel %vm313_vm3, %v3189_v34, %v2761_v37  ;;  %2521 = vmatmul.mubr.msk.bf16.gmra.mxu1 %vm548_vm5, %v336_v55  ;;  %2492 = vmatprep.mubr.msk.bf16.mxu0 %vm2998_vm2, %v3955_v49 }
  0xb1   : >> { %v332_v3 = vsel %vm323_vm4, %v322_v28, %v2767_v2  ;;  %v493_v21 = vsel %vm323_vm4, %v484_v30, %v2766_v36  ;;  %v2770_v23 = vpop.permute.xlu0 %2769  ;;  %2524 = vmatprep.mubr.msk.bf16.mxu1 %vm2998_vm2, %v3955_v49 }
  0xb2   : >> { %v2775_v52 = vpop.permute.xlu1 %2774  ;;  %v498_v8 = vpack.c.bf16 %v493_v21, %v493_v21  ;;  %v2772_v0 = vunpack.i.h.bf16 %v2770_v23  ;;  %v2771_v4 = vunpack.i.l.bf16 %v2770_v23  ;;  %v337_v1 = vpack.c.bf16 %v332_v3, %v332_v3 }
  0xb3   : >> { %v2777_v34 = vunpack.i.h.bf16 %v2775_v52  ;;  %v2776_v46 = vunpack.i.l.bf16 %v2775_v52  ;;  %v2969_v52 = vld [vmem:[%s3936_s1 + $0x20] sm:$0xff]  }
  0xb4   : >> { %v886_v5 = vsel %vm313_vm3, %v3257_v25, %v2772_v0  ;;  %v885_v14 = vsel %vm313_vm3, %v3255_v24, %v2771_v4 }
  0xb5   : >> { %v2780_v27 = vpop.permute.xlu0 %2779  ;;  %v895_v54 = vsel %vm323_vm4, %v886_v5, %v2777_v34  ;;  %v894_v53 = vsel %vm323_vm4, %v885_v14, %v2776_v46 }
  0xb6   : >> { %v2782_v38 = vunpack.i.h.bf16 %v2780_v27  ;;  %v2781_v20 = vunpack.i.l.bf16 %v2780_v27  ;;  %v2785_v31 = vpop.permute.xlu1 %2784  ;;  %v903_v58 = vpack.c.bf16 %v895_v54, %v894_v53 }
  0xb7   : >> { %2493 = vmatmul.mubr.msk.bf16.gmra.mxu0 %vm548_vm5, %v498_v8  ;;  %v2787_v15 = vunpack.i.h.bf16 %v2785_v31  ;;  %v2786_v17 = vunpack.i.l.bf16 %v2785_v31 }
  0xb8   : >> { %2525 = vmatmul.mubr.msk.bf16.gmra.mxu1 %vm548_vm5, %v337_v1  ;;  %v1351_v7 = vsel %vm313_vm3, %v3257_v25, %v2782_v38  ;;  %v1350_v16 = vsel %vm313_vm3, %v3255_v24, %v2781_v20  ;;  %2540 = vmatprep.mubr.msk.bf16.mxu0 %vm2998_vm2, %v3955_v49  ;;  %v2967_v24 = vld [vmem:[%s3936_s1 + $0x28] sm:$0xff]   ;;  %v2970_v1 = vld [vmem:[%s3936_s1 + $0x80] sm:$0xff]   ;;  %v2971_v20 = vld [vmem:[%s3936_s1 + $0x18] sm:$0xff]  }
  0xb9   : >> { %v1360_v56 = vsel %vm323_vm4, %v1351_v7, %v2787_v15  ;;  %v1359_v22 = vsel %vm323_vm4, %v1350_v16, %v2786_v17  ;;  %v2790_v35 = vpop.permute.xlu0 %2789  ;;  %2572 = vmatprep.mubr.msk.bf16.mxu1 %vm2998_vm2, %v3955_v49 }
  0xba   : >> { %v2795_v45 = vpop.permute.xlu1 %2794  ;;  %v2792_v25 = vunpack.i.h.bf16 %v2790_v35  ;;  %v2791_v6 = vunpack.i.l.bf16 %v2790_v35  ;;  %v1368_v13 = vpack.c.bf16 %v1360_v56, %v1359_v22  ;;  %v2972_v56 = vld [vmem:[%s3936_s1 + $0x78] sm:$0xff]  }
  0xbb   : >> { %v2797_v55 = vunpack.i.h.bf16 %v2795_v45  ;;  %v2796_v61 = vunpack.i.l.bf16 %v2795_v45 }
  0xbc   : >> { %v888_v36 = vsel %vm313_vm3, %v3277_v60, %v2792_v25  ;;  %v887_v28 = vsel %vm313_vm3, %v3266_v42, %v2791_v6  ;;  %v2973_v6 = vld [vmem:[%s3936_s1 + $0x10] sm:$0xff]  }
  0xbd   : >> { %v2800_v51 = vpop.permute.xlu0 %2799 }
  0xbe   : >> { %v2802_v37 = vunpack.i.h.bf16 %v2800_v51  ;;  %v2801_v59 = vunpack.i.l.bf16 %v2800_v51  ;;  %v2805_v2 = vpop.permute.xlu1 %2804 }
  0xbf   : >> { %2541 = vmatmul.mubr.msk.bf16.vlgmr.msra.gmra.mxu0 %vm548_vm5, %v903_v58  ;;  %v2807_v30 = vunpack.i.h.bf16 %v2805_v2  ;;  %v2806_v3 = vunpack.i.l.bf16 %v2805_v2 }
  0xc0   : >> { %2593 = vmatpush3.bf16.msra.mxu0 %v2967_v24  ;;  %2573 = vmatmul.mubr.msk.bf16.vlgmr.msra.gmra.mxu1 %vm548_vm5, %v1368_v13  ;;  %v1353_v21 = vsel %vm313_vm3, %v3277_v60, %v2802_v37  ;;  %v1352_v23 = vsel %vm313_vm3, %v3266_v42, %v2801_v59  ;;  %v897_v60 = vsel %vm323_vm4, %v888_v36, %v2797_v55  ;;  %v2975_v36 = vld [vmem:[%s3936_s1 + $0x8] sm:$0xff]  }
  0xc1   : >> { %2625 = vmatpush3.bf16.msra.mxu1 %v2968_v57  ;;  %v1362_v8 = vsel %vm323_vm4, %v1353_v21, %v2807_v30  ;;  %v1361_v0 = vsel %vm323_vm4, %v1352_v23, %v2806_v3  ;;  %v2810_v4 = vpop.permute.xlu0 %2809  ;;  %2594 = vmatprep.subr.bf16.mxu0 %v3955_v49  ;;  %v896_v42 = vsel %vm323_vm4, %v887_v28, %v2796_v61  ;;  %v2974_v57 = vld [vmem:[%s3936_s1 + $0x70] sm:$0xff]  }
  0xc2   : >> { %v2815_v27 = vpop.permute.xlu1 %2814  ;;  %2544 = vmatprep.mubr.msk.bf16.mxu0 %vm2998_vm2, %v3955_v49  ;;  %2576 = vmatprep.mubr.msk.bf16.mxu1 %vm2998_vm2, %v3955_v49  ;;  %v2812_v34 = vunpack.i.h.bf16 %v2810_v4  ;;  %v2811_v46 = vunpack.i.l.bf16 %v2810_v4  ;;  %v1369_v38 = vpack.c.bf16 %v1362_v8, %v1361_v0  ;;  %v904_v31 = vpack.c.bf16 %v897_v60, %v896_v42  ;;  %v3966_v0 = vld [vmem:[#allocation5_spill] sm:$0xff] }
  0xc3   : >> { %2626 = vmatprep.subr.bf16.mxu1 %v3955_v49  ;;  %v2817_v14 = vunpack.i.h.bf16 %v2815_v27  ;;  %v2816_v15 = vunpack.i.l.bf16 %v2815_v27 }
  0xc4   : >> { %2595 = vmatpush3.bf16.msra.mxu0 %v2969_v52  ;;  %v890_v22 = vsel %vm313_vm3, %v3311_v18, %v2812_v34  ;;  %v889_v35 = vsel %vm313_vm3, %v3284_v19, %v2811_v46  ;;  %v2976_v52 = vld [vmem:[%s3936_s1 + $0x68] sm:$0xff]  }
  0xc5   : >> { %2627 = vmatpush3.bf16.msra.mxu1 %v2970_v1  ;;  %v2820_v5 = vpop.permute.xlu0 %2819  ;;  %2596 = vmatprep.subr.bf16.mxu0 %v3955_v49 }
  0xc6   : >> { %v2822_v17 = vunpack.i.h.bf16 %v2820_v5  ;;  %v2821_v7 = vunpack.i.l.bf16 %v2820_v5  ;;  %v2825_v16 = vpop.permute.xlu1 %2824  ;;  %2628 = vmatprep.subr.bf16.mxu1 %v3955_v49 }
  0xc7   : >> { %2545 = vmatmul.mubr.msk.bf16.gmra.mxu0 %vm548_vm5, %v904_v31  ;;  %v2827_v54 = vunpack.i.h.bf16 %v2825_v16  ;;  %v2826_v53 = vunpack.i.l.bf16 %v2825_v16 }
  0xc8   : >> { %2577 = vmatmul.mubr.msk.bf16.gmra.mxu1 %vm548_vm5, %v1369_v38  ;;  %v1355_v45 = vsel %vm313_vm3, %v3311_v18, %v2822_v17  ;;  %v1354_v25 = vsel %vm313_vm3, %v3284_v19, %v2821_v7  ;;  %2597 = vmatpush3.bf16.msra.mxu0 %v2971_v20  ;;  %v899_v18 = vsel %vm323_vm4, %v890_v22, %v2817_v14  ;;  %v2977_v20 = vld [vmem:[%s3936_s1] sm:$0xff]   ;;  %v3967_v22 = vld [vmem:[#allocation4_spill] sm:$0xff] }
  0xc9   : >> { %v1364_v13 = vsel %vm323_vm4, %v1355_v45, %v2827_v54  ;;  %v1363_v24 = vsel %vm323_vm4, %v1354_v25, %v2826_v53  ;;  %v2830_v58 = vpop.permute.xlu0 %2829  ;;  %2548 = vmatprep.mubr.msk.bf16.mxu0 %vm2998_vm2, %v3955_v49  ;;  %2580 = vmatprep.mubr.msk.bf16.mxu1 %vm2998_vm2, %v3955_v49  ;;  %v898_v19 = vsel %vm323_vm4, %v889_v35, %v2816_v15  ;;  %v2978_v17 = vld [vmem:[%s3936_s1 + $0x60] sm:$0xff]  }
  0xca   : >> { %v2835_v51 = vpop.permute.xlu1 %2834  ;;  %2629 = vmatpush3.bf16.msra.mxu1 %v2972_v56  ;;  %2598 = vmatprep.subr.bf16.mxu0 %v3955_v49  ;;  %v2832_v55 = vunpack.i.h.bf16 %v2830_v58  ;;  %v2831_v61 = vunpack.i.l.bf16 %v2830_v58  ;;  %v1370_v37 = vpack.c.bf16 %v1364_v13, %v1363_v24  ;;  %v905_v59 = vpack.c.bf16 %v899_v18, %v898_v19 }
  0xcb   : >> { %2630 = vmatprep.subr.bf16.mxu1 %v3955_v49  ;;  %v2837_v28 = vunpack.i.h.bf16 %v2835_v51  ;;  %v2836_v30 = vunpack.i.l.bf16 %v2835_v51 }
  0xcc   : >> { %2599 = vmatpush3.bf16.msra.mxu0 %v2973_v6  ;;  %v892_v8 = vsel %vm313_vm3, %v3350_v47, %v2832_v55  ;;  %v891_v4 = vsel %vm313_vm3, %v3966_v0, %v2831_v61 }
  0xcd   : >> { %v2840_v2 = vpop.permute.xlu0 %2839  ;;  %2600 = vmatprep.subr.bf16.mxu0 %v3955_v49  ;;  %v900_v31 = vsel %vm323_vm4, %v891_v4, %v2836_v30 }
  0xce   : >> { %v2842_v3 = vunpack.i.h.bf16 %v2840_v2  ;;  %v2841_v21 = vunpack.i.l.bf16 %v2840_v2  ;;  %v2845_v23 = vpop.permute.xlu1 %2844  ;;  %2631 = vmatpush3.bf16.msra.mxu1 %v2974_v57 }
  0xcf   : >> { %2549 = vmatmul.mubr.msk.bf16.gmra.mxu0 %vm548_vm5, %v905_v59  ;;  %v2847_v1 = vunpack.i.h.bf16 %v2845_v23  ;;  %v2846_v60 = vunpack.i.l.bf16 %v2845_v23  ;;  %2632 = vmatprep.subr.bf16.mxu1 %v3955_v49 }
  0xd0   : >> { %2581 = vmatmul.mubr.msk.bf16.gmra.mxu1 %vm548_vm5, %v1370_v37  ;;  %v1357_v42 = vsel %vm313_vm3, %v3350_v47, %v2842_v3  ;;  %v1356_v27 = vsel %vm313_vm3, %v3966_v0, %v2841_v21  ;;  %2552 = vmatprep.mubr.msk.bf16.mxu0 %vm2998_vm2, %v3955_v49  ;;  %v901_v47 = vsel %vm323_vm4, %v892_v8, %v2837_v28 }
  0xd1   : >> { %v1366_v34 = vsel %vm323_vm4, %v1357_v42, %v2847_v1  ;;  %v1365_v46 = vsel %vm323_vm4, %v1356_v27, %v2846_v60  ;;  %2584 = vmatprep.mubr.msk.bf16.mxu1 %vm2998_vm2, %v3955_v49  ;;  %v2850_v38 = vpop.permute.xlu0 %2849  ;;  %2601 = vmatpush3.bf16.msra.mxu0 %v2975_v36  ;;  %v906_v56 = vpack.c.bf16 %v901_v47, %v900_v31 }
  0xd2   : >> { %v2852_v5 = vunpack.i.h.bf16 %v2850_v38  ;;  %v2851_v14 = vunpack.i.l.bf16 %v2850_v38  ;;  %v2855_v15 = vpop.permute.xlu1 %2854  ;;  %2633 = vmatpush3.bf16.msra.mxu1 %v2976_v52  ;;  %2602 = vmatprep.subr.bf16.mxu0 %v3955_v49  ;;  %v1371_v7 = vpack.c.bf16 %v1366_v34, %v1365_v46 }
  0xd3   : >> { %2634 = vmatprep.subr.bf16.mxu1 %v3955_v49  ;;  %v2856_v16 = vunpack.i.l.bf16 %v2855_v15  ;;  %v2857_v54 = vunpack.i.h.bf16 %v2855_v15 }
  0xd4   : >> { %v893_v35 = vsel %vm313_vm3, %v3967_v22, %v2851_v14  ;;  %v1358_v45 = vsel %vm313_vm3, %v3303_v43, %v2852_v5  ;;  %v3968_v5 = vld [vmem:[#allocation7_spill] sm:$0xff] }
  0xd5   : >> { %v2860_v53 = vpop.permute.xlu0 %2859  ;;  %2603 = vmatpush3.bf16.msra.mxu0 %v2977_v20  ;;  %v902_v6 = vsel %vm323_vm4, %v893_v35, %v2856_v16  ;;  %v1367_v13 = vsel %vm323_vm4, %v1358_v45, %v2857_v54 }
  0xd6   : >> { %v2865_v25 = vpop.permute.xlu1 %2864  ;;  %2635 = vmatpush3.bf16.msra.mxu1 %v2978_v17  ;;  %v907_v19 = vpack.c.bf16 %v902_v6, %v902_v6  ;;  %v2862_v51 = vunpack.i.h.bf16 %v2860_v53  ;;  %v2861_v57 = vunpack.i.l.bf16 %v2860_v53  ;;  %v1372_v55 = vpack.c.bf16 %v1367_v13, %v1367_v13 }
  0xd7   : >> { %2553 = vmatmul.mubr.msk.bf16.gmra.mxu0 %vm548_vm5, %v906_v56  ;;  %v2867_v2 = vunpack.i.h.bf16 %v2865_v25  ;;  %v2866_v36 = vunpack.i.l.bf16 %v2865_v25 }
  0xd8   : >> { %2585 = vmatmul.mubr.msk.bf16.gmra.mxu1 %vm548_vm5, %v1371_v7  ;;  %2556 = vmatprep.mubr.msk.bf16.mxu0 %vm2998_vm2, %v3955_v49  ;;  %v1194_v21 = vsel %vm313_vm3, %v3072_v10, %v2862_v51  ;;  %v1193_v23 = vsel %vm313_vm3, %v3070_v9, %v2861_v57 }
  0xd9   : >> { %2588 = vmatprep.mubr.msk.bf16.mxu1 %vm2998_vm2, %v3955_v49  ;;  %v2870_v24 = vpop.permute.xlu0 %2869  ;;  %v1203_v10 = vsel %vm323_vm4, %v1194_v21, %v2867_v2  ;;  %v1202_v8 = vsel %vm323_vm4, %v1193_v23, %v2866_v36 }
  0xda   : >> { %v2872_v58 = vunpack.i.h.bf16 %v2870_v24  ;;  %v2871_v18 = vunpack.i.l.bf16 %v2870_v24  ;;  %v2875_v43 = vpop.permute.xlu1 %2874  ;;  %v1211_v27 = vpack.c.bf16 %v1203_v10, %v1202_v8 }
  0xdb   : >> { %v2877_v61 = vunpack.i.h.bf16 %v2875_v43  ;;  %v2876_v37 = vunpack.i.l.bf16 %v2875_v43 }
  0xdc   : >> { %v1758_v28 = vsel %vm313_vm3, %v3426_v26, %v2872_v58  ;;  %v1757_v30 = vsel %vm313_vm3, %v3424_v33, %v2871_v18 }
  0xdd   : >> { %v2880_v59 = vpop.permute.xlu0 %2879  ;;  %v1767_v52 = vsel %vm323_vm4, %v1758_v28, %v2877_v61  ;;  %v1766_v26 = vsel %vm323_vm4, %v1757_v30, %v2876_v37 }
  0xde   : >> { %v2885_v3 = vpop.permute.xlu1 %2884  ;;  %v2882_v1 = vunpack.i.h.bf16 %v2880_v59  ;;  %v2881_v60 = vunpack.i.l.bf16 %v2880_v59  ;;  %v1775_v42 = vpack.c.bf16 %v1767_v52, %v1766_v26 }
  0xdf   : >> { %2557 = vmatmul.mubr.msk.bf16.gmra.mxu0 %vm548_vm5, %v907_v19  ;;  %v2887_v20 = vunpack.i.h.bf16 %v2885_v3  ;;  %v2886_v47 = vunpack.i.l.bf16 %v2885_v3 }
  0xe0   : >> { %2589 = vmatmul.mubr.msk.bf16.gmra.mxu1 %vm548_vm5, %v1372_v55  ;;  %2604 = vmatprep.mubr.msk.bf16.mxu0 %vm2998_vm2, %v3955_v49  ;;  %v1196_v17 = vsel %vm313_vm3, %v3076_v12, %v2882_v1  ;;  %v1195_v7 = vsel %vm313_vm3, %v3074_v11, %v2881_v60 }
  0xe1   : >> { %2636 = vmatprep.mubr.msk.bf16.mxu1 %vm2998_vm2, %v3955_v49  ;;  %v2890_v33 = vpop.permute.xlu0 %2889  ;;  %v1205_v12 = vsel %vm323_vm4, %v1196_v17, %v2887_v20  ;;  %v1204_v22 = vsel %vm323_vm4, %v1195_v7, %v2886_v47 }
  0xe2   : >> { %v2892_v9 = vunpack.i.h.bf16 %v2890_v33  ;;  %v2891_v0 = vunpack.i.l.bf16 %v2890_v33  ;;  %v2895_v4 = vpop.permute.xlu1 %2894  ;;  %v1212_v6 = vpack.c.bf16 %v1205_v12, %v1204_v22 }
  0xe3   : >> { %v2897_v34 = vunpack.i.h.bf16 %v2895_v4  ;;  %v2896_v46 = vunpack.i.l.bf16 %v2895_v4 }
  0xe4   : >> { %v1760_v31 = vsel %vm313_vm3, %v3449_v44, %v2892_v9  ;;  %v1759_v14 = vsel %vm313_vm3, %v3968_v5, %v2891_v0 }
  0xe5   : >> { %v2900_v38 = vpop.permute.xlu0 %2899  ;;  %v1769_v16 = vsel %vm323_vm4, %v1760_v31, %v2897_v34  ;;  %v1768_v44 = vsel %vm323_vm4, %v1759_v14, %v2896_v46  ;;  %v3969_v34 = vld [vmem:[#allocation6_spill] sm:$0xff] }
  0xe6   : >> { %v2905_v15 = vpop.permute.xlu1 %2904  ;;  %v2902_v53 = vunpack.i.h.bf16 %v2900_v38  ;;  %v2901_v45 = vunpack.i.l.bf16 %v2900_v38  ;;  %v1776_v25 = vpack.c.bf16 %v1769_v16, %v1768_v44 }
  0xe7   : >> { %2605 = vmatmul.mubr.msk.bf16.vlgmr.msra.gmra.mxu0 %vm548_vm5, %v1211_v27  ;;  %v2907_v18 = vunpack.i.h.bf16 %v2905_v15  ;;  %v2906_v43 = vunpack.i.l.bf16 %v2905_v15 }
  0xe8   : >> { %2637 = vmatmul.mubr.msk.bf16.vlgmr.msra.gmra.mxu1 %vm548_vm5, %v1775_v42  ;;  %2608 = vmatprep.mubr.msk.bf16.mxu0 %vm2998_vm2, %v3955_v49  ;;  %v1198_v55 = vsel %vm313_vm3, %v3146_v62, %v2902_v53  ;;  %v1197_v61 = vsel %vm313_vm3, %v3115_v41, %v2901_v45 }
  0xe9   : >> { %2640 = vmatprep.mubr.msk.bf16.mxu1 %vm2998_vm2, %v3955_v49  ;;  %v2910_v56 = vpop.permute.xlu0 %2909  ;;  %v1207_v62 = vsel %vm323_vm4, %v1198_v55, %v2907_v18  ;;  %v1206_v59 = vsel %vm323_vm4, %v1197_v61, %v2906_v43 }
  0xea   : >> { %v2912_v11 = vunpack.i.h.bf16 %v2910_v56  ;;  %v2911_v35 = vunpack.i.l.bf16 %v2910_v56  ;;  %v2915_v54 = vpop.permute.xlu1 %2914  ;;  %v1213_v21 = vpack.c.bf16 %v1207_v62, %v1206_v59 }
  0xeb   : >> { %v2917_v13 = vunpack.i.h.bf16 %v2915_v54  ;;  %v2916_v24 = vunpack.i.l.bf16 %v2915_v54 }
  0xec   : >> { %v1762_v19 = vsel %vm313_vm3, %v3468_v48, %v2912_v11  ;;  %v1761_v51 = vsel %vm313_vm3, %v3451_v39, %v2911_v35 }
  0xed   : >> { %v2920_v58 = vpop.permute.xlu0 %2919  ;;  %v1771_v37 = vsel %vm323_vm4, %v1762_v19, %v2917_v13  ;;  %v1770_v48 = vsel %vm323_vm4, %v1761_v51, %v2916_v24 }
  0xee   : >> { %v2925_v57 = vpop.permute.xlu1 %2924  ;;  %v2922_v28 = vunpack.i.h.bf16 %v2920_v58  ;;  %v2921_v30 = vunpack.i.l.bf16 %v2920_v58  ;;  %v1777_v3 = vpack.c.bf16 %v1771_v37, %v1770_v48 }
  0xef   : >> { %2609 = vmatmul.mubr.msk.bf16.gmra.mxu0 %vm548_vm5, %v1212_v6  ;;  %v2927_v26 = vunpack.i.h.bf16 %v2925_v57  ;;  %v2926_v33 = vunpack.i.l.bf16 %v2925_v57 }
  0xf0   : >> { %2641 = vmatmul.mubr.msk.bf16.gmra.mxu1 %vm548_vm5, %v1776_v25  ;;  %2612 = vmatprep.mubr.msk.bf16.mxu0 %vm2998_vm2, %v3955_v49  ;;  %v1200_v0 = vsel %vm313_vm3, %v3183_v29, %v2922_v28  ;;  %v1199_v4 = vsel %vm313_vm3, %v3148_v63, %v2921_v30 }
  0xf1   : >> { %2644 = vmatprep.mubr.msk.bf16.mxu1 %vm2998_vm2, %v3955_v49  ;;  %v2930_v39 = vpop.permute.xlu0 %2929  ;;  %v1209_v29 = vsel %vm323_vm4, %v1200_v0, %v2927_v26 }
  0xf2   : >> { %v2932_v41 = vunpack.i.h.bf16 %v2930_v39  ;;  %v2931_v2 = vunpack.i.l.bf16 %v2930_v39  ;;  %v2935_v36 = vpop.permute.xlu1 %2934 }
  0xf3   : >> { %v2937_v23 = vunpack.i.h.bf16 %v2935_v36  ;;  %v2936_v52 = vunpack.i.l.bf16 %v2935_v36 }
  0xf4   : >> { %v1764_v10 = vsel %vm313_vm3, %v3486_v32, %v2932_v41  ;;  %v1763_v8 = vsel %vm313_vm3, %v3470_v40, %v2931_v2  ;;  %v1208_v40 = vsel %vm323_vm4, %v1199_v4, %v2926_v33 }
  0xf5   : >> { %v2940_v9 = vpop.permute.xlu0 %2939  ;;  %v1773_v1 = vsel %vm323_vm4, %v1764_v10, %v2937_v23  ;;  %v1772_v32 = vsel %vm323_vm4, %v1763_v8, %v2936_v52  ;;  %v1214_v27 = vpack.c.bf16 %v1209_v29, %v1208_v40 }
  0xf6   : >> { %v2941_v60 = vunpack.i.l.bf16 %v2940_v9  ;;  %v2942_v63 = vunpack.i.h.bf16 %v2940_v9  ;;  %v1778_v42 = vpack.c.bf16 %v1773_v1, %v1772_v32  ;;  %v1183_v38 = vpop.permute.xlu1 %1182 }
  0xf7   : >> { %2613 = vmatmul.mubr.msk.bf16.gmra.mxu0 %vm548_vm5, %v1213_v21 }
  0xf8   : >> { %2645 = vmatmul.mubr.msk.bf16.gmra.mxu1 %vm548_vm5, %v1777_v3  ;;  %2616 = vmatprep.mubr.msk.bf16.mxu0 %vm2998_vm2, %v3955_v49  ;;  %v1201_v46 = vsel %vm313_vm3, %v3969_v34, %v2941_v60  ;;  %v1765_v47 = vsel %vm313_vm3, %v3376_v50, %v2942_v63 }
  0xf9   : >> { %2648 = vmatprep.mubr.msk.bf16.mxu1 %vm2998_vm2, %v3955_v49  ;;  %v1747_v20 = vpop.permute.xlu0 %1746  ;;  %v1210_v31 = vsel %vm323_vm4, %v1201_v46, %v1183_v38 }
  0xfa   : >> { %v1774_v5 = vsel %vm323_vm4, %v1765_v47, %v1747_v20  ;;  %v1215_v14 = vpack.c.bf16 %v1210_v31, %v1210_v31 }
  0xfb   : >> { %v1779_v15 = vpack.c.bf16 %v1774_v5, %v1774_v5 }
  0xff   : >> { %2617 = vmatmul.mubr.msk.bf16.gmra.mxu0 %vm548_vm5, %v1214_v27 }
 0x100   : >> { %2649 = vmatmul.mubr.msk.bf16.gmra.mxu1 %vm548_vm5, %v1778_v42  ;;  %2620 = vmatprep.mubr.msk.bf16.mxu0 %vm2998_vm2, %v3955_v49 }
 0x101   : >> { %2652 = vmatprep.mubr.msk.bf16.mxu1 %vm2998_vm2, %v3955_v49 }
 0x107   : >> { %2621 = vmatmul.mubr.msk.bf16.gmra.mxu0 %vm548_vm5, %v1215_v14 }
 0x108   : >> { %2653 = vmatmul.mubr.msk.bf16.gmra.mxu1 %vm548_vm5, %v1779_v15 }
 0x157   : >> { %v598_v50 = vpop.f32.mrf.mxu0 }
 0x158   : >> { %v721_v17 = vpop.f32.mrf.mxu1 }
 0x159   : >> { %v2478_v7 = vpop.f32.mrf.mxu0  ;;  %v722_v52 = vadd.f32 %v721_v17, %v598_v50 }
 0x15a   : >> { %v2510_v16 = vpop.f32.mrf.mxu1 }
 0x15b   : >> { %v601_v44 = vpop.f32.mrf.mxu0 }
 0x15c   : >> { %v724_v56 = vpop.f32.mrf.mxu1 }
 0x15d   : >> { %v2479_v12 = vpop.f32.mrf.mxu0  ;;  %v725_v0 = vadd.f32 %v724_v56, %v601_v44 }
 0x15e   : >> { %v2511_v22 = vpop.f32.mrf.mxu1 }
 0x15f   : >> { %v606_v11 = vpop.f32.mrf.mxu0 }
 0x160   : >> { %v729_v35 = vpop.f32.mrf.mxu1 }
 0x161   : >> { %v2482_v54 = vpop.f32.mrf.mxu0  ;;  %v730_v40 = vadd.f32 %v729_v35, %v606_v11 }
 0x162   : >> { %v2514_v53 = vpop.f32.mrf.mxu1 }
 0x163   : >> { %v609_v45 = vpop.f32.mrf.mxu0 }
 0x164   : >> { %v732_v49 = vpop.f32.mrf.mxu1 }
 0x165   : >> { %v2483_v25 = vpop.f32.mrf.mxu0  ;;  %v733_v38 = vadd.f32 %v732_v49, %v609_v45 }
 0x166   : >> { %v2515_v6 = vpop.f32.mrf.mxu1 }
 0x167   : >> { %v614_v13 = vpop.f32.mrf.mxu0 }
 0x168   : >> { %v737_v24 = vpop.f32.mrf.mxu1 }
 0x169   : >> { %v2486_v58 = vpop.f32.mrf.mxu0  ;;  %v738_v15 = vadd.f32 %v737_v24, %v614_v13 }
 0x16a   : >> { %v2518_v18 = vpop.f32.mrf.mxu1 }
 0x16b   : >> { %v617_v43 = vpop.f32.mrf.mxu0 }
 0x16c   : >> { %v740_v19 = vpop.f32.mrf.mxu1 }
 0x16d   : >> { %v2487_v51 = vpop.f32.mrf.mxu0  ;;  %v741_v56 = vadd.f32 %v740_v19, %v617_v43 }
 0x16e   : >> { %v2519_v57 = vpop.f32.mrf.mxu1 }
 0x16f   : >> { %v622_v55 = vpop.f32.mrf.mxu0 }
 0x170   : >> { %v745_v61 = vpop.f32.mrf.mxu1 }
 0x171   : >> { %v2490_v37 = vpop.f32.mrf.mxu0  ;;  %v746_v53 = vadd.f32 %v745_v61, %v622_v55 }
 0x172   : >> { %v2522_v48 = vpop.f32.mrf.mxu1 }
 0x173   : >> { %v625_v39 = vpop.f32.mrf.mxu0 }
 0x174   : >> { %v748_v62 = vpop.f32.mrf.mxu1 }
 0x175   : >> { %v2491_v59 = vpop.f32.mrf.mxu0  ;;  %v749_v24 = vadd.f32 %v748_v62, %v625_v39 }
 0x176   : >> { %v2523_v41 = vpop.f32.mrf.mxu1 }
 0x177   : >> { %v630_v2 = vpop.f32.mrf.mxu0 }
 0x178   : >> { %v753_v36 = vpop.f32.mrf.mxu1 }
 0x179   : >> { %v2494_v28 = vpop.f32.mrf.mxu0  ;;  %v754_v57 = vadd.f32 %v753_v36, %v630_v2 }
 0x17a   : >> { %v2526_v30 = vpop.f32.mrf.mxu1 }
 0x17b   : >> { %v633_v3 = vpop.f32.mrf.mxu0 }
 0x17c   : >> { %v756_v21 = vpop.f32.mrf.mxu1 }
 0x17d   : >> { %v2495_v23 = vpop.f32.mrf.mxu0 }
 0x17e   : >> { %v2527_v26 = vpop.f32.mrf.mxu1 }
 0x17f   : >> { %v1006_v33 = vpop.f32.mrf.mxu0 }
 0x180   : >> { %v1044_v10 = vadd.f32 %v1006_v33, %v722_v52  ;;  %v3866_v8 = vpop.f32.mrf.mxu1 }
 0x181   : >> { %v2542_v9 = vpop.f32.mrf.mxu0 }
 0x182   : >> { %1053 = vst.msk [vmem:[#allocation2] sm:$0xff] %vm323_vm4, %v1044_v10  ;;  %v2574_v4 = vpop.f32.mrf.mxu1 }
 0x183   : >> { %v1009_v1 = vpop.f32.mrf.mxu0 }
 0x184   : >> { %v1045_v32 = vadd.f32 %v1009_v1, %v725_v0  ;;  %v3869_v60 = vpop.f32.mrf.mxu1 }
 0x185   : >> { %v2543_v29 = vpop.f32.mrf.mxu0 }
 0x186   : >> { %1054 = vst.msk [vmem:[#allocation2 + $0x8] sm:$0xff] %vm323_vm4, %v1045_v32  ;;  %v2575_v63 = vpop.f32.mrf.mxu1 }
 0x187   : >> { %v1014_v42 = vpop.f32.mrf.mxu0 }
 0x188   : >> { %v1046_v27 = vadd.f32 %v1014_v42, %v730_v40  ;;  %v3872_v34 = vpop.f32.mrf.mxu1 }
 0x189   : >> { %v2546_v46 = vpop.f32.mrf.mxu0  ;;  %v1062_v26 = vld [vmem:[#allocation2] sm:$0xff] }
 0x18a   : >> { %1055 = vst.msk [vmem:[#allocation2 + $0x10] sm:$0xff] %vm323_vm4, %v1046_v27  ;;  %v2578_v20 = vpop.f32.mrf.mxu1 }
 0x18b   : >> { %v1017_v47 = vpop.f32.mrf.mxu0 }
 0x18c   : >> { %v1047_v31 = vadd.f32 %v1017_v47, %v733_v38  ;;  %v3875_v5 = vpop.f32.mrf.mxu1 }
 0x18d   : >> { %v2547_v14 = vpop.f32.mrf.mxu0  ;;  %v1063_v29 = vld [vmem:[#allocation2 + $0x8] sm:$0xff] }
 0x18e   : >> { %1056 = vst.msk [vmem:[#allocation2 + $0x18] sm:$0xff] %vm323_vm4, %v1047_v31  ;;  %v2579_v50 = vpop.f32.mrf.mxu1 }
 0x18f   : >> { %v1022_v17 = vpop.f32.mrf.mxu0 }
 0x190   : >> { %v1048_v7 = vadd.f32 %v1022_v17, %v738_v15  ;;  %v3878_v16 = vpop.f32.mrf.mxu1 }
 0x191   : >> { %v2550_v44 = vpop.f32.mrf.mxu0  ;;  %v1064_v20 = vld [vmem:[#allocation2 + $0x10] sm:$0xff] }
 0x192   : >> { %1057 = vst.msk [vmem:[#allocation2 + $0x20] sm:$0xff] %vm323_vm4, %v1048_v7  ;;  %v2582_v12 = vpop.f32.mrf.mxu1 }
 0x193   : >> { %v1025_v22 = vpop.f32.mrf.mxu0 }
 0x194   : >> { %v1049_v11 = vadd.f32 %v1025_v22, %v741_v56  ;;  %v3881_v35 = vpop.f32.mrf.mxu1 }
 0x195   : >> { %v2551_v54 = vpop.f32.mrf.mxu0  ;;  %v1065_v7 = vld [vmem:[#allocation2 + $0x18] sm:$0xff] }
 0x196   : >> { %1058 = vst.msk [vmem:[#allocation2 + $0x28] sm:$0xff] %vm323_vm4, %v1049_v11  ;;  %v2583_v45 = vpop.f32.mrf.mxu1 }
 0x197   : >> { %v1030_v49 = vpop.f32.mrf.mxu0 }
 0x198   : >> { %v1050_v25 = vadd.f32 %v1030_v49, %v746_v53  ;;  %v3884_v6 = vpop.f32.mrf.mxu1 }
 0x199   : >> { %v2554_v13 = vpop.f32.mrf.mxu0  ;;  %v1066_v49 = vld [vmem:[#allocation2 + $0x20] sm:$0xff] }
 0x19a   : >> { %1059 = vst.msk [vmem:[#allocation2 + $0x30] sm:$0xff] %vm323_vm4, %v1050_v25  ;;  %v2586_v58 = vpop.f32.mrf.mxu1  ;;  %v3970_v13 = vld [vmem:[#allocation3_spill] sm:$0xff] }
 0x19b   : >> { %v1033_v18 = vpop.f32.mrf.mxu0 }
 0x19c   : >> { %v1051_v43 = vadd.f32 %v1033_v18, %v749_v24  ;;  %v3887_v19 = vpop.f32.mrf.mxu1 }
 0x19d   : >> { %v2555_v51 = vpop.f32.mrf.mxu0 }
 0x19e   : >> { %1060 = vst.msk [vmem:[#allocation2 + $0x38] sm:$0xff] %vm323_vm4, %v1051_v43  ;;  %v2587_v55 = vpop.f32.mrf.mxu1 }
 0x19f   : >> { %v1038_v61 = vpop.f32.mrf.mxu0 }
 0x1a0   : >> { %v1052_v37 = vadd.f32 %v1038_v61, %v754_v57  ;;  %v3890_v48 = vpop.f32.mrf.mxu1  ;;  %v1067_v61 = vld [vmem:[#allocation2 + $0x28] sm:$0xff] }
 0x1a1   : >> { %v2558_v59 = vpop.f32.mrf.mxu0 }
 0x1a2   : >> { %1061 = vst.msk [vmem:[#allocation2 + $0x40] sm:$0xff] %vm323_vm4, %v1052_v37  ;;  %v2590_v39 = vpop.f32.mrf.mxu1 }
 0x1a3   : >> { %v1041_v62 = vpop.f32.mrf.mxu0 }
 0x1a4   : >> { %v1505_v41 = vpop.f32.mrf.mxu1 }
 0x1a5   : >> { %v2559_v28 = vpop.f32.mrf.mxu0 }
 0x1a6   : >> { %v2591_v30 = vpop.f32.mrf.mxu1 }
 0x1a7   : >> { %v1593_v3 = vpop.f32.mrf.mxu0 }
 0x1a8   : >> { %v1594_v21 = vadd.f32 %v1593_v3, %v3866_v8  ;;  %v1877_v23 = vpop.f32.mrf.mxu1 }
 0x1a9   : >> { %v2606_v2 = vpop.f32.mrf.mxu0 }
 0x1aa   : >> { %v1915_v36 = vadd.f32 %v1877_v23, %v1594_v21  ;;  %v2638_v52 = vpop.f32.mrf.mxu1  ;;  %v1068_v2 = vld [vmem:[#allocation2 + $0x30] sm:$0xff] }
 0x1ab   : >> { %v1596_v33 = vpop.f32.mrf.mxu0 }
 0x1ac   : >> { %v1924_v10 = vmax.f32 %v1062_v26, %v1915_v36  ;;  %v1597_v9 = vadd.f32 %v1596_v33, %v3869_v60  ;;  %v1880_v0 = vpop.f32.mrf.mxu1 }
 0x1ad   : >> { %v2607_v4 = vpop.f32.mrf.mxu0 }
 0x1ae   : >> { %1933 = vst.msk [vmem:[#allocation2] sm:$0xff] %vm323_vm4, %v1924_v10  ;;  %v1916_v1 = vadd.f32 %v1880_v0, %v1597_v9  ;;  %v2639_v32 = vpop.f32.mrf.mxu1 }
 0x1af   : >> { %v1601_v40 = vpop.f32.mrf.mxu0 }
 0x1b0   : >> { %v1925_v63 = vmax.f32 %v1063_v29, %v1916_v1  ;;  %v1602_v8 = vadd.f32 %v1601_v40, %v3872_v34  ;;  %v1885_v42 = vpop.f32.mrf.mxu1  ;;  %v1069_v1 = vld [vmem:[#allocation2 + $0x38] sm:$0xff] }
 0x1b1   : >> { %v2610_v27 = vpop.f32.mrf.mxu0 }
 0x1b2   : >> { %1934 = vst.msk [vmem:[#allocation2 + $0x8] sm:$0xff] %vm323_vm4, %v1925_v63  ;;  %v1917_v46 = vadd.f32 %v1885_v42, %v1602_v8  ;;  %v2642_v38 = vpop.f32.mrf.mxu1 }
 0x1b3   : >> { %v1604_v47 = vpop.f32.mrf.mxu0 }
 0x1b4   : >> { %v1926_v60 = vmax.f32 %v1064_v20, %v1917_v46  ;;  %v1605_v31 = vadd.f32 %v1604_v47, %v3875_v5  ;;  %v1888_v14 = vpop.f32.mrf.mxu1  ;;  %v1070_v47 = vld [vmem:[#allocation2 + $0x40] sm:$0xff] }
 0x1b5   : >> { %v2611_v15 = vpop.f32.mrf.mxu0 }
 0x1b6   : >> { %1935 = vst.msk [vmem:[#allocation2 + $0x10] sm:$0xff] %vm323_vm4, %v1926_v60  ;;  %v1918_v50 = vadd.f32 %v1888_v14, %v1605_v31  ;;  %v2643_v17 = vpop.f32.mrf.mxu1 }
 0x1b7   : >> { %v1609_v34 = vpop.f32.mrf.mxu0 }
 0x1b8   : >> { %v1927_v44 = vmax.f32 %v1065_v7, %v1918_v50  ;;  %v1610_v56 = vadd.f32 %v1609_v34, %v3878_v16  ;;  %v1893_v12 = vpop.f32.mrf.mxu1 }
 0x1b9   : >> { %v1942_v22 = vld [vmem:[#allocation2] ss:$2 sm:$0xff]  ;;  %v1952_v11 = vld [vmem:[#allocation2 + $0x1] ss:$2 sm:$0xff]  ;;  %v2614_v54 = vpop.f32.mrf.mxu0 }
 0x1ba   : >> { %v1961_v53 = vmax.f32 %v1942_v22, %v1952_v11  ;;  %1936 = vst.msk [vmem:[#allocation2 + $0x18] sm:$0xff] %vm323_vm4, %v1927_v44  ;;  %v1919_v5 = vadd.f32 %v1893_v12, %v1610_v56  ;;  %v2646_v45 = vpop.f32.mrf.mxu1 }
 0x1bb   : >> { %v1612_v25 = vpop.f32.mrf.mxu0 }
 0x1bc   : >> { %v1966_v24 = vadd.f32 %v3970_v13, %v1961_v53  ;;  %v1928_v58 = vmax.f32 %v1066_v49, %v1919_v5  ;;  %v1613_v18 = vadd.f32 %v1612_v25, %v3881_v35  ;;  %v1896_v43 = vpop.f32.mrf.mxu1 }
 0x1bd   : >> { %v2615_v16 = vpop.f32.mrf.mxu0 }
 0x1be   : >> { %v1971_v51 = vmax.f32 %v1966_v24, 0.0  ;;  %1937 = vst.msk [vmem:[#allocation2 + $0x20] sm:$0xff] %vm323_vm4, %v1928_v58  ;;  %v1920_v57 = vadd.f32 %v1896_v43, %v1613_v18  ;;  %v2647_v55 = vpop.f32.mrf.mxu1 }
 0x1bf   : >> { %v1617_v37 = vpop.f32.mrf.mxu0 }
 0x1c0   : >> { %v2273_v59 = vpack.c.bf16 %v1971_v51, %v1971_v51  ;;  %v1929_v39 = vmax.f32 %v1067_v61, %v1920_v57  ;;  %v1618_v62 = vadd.f32 %v1617_v37, %v3884_v6  ;;  %v1901_v41 = vpop.f32.mrf.mxu1 }
 0x1c1   : >> { %v1944_v28 = vld [vmem:[#allocation2 + $0x10] ss:$2 sm:$0xff]  ;;  %v1954_v35 = vld [vmem:[#allocation2 + $0x11] ss:$2 sm:$0xff]  ;;  %v2618_v30 = vpop.f32.mrf.mxu0 }
 0x1c2   : >> { %2001 = vst.msk [vmem:[%s3907_s6] sm:$0xf] %vm2000_vm6, %v2273_v59  ;;  %v1962_v3 = vmax.f32 %v1944_v28, %v1954_v35  ;;  %v1921_v21 = vadd.f32 %v1901_v41, %v1618_v62  ;;  %v2650_v23 = vpop.f32.mrf.mxu1 }
 0x1c3   : >> { %1938 = vst.msk [vmem:[#allocation2 + $0x28] sm:$0xff] %vm323_vm4, %v1929_v39  ;;  %v1620_v36 = vpop.f32.mrf.mxu0 }
 0x1c4   : >> { %v1967_v52 = vadd.f32 %v3970_v13, %v1962_v3  ;;  %v1930_v26 = vmax.f32 %v1068_v2, %v1921_v21  ;;  %v1621_v33 = vadd.f32 %v1620_v36, %v3887_v19  ;;  %v1904_v6 = vpop.f32.mrf.mxu1 }
 0x1c5   : >> { %v2619_v10 = vpop.f32.mrf.mxu0 }
 0x1c6   : >> { %v1972_v9 = vmax.f32 %v1967_v52, 0.0  ;;  %1939 = vst.msk [vmem:[#allocation2 + $0x30] sm:$0xff] %vm323_vm4, %v1930_v26  ;;  %v1922_v0 = vadd.f32 %v1904_v6, %v1621_v33  ;;  %v2651_v4 = vpop.f32.mrf.mxu1 }
 0x1c7   : >> { %v1625_v32 = vpop.f32.mrf.mxu0 }
 0x1c8   : >> { %v2274_v29 = vpack.c.bf16 %v1972_v9, %v1972_v9  ;;  %v1931_v40 = vmax.f32 %v1069_v1, %v1922_v0  ;;  %v1626_v63 = vadd.f32 %v1625_v32, %v3890_v48  ;;  %v1909_v8 = vpop.f32.mrf.mxu1 }
 0x1c9   : >> { %v2622_v46 = vpop.f32.mrf.mxu0 }
 0x1ca   : >> { %v1946_v42 = vld [vmem:[#allocation2 + $0x20] ss:$2 sm:$0xff]  ;;  %v1956_v27 = vld [vmem:[#allocation2 + $0x21] ss:$2 sm:$0xff]  ;;  %2002 = vst.msk [vmem:[%s3907_s6 + $0x4] sm:$0xf] %vm2000_vm6, %v2274_v29  ;;  %v1923_v38 = vadd.f32 %v1909_v8, %v1626_v63  ;;  %v2654_v20 = vpop.f32.mrf.mxu1 }
 0x1cb   : >> { %v1963_v19 = vmax.f32 %v1946_v42, %v1956_v27  ;;  %1940 = vst.msk [vmem:[#allocation2 + $0x38] sm:$0xff] %vm323_vm4, %v1931_v40  ;;  %v1628_v60 = vpop.f32.mrf.mxu0 }
 0x1cc   : >> { %v1932_v14 = vmax.f32 %v1070_v47, %v1923_v38  ;;  %v1912_v15 = vpop.f32.mrf.mxu1 }
 0x1cd   : >> { %v1968_v31 = vadd.f32 %v3970_v13, %v1963_v19  ;;  %v2623_v50 = vpop.f32.mrf.mxu0 }
 0x1ce   : >> { %1941 = vst.msk [vmem:[#allocation2 + $0x40] sm:$0xff] %vm323_vm4, %v1932_v14  ;;  %v2655_v17 = vpop.f32.mrf.mxu1 }
 0x1cf   : >> { %v1973_v48 = vmax.f32 %v1968_v31, 0.0 }
 0x1d1   : >> { %v2275_v7 = vpack.c.bf16 %v1973_v48, %v1973_v48 }
 0x1d2   : >> { %v1948_v34 = vld [vmem:[#allocation2 + $0x30] ss:$2 sm:$0xff]  ;;  %v1958_v44 = vld [vmem:[#allocation2 + $0x31] ss:$2 sm:$0xff] }
 0x1d3   : >> { %2003 = vst.msk [vmem:[%s3907_s6 + $0x8] sm:$0xf] %vm2000_vm6, %v2275_v7  ;;  %v1964_v56 = vmax.f32 %v1948_v34, %v1958_v44 }
 0x1d5   : >> { %v1969_v12 = vadd.f32 %v3970_v13, %v1964_v56  ;;  %v1950_v22 = vld [vmem:[#allocation2 + $0x40] ss:$2 sm:$0xf]  ;;  %v1960_v11 = vld [vmem:[#allocation2 + $0x41] ss:$2 sm:$0xf] }
 0x1d6   : >> { %v1965_v53 = vmax.f32 %v1950_v22, %v1960_v11 }
 0x1d7   : >> { %v1974_v54 = vmax.f32 %v1969_v12, 0.0 }
 0x1d8   : >> { %v1970_v45 = vadd.f32 %v3970_v13, %v1965_v53 }
 0x1d9   : >> { %v2276_v5 = vpack.c.bf16 %v1974_v54, %v1974_v54 }
 0x1da   : >> { %v1975_v49 = vmax.f32 %v1970_v45, 0.0  ;;  %183 = sbr.rel (!%p181_p4) target bundleno = 16 (0x10), region = 85 }
 0x1db   : >> { %2004 = vst.msk [vmem:[%s3907_s6 + $0xc] sm:$0xf] %vm2000_vm6, %v2276_v5 }
 0x1dc   : >> { %v2277_v25 = vpack.c.bf16 %v1975_v49, %v1975_v49 }
 0x1de   : >> { %2006 = vst.msk [vmem:[%s3907_s6 + $0x10] sm:$0x3] %vm2005_vm7, %v2277_v25 }
 0x1df PF: > { %s13_s12 = sadd.s32 1, %s2989_s12  }
 0x1e0   : > { %p10_p5 = scmp.ge.s32.totalorder %s13_s12, 4  }
 0x1e2   :  { %12 = sbr.rel (!%p10_p5) target bundleno = 1 (0x1), region = 96 }

// kernel: convnet_forward.7
= control target key start
LH: loop header
LB: loop body
LE: loop exit
PB: predicated region body
PF: predicated region fallthrough
CT: control target
= control target key end

     0   :  { %s3914_s18 = smov 0   ;;  %s5169_s0 = inlined_call_operand.vmem [shape: bf16[2,36,36,64], index: 0, kind: input, shape index: {}]   ;;  %s5170_s1 = inlined_call_operand.vmem [shape: bf16[3,192,64], index: 1, kind: input, shape index: {}]   ;;  %s5171_s2 = inlined_call_operand.vmem [shape: f32[1,64], index: 2, kind: input, shape index: {}]   ;;  %s5172_s3 = inlined_call_operand.vmem [shape: bf16[3,192,64], index: 3, kind: input, shape index: {}]   ;;  %s5173_s4 = inlined_call_operand.vmem [shape: f32[1,64], index: 4, kind: input, shape index: {}]   ;;  %s5174_s5 = inlined_call_operand.vmem [shape: bf16[2,16,16,64], index: 5, kind: output, shape index: {}]  }
   0x1 LB: > { %s3054_s19 = sadd.s32 4294967295, %s3870_s18   ;;  %p3058_p0 = scmp.ge.s32.totalorder %s3870_s18, 1  ;;  %s3870_s18 = sphi %s3914_s18, %s15_s18  }
   0x2   : > { %p187_p1 = scmp.lt.s32.totalorder %s3870_s18, 3 }
   0x4   : > { %p188_p2 = pnand %p3058_p0, %p187_p1 }
   0x5   : > { %p215_p3 = scmp.lt.s32.totalorder (!%p188_p2), %s3054_s19, 1  ;;  %s3937_s30 = smov (!%p188_p2), 0  }
   0x6   : > { %191 = sbr.rel (%p188_p2) target bundleno = 920 (0x398), region = 40 }
   0xb   : > { %v3925_v0 = vld [vmem:[%s5171_s2] ss:$0 sm:$0xff]  ;;  %s5176_s19 = smov (!%p215_p3, %s3054_s19), 1 }
   0xc   : > { %s3559_s22 = smul.u32 720, %s5176_s19  ;;  %s3510_s23 = sshll.u32 %s5176_s19, 7 }
   0xd   : > { %s3930_s26 = scalar_lea.vmem %s5174_s5, %s3510_s23 }
   0xe   : > { %s3935_s29 = scalar_lea.vmem %s5169_s0, %s3559_s22 }
   0xf LB: >> { %v3648_v1 = vld [vmem:[%s5170_s1 + $0x98] sm:$0xff]   ;;  %v3880_v2 = vmov 0   ;;  %s3511_s8 = smul.u32 40, %s3874_s30  ;;  %v3649_v3 = vld [vmem:[%s5170_s1 + $0x90] sm:$0xff]   ;;  %vm258_vm0 = vcmask 1046528   ;;  %v3651_v14 = vld [vmem:[%s5170_s1 + $0x88] sm:$0xff]   ;;  %s3874_s30 = sphi %s3937_s30, %s238_s30  }
  0x10   : >> { %508 = vmatprep.subr.bf16.mxu0 %v3880_v2  ;;  %645 = vmatprep.subr.bf16.mxu1 %v3880_v2  ;;  %v3650_v4 = vld [vmem:[%s5170_s1 + $0x38] sm:$0xff]   ;;  %v3652_v31 = vld [vmem:[%s5170_s1 + $0x30] sm:$0xff]   ;;  %v3653_v32 = vld [vmem:[%s5170_s1 + $0x80] sm:$0xff]   ;;  %s3881_s23 = smov 64   ;;  %vm283_vm1 = vcmask 1045504   ;;  %vm298_vm2 = vcmask 523264  }
  0x11   : >> { %509 = vmatpush1.bf16.msra.mxu0 %v3648_v1  ;;  %s3956_s13 = scalar_lea.vmem %s3935_s29, %s3511_s8  ;;  %646 = vmatpush1.bf16.msra.mxu1 %v3650_v4  ;;  %v3654_v41 = vld [vmem:[%s5170_s1 + $0x28] sm:$0xff]   ;;  %v3655_v55 = vld [vmem:[%s5170_s1 + $0x78] sm:$0xff]   ;;  %v3656_v60 = vld [vmem:[%s5170_s1 + $0x20] sm:$0xff]   ;;  %s3173_s7 = smul.u32 80, %s3874_s30  ;;  %vm952_vm3 = vcmask 517120  }
  0x12   : >> { %510 = vmatprep.subr.bf16.mxu0 %v3880_v2  ;;  %v3068_v5 = vld [vmem:[%s3956_s13 + $0x14] ss:$12 sps:$4 sm:$0xff]   ;;  %v3552_v6 = vld [vmem:[%s3956_s13 + $0x18] sm:$0xff]   ;;  %v3551_v12 = vld [vmem:[%s3956_s13 + $0x8] sm:$0xff]   ;;  %647 = vmatprep.subr.bf16.mxu1 %v3880_v2  ;;  %s238_s30 = sadd.s32 1, %s3874_s30  }
  0x13   : >> { %v3516_v7 = vld [vmem:[%s3956_s13] sm:$0xff]   ;;  %v3961_v8 = vunpack.c.l.bf16 %v3552_v6  ;;  %v3963_v9 = vunpack.c.h.bf16 %v3552_v6  ;;  %v3965_v10 = vunpack.c.l.bf16 %v3068_v5  ;;  %v3977_v16 = vunpack.c.l.bf16 %v3551_v12  ;;  %v247_v19 = vld [vmem:[%s3956_s13 + $0x10] sm:$0x3]  ;;  %v3553_v24 = vld [vmem:[%s3956_s13 + $0x28] sm:$0xff]   ;;  %s4551_s8 = scalar_lea.vmem [#allocation2], %s3173_s7  ;;  %p235_p4 = scmp.ge.s32.totalorder %s238_s30, 17  }
  0x14   : >> { %v3967_v11 = vunpack.c.l.bf16 %v3516_v7  ;;  %v3072_v13 = vld [vmem:[%s3956_s13 + $0x24] sm:$0x3]  ;;  %v3975_v15 = vunpack.c.h.bf16 %v3516_v7  ;;  %v3979_v17 = vunpack.c.h.bf16 %v3068_v5  ;;  %v3554_v25 = vld [vmem:[%s3956_s13 + $0x30] sm:$0xff]   ;;  %v3133_v30 = vld [vmem:[%s3956_s13 + $0x38] sm:$0x3]  ;;  %v4013_v35 = vunpack.c.h.bf16 %v3551_v12  ;;  %s4590_s11 = smov (%p235_p4), 0  }
  0x15   : >> { %511 = vmatpush1.bf16.msra.mxu0 %v3649_v3  ;;  %v3981_v18 = vunpack.c.l.bf16 %v3072_v13  ;;  %v353_v20 = vrot.slane %v3965_v10, 1  ;;  %v3987_v21 = vrot.slane %v3961_v8, 1  ;;  %v3990_v22 = vrot.slane %v3963_v9, 1  ;;  %648 = vmatpush1.bf16.msra.mxu1 %v3652_v31  ;;  %v3183_v46 = vld [vmem:[%s3956_s13 + $0x38] sm:$0x3]  ;;  %v3657_v5 = vld [vmem:[%s5170_s1 + $0x70] sm:$0xff]  }
  0x16   : >> { %512 = vmatprep.subr.bf16.mxu0 %v3880_v2  ;;  %v259_v23 = vrot.slane %v3967_v11, 1  ;;  %v260_v26 = vrot.slane %v3975_v15, 1  ;;  %v262_v27 = vrot.slane %v3977_v16, 1  ;;  %v358_v28 = vrot.slane %v3979_v17, 1  ;;  %649 = vmatprep.subr.bf16.mxu1 %v3880_v2  ;;  %v3174_v62 = vld [vmem:[%s3956_s13 + $0x14] ss:$40 sps:$4 sm:$0xff]  }
  0x17   : >> { %v360_v29 = vrot.slane %v3981_v18, 1  ;;  %v355_v33 = vsel %vm258_vm0, %v353_v20, %v3987_v21  ;;  %v4011_v34 = vsel %vm258_vm0, %v3987_v21, %v3990_v22  ;;  %v4015_v36 = vunpack.c.l.bf16 %v247_v19  ;;  %v3658_v6 = vld [vmem:[%s5170_s1 + $0x18] sm:$0xff]   ;;  %v3558_v13 = vld [vmem:[%s3956_s13 + $0x40] sm:$0xff]   ;;  %v3659_v20 = vld [vmem:[%s5170_s1 + $0x68] sm:$0xff]  }
  0x18   : >> { %v3588_v37 = vpack.i.bf16 %v4011_v34, %v355_v33  ;;  %v261_v38 = vsel %vm258_vm0, %v259_v23, %v260_v26  ;;  %v263_v39 = vsel %vm258_vm0, %v260_v26, %v262_v27  ;;  %v359_v40 = vsel %vm258_vm0, %v3990_v22, %v358_v28  ;;  %v3660_v23 = vld [vmem:[%s5170_s1 + $0x10] sm:$0xff]   ;;  %v3177_v26 = vld [vmem:[%s3956_s13 + $0x20] ss:$40 sps:$4 sm:$0xff]  }
  0x19   : >> { %513 = vmatpush1.bf16.msra.mxu0 %v3651_v14  ;;  %v3593_v42 = vpack.i.bf16 %v263_v39, %v261_v38  ;;  %v361_v43 = vsel %vm258_vm0, %v358_v28, %v360_v29  ;;  %v264_v44 = vrot.slane %v4013_v35, 1  ;;  %v266_v45 = vrot.slane %v4015_v36, 1  ;;  %650 = vmatpush1.bf16.msra.mxu1 %v3654_v41  ;;  %v3661_v33 = vld [vmem:[%s5170_s1 + $0x60] sm:$0xff]   ;;  %v3662_v41 = vld [vmem:[%s5170_s1 + $0x8] sm:$0xff]  }
  0x1a   : >> { %514 = vmatprep.subr.bf16.mxu0 %v3880_v2  ;;  %3589 = vrot.lane.b32.xlu0 %v3588_v37, %s3881_s23  ;;  %v3598_v47 = vpack.i.bf16 %v361_v43, %v359_v40  ;;  %v4032_v48 = vunpack.c.l.bf16 %v3553_v24  ;;  %v4034_v49 = vunpack.c.h.bf16 %v3553_v24  ;;  %v4036_v50 = vunpack.c.l.bf16 %v3554_v25  ;;  %v3244_v37 = vld [vmem:[%s3956_s13 + $0x4c] sm:$0x3] }
  0x1b   : >> { %v265_v51 = vsel %vm258_vm0, %v262_v27, %v264_v44  ;;  %v267_v52 = vsel %vm258_vm0, %v264_v44, %v266_v45  ;;  %v4040_v53 = vunpack.c.h.bf16 %v3554_v25  ;;  %v4042_v54 = vunpack.c.l.bf16 %v3133_v30  ;;  %651 = vmatprep.subr.bf16.mxu1 %v3880_v2 }
  0x1c   : >> { %3599 = vrot.lane.b32.xlu1 %v3598_v47, %s3881_s23  ;;  %v3603_v56 = vpack.i.bf16 %v267_v52, %v265_v51  ;;  %v720_v57 = vrot.slane %v4032_v48, 1  ;;  %v721_v58 = vrot.slane %v4034_v49, 1  ;;  %v723_v59 = vrot.slane %v4036_v50, 1  ;;  %v3663_v47 = vld [vmem:[%s5170_s1 + $0xb8] sm:$0xff]  }
  0x1d   : >> { %515 = vmatpush1.bf16.msra.mxu0 %v3653_v32  ;;  %v4054_v61 = vunpack.c.l.bf16 %v3183_v46  ;;  %v725_v3 = vrot.slane %v4040_v53, 1  ;;  %v727_v4 = vrot.slane %v4042_v54, 1  ;;  %652 = vmatpush1.bf16.msra.mxu1 %v3656_v60  ;;  %v4074_v12 = vunpack.c.l.bf16 %v3174_v62 }
  0x1e   : >> { %516 = vmatprep.subr.bf16.mxu0 %v3880_v2  ;;  %3594 = vrot.lane.b32.xlu0 %v3593_v42, %s3881_s23  ;;  %v722_v63 = vsel %vm258_vm0, %v720_v57, %v721_v58  ;;  %v724_v1 = vsel %vm258_vm0, %v721_v58, %v723_v59  ;;  %v4077_v14 = vunpack.c.h.bf16 %v3174_v62  ;;  %v4092_v27 = vunpack.c.l.bf16 %v3558_v13 }
  0x1f   : >> { %v1064_v7 = vrot.slane %v4054_v61, 1  ;;  %653 = vmatprep.subr.bf16.mxu1 %v3880_v2  ;;  %v3608_v19 = vpack.i.bf16 %v724_v1, %v722_v63  ;;  %v726_v24 = vsel %vm258_vm0, %v723_v59, %v725_v3  ;;  %v728_v25 = vsel %vm258_vm0, %v725_v3, %v727_v4 }
  0x20   : >> { %3604 = vrot.lane.b32.xlu1 %v3603_v56, %s3881_s23  ;;  %v4094_v28 = vunpack.c.h.bf16 %v3558_v13  ;;  %v969_v31 = vrot.slane %v4074_v12, 1  ;;  %v1423_v32 = vrot.slane %v4077_v14, 1  ;;  %v377_v38 = vrot.slane %v3965_v10, 2 }
  0x21   : >> { %517 = vmatpush1.bf16.msra.mxu0 %v3655_v55  ;;  %654 = vmatpush1.bf16.msra.mxu1 %v3658_v6  ;;  %v1065_v30 = vsel %vm258_vm0, %v725_v3, %v1064_v7  ;;  %v3618_v39 = vpack.i.bf16 %v728_v25, %v726_v24  ;;  %v4110_v40 = vunpack.c.l.bf16 %v3177_v26  ;;  %v4118_v43 = vrot.slane %v3961_v8, 2  ;;  %v3664_v3 = vld [vmem:[%s5170_s1] sm:$0xff]  }
  0x22   : >> { %518 = vmatprep.subr.bf16.mxu0 %v3880_v2  ;;  %370 = vrot.lane.b32.xlu0 %v360_v29, %s3881_s23  ;;  %v3178_v29 = vld [vmem:[%s3956_s13 + $0x24] sm:$0x3]  ;;  %v3623_v44 = vpack.i.bf16 %v1065_v30, %v726_v24  ;;  %v1426_v46 = vrot.slane %v4094_v28, 1  ;;  %v4128_v51 = vunpack.c.h.bf16 %v3177_v26  ;;  %v4130_v52 = vunpack.c.l.bf16 %v3244_v37  ;;  %v3668_v37 = vld [vmem:[%s5170_s1 + $0x50] sm:$0xff]  }
  0x23   : >> { %655 = vmatprep.subr.bf16.mxu1 %v3880_v2  ;;  %v4115_v42 = vunpack.c.l.bf16 %v3178_v29  ;;  %v379_v55 = vsel %vm283_vm1, %v377_v38, %v4118_v43  ;;  %v4135_v56 = vrot.slane %v3963_v9, 2  ;;  %v974_v57 = vrot.slane %v4110_v40, 1  ;;  %v3665_v29 = vld [vmem:[%s5170_s1 + $0xb0] sm:$0xff]   ;;  %v3669_v38 = vld [vmem:[%s5170_s1 + $0xa0] sm:$0xff]  }
  0x24   : >> { %276 = vrot.lane.b32.xlu1 %v266_v45, %s3881_s23  ;;  %v1424_v45 = vrot.slane %v4092_v27, 1  ;;  %v284_v58 = vrot.slane %v3967_v11, 2  ;;  %v971_v59 = vsel %vm258_vm0, %v969_v31, %v3987_v21  ;;  %v285_v63 = vrot.slane %v3975_v15, 2 }
  0x25   : >> { %519 = vmatpush1.bf16.msra.mxu0 %v3657_v5  ;;  %656 = vmatpush1.bf16.msra.mxu1 %v3660_v23  ;;  %v976_v60 = vrot.slane %v4115_v42, 1  ;;  %v4146_v62 = vsel %vm283_vm1, %v4118_v43, %v4135_v56  ;;  %v287_v5 = vrot.slane %v3977_v16, 2  ;;  %v1428_v13 = vrot.slane %v4128_v51, 1 }
  0x26   : >> { %520 = vmatprep.subr.bf16.mxu0 %v3880_v2  ;;  %3609 = vrot.lane.b32.xlu0 %v3608_v19, %s3881_s23  ;;  %v1425_v1 = vsel %vm258_vm0, %v1423_v32, %v1424_v45  ;;  %v397_v21 = vpack.c.bf16 %v4146_v62, %v379_v55  ;;  %v1427_v6 = vsel %vm258_vm0, %v1424_v45, %v1426_v46  ;;  %v4217_v45 = vrot.slane %v3981_v18, 2 }
  0x27   : >> { %657 = vmatprep.subr.bf16.mxu1 %v3880_v2  ;;  %v3628_v23 = vpack.i.bf16 %v4011_v34, %v971_v59  ;;  %v288_v24 = vsel %vm283_vm1, %v285_v63, %v287_v5  ;;  %v975_v25 = vsel %vm258_vm0, %v3990_v22, %v974_v57  ;;  %v977_v26 = vsel %vm258_vm0, %v974_v57, %v976_v60 }
  0x28   : >> { %3614 = vrot.lane.b32.xlu1 %v3608_v19, %s3881_s23  ;;  %v1430_v19 = vrot.slane %v4130_v52, 1  ;;  %3109 = vmatprep.mubr.msk.bf16.mxu0 %vm298_vm2, %v397_v21  ;;  %v3633_v34 = vpack.i.bf16 %v1427_v6, %v1425_v1  ;;  %v1429_v22 = vsel %vm258_vm0, %v1426_v46, %v1428_v13  ;;  %v3638_v32 = vpack.i.bf16 %v977_v26, %v975_v25  ;;  %v3672_v6 = vld [vmem:[%s5170_s1 + $0xf8] sm:$0xff]  }
  0x29   : >> { %521 = vmatpush1.bf16.msra.mxu0 %v3659_v20  ;;  %658 = vmatpush1.bf16.msra.mxu1 %v3662_v41  ;;  %v286_v20 = vsel %vm283_vm1, %v284_v58, %v285_v63  ;;  %v3671_v41 = vld [vmem:[%s5170_s1 + $0x40] sm:$0xff]   ;;  %v289_v63 = vrot.slane %v4013_v35, 2  ;;  %v4225_v1 = vrot.slane %v4015_v36, 2 }
  0x2a   : >> { %522 = vmatprep.subr.bf16.mxu0 %v3880_v2  ;;  %3619 = vrot.lane.b32.xlu0 %v3618_v39, %s3881_s23  ;;  %v305_v30 = vpack.c.bf16 %v288_v24, %v286_v20  ;;  %v1431_v31 = vsel %vm258_vm0, %v1428_v13, %v1430_v19  ;;  %v3670_v39 = vld [vmem:[%s5170_s1 + $0x48] sm:$0xff]  }
  0x2b   : >> { %659 = vmatprep.subr.bf16.mxu1 %v3880_v2 }
  0x2c   : >> { %3624 = vrot.lane.b32.xlu1 %v3623_v44, %s3881_s23  ;;  %3124 = vmatprep.mubr.msk.bf16.mxu1 %vm298_vm2, %v305_v30  ;;  %v382_v44 = vrot.slane %v3979_v17, 2  ;;  %v290_v30 = vsel %vm283_vm1, %v287_v5, %v289_v63 }
  0x2d   : >> { %523 = vmatpush1.bf16.msra.mxu0 %v3661_v33  ;;  %660 = vmatpush1.bf16.msra.mxu1 %v3664_v3  ;;  %v3643_v33 = vpack.i.bf16 %v1431_v31, %v1429_v22  ;;  %v3673_v31 = vld [vmem:[%s5170_s1 + $0xf0] sm:$0xff]  }
  0x2e   : >> { %532 = vmatprep.subr.bf16.mxu0 %v3880_v2  ;;  %737 = vrot.lane.b32.xlu0 %v727_v4, %s3881_s23  ;;  %v3666_v4 = vld [vmem:[%s5170_s1 + $0x58] sm:$0xff]   ;;  %v383_v46 = vsel %vm283_vm1, %v4135_v56, %v382_v44 }
  0x2f   : >> { %669 = vmatprep.subr.bf16.mxu1 %v3880_v2 }
  0x30   : >> { %1074 = vrot.lane.b32.xlu1 %v1064_v7, %s3881_s23  ;;  %v3667_v7 = vld [vmem:[%s5170_s1 + $0xa8] sm:$0xff]  }
  0x31   : >> { %533 = vmatpush2.bf16.msra.mxu0 %v3663_v47  ;;  %670 = vmatpush2.bf16.msra.mxu1 %v3666_v4  ;;  %v385_v47 = vsel %vm283_vm1, %v382_v44, %v4217_v45  ;;  %v401_v44 = vpack.c.bf16 %v4217_v45, %v4217_v45 }
  0x32   : >> { %534 = vmatprep.subr.bf16.mxu0 %v3880_v2  ;;  %3629 = vrot.lane.b32.xlu0 %v3628_v23, %s3881_s23 }
  0x33   : >> { %671 = vmatprep.subr.bf16.mxu1 %v3880_v2 }
  0x34   : >> { %3634 = vrot.lane.b32.xlu1 %v3633_v34, %s3881_s23  ;;  %v292_v34 = vsel %vm283_vm1, %v289_v63, %v4225_v1 }
  0x35   : >> { %535 = vmatpush2.bf16.msra.mxu0 %v3665_v29  ;;  %672 = vmatpush2.bf16.msra.mxu1 %v3668_v37  ;;  %v3676_v37 = vld [vmem:[%s5170_s1 + $0x90] sm:$0xff]  }
  0x36   : >> { %536 = vmatprep.subr.bf16.mxu0 %v3880_v2  ;;  %3639 = vrot.lane.b32.xlu0 %v3638_v32, %s3881_s23 }
  0x37   : >> { %673 = vmatprep.subr.bf16.mxu1 %v3880_v2 }
  0x38   : >> { %3644 = vrot.lane.b32.xlu1 %v3643_v33, %s3881_s23  ;;  %v307_v33 = vpack.c.bf16 %v292_v34, %v290_v30  ;;  %v3690_v30 = vld [vmem:[%s5170_s1 + $0xb8] sm:$0xff]  }
  0x39   : >> { %537 = vmatpush2.bf16.msra.mxu0 %v3667_v7  ;;  %674 = vmatpush2.bf16.msra.mxu1 %v3670_v39 }
  0x3a   : >> { %538 = vmatprep.subr.bf16.mxu0 %v3880_v2  ;;  %986 = vrot.lane.b32.xlu0 %v976_v60, %s3881_s23  ;;  %v399_v60 = vpack.c.bf16 %v385_v47, %v383_v46  ;;  %v744_v47 = vrot.slane %v4032_v48, 2 }
  0x3b   : >> { %675 = vmatprep.subr.bf16.mxu1 %v3880_v2 }
  0x3c   : >> { %1440 = vrot.lane.b32.xlu1 %v1430_v19, %s3881_s23 }
  0x3d   : >> { %539 = vmatpush2.bf16.msra.mxu0 %v3669_v38  ;;  %676 = vmatpush2.bf16.msra.mxu1 %v3671_v41 }
  0x3e   : >> { %875 = vmatprep.subr.bf16.mxu0 %v3880_v2  ;;  %1211 = vmatprep.subr.bf16.mxu1 %v3880_v2 }
  0x8c   : >> { %v3590_v55 = vpop.permute.xlu0 %3589 }
  0x8d   : >> { %v3592_v57 = vunpack.i.h.bf16 %v3590_v55  ;;  %v3591_v58 = vunpack.i.l.bf16 %v3590_v55  ;;  %v745_v55 = vrot.slane %v4034_v49, 2 }
  0x8e   : >> { %v3600_v59 = vpop.permute.xlu1 %3599 }
  0x8f   : >> { %v391_v3 = vsel %vm298_vm2, %v3965_v10, %v3591_v58  ;;  %v392_v21 = vsel %vm298_vm2, %v3961_v8, %v3592_v57  ;;  %v3602_v13 = vunpack.i.h.bf16 %v3600_v59  ;;  %v3601_v19 = vunpack.i.l.bf16 %v3600_v59  ;;  %v3678_v57 = vld [vmem:[%s5170_s1 + $0x88] sm:$0xff]  }
  0x90   : >> { %v3595_v20 = vpop.permute.xlu0 %3594  ;;  %v396_v23 = vpack.c.bf16 %v392_v21, %v391_v3  ;;  %v309_v59 = vpack.c.bf16 %v4225_v1, %v4225_v1  ;;  %v746_v63 = vsel %vm283_vm1, %v744_v47, %v745_v55  ;;  %v3680_v21 = vld [vmem:[%s5170_s1 + $0x80] sm:$0xff]  }
  0x91   : >> { %v3597_v24 = vunpack.i.h.bf16 %v3595_v20  ;;  %v3596_v25 = vunpack.i.l.bf16 %v3595_v20  ;;  %v393_v29 = vsel %vm298_vm2, %v3963_v9, %v3601_v19  ;;  %v394_v10 = vsel %vm298_vm2, %v3979_v17, %v3602_v13  ;;  %v3674_v17 = vld [vmem:[%s5170_s1 + $0x98] sm:$0xff]   ;;  %v3681_v19 = vld [vmem:[%s5170_s1 + $0xd0] sm:$0xff]  }
  0x92   : >> { %541 = vmatmul.mubr.bf16.vlgmr.msra.gmra.mxu0 %v396_v23  ;;  %v3605_v26 = vpop.permute.xlu1 %3604  ;;  %v3682_v20 = vld [vmem:[%s5170_s1 + $0x78] sm:$0xff]   ;;  %v3684_v23 = vld [vmem:[%s5170_s1 + $0x70] sm:$0xff]  }
  0x93   : >> { %876 = vmatpush1.bf16.msra.mxu0 %v3672_v6  ;;  %v299_v4 = vsel %vm298_vm2, %v3967_v11, %v3596_v25  ;;  %v300_v22 = vsel %vm298_vm2, %v3975_v15, %v3597_v24  ;;  %v3607_v32 = vunpack.i.h.bf16 %v3605_v26  ;;  %v3606_v5 = vunpack.i.l.bf16 %v3605_v26  ;;  %3110 = vmatprep.mubr.msk.bf16.mxu0 %vm298_vm2, %v399_v60  ;;  %v3675_v15 = vld [vmem:[%s5170_s1 + $0xe8] sm:$0xff]   ;;  %v3685_v24 = vld [vmem:[%s5170_s1 + $0xc0] sm:$0xff]   ;;  %v3687_v26 = vld [vmem:[%s5170_s1 + $0x118] sm:$0xff]  }
  0x94   : >> { %877 = vmatprep.subr.bf16.mxu0 %v3880_v2  ;;  %v304_v7 = vpack.c.bf16 %v300_v22, %v299_v4  ;;  %v398_v11 = vpack.c.bf16 %v394_v10, %v393_v29  ;;  %v371_v41 = vpop.permute.xlu0 %370  ;;  %v3686_v25 = vld [vmem:[%s5170_s1 + $0x68] sm:$0xff]   ;;  %v3688_v29 = vld [vmem:[%s5170_s1 + $0x60] sm:$0xff]   ;;  %v3689_v10 = vld [vmem:[%s5170_s1 + $0x110] sm:$0xff]  }
  0x95   : >> { %v301_v38 = vsel %vm298_vm2, %v3977_v16, %v3606_v5  ;;  %v302_v39 = vsel %vm298_vm2, %v4013_v35, %v3607_v32  ;;  %v747_v16 = vrot.slane %v4036_v50, 2  ;;  %v3677_v35 = vld [vmem:[%s5170_s1 + $0xe0] sm:$0xff]   ;;  %v395_v45 = vsel %vm298_vm2, %v3981_v18, %v371_v41  ;;  %v3679_v18 = vld [vmem:[%s5170_s1 + $0xd8] sm:$0xff]   ;;  %v3691_v4 = vld [vmem:[%s5170_s1 + $0x108] sm:$0xff]  }
  0x96   : >> { %678 = vmatmul.mubr.bf16.vlgmr.msra.gmra.mxu1 %v304_v7  ;;  %v306_v46 = vpack.c.bf16 %v302_v39, %v301_v38  ;;  %v277_v58 = vpop.permute.xlu1 %276  ;;  %v400_v60 = vpack.c.bf16 %v395_v45, %v395_v45  ;;  %v3692_v22 = vld [vmem:[%s5170_s1 + $0xb0] sm:$0xff]   ;;  %v749_v5 = vrot.slane %v4040_v53, 2  ;;  %v4353_v7 = vrot.slane %v4042_v54, 2  ;;  %v3695_v45 = vld [vmem:[%s5170_s1 + $0xa0] sm:$0xff]  }
  0x97   : >> { %878 = vmatpush1.bf16.msra.mxu0 %v3673_v31  ;;  %1212 = vmatpush1.bf16.msra.mxu1 %v3674_v17  ;;  %v748_v3 = vsel %vm283_vm1, %v745_v55, %v747_v16  ;;  %v303_v1 = vsel %vm298_vm2, %v4015_v36, %v277_v58  ;;  %v3683_v36 = vld [vmem:[%s5170_s1 + $0xc8] sm:$0xff]   ;;  %v4373_v55 = vrot.slane %v4054_v61, 2 }
  0x98   : >> { %879 = vmatprep.subr.bf16.mxu0 %v3880_v2  ;;  %1213 = vmatprep.subr.bf16.mxu1 %v3880_v2  ;;  %v764_v6 = vpack.c.bf16 %v748_v3, %v746_v63  ;;  %v308_v13 = vpack.c.bf16 %v303_v1, %v303_v1  ;;  %v3610_v34 = vpop.permute.xlu0 %3609  ;;  %v752_v47 = vsel %vm283_vm1, %v749_v5, %v4353_v7  ;;  %v3697_v3 = vld [vmem:[%s5170_s1 + $0x30] sm:$0xff]  }
  0x99   : >> { %3125 = vmatprep.mubr.msk.bf16.mxu1 %vm298_vm2, %v307_v33  ;;  %v3612_v31 = vunpack.i.h.bf16 %v3610_v34  ;;  %v3611_v17 = vunpack.i.l.bf16 %v3610_v34  ;;  %v3702_v34 = vld [vmem:[%s5170_s1 + $0xe8] sm:$0xff]  }
  0x9a   : >> { %549 = vmatmul.mubr.bf16.gmra.mxu0 %v398_v11  ;;  %v3615_v32 = vpop.permute.xlu1 %3614 }
  0x9b   : >> { %880 = vmatpush1.bf16.msra.mxu0 %v3675_v15  ;;  %1214 = vmatpush1.bf16.msra.mxu1 %v3676_v37  ;;  %v759_v33 = vsel %vm298_vm2, %v4034_v49, %v3612_v31  ;;  %v758_v11 = vsel %vm298_vm2, %v4032_v48, %v3611_v17  ;;  %v3693_v15 = vld [vmem:[%s5170_s1 + $0x100] sm:$0xff]   ;;  %v3694_v37 = vld [vmem:[%s5170_s1 + $0xa8] sm:$0xff]   ;;  %v3617_v38 = vunpack.i.h.bf16 %v3615_v32  ;;  %v3616_v39 = vunpack.i.l.bf16 %v3615_v32 }
  0x9c   : >> { %881 = vmatprep.subr.bf16.mxu0 %v3880_v2  ;;  %1215 = vmatprep.subr.bf16.mxu1 %v3880_v2  ;;  %v3620_v41 = vpop.permute.xlu0 %3619  ;;  %v1447_v17 = vrot.slane %v4077_v14, 2  ;;  %v1448_v32 = vrot.slane %v4092_v27, 2 }
  0x9d   : >> { %3111 = vmatprep.mubr.msk.bf16.mxu0 %vm298_vm2, %v401_v44  ;;  %v763_v44 = vpack.c.bf16 %v759_v33, %v758_v11  ;;  %v3622_v58 = vunpack.i.h.bf16 %v3620_v41  ;;  %v3704_v33 = vld [vmem:[%s5170_s1 + $0xe0] sm:$0xff]  }
  0x9e   : >> { %686 = vmatmul.mubr.bf16.gmra.mxu1 %v306_v46  ;;  %v750_v46 = vsel %vm283_vm1, %v747_v16, %v749_v5  ;;  %v3696_v16 = vld [vmem:[%s5170_s1 + $0x38] sm:$0xff]  }
  0x9f   : >> { %882 = vmatpush1.bf16.msra.mxu0 %v3677_v35  ;;  %1216 = vmatpush1.bf16.msra.mxu1 %v3678_v57  ;;  %v1096_v35 = vsel %vm298_vm2, %v4034_v49, %v3617_v38  ;;  %v1095_v57 = vsel %vm298_vm2, %v4032_v48, %v3616_v39  ;;  %v766_v63 = vpack.c.bf16 %v752_v47, %v750_v46  ;;  %v3706_v39 = vld [vmem:[%s5170_s1 + $0xd8] sm:$0xff]   ;;  %v3710_v47 = vld [vmem:[%s5170_s1 + $0xc8] sm:$0xff]  }
  0xa0   : >> { %883 = vmatprep.subr.bf16.mxu0 %v3880_v2  ;;  %1217 = vmatprep.subr.bf16.mxu1 %v3880_v2  ;;  %v1100_v49 = vpack.c.bf16 %v1096_v35, %v1095_v57  ;;  %v1089_v48 = vsel %vm283_vm1, %v749_v5, %v4373_v55  ;;  %v761_v1 = vsel %vm298_vm2, %v4040_v53, %v3622_v58  ;;  %v1450_v5 = vrot.slane %v4094_v28, 2  ;;  %v3712_v35 = vld [vmem:[%s5170_s1 + $0xc0] sm:$0xff]   ;;  %v3713_v57 = vld [vmem:[%s5170_s1 + $0x50] sm:$0xff]  }
  0xa1   : >> { %3126 = vmatprep.mubr.msk.bf16.mxu1 %vm298_vm2, %v309_v59  ;;  %v3621_v59 = vunpack.i.l.bf16 %v3620_v41  ;;  %v3707_v41 = vld [vmem:[%s5170_s1 + $0x8] sm:$0xff]   ;;  %v998_v58 = vrot.slane %v4110_v40, 2 }
  0xa2   : >> { %557 = vmatmul.mubr.bf16.gmra.mxu0 %v400_v60  ;;  %v3625_v60 = vpop.permute.xlu1 %3624  ;;  %v1451_v38 = vsel %vm283_vm1, %v1448_v32, %v1450_v5 }
  0xa3   : >> { %884 = vmatpush1.bf16.msra.mxu0 %v3679_v18  ;;  %1218 = vmatpush1.bf16.msra.mxu1 %v3680_v21  ;;  %v3698_v18 = vld [vmem:[%s5170_s1 + $0xf8] sm:$0xff]   ;;  %v760_v21 = vsel %vm298_vm2, %v4036_v50, %v3621_v59  ;;  %v1000_v59 = vrot.slane %v4115_v42, 2 }
  0xa4   : >> { %885 = vmatprep.subr.bf16.mxu0 %v3880_v2  ;;  %1219 = vmatprep.subr.bf16.mxu1 %v3880_v2 }
  0xa5   : >> { %3170 = vmatprep.mubr.msk.bf16.mxu0 %vm298_vm2, %v764_v6 }
  0xa6   : >> { %694 = vmatmul.mubr.bf16.gmra.mxu1 %v308_v13  ;;  %v3626_v13 = vunpack.i.l.bf16 %v3625_v60 }
  0xa7   : >> { %886 = vmatpush1.bf16.msra.mxu0 %v3681_v19  ;;  %1220 = vmatpush1.bf16.msra.mxu1 %v3682_v20  ;;  %v1103_v19 = vpack.c.bf16 %v1089_v48, %v750_v46  ;;  %v765_v20 = vpack.c.bf16 %v761_v1, %v760_v21  ;;  %v3709_v46 = vld [vmem:[%s5170_s1] sm:$0xff]   ;;  %v1001_v21 = vsel %vm283_vm1, %v998_v58, %v1000_v59  ;;  %v1452_v1 = vrot.slane %v4128_v51, 2 }
  0xa8   : >> { %887 = vmatprep.subr.bf16.mxu0 %v3880_v2  ;;  %1221 = vmatprep.subr.bf16.mxu1 %v3880_v2 }
  0xa9   : >> { %3220 = vmatprep.mubr.msk.bf16.mxu1 %vm298_vm2, %v764_v6  ;;  %v3627_v6 = vunpack.i.h.bf16 %v3625_v60  ;;  %v3715_v60 = vld [vmem:[%s5170_s1 + $0x48] sm:$0xff]  }
  0xab   : >> { %888 = vmatpush1.bf16.msra.mxu0 %v3683_v36  ;;  %1222 = vmatpush1.bf16.msra.mxu1 %v3684_v23  ;;  %v3699_v36 = vld [vmem:[%s5170_s1 + $0x28] sm:$0xff]   ;;  %v3700_v23 = vld [vmem:[%s5170_s1 + $0xf0] sm:$0xff]  }
  0xac   : >> { %889 = vmatprep.subr.bf16.mxu0 %v3880_v2  ;;  %1223 = vmatprep.subr.bf16.mxu1 %v3880_v2 }
  0xaf   : >> { %890 = vmatpush1.bf16.msra.mxu0 %v3685_v24  ;;  %1224 = vmatpush1.bf16.msra.mxu1 %v3686_v25  ;;  %v1097_v24 = vsel %vm298_vm2, %v4036_v50, %v3626_v13  ;;  %v1098_v25 = vsel %vm298_vm2, %v4040_v53, %v3627_v6  ;;  %v3701_v53 = vld [vmem:[%s5170_s1 + $0x20] sm:$0xff]   ;;  %v1454_v6 = vrot.slane %v4130_v52, 2 }
  0xb0   : >> { %899 = vmatprep.subr.bf16.mxu0 %v3880_v2  ;;  %1225 = vmatprep.subr.bf16.mxu1 %v3880_v2 }
  0xb3   : >> { %900 = vmatpush2.bf16.msra.mxu0 %v3687_v26  ;;  %1226 = vmatpush1.bf16.msra.mxu1 %v3688_v29  ;;  %v738_v26 = vpop.permute.xlu0 %737  ;;  %v768_v29 = vpack.c.bf16 %v4353_v7, %v4353_v7  ;;  %v3703_v7 = vld [vmem:[%s5170_s1 + $0x18] sm:$0xff]  }
  0xb4   : >> { %901 = vmatprep.subr.bf16.mxu0 %v3880_v2  ;;  %1235 = vmatprep.subr.bf16.mxu1 %v3880_v2  ;;  %v762_v50 = vsel %vm298_vm2, %v4042_v54, %v738_v26  ;;  %v1455_v26 = vsel %vm283_vm1, %v1452_v1, %v1454_v6 }
  0xb5   : >> { %v767_v31 = vpack.c.bf16 %v762_v50, %v762_v50 }
  0xb7   : >> { %902 = vmatpush2.bf16.msra.mxu0 %v3689_v10  ;;  %1236 = vmatpush2.bf16.msra.mxu1 %v3690_v30  ;;  %v993_v10 = vrot.slane %v4074_v12, 2  ;;  %v1102_v30 = vpack.c.bf16 %v1098_v25, %v1097_v24 }
  0xb8   : >> { %903 = vmatprep.subr.bf16.mxu0 %v3880_v2  ;;  %1237 = vmatprep.subr.bf16.mxu1 %v3880_v2 }
  0xb9   : >> { %v995_v54 = vsel %vm283_vm1, %v993_v10, %v4118_v43 }
  0xba   : >> { %v1013_v11 = vpack.c.bf16 %v4146_v62, %v995_v54 }
  0xbb   : >> { %904 = vmatpush2.bf16.msra.mxu0 %v3691_v4  ;;  %1238 = vmatpush2.bf16.msra.mxu1 %v3692_v22  ;;  %v1075_v4 = vpop.permute.xlu1 %1074  ;;  %v1105_v22 = vpack.c.bf16 %v4373_v55, %v4373_v55  ;;  %v3711_v55 = vld [vmem:[%s5170_s1 + $0x58] sm:$0xff]  }
  0xbc   : >> { %905 = vmatprep.subr.bf16.mxu0 %v3880_v2  ;;  %1239 = vmatprep.subr.bf16.mxu1 %v3880_v2  ;;  %v1099_v43 = vsel %vm298_vm2, %v4054_v61, %v1075_v4  ;;  %v3705_v61 = vld [vmem:[%s5170_s1 + $0x10] sm:$0xff]  }
  0xbf   : >> { %906 = vmatpush2.bf16.msra.mxu0 %v3693_v15  ;;  %1240 = vmatpush2.bf16.msra.mxu1 %v3694_v37  ;;  %v1104_v15 = vpack.c.bf16 %v1099_v43, %v1099_v43  ;;  %v1449_v37 = vsel %vm283_vm1, %v1447_v17, %v1448_v32 }
  0xc0   : >> { %1241 = vmatprep.subr.bf16.mxu1 %v3880_v2  ;;  %1348 = vmatprep.subr.bf16.mxu0 %v3880_v2  ;;  %v1467_v62 = vpack.c.bf16 %v1451_v38, %v1449_v37 }
  0xc2   : >> { %908 = vmatmul.mubr.bf16.vlgmr.msra.gmra.mxu0 %v763_v44  ;;  %v3708_v44 = vld [vmem:[%s5170_s1 + $0xd0] sm:$0xff]  }
  0xc3   : >> { %1242 = vmatpush2.bf16.msra.mxu1 %v3695_v45  ;;  %1349 = vmatpush1.bf16.msra.mxu0 %v3696_v16  ;;  %v3714_v45 = vld [vmem:[%s5170_s1 + $0x118] sm:$0xff]   ;;  %v3630_v16 = vpop.permute.xlu0 %3629 }
  0xc4   : >> { %1350 = vmatprep.subr.bf16.mxu0 %v3880_v2  ;;  %1577 = vmatprep.subr.bf16.mxu1 %v3880_v2  ;;  %v3631_v48 = vunpack.i.l.bf16 %v3630_v16 }
  0xc5   : >> { %3171 = vmatprep.mubr.msk.bf16.mxu0 %vm298_vm2, %v766_v63  ;;  %v3716_v63 = vld [vmem:[%s5170_s1 + $0x110] sm:$0xff]  }
  0xc6   : >> { %1244 = vmatmul.mubr.bf16.vlgmr.msra.gmra.mxu1 %v1100_v49  ;;  %v3632_v49 = vunpack.i.h.bf16 %v3630_v16 }
  0xc7   : >> { %1351 = vmatpush1.bf16.msra.mxu0 %v3697_v3  ;;  %1578 = vmatpush1.bf16.msra.mxu1 %v3698_v18  ;;  %v3635_v3 = vpop.permute.xlu1 %3634  ;;  %v999_v18 = vsel %vm283_vm1, %v4135_v56, %v998_v58  ;;  %v3718_v56 = vld [vmem:[%s5170_s1 + $0x108] sm:$0xff]   ;;  %v3640_v24 = vpop.permute.xlu0 %3639 }
  0xc8   : >> { %1352 = vmatprep.subr.bf16.mxu0 %v3880_v2  ;;  %1579 = vmatprep.subr.bf16.mxu1 %v3880_v2  ;;  %v1008_v13 = vsel %vm298_vm2, %v3961_v8, %v3632_v49  ;;  %v1015_v8 = vpack.c.bf16 %v1001_v21, %v999_v18  ;;  %v3642_v50 = vunpack.i.h.bf16 %v3640_v24 }
  0xc9   : >> { %3221 = vmatprep.mubr.msk.bf16.mxu1 %vm298_vm2, %v1103_v19  ;;  %v1007_v19 = vsel %vm298_vm2, %v4074_v12, %v3631_v48  ;;  %v1453_v12 = vsel %vm283_vm1, %v1450_v5, %v1452_v1  ;;  %v1017_v5 = vpack.c.bf16 %v1000_v59, %v1000_v59 }
  0xca   : >> { %916 = vmatmul.mubr.bf16.gmra.mxu0 %v765_v20  ;;  %v3717_v20 = vld [vmem:[%s5170_s1 + $0x40] sm:$0xff]   ;;  %v1012_v25 = vpack.c.bf16 %v1008_v13, %v1007_v19 }
  0xcb   : >> { %1353 = vmatpush1.bf16.msra.mxu0 %v3699_v36  ;;  %1580 = vmatpush1.bf16.msra.mxu1 %v3700_v23  ;;  %v3637_v36 = vunpack.i.h.bf16 %v3635_v3  ;;  %v3636_v23 = vunpack.i.l.bf16 %v3635_v3 }
  0xcc   : >> { %1354 = vmatprep.subr.bf16.mxu0 %v3880_v2  ;;  %1581 = vmatprep.subr.bf16.mxu1 %v3880_v2 }
  0xcd   : >> { %3172 = vmatprep.mubr.msk.bf16.mxu0 %vm298_vm2, %v768_v29  ;;  %v1462_v29 = vsel %vm298_vm2, %v4092_v27, %v3637_v36  ;;  %v1461_v10 = vsel %vm298_vm2, %v4077_v14, %v3636_v23  ;;  %v1010_v27 = vsel %vm298_vm2, %v4110_v40, %v3642_v50  ;;  %v1471_v40 = vpack.c.bf16 %v1454_v6, %v1454_v6 }
  0xce   : >> { %1252 = vmatmul.mubr.bf16.gmra.mxu1 %v1102_v30  ;;  %v3719_v30 = vld [vmem:[%s5170_s1 + $0x100] sm:$0xff]   ;;  %v1466_v4 = vpack.c.bf16 %v1462_v29, %v1461_v10 }
  0xcf   : >> { %1355 = vmatpush1.bf16.msra.mxu0 %v3701_v53  ;;  %1582 = vmatpush1.bf16.msra.mxu1 %v3702_v34  ;;  %v3641_v53 = vunpack.i.l.bf16 %v3640_v24  ;;  %v3645_v34 = vpop.permute.xlu1 %3644 }
  0xd0   : >> { %1356 = vmatprep.subr.bf16.mxu0 %v3880_v2  ;;  %1583 = vmatprep.subr.bf16.mxu1 %v3880_v2  ;;  %v3647_v54 = vunpack.i.h.bf16 %v3645_v34 }
  0xd1   : >> { %3222 = vmatprep.mubr.msk.bf16.mxu1 %vm298_vm2, %v1105_v22  ;;  %v1469_v22 = vpack.c.bf16 %v1455_v26, %v1453_v12  ;;  %v1009_v14 = vsel %vm298_vm2, %v3963_v9, %v3641_v53 }
  0xd2   : >> { %924 = vmatmul.mubr.bf16.gmra.mxu0 %v767_v31  ;;  %v3646_v31 = vunpack.i.l.bf16 %v3645_v34  ;;  %v1014_v17 = vpack.c.bf16 %v1010_v27, %v1009_v14  ;;  %v1464_v32 = vsel %vm298_vm2, %v4128_v51, %v3647_v54 }
  0xd3   : >> { %1357 = vmatpush1.bf16.msra.mxu0 %v3703_v7  ;;  %1584 = vmatpush1.bf16.msra.mxu1 %v3704_v33  ;;  %v987_v7 = vpop.permute.xlu0 %986  ;;  %v1441_v43 = vpop.permute.xlu1 %1440 }
  0xd4   : >> { %1358 = vmatprep.subr.bf16.mxu0 %v3880_v2  ;;  %1585 = vmatprep.subr.bf16.mxu1 %v3880_v2  ;;  %v1011_v9 = vsel %vm298_vm2, %v4115_v42, %v987_v7 }
  0xd5   : >> { %3235 = vmatprep.mubr.msk.bf16.mxu0 %vm298_vm2, %v1013_v11  ;;  %v1016_v11 = vpack.c.bf16 %v1011_v9, %v1011_v9 }
  0xd6   : >> { %1260 = vmatmul.mubr.bf16.gmra.mxu1 %v1104_v15  ;;  %v1465_v15 = vsel %vm298_vm2, %v4130_v52, %v1441_v43 }
  0xd7   : >> { %1359 = vmatpush1.bf16.msra.mxu0 %v3705_v61  ;;  %1586 = vmatpush1.bf16.msra.mxu1 %v3706_v39 }
  0xd8   : >> { %1360 = vmatprep.subr.bf16.mxu0 %v3880_v2  ;;  %1587 = vmatprep.subr.bf16.mxu1 %v3880_v2 }
  0xd9   : >> { %3281 = vmatprep.mubr.msk.bf16.mxu1 %vm298_vm2, %v1467_v62 }
  0xdb   : >> { %1361 = vmatpush1.bf16.msra.mxu0 %v3707_v41  ;;  %1588 = vmatpush1.bf16.msra.mxu1 %v3708_v44 }
  0xdc   : >> { %1362 = vmatprep.subr.bf16.mxu0 %v3880_v2  ;;  %1589 = vmatprep.subr.bf16.mxu1 %v3880_v2 }
  0xdf   : >> { %1363 = vmatpush1.bf16.msra.mxu0 %v3709_v46  ;;  %1590 = vmatpush1.bf16.msra.mxu1 %v3710_v47 }
  0xe0   : >> { %1372 = vmatprep.subr.bf16.mxu0 %v3880_v2  ;;  %1591 = vmatprep.subr.bf16.mxu1 %v3880_v2 }
  0xe3   : >> { %1373 = vmatpush2.bf16.msra.mxu0 %v3711_v55  ;;  %1592 = vmatpush1.bf16.msra.mxu1 %v3712_v35 }
  0xe4   : >> { %1374 = vmatprep.subr.bf16.mxu0 %v3880_v2  ;;  %1601 = vmatprep.subr.bf16.mxu1 %v3880_v2 }
  0xe7   : >> { %1375 = vmatpush2.bf16.msra.mxu0 %v3713_v57  ;;  %1602 = vmatpush2.bf16.msra.mxu1 %v3714_v45 }
  0xe8   : >> { %1376 = vmatprep.subr.bf16.mxu0 %v3880_v2  ;;  %1603 = vmatprep.subr.bf16.mxu1 %v3880_v2 }
  0xeb   : >> { %1377 = vmatpush2.bf16.msra.mxu0 %v3715_v60  ;;  %1604 = vmatpush2.bf16.msra.mxu1 %v3716_v63 }
  0xec   : >> { %1378 = vmatprep.subr.bf16.mxu0 %v3880_v2  ;;  %1605 = vmatprep.subr.bf16.mxu1 %v3880_v2 }
  0xef   : >> { %1379 = vmatpush2.bf16.msra.mxu0 %v3717_v20  ;;  %1606 = vmatpush2.bf16.msra.mxu1 %v3718_v56 }
  0xf0   : >> { %1607 = vmatprep.subr.bf16.mxu1 %v3880_v2  ;;  %v1463_v2 = vsel %vm298_vm2, %v4094_v28, %v3646_v31  ;;  %v1470_v28 = vpack.c.bf16 %v1465_v15, %v1465_v15 }
  0xf1   : >> { %v1468_v33 = vpack.c.bf16 %v1464_v32, %v1463_v2 }
  0xf2   : >> { %1381 = vmatmul.mubr.bf16.vlgmr.msra.gmra.mxu0 %v1012_v25 }
  0xf3   : >> { %1608 = vmatpush2.bf16.msra.mxu1 %v3719_v30  ;;  %3236 = vmatprep.mubr.msk.bf16.mxu0 %vm298_vm2, %v1015_v8 }
  0xf6   : >> { %1610 = vmatmul.mubr.bf16.vlgmr.msra.gmra.mxu1 %v1466_v4 }
  0xf7   : >> { %3282 = vmatprep.mubr.msk.bf16.mxu1 %vm298_vm2, %v1469_v22 }
  0xfa   : >> { %1389 = vmatmul.mubr.bf16.gmra.mxu0 %v1014_v17 }
  0xfb   : >> { %3237 = vmatprep.mubr.msk.bf16.mxu0 %vm298_vm2, %v1017_v5 }
  0xfe   : >> { %1618 = vmatmul.mubr.bf16.gmra.mxu1 %v1468_v33 }
  0xff   : >> { %3283 = vmatprep.mubr.msk.bf16.mxu1 %vm298_vm2, %v1471_v40 }
 0x102   : >> { %1397 = vmatmul.mubr.bf16.gmra.mxu0 %v1016_v11 }
 0x106   : >> { %1626 = vmatmul.mubr.bf16.gmra.mxu1 %v1470_v28 }
 0x152   : >> { %v542_v51 = vpop.f32.mrf.mxu0 }
 0x154   : >> { %v544_v37 = vpop.f32.mrf.mxu0 }
 0x156   : >> { %v545_v38 = vpop.f32.mrf.mxu0  ;;  %v679_v61 = vpop.f32.mrf.mxu1 }
 0x157   : >> { %v680_v18 = vadd.f32 %v679_v61, %v542_v51 }
 0x158   : >> { %v547_v39 = vpop.f32.mrf.mxu0  ;;  %v681_v42 = vpop.f32.mrf.mxu1 }
 0x15a   : >> { %v682_v62 = vpop.f32.mrf.mxu1  ;;  %v550_v41 = vpop.f32.mrf.mxu0 }
 0x15b   : >> { %v683_v13 = vadd.f32 %v682_v62, %v545_v38 }
 0x15c   : >> { %v684_v44 = vpop.f32.mrf.mxu1  ;;  %v552_v46 = vpop.f32.mrf.mxu0 }
 0x15e   : >> { %v687_v47 = vpop.f32.mrf.mxu1  ;;  %v553_v55 = vpop.f32.mrf.mxu0 }
 0x15f   : >> { %v688_v8 = vadd.f32 %v687_v47, %v550_v41 }
 0x160   : >> { %v689_v35 = vpop.f32.mrf.mxu1  ;;  %v555_v52 = vpop.f32.mrf.mxu0 }
 0x162   : >> { %v690_v57 = vpop.f32.mrf.mxu1  ;;  %v558_v45 = vpop.f32.mrf.mxu0 }
 0x163   : >> { %v691_v34 = vadd.f32 %v690_v57, %v553_v55 }
 0x164   : >> { %v692_v16 = vpop.f32.mrf.mxu1  ;;  %v560_v58 = vpop.f32.mrf.mxu0 }
 0x166   : >> { %v695_v59 = vpop.f32.mrf.mxu1  ;;  %v561_v60 = vpop.f32.mrf.mxu0 }
 0x167   : >> { %v696_v2 = vadd.f32 %v695_v59, %v558_v45 }
 0x168   : >> { %v697_v63 = vpop.f32.mrf.mxu1  ;;  %v562_v49 = vpop.f32.mrf.mxu0 }
 0x16a   : >> { %v698_v48 = vpop.f32.mrf.mxu1 }
 0x16c   : >> { %v699_v3 = vpop.f32.mrf.mxu1 }
 0x182   : >> { %v909_v21 = vpop.f32.mrf.mxu0 }
 0x183   : >> { %v931_v1 = vadd.f32 %v909_v21, %v680_v18 }
 0x184   : >> { %v911_v6 = vpop.f32.mrf.mxu0 }
 0x185   : >> { %v936_v19 = vadd.f32 %v3925_v0, %v931_v1 }
 0x186   : >> { %v912_v20 = vpop.f32.mrf.mxu0  ;;  %v1245_v56 = vpop.f32.mrf.mxu1 }
 0x187   : >> { %v941_v36 = vmax.f32 %v936_v19, 0.0  ;;  %v932_v23 = vadd.f32 %v912_v20, %v683_v13 }
 0x188   : >> { %v914_v24 = vpop.f32.mrf.mxu0  ;;  %v1247_v25 = vpop.f32.mrf.mxu1 }
 0x189   : >> { %948 = vst.msk [vmem:[%s4551_s8] sm:$0xff] %vm298_vm2, %v941_v36  ;;  %v937_v12 = vadd.f32 %v3925_v0, %v932_v23 }
 0x18a   : >> { %v917_v26 = vpop.f32.mrf.mxu0  ;;  %v1248_v29 = vpop.f32.mrf.mxu1 }
 0x18b   : >> { %v942_v10 = vmax.f32 %v937_v12, 0.0  ;;  %v933_v30 = vadd.f32 %v917_v26, %v688_v8 }
 0x18c   : >> { %v919_v50 = vpop.f32.mrf.mxu0  ;;  %v1250_v53 = vpop.f32.mrf.mxu1 }
 0x18d   : >> { %949 = vst.msk [vmem:[%s4551_s8 + $0x8] sm:$0xff] %vm298_vm2, %v942_v10  ;;  %v938_v4 = vadd.f32 %v3925_v0, %v933_v30 }
 0x18e   : >> { %v920_v22 = vpop.f32.mrf.mxu0  ;;  %v1253_v54 = vpop.f32.mrf.mxu1 }
 0x18f   : >> { %v943_v31 = vmax.f32 %v938_v4, 0.0  ;;  %v934_v14 = vadd.f32 %v920_v22, %v691_v34 }
 0x190   : >> { %v922_v27 = vpop.f32.mrf.mxu0  ;;  %v1255_v17 = vpop.f32.mrf.mxu1 }
 0x191   : >> { %950 = vst.msk [vmem:[%s4551_s8 + $0x10] sm:$0xff] %vm298_vm2, %v943_v31  ;;  %v939_v32 = vadd.f32 %v3925_v0, %v934_v14  ;;  %v4588_v14 = vld [vmem:[%s5173_s4] ss:$0 sm:$0xff] (%p235_p4) }
 0x192   : >> { %v925_v5 = vpop.f32.mrf.mxu0  ;;  %v1256_v7 = vpop.f32.mrf.mxu1 }
 0x193   : >> { %v944_v33 = vmax.f32 %v939_v32, 0.0  ;;  %v935_v9 = vadd.f32 %v925_v5, %v696_v2 }
 0x194   : >> { %v1258_v40 = vpop.f32.mrf.mxu1  ;;  %v927_v43 = vpop.f32.mrf.mxu0 }
 0x195   : >> { %951 = vst.msk [vmem:[%s4551_s8 + $0x18] sm:$0xff] %vm298_vm2, %v944_v33  ;;  %v940_v11 = vadd.f32 %v3925_v0, %v935_v9 }
 0x196   : >> { %v1261_v15 = vpop.f32.mrf.mxu1  ;;  %v928_v28 = vpop.f32.mrf.mxu0 }
 0x197   : >> { %v945_v51 = vmax.f32 %v940_v11, 0.0 }
 0x198   : >> { %v1263_v37 = vpop.f32.mrf.mxu1  ;;  %v929_v38 = vpop.f32.mrf.mxu0 }
 0x199   : >> { %953 = vst.msk [vmem:[%s4551_s8 + $0x20] sm:$0x3] %vm952_vm3, %v945_v51 }
 0x19a   : >> { %v1264_v61 = vpop.f32.mrf.mxu1 }
 0x19c   : >> { %v1265_v39 = vpop.f32.mrf.mxu1 }
 0x1b2   : >> { %v1382_v42 = vpop.f32.mrf.mxu0 }
 0x1b3   : >> { %v1383_v41 = vadd.f32 %v1382_v42, %v1245_v56 }
 0x1b4   : >> { %v1384_v62 = vpop.f32.mrf.mxu0 }
 0x1b6   : >> { %v1385_v44 = vpop.f32.mrf.mxu0  ;;  %v1611_v46 = vpop.f32.mrf.mxu1 }
 0x1b7   : >> { %v1633_v47 = vadd.f32 %v1611_v46, %v1383_v41  ;;  %v1386_v52 = vadd.f32 %v1385_v44, %v1248_v29 }
 0x1b8   : >> { %v1387_v55 = vpop.f32.mrf.mxu0  ;;  %v1613_v35 = vpop.f32.mrf.mxu1 }
 0x1b9   : >> { %v1638_v57 = vadd.f32 %v3925_v0, %v1633_v47 }
 0x1ba   : >> { %v1390_v45 = vpop.f32.mrf.mxu0  ;;  %v1614_v16 = vpop.f32.mrf.mxu1 }
 0x1bb   : >> { %v1643_v58 = vmax.f32 %v1638_v57, 0.0  ;;  %v1634_v59 = vadd.f32 %v1614_v16, %v1386_v52  ;;  %v1391_v49 = vadd.f32 %v1390_v45, %v1253_v54 }
 0x1bc   : >> { %v1392_v60 = vpop.f32.mrf.mxu0  ;;  %v1616_v63 = vpop.f32.mrf.mxu1 }
 0x1bd   : >> { %3286 = vst.msk [vmem:[%s4551_s8 + $0x28] sm:$0xff] %vm298_vm2, %v1643_v58  ;;  %v1639_v48 = vadd.f32 %v3925_v0, %v1634_v59 }
 0x1be   : >> { %v1393_v3 = vpop.f32.mrf.mxu0  ;;  %v1619_v18 = vpop.f32.mrf.mxu1 }
 0x1bf   : >> { %v1644_v21 = vmax.f32 %v1639_v48, 0.0  ;;  %v1635_v1 = vadd.f32 %v1619_v18, %v1391_v49  ;;  %v1394_v19 = vadd.f32 %v1393_v3, %v1256_v7 }
 0x1c0   : >> { %v1395_v6 = vpop.f32.mrf.mxu0  ;;  %v1621_v13 = vpop.f32.mrf.mxu1 }
 0x1c1   : >> { %3287 = vst.msk [vmem:[%s4551_s8 + $0x30] sm:$0xff] %vm298_vm2, %v1644_v21  ;;  %v1640_v20 = vadd.f32 %v3925_v0, %v1635_v1 }
 0x1c2   : >> { %v1398_v56 = vpop.f32.mrf.mxu0  ;;  %v1622_v36 = vpop.f32.mrf.mxu1 }
 0x1c3   : >> { %v1645_v23 = vmax.f32 %v1640_v20, 0.0  ;;  %v1636_v24 = vadd.f32 %v1622_v36, %v1394_v19  ;;  %v1399_v12 = vadd.f32 %v1398_v56, %v1261_v15 }
 0x1c4   : >> { %v1400_v25 = vpop.f32.mrf.mxu0  ;;  %v1624_v8 = vpop.f32.mrf.mxu1 }
 0x1c5   : >> { %3288 = vst.msk [vmem:[%s4551_s8 + $0x38] sm:$0xff] %vm298_vm2, %v1645_v23  ;;  %v1641_v26 = vadd.f32 %v3925_v0, %v1636_v24 }
 0x1c6   : >> { %v1401_v29 = vpop.f32.mrf.mxu0  ;;  %v1627_v10 = vpop.f32.mrf.mxu1 }
 0x1c7   : >> { %v1646_v30 = vmax.f32 %v1641_v26, 0.0  ;;  %v1637_v50 = vadd.f32 %v1627_v10, %v1399_v12 }
 0x1c8   : >> { %v1402_v53 = vpop.f32.mrf.mxu0  ;;  %v1629_v34 = vpop.f32.mrf.mxu1 }
 0x1c9   : >> { %3289 = vst.msk [vmem:[%s4551_s8 + $0x40] sm:$0xff] %vm298_vm2, %v1646_v30  ;;  %v1642_v4 = vadd.f32 %v3925_v0, %v1637_v50  ;;  %237 = sbr.rel (!%p235_p4) target bundleno = 15 (0xf), region = 102 }
 0x1ca   : >> { %v1630_v22 = vpop.f32.mrf.mxu1 }
 0x1cb   : >> { %v1647_v54 = vmax.f32 %v1642_v4, 0.0 }
 0x1cc   : >> { %v1631_v31 = vpop.f32.mrf.mxu1 }
 0x1cd   : >> { %3290 = vst.msk [vmem:[%s4551_s8 + $0x48] sm:$0x3] %vm952_vm3, %v1647_v54 }
 0x1ce LB: >> { %v3882_v27 = vmov 0   ;;  %v3780_v17 = vld [vmem:[%s5172_s3 + $0x98] sm:$0xff]   ;;  %s3293_s29 = smul.u32 80, %s3878_s11  ;;  %v3781_v0 = vld [vmem:[%s5172_s3 + $0x90] sm:$0xff]   ;;  %v3783_v33 = vld [vmem:[%s5172_s3 + $0x88] sm:$0xff]   ;;  %s3883_s22 = smov 64   ;;  %s3878_s11 = sphi %s4590_s11, %s1667_s11  }
 0x1cf   : >> { %1908 = vmatprep.subr.bf16.mxu0 %v3882_v27  ;;  %2035 = vmatprep.subr.bf16.mxu1 %v3882_v27  ;;  %v3782_v2 = vld [vmem:[%s5172_s3 + $0x38] sm:$0xff]   ;;  %v3784_v3 = vld [vmem:[%s5172_s3 + $0x30] sm:$0xff]   ;;  %v3785_v13 = vld [vmem:[%s5172_s3 + $0x80] sm:$0xff]   ;;  %vm2950_vm4 = vcmask 519168  }
 0x1d0   : >> { %1909 = vmatpush1.bf16.msra.mxu0 %v3780_v17  ;;  %s4608_s17 = scalar_lea.vmem [#allocation2], %s3293_s29  ;;  %2036 = vmatpush1.bf16.msra.mxu1 %v3782_v2  ;;  %v3786_v23 = vld [vmem:[%s5172_s3 + $0x28] sm:$0xff]   ;;  %v3787_v30 = vld [vmem:[%s5172_s3 + $0x78] sm:$0xff]   ;;  %v3788_v34 = vld [vmem:[%s5172_s3 + $0x20] sm:$0xff]  }
 0x1d1   : >> { %1910 = vmatprep.subr.bf16.mxu0 %v3882_v27  ;;  %2037 = vmatprep.subr.bf16.mxu1 %v3882_v27  ;;  %v3789_v31 = vld [vmem:[%s5172_s3 + $0x70] sm:$0xff]   ;;  %v3790_v2 = vld [vmem:[%s5172_s3 + $0x18] sm:$0xff]  }
 0x1d4   : >> { %v4611_v32 = vld [vmem:[%s4608_s17 + $0x28] sm:$0xff]  ;;  %v4614_v5 = vld [vmem:[%s4608_s17 + $0x30] sm:$0xff]  ;;  %v4617_v7 = vld [vmem:[%s4608_s17 + $0x38] sm:$0xff]  ;;  %1911 = vmatpush1.bf16.msra.mxu0 %v3781_v0  ;;  %2038 = vmatpush1.bf16.msra.mxu1 %v3784_v3 }
 0x1d5   : >> { %v1763_v9 = vrot.slane %v4611_v32, 1  ;;  %v1764_v40 = vrot.slane %v4614_v5, 1  ;;  %v1766_v43 = vrot.slane %v4617_v7, 1  ;;  %v4626_v11 = vld [vmem:[%s4608_s17] sm:$0xff]  ;;  %v4629_v15 = vld [vmem:[%s4608_s17 + $0x8] sm:$0xff]  ;;  %v4632_v28 = vld [vmem:[%s4608_s17 + $0x10] sm:$0xff]  ;;  %1912 = vmatprep.subr.bf16.mxu0 %v3882_v27  ;;  %2039 = vmatprep.subr.bf16.mxu1 %v3882_v27 }
 0x1d6   : >> { %v1682_v51 = vrot.slane %v4626_v11, 1  ;;  %v1683_v37 = vrot.slane %v4629_v15, 1  ;;  %v1685_v38 = vrot.slane %v4632_v28, 1  ;;  %v4639_v61 = vld [vmem:[%s4608_s17 + $0x40] sm:$0xff]  ;;  %v4642_v39 = vld [vmem:[%s4608_s17 + $0x48] sm:$0x3] }
 0x1d7   : >> { %v1765_v42 = vsel %vm258_vm0, %v1763_v9, %v1764_v40  ;;  %v1767_v62 = vsel %vm258_vm0, %v1764_v40, %v1766_v43  ;;  %v4647_v41 = vrot.slane %v4639_v61, 1  ;;  %v1770_v44 = vrot.slane %v4642_v39, 1  ;;  %v4651_v46 = vld [vmem:[%s4608_s17 + $0x18] sm:$0xff]  ;;  %v4654_v47 = vld [vmem:[%s4608_s17 + $0x20] sm:$0x3]  ;;  %v4657_v55 = vld [vmem:[%s4608_s17 + $0x50] sm:$0xff] }
 0x1d8   : >> { %v4660_v35 = vpack.i.bf16 %v1767_v62, %v1765_v42  ;;  %v1684_v52 = vsel %vm258_vm0, %v1682_v51, %v1683_v37  ;;  %v1686_v57 = vsel %vm258_vm0, %v1683_v37, %v1685_v38  ;;  %v4665_v45 = vld [vmem:[%s4608_s17 + $0x58] sm:$0xff]  ;;  %v4668_v16 = vld [vmem:[%s4608_s17 + $0x60] sm:$0xff]  ;;  %v4671_v58 = vld [vmem:[%s4608_s17 + $0x68] sm:$0xff]  ;;  %v1687_v49 = vrot.slane %v4651_v46, 1  ;;  %1913 = vmatpush1.bf16.msra.mxu0 %v3783_v33  ;;  %2040 = vmatpush1.bf16.msra.mxu1 %v3786_v23 }
 0x1d9   : >> { %v3725_v59 = vpack.i.bf16 %v1686_v57, %v1684_v52  ;;  %v4675_v60 = vsel %vm258_vm0, %v1766_v43, %v4647_v41  ;;  %v1771_v63 = vsel %vm258_vm0, %v4647_v41, %v1770_v44  ;;  %v4681_v48 = vld [vmem:[%s4608_s17 + $0x70] sm:$0x3]  ;;  %v1689_v21 = vrot.slane %v4654_v47, 1  ;;  %1914 = vmatprep.subr.bf16.mxu0 %v3882_v27  ;;  %2041 = vmatprep.subr.bf16.mxu1 %v3882_v27  ;;  %v4736_v33 = vld [vmem:[%s4608_s17 + $0x78] sm:$0xff]  ;;  %v4743_v51 = vld [vmem:[%s4608_s17 + $0x80] sm:$0xff] }
 0x1da   : >> { %3721 = vrot.lane.b32.xlu0 %v4660_v35, %s3883_s22  ;;  %v3730_v18 = vpack.i.bf16 %v1771_v63, %v4675_v60  ;;  %v2097_v1 = vrot.slane %v4657_v55, 1  ;;  %v2098_v6 = vrot.slane %v4665_v45, 1  ;;  %v1688_v19 = vsel %vm258_vm0, %v1685_v38, %v1687_v49  ;;  %v4708_v8 = vld [vmem:[%s4608_s17 + $0x70] sm:$0x3]  ;;  %v4746_v37 = vld [vmem:[%s4608_s17 + $0x88] sm:$0xff] }
 0x1db   : >> { %v2100_v20 = vrot.slane %v4668_v16, 1  ;;  %v2102_v56 = vrot.slane %v4671_v58, 1  ;;  %v2104_v36 = vrot.slane %v4681_v48, 1  ;;  %v1690_v24 = vsel %vm258_vm0, %v1687_v49, %v1689_v21  ;;  %v4759_v63 = vld [vmem:[%s4608_s17 + $0x48] sm:$0x3] }
 0x1dc   : >> { %3731 = vrot.lane.b32.xlu1 %v3730_v18, %s3883_s22  ;;  %v2099_v25 = vsel %vm258_vm0, %v2097_v1, %v2098_v6  ;;  %v3735_v12 = vpack.i.bf16 %v1690_v24, %v1688_v19  ;;  %1915 = vmatpush1.bf16.msra.mxu0 %v3785_v13  ;;  %v2396_v10 = vrot.slane %v4708_v8, 1  ;;  %v1784_v4 = vrot.slane %v4611_v32, 2  ;;  %v3791_v18 = vld [vmem:[%s5172_s3 + $0x68] sm:$0xff]   ;;  %v3792_v19 = vld [vmem:[%s5172_s3 + $0x10] sm:$0xff]   ;;  %v4783_v23 = vld [vmem:[%s4608_s17 + $0x98] sm:$0x3] }
 0x1dd   : >> { %v2101_v26 = vsel %vm258_vm0, %v2098_v6, %v2100_v20  ;;  %v2103_v50 = vsel %vm258_vm0, %v2100_v20, %v2102_v56  ;;  %v2105_v53 = vsel %vm258_vm0, %v2102_v56, %v2104_v36  ;;  %1916 = vmatprep.subr.bf16.mxu0 %v3882_v27  ;;  %v1785_v22 = vrot.slane %v4614_v5, 2  ;;  %2042 = vmatpush1.bf16.msra.mxu1 %v3788_v34  ;;  %v4780_v36 = vld [vmem:[%s4608_s17 + $0x90] sm:$0xff]  ;;  %v3793_v24 = vld [vmem:[%s5172_s3 + $0x60] sm:$0xff]  }
 0x1de   : >> { %3726 = vrot.lane.b32.xlu0 %v3725_v59, %s3883_s22  ;;  %v3740_v29 = vpack.i.bf16 %v2101_v26, %v2099_v25  ;;  %v2397_v54 = vsel %vm258_vm0, %v2102_v56, %v2396_v10  ;;  %v1787_v17 = vrot.slane %v4617_v7, 2  ;;  %v3750_v0 = vpack.i.bf16 %v2105_v53, %v2103_v50  ;;  %2043 = vmatprep.subr.bf16.mxu1 %v3882_v27  ;;  %v3794_v26 = vld [vmem:[%s5172_s3 + $0x8] sm:$0xff]   ;;  %v3797_v53 = vld [vmem:[%s5172_s3 + $0xb0] sm:$0xff]  }
 0x1df   : >> { %v1786_v9 = vsel %vm283_vm1, %v1784_v4, %v1785_v22  ;;  %v1704_v40 = vrot.slane %v4626_v11, 2  ;;  %v1705_v43 = vrot.slane %v4629_v15, 2  ;;  %v2722_v38 = vrot.slane %v4736_v33, 1  ;;  %v3798_v4 = vld [vmem:[%s5172_s3 + $0x58] sm:$0xff]  }
 0x1e0   : >> { %3736 = vrot.lane.b32.xlu1 %v3735_v12, %s3883_s22  ;;  %1917 = vmatpush1.bf16.msra.mxu0 %v3787_v30  ;;  %v1788_v42 = vsel %vm283_vm1, %v1785_v22, %v1787_v17  ;;  %v1707_v62 = vrot.slane %v4632_v28, 2  ;;  %v3755_v44 = vpack.i.bf16 %v2397_v54, %v2103_v50  ;;  %v2723_v52 = vrot.slane %v4743_v51, 1 }
 0x1e1   : >> { %1918 = vmatprep.subr.bf16.mxu0 %v3882_v27  ;;  %v2725_v57 = vrot.slane %v4746_v37, 1  ;;  %v1706_v59 = vsel %vm283_vm1, %v1704_v40, %v1705_v43  ;;  %v4761_v49 = vpack.c.bf16 %v1788_v42, %v1786_v9  ;;  %v2320_v6 = vrot.slane %v4759_v63, 1  ;;  %2044 = vmatpush1.bf16.msra.mxu1 %v3790_v2  ;;  %v3801_v2 = vld [vmem:[%s5172_s3 + $0xa0] sm:$0xff]   ;;  %v3802_v9 = vld [vmem:[%s5172_s3 + $0x48] sm:$0xff]  }
 0x1e2   : >> { %3741 = vrot.lane.b32.xlu0 %v3740_v29, %s3883_s22  ;;  %v1708_v3 = vsel %vm283_vm1, %v1705_v43, %v1707_v62  ;;  %v2724_v21 = vsel %vm258_vm0, %v2722_v38, %v2723_v52  ;;  %2045 = vmatprep.subr.bf16.mxu1 %v3882_v27  ;;  %v2727_v25 = vrot.slane %v4780_v36, 1  ;;  %v2729_v12 = vrot.slane %v4783_v23, 1  ;;  %v3803_v40 = vld [vmem:[%s5172_s3 + $0x40] sm:$0xff]  }
 0x1e3   : >> { %v2726_v1 = vsel %vm258_vm0, %v2723_v52, %v2725_v57  ;;  %v1723_v13 = vpack.c.bf16 %v1708_v3, %v1706_v59  ;;  %v2321_v56 = vsel %vm258_vm0, %v4647_v41, %v2320_v6  ;;  %3337 = vmatprep.mubr.msk.bf16.mxu0 %vm298_vm2, %v4761_v49  ;;  %v1709_v50 = vrot.slane %v4651_v46, 2 }
 0x1e4   : >> { %3746 = vrot.lane.b32.xlu1 %v3740_v29, %s3883_s22  ;;  %1919 = vmatpush1.bf16.msra.mxu0 %v3789_v31  ;;  %v3765_v20 = vpack.i.bf16 %v2726_v1, %v2724_v21  ;;  %v3770_v41 = vpack.i.bf16 %v2321_v56, %v4675_v60  ;;  %v2728_v29 = vsel %vm258_vm0, %v2725_v57, %v2727_v25  ;;  %v3796_v60 = vld [vmem:[%s5172_s3] sm:$0xff]   ;;  %v1711_v34 = vrot.slane %v4654_v47, 2  ;;  %v3799_v47 = vld [vmem:[%s5172_s3 + $0xa8] sm:$0xff]  }
 0x1e5   : >> { %1920 = vmatprep.subr.bf16.mxu0 %v3882_v27  ;;  %3351 = vmatprep.mubr.msk.bf16.mxu1 %vm298_vm2, %v1723_v13  ;;  %v2730_v10 = vsel %vm258_vm0, %v2727_v25, %v2729_v12  ;;  %v4824_v22 = vsel %vm283_vm1, %v1707_v62, %v1709_v50  ;;  %v1791_v43 = vrot.slane %v4642_v39, 2  ;;  %v4856_v38 = vrot.slane %v4639_v61, 2 }
 0x1e6   : >> { %3751 = vrot.lane.b32.xlu0 %v3750_v0, %s3883_s22  ;;  %2046 = vmatpush1.bf16.msra.mxu1 %v3792_v19  ;;  %v3775_v30 = vpack.i.bf16 %v2730_v10, %v2728_v29  ;;  %v4828_v54 = vsel %vm283_vm1, %v1709_v50, %v1711_v34  ;;  %v3800_v0 = vld [vmem:[%s5172_s3 + $0x50] sm:$0xff]   ;;  %v2118_v56 = vrot.slane %v4657_v55, 2  ;;  %v2119_v25 = vrot.slane %v4665_v45, 2 }
 0x1e7   : >> { %2047 = vmatprep.subr.bf16.mxu1 %v3882_v27  ;;  %v1725_v31 = vpack.c.bf16 %v4828_v54, %v4824_v22  ;;  %v4862_v42 = vsel %vm283_vm1, %v1787_v17, %v4856_v38  ;;  %v1792_v62 = vsel %vm283_vm1, %v4856_v38, %v1791_v43  ;;  %v3804_v17 = vld [vmem:[%s5172_s3 + $0xf8] sm:$0xff]   ;;  %v2121_v12 = vrot.slane %v4668_v16, 2  ;;  %v3805_v29 = vld [vmem:[%s5172_s3 + $0xf0] sm:$0xff]   ;;  %v3812_v54 = vld [vmem:[%s5172_s3 + $0x80] sm:$0xff]  }
 0x1e8   : >> { %3756 = vrot.lane.b32.xlu1 %v3755_v44, %s3883_s22  ;;  %1921 = vmatpush1.bf16.msra.mxu0 %v3791_v18  ;;  %v1804_v3 = vpack.c.bf16 %v1792_v62, %v4862_v42  ;;  %v3808_v50 = vld [vmem:[%s5172_s3 + $0x90] sm:$0xff]   ;;  %v3811_v22 = vld [vmem:[%s5172_s3 + $0xd8] sm:$0xff]   ;;  %v3818_v43 = vld [vmem:[%s5172_s3 + $0x68] sm:$0xff]  }
 0x1e9   : >> { %1922 = vmatprep.subr.bf16.mxu0 %v3882_v27  ;;  %v3819_v62 = vld [vmem:[%s5172_s3 + $0x118] sm:$0xff]  }
 0x1ea   : >> { %3761 = vrot.lane.b32.xlu0 %v4660_v35, %s3883_s22  ;;  %v3795_v35 = vld [vmem:[%s5172_s3 + $0xb8] sm:$0xff]   ;;  %2048 = vmatpush1.bf16.msra.mxu1 %v3794_v26 }
 0x1eb   : >> { %2049 = vmatprep.subr.bf16.mxu1 %v3882_v27 }
 0x1ec   : >> { %3766 = vrot.lane.b32.xlu1 %v3765_v20, %s3883_s22  ;;  %1923 = vmatpush1.bf16.msra.mxu0 %v3793_v24 }
 0x1ed   : >> { %1932 = vmatprep.subr.bf16.mxu0 %v3882_v27 }
 0x1ee   : >> { %3771 = vrot.lane.b32.xlu0 %v3770_v41, %s3883_s22  ;;  %2050 = vmatpush1.bf16.msra.mxu1 %v3796_v60  ;;  %v3807_v60 = vld [vmem:[%s5172_s3 + $0xe8] sm:$0xff]  }
 0x1ef   : >> { %2059 = vmatprep.subr.bf16.mxu1 %v3882_v27 }
 0x1f0   : >> { %3776 = vrot.lane.b32.xlu1 %v3775_v30, %s3883_s22  ;;  %1933 = vmatpush2.bf16.msra.mxu0 %v3795_v35  ;;  %v2122_v35 = vsel %vm283_vm1, %v2119_v25, %v2121_v12 }
 0x1f1   : >> { %1934 = vmatprep.subr.bf16.mxu0 %v3882_v27 }
 0x1f2   : >> { %2060 = vmatpush2.bf16.msra.mxu1 %v3798_v4 }
 0x1f3   : >> { %2061 = vmatprep.subr.bf16.mxu1 %v3882_v27 }
 0x1f4   : >> { %1935 = vmatpush2.bf16.msra.mxu0 %v3797_v53 }
 0x1f5   : >> { %1936 = vmatprep.subr.bf16.mxu0 %v3882_v27 }
 0x1f6   : >> { %2062 = vmatpush2.bf16.msra.mxu1 %v3800_v0  ;;  %v3814_v0 = vld [vmem:[%s5172_s3 + $0x78] sm:$0xff]  }
 0x1f7   : >> { %2063 = vmatprep.subr.bf16.mxu1 %v3882_v27 }
 0x1f8   : >> { %1937 = vmatpush2.bf16.msra.mxu0 %v3799_v47 }
 0x1f9   : >> { %1938 = vmatprep.subr.bf16.mxu0 %v3882_v27 }
 0x1fa   : >> { %2064 = vmatpush2.bf16.msra.mxu1 %v3802_v9  ;;  %v3816_v9 = vld [vmem:[%s5172_s3 + $0x70] sm:$0xff]  }
 0x1fb   : >> { %2065 = vmatprep.subr.bf16.mxu1 %v3882_v27 }
 0x1fc   : >> { %1939 = vmatpush2.bf16.msra.mxu0 %v3801_v2  ;;  %v3815_v2 = vld [vmem:[%s5172_s3 + $0xc8] sm:$0xff]  }
 0x1fd   : >> { %2242 = vmatprep.subr.bf16.mxu0 %v3882_v27 }
 0x1fe   : >> { %2066 = vmatpush2.bf16.msra.mxu1 %v3803_v40  ;;  %v3817_v40 = vld [vmem:[%s5172_s3 + $0xc0] sm:$0xff]  }
 0x1ff   : >> { %2533 = vmatprep.subr.bf16.mxu1 %v3882_v27 }
 0x24c   : >> { %v3722_v44 = vpop.permute.xlu0 %3721 }
 0x24d   : >> { %v3724_v52 = vunpack.i.h.bf16 %v3722_v44  ;;  %v3723_v57 = vunpack.i.l.bf16 %v3722_v44  ;;  %v3820_v44 = vld [vmem:[%s5172_s3 + $0x60] sm:$0xff]  }
 0x24e   : >> { %v3732_v59 = vpop.permute.xlu1 %3731 }
 0x24f   : >> { %v1798_v39 = vsel %vm298_vm2, %v4614_v5, %v3724_v52  ;;  %v1797_v18 = vsel %vm298_vm2, %v4611_v32, %v3723_v57  ;;  %v3734_v21 = vunpack.i.h.bf16 %v3732_v59  ;;  %v3733_v1 = vunpack.i.l.bf16 %v3732_v59  ;;  %v3821_v52 = vld [vmem:[%s5172_s3 + $0x110] sm:$0xff]   ;;  %v3822_v57 = vld [vmem:[%s5172_s3 + $0xb8] sm:$0xff]  }
 0x250   : >> { %v3727_v6 = vpop.permute.xlu0 %3726  ;;  %v1801_v13 = vpack.c.bf16 %v1798_v39, %v1797_v18  ;;  %v3824_v39 = vld [vmem:[%s5172_s3 + $0xb0] sm:$0xff]  }
 0x251   : >> { %v3729_v19 = vunpack.i.h.bf16 %v3727_v6  ;;  %v3728_v20 = vunpack.i.l.bf16 %v3727_v6  ;;  %v1800_v24 = vsel %vm298_vm2, %v4639_v61, %v3734_v21  ;;  %v1799_v5 = vsel %vm298_vm2, %v4617_v7, %v3733_v1  ;;  %v3806_v7 = vld [vmem:[%s5172_s3 + $0x98] sm:$0xff]  }
 0x252   : >> { %1941 = vmatmul.mubr.bf16.vlgmr.msra.gmra.mxu0 %v1801_v13  ;;  %v3737_v32 = vpop.permute.xlu1 %3736  ;;  %v2123_v1 = vrot.slane %v4671_v58, 2  ;;  %v2125_v6 = vrot.slane %v4681_v48, 2 }
 0x253   : >> { %v1719_v41 = vsel %vm298_vm2, %v4629_v15, %v3729_v19  ;;  %v1718_v26 = vsel %vm298_vm2, %v4626_v11, %v3728_v20  ;;  %2243 = vmatpush1.bf16.msra.mxu0 %v3804_v17  ;;  %v3739_v61 = vunpack.i.h.bf16 %v3737_v32  ;;  %v3738_v10 = vunpack.i.l.bf16 %v3737_v32  ;;  %3338 = vmatprep.mubr.msk.bf16.mxu0 %vm298_vm2, %v1804_v3  ;;  %v3823_v3 = vld [vmem:[%s5172_s3 + $0x108] sm:$0xff]   ;;  %v3825_v20 = vld [vmem:[%s5172_s3 + $0x100] sm:$0xff]  }
 0x254   : >> { %2244 = vmatprep.subr.bf16.mxu0 %v3882_v27  ;;  %v1722_v30 = vpack.c.bf16 %v1719_v41, %v1718_v26  ;;  %v1803_v15 = vpack.c.bf16 %v1800_v24, %v1799_v5  ;;  %v2120_v11 = vsel %vm283_vm1, %v2118_v56, %v2119_v25  ;;  %v3742_v59 = vpop.permute.xlu0 %3741  ;;  %v3826_v56 = vld [vmem:[%s5172_s3 + $0xa8] sm:$0xff]   ;;  %v2124_v25 = vsel %vm283_vm1, %v2121_v12, %v2123_v1  ;;  %v3828_v12 = vld [vmem:[%s5172_s3 + $0x38] sm:$0xff]  }
 0x255   : >> { %v1721_v53 = vsel %vm298_vm2, %v4651_v46, %v3739_v61  ;;  %v1720_v34 = vsel %vm298_vm2, %v4632_v28, %v3738_v10  ;;  %v2136_v4 = vpack.c.bf16 %v2122_v35, %v2120_v11  ;;  %v3809_v46 = vld [vmem:[%s5172_s3 + $0xe0] sm:$0xff]   ;;  %v3810_v28 = vld [vmem:[%s5172_s3 + $0x88] sm:$0xff]   ;;  %v3744_v18 = vunpack.i.h.bf16 %v3742_v59 }
 0x256   : >> { %2068 = vmatmul.mubr.bf16.vlgmr.msra.gmra.mxu1 %v1722_v30  ;;  %v1724_v47 = vpack.c.bf16 %v1721_v53, %v1720_v34  ;;  %v3743_v17 = vunpack.i.l.bf16 %v3742_v59  ;;  %v3747_v21 = vpop.permute.xlu1 %3746  ;;  %v2126_v41 = vsel %vm283_vm1, %v2123_v1, %v2125_v6  ;;  %v2417_v26 = vrot.slane %v4708_v8, 2  ;;  %v3827_v61 = vld [vmem:[%s5172_s3 + $0xa0] sm:$0xff]   ;;  %v3839_v59 = vld [vmem:[%s5172_s3 + $0x8] sm:$0xff]   ;;  %v3846_v6 = vld [vmem:[%s5172_s3 + $0x118] sm:$0xff]  }
 0x257   : >> { %2245 = vmatpush1.bf16.msra.mxu0 %v3805_v29  ;;  %2534 = vmatpush1.bf16.msra.mxu1 %v3806_v7  ;;  %v2132_v13 = vsel %vm298_vm2, %v4665_v45, %v3744_v18  ;;  %v3749_v24 = vunpack.i.h.bf16 %v3747_v21  ;;  %v3748_v5 = vunpack.i.l.bf16 %v3747_v21  ;;  %v3842_v18 = vld [vmem:[%s5172_s3 + $0xc8] sm:$0xff]   ;;  %v3844_v21 = vld [vmem:[%s5172_s3 + $0xc0] sm:$0xff]  }
 0x258   : >> { %2246 = vmatprep.subr.bf16.mxu0 %v3882_v27  ;;  %2535 = vmatprep.subr.bf16.mxu1 %v3882_v27  ;;  %v2131_v19 = vsel %vm298_vm2, %v4657_v55, %v3743_v17  ;;  %v3752_v48 = vpop.permute.xlu0 %3751  ;;  %v3843_v17 = vld [vmem:[%s5172_s3 + $0x58] sm:$0xff]  }
 0x259   : >> { %3352 = vmatprep.mubr.msk.bf16.mxu1 %vm298_vm2, %v1725_v31  ;;  %v3813_v31 = vld [vmem:[%s5172_s3 + $0xd0] sm:$0xff]   ;;  %v2135_v32 = vpack.c.bf16 %v2132_v13, %v2131_v19  ;;  %v2424_v29 = vsel %vm298_vm2, %v4665_v45, %v3749_v24  ;;  %v2423_v7 = vsel %vm298_vm2, %v4657_v55, %v3748_v5  ;;  %v3754_v10 = vunpack.i.h.bf16 %v3752_v48 }
 0x25a   : >> { %1949 = vmatmul.mubr.bf16.gmra.mxu0 %v1803_v15  ;;  %v3753_v30 = vunpack.i.l.bf16 %v3752_v48  ;;  %v3757_v8 = vpop.permute.xlu1 %3756  ;;  %v2138_v15 = vpack.c.bf16 %v2126_v41, %v2124_v25  ;;  %v2427_v45 = vpack.c.bf16 %v2424_v29, %v2423_v7  ;;  %v2418_v55 = vsel %vm283_vm1, %v2123_v1, %v2417_v26  ;;  %v3845_v1 = vld [vmem:[%s5172_s3 + $0x50] sm:$0xff]   ;;  %v3853_v29 = vld [vmem:[%s4608_s17 + $0x28] sm:$0xff] }
 0x25b   : >> { %2247 = vmatpush1.bf16.msra.mxu0 %v3807_v60  ;;  %2536 = vmatpush1.bf16.msra.mxu1 %v3808_v50  ;;  %v2134_v11 = vsel %vm298_vm2, %v4671_v58, %v3754_v10  ;;  %v3829_v60 = vld [vmem:[%s5172_s3 + $0x30] sm:$0xff]   ;;  %v3830_v50 = vld [vmem:[%s5172_s3 + $0xf8] sm:$0xff]   ;;  %v3759_v53 = vunpack.i.h.bf16 %v3757_v8  ;;  %v3758_v34 = vunpack.i.l.bf16 %v3757_v8  ;;  %v2341_v19 = vrot.slane %v4759_v63, 2 }
 0x25c   : >> { %2248 = vmatprep.subr.bf16.mxu0 %v3882_v27  ;;  %2537 = vmatprep.subr.bf16.mxu1 %v3882_v27  ;;  %v2133_v35 = vsel %vm298_vm2, %v4668_v16, %v3753_v30  ;;  %v3762_v13 = vpop.permute.xlu0 %3761  ;;  %v3852_v41 = vld [vmem:[%s4608_s17 + $0x30] sm:$0xff] }
 0x25d   : >> { %3396 = vmatprep.mubr.msk.bf16.mxu0 %vm298_vm2, %v2136_v4  ;;  %v3764_v24 = vunpack.i.h.bf16 %v3762_v13  ;;  %v3763_v5 = vunpack.i.l.bf16 %v3762_v13  ;;  %v2342_v63 = vsel %vm283_vm1, %v4856_v38, %v2341_v19  ;;  %v3850_v38 = vld [vmem:[%s5172_s3 + $0x108] sm:$0xff]  }
 0x25e   : >> { %2076 = vmatmul.mubr.bf16.gmra.mxu1 %v1724_v47  ;;  %v2137_v47 = vpack.c.bf16 %v2134_v11, %v2133_v35  ;;  %v3767_v48 = vpop.permute.xlu1 %3766  ;;  %v2354_v8 = vpack.c.bf16 %v2342_v63, %v4862_v42  ;;  %v3851_v42 = vld [vmem:[%s5172_s3 + $0x100] sm:$0xff]  }
 0x25f   : >> { %2249 = vmatpush1.bf16.msra.mxu0 %v3809_v46  ;;  %2538 = vmatpush1.bf16.msra.mxu1 %v3810_v28  ;;  %v2743_v46 = vrot.slane %v4736_v33, 2  ;;  %v2744_v28 = vrot.slane %v4743_v51, 2  ;;  %v2348_v26 = vsel %vm298_vm2, %v3852_v41, %v3764_v24  ;;  %v2347_v7 = vsel %vm298_vm2, %v3853_v29, %v3763_v5 }
 0x260   : >> { %2250 = vmatprep.subr.bf16.mxu0 %v3882_v27  ;;  %2539 = vmatprep.subr.bf16.mxu1 %v3882_v27  ;;  %v3768_v10 = vunpack.i.l.bf16 %v3767_v48  ;;  %v2351_v30 = vpack.c.bf16 %v2348_v26, %v2347_v7 }
 0x261   : >> { %3444 = vmatprep.mubr.msk.bf16.mxu1 %vm298_vm2, %v2136_v4  ;;  %v2430_v4 = vpack.c.bf16 %v2418_v55, %v2124_v25  ;;  %v2750_v25 = vrot.slane %v4783_v23, 2  ;;  %v3772_v23 = vpop.permute.xlu0 %3771 }
 0x262   : >> { %v2756_v11 = vsel %vm298_vm2, %v4736_v33, %v3768_v10  ;;  %v3774_v35 = vunpack.i.h.bf16 %v3772_v23 }
 0x263   : >> { %2251 = vmatpush1.bf16.msra.mxu0 %v3811_v22  ;;  %2540 = vmatpush1.bf16.msra.mxu1 %v3812_v54  ;;  %v2746_v22 = vrot.slane %v4746_v37, 2  ;;  %v3831_v54 = vld [vmem:[%s5172_s3 + $0x28] sm:$0xff]  }
 0x264   : >> { %2252 = vmatprep.subr.bf16.mxu0 %v3882_v27  ;;  %2541 = vmatprep.subr.bf16.mxu1 %v3882_v27 }
 0x267   : >> { %2253 = vmatpush1.bf16.msra.mxu0 %v3813_v31  ;;  %2542 = vmatpush1.bf16.msra.mxu1 %v3814_v0  ;;  %v3832_v31 = vld [vmem:[%s5172_s3 + $0xf0] sm:$0xff]   ;;  %v2426_v0 = vsel %vm298_vm2, %v4671_v58, %v3759_v53  ;;  %v3834_v58 = vld [vmem:[%s5172_s3 + $0xe8] sm:$0xff]  }
 0x268   : >> { %2254 = vmatprep.subr.bf16.mxu0 %v3882_v27  ;;  %2543 = vmatprep.subr.bf16.mxu1 %v3882_v27 }
 0x26b   : >> { %2255 = vmatpush1.bf16.msra.mxu0 %v3815_v2  ;;  %2544 = vmatpush1.bf16.msra.mxu1 %v3816_v9  ;;  %v2425_v2 = vsel %vm298_vm2, %v4668_v16, %v3758_v34  ;;  %v3833_v16 = vld [vmem:[%s5172_s3 + $0x20] sm:$0xff]  }
 0x26c   : >> { %2256 = vmatprep.subr.bf16.mxu0 %v3882_v27  ;;  %2545 = vmatprep.subr.bf16.mxu1 %v3882_v27  ;;  %v2429_v9 = vpack.c.bf16 %v2426_v0, %v2425_v2 }
 0x26f   : >> { %2257 = vmatpush1.bf16.msra.mxu0 %v3817_v40  ;;  %2546 = vmatpush1.bf16.msra.mxu1 %v3818_v43  ;;  %v2745_v40 = vsel %vm283_vm1, %v2743_v46, %v2744_v28  ;;  %v2747_v43 = vsel %vm283_vm1, %v2744_v28, %v2746_v22 }
 0x270   : >> { %2266 = vmatprep.subr.bf16.mxu0 %v3882_v27  ;;  %2547 = vmatprep.subr.bf16.mxu1 %v3882_v27 }
 0x273   : >> { %2267 = vmatpush2.bf16.msra.mxu0 %v3819_v62  ;;  %2548 = vmatpush1.bf16.msra.mxu1 %v3820_v44  ;;  %v2761_v62 = vpack.c.bf16 %v2747_v43, %v2745_v40  ;;  %v3835_v44 = vld [vmem:[%s5172_s3 + $0x18] sm:$0xff]  }
 0x274   : >> { %2268 = vmatprep.subr.bf16.mxu0 %v3882_v27  ;;  %2557 = vmatprep.subr.bf16.mxu1 %v3882_v27 }
 0x277   : >> { %2269 = vmatpush2.bf16.msra.mxu0 %v3821_v52  ;;  %2558 = vmatpush2.bf16.msra.mxu1 %v3822_v57  ;;  %v3836_v52 = vld [vmem:[%s5172_s3 + $0xe0] sm:$0xff]   ;;  %v3838_v57 = vld [vmem:[%s5172_s3 + $0xd8] sm:$0xff]  }
 0x278   : >> { %2270 = vmatprep.subr.bf16.mxu0 %v3882_v27  ;;  %2559 = vmatprep.subr.bf16.mxu1 %v3882_v27 }
 0x27b   : >> { %2271 = vmatpush2.bf16.msra.mxu0 %v3823_v3  ;;  %2560 = vmatpush2.bf16.msra.mxu1 %v3824_v39  ;;  %v3840_v3 = vld [vmem:[%s5172_s3 + $0xd0] sm:$0xff]   ;;  %v3841_v39 = vld [vmem:[%s5172_s3] sm:$0xff]  }
 0x27c   : >> { %2272 = vmatprep.subr.bf16.mxu0 %v3882_v27  ;;  %2561 = vmatprep.subr.bf16.mxu1 %v3882_v27 }
 0x27f   : >> { %2273 = vmatpush2.bf16.msra.mxu0 %v3825_v20  ;;  %2562 = vmatpush2.bf16.msra.mxu1 %v3826_v56  ;;  %v3847_v20 = vld [vmem:[%s5172_s3 + $0x48] sm:$0xff]   ;;  %v3848_v56 = vld [vmem:[%s5172_s3 + $0x110] sm:$0xff]  }
 0x280   : >> { %2563 = vmatprep.subr.bf16.mxu1 %v3882_v27  ;;  %2660 = vmatprep.subr.bf16.mxu0 %v3882_v27 }
 0x282   : >> { %2275 = vmatmul.mubr.bf16.vlgmr.msra.gmra.mxu0 %v2135_v32  ;;  %v2748_v32 = vrot.slane %v4780_v36, 2 }
 0x283   : >> { %2564 = vmatpush2.bf16.msra.mxu1 %v3827_v61  ;;  %2661 = vmatpush1.bf16.msra.mxu0 %v3828_v12  ;;  %v3849_v61 = vld [vmem:[%s5172_s3 + $0x40] sm:$0xff]   ;;  %v3769_v12 = vunpack.i.h.bf16 %v3767_v48 }
 0x284   : >> { %2662 = vmatprep.subr.bf16.mxu0 %v3882_v27  ;;  %2866 = vmatprep.subr.bf16.mxu1 %v3882_v27 }
 0x285   : >> { %3397 = vmatprep.mubr.msk.bf16.mxu0 %vm298_vm2, %v2138_v15  ;;  %v2749_v15 = vsel %vm283_vm1, %v2746_v22, %v2748_v32  ;;  %v2757_v55 = vsel %vm298_vm2, %v4743_v51, %v3769_v12  ;;  %v3855_v51 = vld [vmem:[%s4608_s17 + $0x38] sm:$0xff] }
 0x286   : >> { %2566 = vmatmul.mubr.bf16.vlgmr.msra.gmra.mxu1 %v2427_v45  ;;  %v2751_v45 = vsel %vm283_vm1, %v2748_v32, %v2750_v25  ;;  %v2760_v53 = vpack.c.bf16 %v2757_v55, %v2756_v11 }
 0x287   : >> { %2663 = vmatpush1.bf16.msra.mxu0 %v3829_v60  ;;  %2867 = vmatpush1.bf16.msra.mxu1 %v3830_v50  ;;  %v3773_v60 = vunpack.i.l.bf16 %v3772_v23  ;;  %v3777_v50 = vpop.permute.xlu1 %3776  ;;  %v2763_v34 = vpack.c.bf16 %v2751_v45, %v2749_v15 }
 0x288   : >> { %2664 = vmatprep.subr.bf16.mxu0 %v3882_v27  ;;  %2868 = vmatprep.subr.bf16.mxu1 %v3882_v27  ;;  %v3779_v33 = vunpack.i.h.bf16 %v3777_v50  ;;  %v3778_v28 = vunpack.i.l.bf16 %v3777_v50 }
 0x289   : >> { %3445 = vmatprep.mubr.msk.bf16.mxu1 %vm298_vm2, %v2430_v4  ;;  %v3854_v4 = vld [vmem:[%s4608_s17 + $0x40] sm:$0xff]  ;;  %v2349_v46 = vsel %vm298_vm2, %v3855_v51, %v3773_v60  ;;  %s3514_s17 = sshll.u32 %s3878_s11, 3  ;;  %s1667_s11 = sadd.s32 1, %s3878_s11  }
 0x28a   : >> { %2283 = vmatmul.mubr.bf16.gmra.mxu0 %v2137_v47  ;;  %v2350_v47 = vsel %vm298_vm2, %v3854_v4, %v3774_v35  ;;  %s2949_s10 = scalar_lea.vmem %s3930_s26, %s3514_s17  ;;  %p1664_p5 = scmp.ge.s32.totalorder %s1667_s11, 16  }
 0x28b   : >> { %2665 = vmatpush1.bf16.msra.mxu0 %v3831_v54  ;;  %2869 = vmatpush1.bf16.msra.mxu1 %v3832_v31  ;;  %v2353_v22 = vpack.c.bf16 %v2350_v47, %v2349_v46  ;;  %v2758_v54 = vsel %vm298_vm2, %v4746_v37, %v3778_v28 }
 0x28c   : >> { %2666 = vmatprep.subr.bf16.mxu0 %v3882_v27  ;;  %2870 = vmatprep.subr.bf16.mxu1 %v3882_v27 }
 0x28d   : >> { %3458 = vmatprep.mubr.msk.bf16.mxu0 %vm298_vm2, %v4761_v49  ;;  %v3837_v49 = vld [vmem:[%s5172_s3 + $0x10] sm:$0xff]  }
 0x28e   : >> { %2574 = vmatmul.mubr.bf16.gmra.mxu1 %v2429_v9 }
 0x28f   : >> { %2667 = vmatpush1.bf16.msra.mxu0 %v3833_v16  ;;  %2871 = vmatpush1.bf16.msra.mxu1 %v3834_v58 }
 0x290   : >> { %2668 = vmatprep.subr.bf16.mxu0 %v3882_v27  ;;  %2872 = vmatprep.subr.bf16.mxu1 %v3882_v27 }
 0x291   : >> { %3503 = vmatprep.mubr.msk.bf16.mxu1 %vm298_vm2, %v2761_v62 }
 0x293   : >> { %2669 = vmatpush1.bf16.msra.mxu0 %v3835_v44  ;;  %2873 = vmatpush1.bf16.msra.mxu1 %v3836_v52 }
 0x294   : >> { %2670 = vmatprep.subr.bf16.mxu0 %v3882_v27  ;;  %2874 = vmatprep.subr.bf16.mxu1 %v3882_v27 }
 0x297   : >> { %2671 = vmatpush1.bf16.msra.mxu0 %v3837_v49  ;;  %2875 = vmatpush1.bf16.msra.mxu1 %v3838_v57 }
 0x298   : >> { %2672 = vmatprep.subr.bf16.mxu0 %v3882_v27  ;;  %2876 = vmatprep.subr.bf16.mxu1 %v3882_v27 }
 0x29b   : >> { %2673 = vmatpush1.bf16.msra.mxu0 %v3839_v59  ;;  %2877 = vmatpush1.bf16.msra.mxu1 %v3840_v3 }
 0x29c   : >> { %2674 = vmatprep.subr.bf16.mxu0 %v3882_v27  ;;  %2878 = vmatprep.subr.bf16.mxu1 %v3882_v27 }
 0x29f   : >> { %2675 = vmatpush1.bf16.msra.mxu0 %v3841_v39  ;;  %2879 = vmatpush1.bf16.msra.mxu1 %v3842_v18 }
 0x2a0   : >> { %2684 = vmatprep.subr.bf16.mxu0 %v3882_v27  ;;  %2880 = vmatprep.subr.bf16.mxu1 %v3882_v27 }
 0x2a3   : >> { %2685 = vmatpush2.bf16.msra.mxu0 %v3843_v17  ;;  %2881 = vmatpush1.bf16.msra.mxu1 %v3844_v21 }
 0x2a4   : >> { %2686 = vmatprep.subr.bf16.mxu0 %v3882_v27  ;;  %2890 = vmatprep.subr.bf16.mxu1 %v3882_v27 }
 0x2a7   : >> { %2687 = vmatpush2.bf16.msra.mxu0 %v3845_v1  ;;  %2891 = vmatpush2.bf16.msra.mxu1 %v3846_v6 }
 0x2a8   : >> { %2688 = vmatprep.subr.bf16.mxu0 %v3882_v27  ;;  %2892 = vmatprep.subr.bf16.mxu1 %v3882_v27 }
 0x2ab   : >> { %2689 = vmatpush2.bf16.msra.mxu0 %v3847_v20  ;;  %2893 = vmatpush2.bf16.msra.mxu1 %v3848_v56 }
 0x2ac   : >> { %2690 = vmatprep.subr.bf16.mxu0 %v3882_v27  ;;  %2894 = vmatprep.subr.bf16.mxu1 %v3882_v27 }
 0x2af   : >> { %2691 = vmatpush2.bf16.msra.mxu0 %v3849_v61  ;;  %2895 = vmatpush2.bf16.msra.mxu1 %v3850_v38 }
 0x2b0   : >> { %2896 = vmatprep.subr.bf16.mxu1 %v3882_v27  ;;  %v2759_v27 = vsel %vm298_vm2, %v4780_v36, %v3779_v33 }
 0x2b1   : >> { %v2762_v31 = vpack.c.bf16 %v2759_v27, %v2758_v54 }
 0x2b2   : >> { %2693 = vmatmul.mubr.bf16.vlgmr.msra.gmra.mxu0 %v2351_v30 }
 0x2b3   : >> { %2897 = vmatpush2.bf16.msra.mxu1 %v3851_v42  ;;  %3459 = vmatprep.mubr.msk.bf16.mxu0 %vm298_vm2, %v2354_v8 }
 0x2b6   : >> { %2899 = vmatmul.mubr.bf16.vlgmr.msra.gmra.mxu1 %v2760_v53 }
 0x2b7   : >> { %3504 = vmatprep.mubr.msk.bf16.mxu1 %vm298_vm2, %v2763_v34 }
 0x2ba   : >> { %2701 = vmatmul.mubr.bf16.gmra.mxu0 %v2353_v22 }
 0x2be   : >> { %2907 = vmatmul.mubr.bf16.gmra.mxu1 %v2762_v31 }
 0x312   : >> { %v1942_v0 = vpop.f32.mrf.mxu0 }
 0x314   : >> { %v1944_v2 = vpop.f32.mrf.mxu0 }
 0x316   : >> { %v1945_v9 = vpop.f32.mrf.mxu0  ;;  %v2069_v40 = vpop.f32.mrf.mxu1 }
 0x317   : >> { %v2070_v39 = vadd.f32 %v2069_v40, %v1942_v0 }
 0x318   : >> { %v1947_v43 = vpop.f32.mrf.mxu0  ;;  %v2071_v16 = vpop.f32.mrf.mxu1 }
 0x31a   : >> { %v2072_v58 = vpop.f32.mrf.mxu1  ;;  %v1950_v62 = vpop.f32.mrf.mxu0 }
 0x31b   : >> { %v2073_v1 = vadd.f32 %v2072_v58, %v1945_v9 }
 0x31c   : >> { %v2074_v44 = vpop.f32.mrf.mxu1  ;;  %v1952_v52 = vpop.f32.mrf.mxu0 }
 0x31e   : >> { %v2077_v49 = vpop.f32.mrf.mxu1  ;;  %v1953_v36 = vpop.f32.mrf.mxu0 }
 0x31f   : >> { %v2078_v24 = vadd.f32 %v2077_v49, %v1950_v62 }
 0x320   : >> { %v2079_v57 = vpop.f32.mrf.mxu1  ;;  %v1955_v59 = vpop.f32.mrf.mxu0 }
 0x322   : >> { %v2080_v37 = vpop.f32.mrf.mxu1 }
 0x323   : >> { %v2081_v41 = vadd.f32 %v2080_v37, %v1953_v36 }
 0x324   : >> { %v2082_v3 = vpop.f32.mrf.mxu1 }
 0x342   : >> { %v2276_v18 = vpop.f32.mrf.mxu0 }
 0x343   : >> { %v2291_v17 = vadd.f32 %v2276_v18, %v2070_v39 }
 0x344   : >> { %v2278_v21 = vpop.f32.mrf.mxu0 }
 0x345   : >> { %2295 = vst.msk [vmem:[#allocation3] sm:$0xff] %vm298_vm2, %v2291_v17 }
 0x346   : >> { %v2279_v6 = vpop.f32.mrf.mxu0  ;;  %v2567_v13 = vpop.f32.mrf.mxu1 }
 0x347   : >> { %v2292_v19 = vadd.f32 %v2279_v6, %v2073_v1 }
 0x348   : >> { %v2281_v20 = vpop.f32.mrf.mxu0  ;;  %v2569_v56 = vpop.f32.mrf.mxu1 }
 0x349   : >> { %2296 = vst.msk [vmem:[#allocation3 + $0x8] sm:$0xff] %vm298_vm2, %v2292_v19 }
 0x34a   : >> { %v2284_v5 = vpop.f32.mrf.mxu0  ;;  %v2570_v48 = vpop.f32.mrf.mxu1 }
 0x34b   : >> { %v2293_v63 = vadd.f32 %v2284_v5, %v2078_v24 }
 0x34c   : >> { %v2286_v32 = vpop.f32.mrf.mxu0  ;;  %v2572_v25 = vpop.f32.mrf.mxu1  ;;  %v2299_v11 = vld [vmem:[#allocation3] sm:$0xff] }
 0x34d   : >> { %2297 = vst.msk [vmem:[#allocation3 + $0x10] sm:$0xff] %vm298_vm2, %v2293_v63 }
 0x34e   : >> { %v2287_v26 = vpop.f32.mrf.mxu0  ;;  %v2575_v29 = vpop.f32.mrf.mxu1 }
 0x34f   : >> { %v2294_v7 = vadd.f32 %v2287_v26, %v2081_v41 }
 0x350   : >> { %v2577_v61 = vpop.f32.mrf.mxu1  ;;  %v2289_v38 = vpop.f32.mrf.mxu0  ;;  %v2300_v47 = vld [vmem:[#allocation3 + $0x8] sm:$0xff] }
 0x351   : >> { %2298 = vst.msk [vmem:[#allocation3 + $0x18] sm:$0xff] %vm298_vm2, %v2294_v7 }
 0x352   : >> { %v2578_v12 = vpop.f32.mrf.mxu1 }
 0x354   : >> { %v2580_v10 = vpop.f32.mrf.mxu1  ;;  %v2301_v31 = vld [vmem:[#allocation3 + $0x10] sm:$0xff] }
 0x358   : >> { %v2302_v58 = vld [vmem:[#allocation3 + $0x18] sm:$0xff] }
 0x372   : >> { %v2694_v23 = vpop.f32.mrf.mxu0 }
 0x373   : >> { %v2695_v8 = vadd.f32 %v2694_v23, %v2567_v13 }
 0x374   : >> { %v2696_v30 = vpop.f32.mrf.mxu0 }
 0x376   : >> { %v2697_v15 = vpop.f32.mrf.mxu0  ;;  %v2900_v45 = vpop.f32.mrf.mxu1 }
 0x377   : >> { %v2915_v55 = vadd.f32 %v2900_v45, %v2695_v8  ;;  %v2698_v60 = vadd.f32 %v2697_v15, %v2570_v48 }
 0x378   : >> { %v2699_v42 = vpop.f32.mrf.mxu0  ;;  %v2902_v35 = vpop.f32.mrf.mxu1 }
 0x379   : >> { %v2919_v50 = vmax.f32 %v2299_v11, %v2915_v55 }
 0x37a   : >> { %v2702_v53 = vpop.f32.mrf.mxu0  ;;  %v2903_v34 = vpop.f32.mrf.mxu1 }
 0x37b   : >> { %2923 = vst.msk [vmem:[#allocation3] sm:$0xff] %vm298_vm2, %v2919_v50  ;;  %v2916_v4 = vadd.f32 %v2903_v34, %v2698_v60  ;;  %v2703_v33 = vadd.f32 %v2702_v53, %v2575_v29 }
 0x37c   : >> { %v2704_v51 = vpop.f32.mrf.mxu0  ;;  %v2905_v46 = vpop.f32.mrf.mxu1 }
 0x37d   : >> { %v2920_v28 = vmax.f32 %v2300_v47, %v2916_v4 }
 0x37e   : >> { %v2705_v22 = vpop.f32.mrf.mxu0  ;;  %v2908_v27 = vpop.f32.mrf.mxu1 }
 0x37f   : >> { %2924 = vst.msk [vmem:[#allocation3 + $0x8] sm:$0xff] %vm298_vm2, %v2920_v28  ;;  %v2917_v54 = vadd.f32 %v2908_v27, %v2703_v33  ;;  %v2706_v9 = vadd.f32 %v2705_v22, %v2578_v12 }
 0x380   : >> { %v2707_v0 = vpop.f32.mrf.mxu0  ;;  %v2910_v2 = vpop.f32.mrf.mxu1 }
 0x381   : >> { %v2921_v40 = vmax.f32 %v2301_v31, %v2917_v54 }
 0x382   : >> { %v2911_v43 = vpop.f32.mrf.mxu1 }
 0x383   : >> { %2925 = vst.msk [vmem:[#allocation3 + $0x10] sm:$0xff] %vm298_vm2, %v2921_v40  ;;  %v2918_v16 = vadd.f32 %v2911_v43, %v2706_v9 }
 0x384   : >> { %v2913_v62 = vpop.f32.mrf.mxu1 }
 0x385   : >> { %v2922_v44 = vmax.f32 %v2302_v58, %v2918_v16 }
 0x386   : >> { %v2927_v52 = vld [vmem:[#allocation3] ss:$2 sm:$0xff]  ;;  %v2931_v49 = vld [vmem:[#allocation3 + $0x1] ss:$2 sm:$0xff] }
 0x387   : >> { %v2934_v36 = vmax.f32 %v2927_v52, %v2931_v49  ;;  %2926 = vst.msk [vmem:[#allocation3 + $0x18] sm:$0xff] %vm298_vm2, %v2922_v44 }
 0x389   : >> { %v2936_v57 = vadd.f32 %v4588_v14, %v2934_v36 }
 0x38b   : >> { %v2938_v59 = vmax.f32 %v2936_v57, 0.0 }
 0x38d   : >> { %v3512_v37 = vpack.c.bf16 %v2938_v59, %v2938_v59 }
 0x38e   : >> { %v2929_v3 = vld [vmem:[#allocation3 + $0x10] ss:$2 sm:$0xff]  ;;  %v2933_v39 = vld [vmem:[#allocation3 + $0x11] ss:$2 sm:$0xff] }
 0x38f   : >> { %2951 = vst.msk [vmem:[%s2949_s10] sm:$0xf] %vm2950_vm4, %v3512_v37  ;;  %v2935_v18 = vmax.f32 %v2929_v3, %v2933_v39 }
 0x391   : >> { %v2937_v17 = vadd.f32 %v4588_v14, %v2935_v18 }
 0x393   : >> { %v2939_v21 = vmax.f32 %v2937_v17, 0.0  ;;  %1666 = sbr.rel (!%p1664_p5) target bundleno = 462 (0x1ce), region = 113 }
 0x395   : >> { %v3513_v1 = vpack.c.bf16 %v2939_v21, %v2939_v21 }
 0x397   : >> { %2952 = vst.msk [vmem:[%s2949_s10 + $0x4] sm:$0xf] %vm2950_vm4, %v3513_v1 }
 0x398 PF: > { %s15_s18 = sadd.s32 1, %s3870_s18  }
 0x399   : > { %p12_p6 = scmp.ge.s32.totalorder %s15_s18, 4  }
 0x39b   :  { %14 = sbr.rel (!%p12_p6) target bundleno = 1 (0x1), region = 124 }

// kernel: convnet_forward.8
= control target key start
LH: loop header
LB: loop body
LE: loop exit
PB: predicated region body
PF: predicated region fallthrough
CT: control target
= control target key end

     0   :  { %s4408_s18 = smov 0   ;;  %s5404_s0 = inlined_call_operand.vmem [shape: bf16[2,16,16,64], index: 0, kind: input, shape index: {}]   ;;  %s5405_s1 = inlined_call_operand.vmem [shape: bf16[3,192,128], index: 1, kind: input, shape index: {}]   ;;  %s5406_s2 = inlined_call_operand.vmem [shape: f32[1,128], index: 2, kind: input, shape index: {}]   ;;  %s5407_s3 = inlined_call_operand.vmem [shape: bf16[3,384,128], index: 3, kind: input, shape index: {}]   ;;  %s5408_s4 = inlined_call_operand.vmem [shape: f32[1,128], index: 4, kind: input, shape index: {}]   ;;  %s5409_s5 = inlined_call_operand.vmem [shape: bf16[2,6,6,128], index: 5, kind: output, shape index: {}]  }
   0x1 LB: > { %s3162_s19 = sadd.s32 4294967295, %s4364_s18   ;;  %p3166_p0 = scmp.ge.s32.totalorder %s4364_s18, 1  ;;  %s4364_s18 = sphi %s4408_s18, %s15_s18  }
   0x2   : > { %p187_p1 = scmp.lt.s32.totalorder %s4364_s18, 3 }
   0x4   : > { %p188_p2 = pnand %p3166_p0, %p187_p1 }
   0x5   : > { %p215_p3 = scmp.lt.s32.totalorder (!%p188_p2), %s3162_s19, 1  ;;  %s4431_s30 = smov (!%p188_p2), 0  }
   0x6   : > { %191 = sbr.rel (%p188_p2) target bundleno = 867 (0x363), region = 40 }
   0xb   : > { %v4419_v0 = vld [vmem:[%s5406_s2] ss:$0 sm:$0xff]  ;;  %s5411_s19 = smov (!%p215_p3, %s3162_s19), 1 }
   0xc   : > { %s3727_s22 = sshll.u32 %s5411_s19, 7  ;;  %s4074_s23 = smul.u32 24, %s5411_s19 }
   0xd   : > { %s4424_s26 = scalar_lea.vmem %s5404_s0, %s3727_s22 }
   0xe   : > { %s4429_s29 = scalar_lea.vmem %s5409_s5, %s4074_s23 }
   0xf LB: >> { %v4133_v1 = vld [vmem:[%s5405_s1 + $0x98] sm:$0xff]   ;;  %v4374_v2 = vmov 0   ;;  %s3729_s8 = sshll.u32 %s4368_s30, 4  ;;  %v4134_v3 = vld [vmem:[%s5405_s1 + $0x90] sm:$0xff]   ;;  %vm249_vm0 = vcmask 1046528   ;;  %v4136_v12 = vld [vmem:[%s5405_s1 + $0x88] sm:$0xff]   ;;  %s4368_s30 = sphi %s4431_s30, %s238_s30  }
  0x10   : >> { %422 = vmatprep.subr.bf16.mxu0 %v4374_v2  ;;  %538 = vmatprep.subr.bf16.mxu1 %v4374_v2  ;;  %s4446_s11 = scalar_lea.vmem %s4424_s26, %s3729_s8  ;;  %v4135_v4 = vld [vmem:[%s5405_s1 + $0x38] sm:$0xff]   ;;  %v4137_v15 = vld [vmem:[%s5405_s1 + $0x30] sm:$0xff]   ;;  %vm259_vm1 = vcmask 1045504   ;;  %v4139_v24 = vld [vmem:[%s5405_s1 + $0x28] sm:$0xff]   ;;  %s4375_s23 = smov 64   ;;  %vm265_vm2 = vcmask 523264  }
  0x11   : >> { %423 = vmatpush1.bf16.msra.mxu0 %v4133_v1  ;;  %v3763_v5 = vld [vmem:[%s4446_s11 + $0x8] sm:$0xff]   ;;  %v3740_v6 = vld [vmem:[%s4446_s11] sm:$0xff]   ;;  %v3764_v7 = vld [vmem:[%s4446_s11 + $0x10] sm:$0xff]   ;;  %539 = vmatpush1.bf16.msra.mxu1 %v4135_v4  ;;  %s3732_s6 = sshll.u32 %s4368_s30, 5  ;;  %s238_s30 = sadd.s32 1, %s4368_s30  }
  0x12   : >> { %424 = vmatprep.subr.bf16.mxu0 %v4374_v2  ;;  %v4455_v8 = vunpack.c.l.bf16 %v3763_v5  ;;  %v4457_v9 = vunpack.c.h.bf16 %v3763_v5  ;;  %v4459_v10 = vunpack.c.l.bf16 %v3740_v6  ;;  %v4461_v11 = vunpack.c.h.bf16 %v3740_v6  ;;  %540 = vmatprep.subr.bf16.mxu1 %v4374_v2  ;;  %v4138_v28 = vld [vmem:[%s5405_s1 + $0x80] sm:$0xff]   ;;  %v4140_v37 = vld [vmem:[%s5405_s1 + $0x78] sm:$0xff]   ;;  %v4142_v44 = vld [vmem:[%s5405_s1 + $0x70] sm:$0xff]   ;;  %s755_s7 = scalar_lea.vmem [#allocation2], %s3732_s6  ;;  %p235_p4 = scmp.ge.s32.totalorder %s238_s30, 7  }
  0x13   : >> { %v4466_v13 = vunpack.c.l.bf16 %v3764_v7  ;;  %v4468_v14 = vunpack.c.h.bf16 %v3764_v7  ;;  %v4141_v35 = vld [vmem:[%s5405_s1 + $0x20] sm:$0xff]   ;;  %v3767_v39 = vld [vmem:[%s4446_s11 + $0x18] sm:$0xff]   ;;  %v4145_v48 = vld [vmem:[%s5405_s1 + $0x10] sm:$0xff]   ;;  %s4825_s10 = smov (%p235_p4), 0  }
  0x14   : >> { %v304_v16 = vrot.slane %v4455_v8, 1  ;;  %v305_v17 = vrot.slane %v4457_v9, 1  ;;  %v250_v18 = vrot.slane %v4459_v10, 1  ;;  %v251_v19 = vrot.slane %v4461_v11, 1  ;;  %v4143_v43 = vld [vmem:[%s5405_s1 + $0x18] sm:$0xff]   ;;  %v4144_v50 = vld [vmem:[%s5405_s1 + $0x68] sm:$0xff]  }
  0x15   : >> { %425 = vmatpush1.bf16.msra.mxu0 %v4134_v3  ;;  %v589_v20 = vrot.slane %v4466_v13, 1  ;;  %v590_v21 = vrot.slane %v4468_v14, 1  ;;  %541 = vmatpush1.bf16.msra.mxu1 %v4137_v15  ;;  %v313_v25 = vrot.slane %v4455_v8, 2  ;;  %v314_v29 = vrot.slane %v4457_v9, 2  ;;  %v4147_v51 = vld [vmem:[%s5405_s1 + $0x8] sm:$0xff]   ;;  %v4146_v52 = vld [vmem:[%s5405_s1 + $0x60] sm:$0xff]  }
  0x16   : >> { %426 = vmatprep.subr.bf16.mxu0 %v4374_v2  ;;  %v306_v22 = vsel %vm249_vm0, %v304_v16, %v305_v17  ;;  %v252_v23 = vsel %vm249_vm0, %v250_v18, %v251_v19  ;;  %542 = vmatprep.subr.bf16.mxu1 %v4374_v2  ;;  %v260_v31 = vrot.slane %v4459_v10, 2  ;;  %v261_v34 = vrot.slane %v4461_v11, 2  ;;  %v4149_v53 = vld [vmem:[%s5405_s1] sm:$0xff]   ;;  %v4148_v54 = vld [vmem:[%s5405_s1 + $0xb8] sm:$0xff]   ;;  %v4150_v56 = vld [vmem:[%s5405_s1 + $0xb0] sm:$0xff]  }
  0x17   : >> { %v4103_v26 = vpack.i.bf16 %v305_v17, %v306_v22  ;;  %v591_v27 = vsel %vm249_vm0, %v589_v20, %v590_v21  ;;  %v4108_v32 = vpack.i.bf16 %v251_v19, %v252_v23  ;;  %v315_v33 = vsel %vm259_vm1, %v313_v25, %v314_v29  ;;  %v4151_v55 = vld [vmem:[%s5405_s1 + $0x58] sm:$0xff]   ;;  %v4153_v57 = vld [vmem:[%s5405_s1 + $0x50] sm:$0xff]   ;;  %v4152_v58 = vld [vmem:[%s5405_s1 + $0xa8] sm:$0xff]  }
  0x18   : >> { %v4113_v30 = vpack.i.bf16 %v590_v21, %v591_v27  ;;  %v4502_v36 = vpack.c.bf16 %v314_v29, %v315_v33  ;;  %v262_v38 = vsel %vm259_vm1, %v260_v31, %v261_v34  ;;  %v4514_v41 = vunpack.c.l.bf16 %v3767_v39  ;;  %v4155_v59 = vld [vmem:[%s5405_s1 + $0x48] sm:$0xff]   ;;  %v4154_v60 = vld [vmem:[%s5405_s1 + $0xa0] sm:$0xff]   ;;  %v4158_v22 = vld [vmem:[%s5405_s1 + $0xf0] sm:$0xff]  }
  0x19   : >> { %427 = vmatpush1.bf16.msra.mxu0 %v4136_v12  ;;  %4104 = vrot.lane.b32.xlu0 %v4103_v26, %s4375_s23  ;;  %v269_v40 = vpack.c.bf16 %v261_v34, %v262_v38  ;;  %v4516_v42 = vunpack.c.h.bf16 %v3767_v39  ;;  %v4156_v61 = vld [vmem:[%s5405_s1 + $0x40] sm:$0xff]   ;;  %v598_v62 = vrot.slane %v4466_v13, 2  ;;  %v599_v63 = vrot.slane %v4468_v14, 2  ;;  %v4157_v12 = vld [vmem:[%s5405_s1 + $0xf8] sm:$0xff]   ;;  %v4166_v29 = vld [vmem:[%s5405_s1 + $0xd0] sm:$0xff]  }
  0x1a   : >> { %428 = vmatprep.subr.bf16.mxu0 %v4374_v2  ;;  %4114 = vrot.lane.b32.xlu1 %v4113_v30, %s4375_s23  ;;  %v1096_v45 = vrot.slane %v4514_v41, 1  ;;  %v4159_v23 = vld [vmem:[%s5405_s1 + $0x98] sm:$0xff]   ;;  %v4162_v25 = vld [vmem:[%s5405_s1 + $0xe0] sm:$0xff]   ;;  %v4168_v31 = vld [vmem:[%s5405_s1 + $0xc8] sm:$0xff]  }
  0x1b   : >> { %543 = vmatpush1.bf16.msra.mxu1 %v4139_v24  ;;  %3214 = vmatprep.mubr.msk.bf16.mxu0 %vm265_vm2, %v4502_v36  ;;  %v1097_v46 = vrot.slane %v4516_v42, 1  ;;  %v600_v3 = vsel %vm259_vm1, %v598_v62, %v599_v63  ;;  %v4164_v27 = vld [vmem:[%s5405_s1 + $0xd8] sm:$0xff]   ;;  %v4170_v33 = vld [vmem:[%s5405_s1 + $0xc0] sm:$0xff]   ;;  %v4171_v34 = vld [vmem:[%s5405_s1 + $0x68] sm:$0xff]  }
  0x1c   : >> { %544 = vmatprep.subr.bf16.mxu1 %v4374_v2  ;;  %3227 = vmatprep.mubr.msk.bf16.mxu1 %vm265_vm2, %v269_v40  ;;  %v606_v15 = vpack.c.bf16 %v599_v63, %v600_v3  ;;  %v4174_v39 = vld [vmem:[%s5405_s1 + $0x110] sm:$0xff]   ;;  %v4175_v40 = vld [vmem:[%s5405_s1 + $0xb8] sm:$0xff]  }
  0x1d   : >> { %429 = vmatpush1.bf16.msra.mxu0 %v4138_v28  ;;  %4109 = vrot.lane.b32.xlu0 %v4108_v32, %s4375_s23  ;;  %v1098_v47 = vsel %vm249_vm0, %v1096_v45, %v1097_v46  ;;  %v4165_v28 = vld [vmem:[%s5405_s1 + $0x80] sm:$0xff]   ;;  %v4169_v32 = vld [vmem:[%s5405_s1 + $0x70] sm:$0xff]  }
  0x1e   : >> { %430 = vmatprep.subr.bf16.mxu0 %v4374_v2  ;;  %4119 = vrot.lane.b32.xlu1 %v4113_v30, %s4375_s23  ;;  %v4128_v49 = vpack.i.bf16 %v1097_v46, %v1098_v47  ;;  %v4167_v30 = vld [vmem:[%s5405_s1 + $0x78] sm:$0xff]   ;;  %v4185_v3 = vld [vmem:[%s5405_s1 + $0xf0] sm:$0xff]  }
  0x1f   : >> { %545 = vmatpush1.bf16.msra.mxu1 %v4141_v35  ;;  %v4172_v35 = vld [vmem:[%s5405_s1 + $0x118] sm:$0xff]  }
  0x20   : >> { %546 = vmatprep.subr.bf16.mxu1 %v4374_v2 }
  0x21   : >> { %431 = vmatpush1.bf16.msra.mxu0 %v4140_v37  ;;  %4124 = vrot.lane.b32.xlu0 %v4103_v26, %s4375_s23  ;;  %v4163_v26 = vld [vmem:[%s5405_s1 + $0x88] sm:$0xff]   ;;  %v4173_v37 = vld [vmem:[%s5405_s1 + $0x60] sm:$0xff]  }
  0x22   : >> { %432 = vmatprep.subr.bf16.mxu0 %v4374_v2  ;;  %4129 = vrot.lane.b32.xlu1 %v4128_v49, %s4375_s23 }
  0x23   : >> { %547 = vmatpush1.bf16.msra.mxu1 %v4143_v43  ;;  %v4176_v43 = vld [vmem:[%s5405_s1 + $0x108] sm:$0xff]  }
  0x24   : >> { %548 = vmatprep.subr.bf16.mxu1 %v4374_v2 }
  0x25   : >> { %433 = vmatpush1.bf16.msra.mxu0 %v4142_v44  ;;  %v4177_v44 = vld [vmem:[%s5405_s1 + $0xb0] sm:$0xff]  }
  0x26   : >> { %434 = vmatprep.subr.bf16.mxu0 %v4374_v2 }
  0x27   : >> { %549 = vmatpush1.bf16.msra.mxu1 %v4145_v48 }
  0x28   : >> { %550 = vmatprep.subr.bf16.mxu1 %v4374_v2 }
  0x29   : >> { %435 = vmatpush1.bf16.msra.mxu0 %v4144_v50  ;;  %v4178_v50 = vld [vmem:[%s5405_s1 + $0x100] sm:$0xff]  }
  0x2a   : >> { %436 = vmatprep.subr.bf16.mxu0 %v4374_v2 }
  0x2b   : >> { %551 = vmatpush1.bf16.msra.mxu1 %v4147_v51  ;;  %v4179_v51 = vld [vmem:[%s5405_s1 + $0xa8] sm:$0xff]  }
  0x2c   : >> { %552 = vmatprep.subr.bf16.mxu1 %v4374_v2 }
  0x2d   : >> { %437 = vmatpush1.bf16.msra.mxu0 %v4146_v52 }
  0x2e   : >> { %446 = vmatprep.subr.bf16.mxu0 %v4374_v2 }
  0x2f   : >> { %553 = vmatpush1.bf16.msra.mxu1 %v4149_v53 }
  0x30   : >> { %562 = vmatprep.subr.bf16.mxu1 %v4374_v2 }
  0x31   : >> { %447 = vmatpush2.bf16.msra.mxu0 %v4148_v54 }
  0x32   : >> { %448 = vmatprep.subr.bf16.mxu0 %v4374_v2 }
  0x33   : >> { %563 = vmatpush2.bf16.msra.mxu1 %v4151_v55  ;;  %v1105_v55 = vrot.slane %v4514_v41, 2 }
  0x34   : >> { %564 = vmatprep.subr.bf16.mxu1 %v4374_v2 }
  0x35   : >> { %449 = vmatpush2.bf16.msra.mxu0 %v4150_v56  ;;  %v1106_v56 = vrot.slane %v4516_v42, 2 }
  0x36   : >> { %450 = vmatprep.subr.bf16.mxu0 %v4374_v2 }
  0x37   : >> { %565 = vmatpush2.bf16.msra.mxu1 %v4153_v57  ;;  %v1107_v62 = vsel %vm259_vm1, %v1105_v55, %v1106_v56 }
  0x38   : >> { %566 = vmatprep.subr.bf16.mxu1 %v4374_v2  ;;  %v1113_v63 = vpack.c.bf16 %v1106_v56, %v1107_v62 }
  0x39   : >> { %451 = vmatpush2.bf16.msra.mxu0 %v4152_v58 }
  0x3a   : >> { %452 = vmatprep.subr.bf16.mxu0 %v4374_v2 }
  0x3b   : >> { %567 = vmatpush2.bf16.msra.mxu1 %v4155_v59  ;;  %v4180_v59 = vld [vmem:[%s5405_s1 + $0xa0] sm:$0xff]  }
  0x3c   : >> { %568 = vmatprep.subr.bf16.mxu1 %v4374_v2 }
  0x3d   : >> { %453 = vmatpush2.bf16.msra.mxu0 %v4154_v60  ;;  %v4181_v60 = vld [vmem:[%s5405_s1 + $0x38] sm:$0xff]  }
  0x3e   : >> { %707 = vmatprep.subr.bf16.mxu0 %v4374_v2 }
  0x3f   : >> { %569 = vmatpush2.bf16.msra.mxu1 %v4156_v61 }
  0x40   : >> { %929 = vmatprep.subr.bf16.mxu1 %v4374_v2 }
  0x8b   : >> { %v4105_v1 = vpop.permute.xlu0 %4104 }
  0x8c   : >> { %v4107_v4 = vunpack.i.h.bf16 %v4105_v1  ;;  %v4106_v5 = vunpack.i.l.bf16 %v4105_v1  ;;  %v4115_v38 = vpop.permute.xlu1 %4114  ;;  %v4184_v1 = vld [vmem:[%s5405_s1 + $0x28] sm:$0xff]  }
  0x8d   : >> { %v4117_v45 = vunpack.i.h.bf16 %v4115_v38  ;;  %v4116_v46 = vunpack.i.l.bf16 %v4115_v38 }
  0x8e   : >> { %v318_v6 = vsel %vm265_vm2, %v4455_v8, %v4106_v5  ;;  %v319_v7 = vsel %vm265_vm2, %v4457_v9, %v4107_v4  ;;  %v4187_v4 = vld [vmem:[%s5405_s1 + $0xe8] sm:$0xff]   ;;  %v4188_v5 = vld [vmem:[%s5405_s1 + $0x18] sm:$0xff]  }
  0x8f   : >> { %v4110_v16 = vpop.permute.xlu0 %4109  ;;  %v320_v17 = vpack.c.bf16 %v319_v7, %v318_v6  ;;  %v604_v48 = vsel %vm265_vm2, %v4468_v14, %v4117_v45  ;;  %v603_v49 = vsel %vm265_vm2, %v4466_v13, %v4116_v46  ;;  %v4189_v6 = vld [vmem:[%s5405_s1 + $0xe0] sm:$0xff]   ;;  %v4190_v7 = vld [vmem:[%s5405_s1 + $0x10] sm:$0xff]  }
  0x90   : >> { %v4112_v18 = vunpack.i.h.bf16 %v4110_v16  ;;  %v4111_v19 = vunpack.i.l.bf16 %v4110_v16  ;;  %v4120_v47 = vpop.permute.xlu1 %4119  ;;  %v605_v54 = vpack.c.bf16 %v604_v48, %v603_v49  ;;  %v4193_v16 = vld [vmem:[%s5405_s1 + $0xd0] sm:$0xff]  }
  0x91   : >> { %455 = vmatmul.mubr.bf16.vlgmr.msra.gmra.mxu0 %v320_v17  ;;  %v4122_v52 = vunpack.i.h.bf16 %v4120_v47  ;;  %v4121_v53 = vunpack.i.l.bf16 %v4120_v47  ;;  %v4194_v17 = vld [vmem:[%s5405_s1] sm:$0xff]  }
  0x92   : >> { %708 = vmatpush1.bf16.msra.mxu0 %v4157_v12  ;;  %v266_v20 = vsel %vm265_vm2, %v4459_v10, %v4111_v19  ;;  %v267_v21 = vsel %vm265_vm2, %v4461_v11, %v4112_v18  ;;  %3268 = vmatprep.mubr.msk.bf16.mxu0 %vm265_vm2, %v606_v15  ;;  %v4160_v10 = vld [vmem:[%s5405_s1 + $0xe8] sm:$0xff]   ;;  %v4161_v11 = vld [vmem:[%s5405_s1 + $0x90] sm:$0xff]   ;;  %v4191_v12 = vld [vmem:[%s5405_s1 + $0xd8] sm:$0xff]  }
  0x93   : >> { %709 = vmatprep.subr.bf16.mxu0 %v4374_v2  ;;  %v268_v24 = vpack.c.bf16 %v267_v21, %v266_v20  ;;  %v827_v57 = vsel %vm265_vm2, %v4468_v14, %v4122_v52  ;;  %v826_v58 = vsel %vm265_vm2, %v4466_v13, %v4121_v53  ;;  %v4182_v13 = vld [vmem:[%s5405_s1 + $0x30] sm:$0xff]   ;;  %v4183_v14 = vld [vmem:[%s5405_s1 + $0xf8] sm:$0xff]   ;;  %v4195_v18 = vld [vmem:[%s5405_s1 + $0xc8] sm:$0xff]  }
  0x94   : >> { %v828_v61 = vpack.c.bf16 %v827_v57, %v826_v58  ;;  %v4196_v19 = vld [vmem:[%s5405_s1 + $0x58] sm:$0xff]   ;;  %v4197_v20 = vld [vmem:[%s5405_s1 + $0xc0] sm:$0xff]   ;;  %v4198_v21 = vld [vmem:[%s5405_s1 + $0x50] sm:$0xff]  }
  0x95   : >> { %571 = vmatmul.mubr.bf16.vlgmr.msra.gmra.mxu1 %v268_v24  ;;  %v4200_v24 = vld [vmem:[%s5405_s1 + $0x48] sm:$0xff]  }
  0x96   : >> { %710 = vmatpush1.bf16.msra.mxu0 %v4158_v22  ;;  %930 = vmatpush1.bf16.msra.mxu1 %v4159_v23  ;;  %v4199_v22 = vld [vmem:[%s5405_s1 + $0x118] sm:$0xff]   ;;  %v4125_v23 = vpop.permute.xlu0 %4124 }
  0x97   : >> { %711 = vmatprep.subr.bf16.mxu0 %v4374_v2  ;;  %931 = vmatprep.subr.bf16.mxu1 %v4374_v2 }
  0x98   : >> { %3310 = vmatprep.mubr.msk.bf16.mxu1 %vm265_vm2, %v606_v15  ;;  %v4192_v15 = vld [vmem:[%s5405_s1 + $0x8] sm:$0xff]  }
  0x9a   : >> { %712 = vmatpush1.bf16.msra.mxu0 %v4160_v10  ;;  %932 = vmatpush1.bf16.msra.mxu1 %v4161_v11  ;;  %v4201_v10 = vld [vmem:[%s5405_s1 + $0x110] sm:$0xff]   ;;  %v4127_v11 = vunpack.i.h.bf16 %v4125_v23 }
  0x9b   : >> { %713 = vmatprep.subr.bf16.mxu0 %v4374_v2  ;;  %933 = vmatprep.subr.bf16.mxu1 %v4374_v2 }
  0x9e   : >> { %714 = vmatpush1.bf16.msra.mxu0 %v4162_v25  ;;  %934 = vmatpush1.bf16.msra.mxu1 %v4163_v26  ;;  %v4126_v25 = vunpack.i.l.bf16 %v4125_v23  ;;  %v4130_v26 = vpop.permute.xlu1 %4129 }
  0x9f   : >> { %715 = vmatprep.subr.bf16.mxu0 %v4374_v2  ;;  %935 = vmatprep.subr.bf16.mxu1 %v4374_v2 }
  0xa2   : >> { %716 = vmatpush1.bf16.msra.mxu0 %v4164_v27  ;;  %936 = vmatpush1.bf16.msra.mxu1 %v4165_v28  ;;  %v779_v27 = vsel %vm265_vm2, %v4457_v9, %v4127_v11  ;;  %v778_v28 = vsel %vm265_vm2, %v4455_v8, %v4126_v25 }
  0xa3   : >> { %717 = vmatprep.subr.bf16.mxu0 %v4374_v2  ;;  %937 = vmatprep.subr.bf16.mxu1 %v4374_v2 }
  0xa6   : >> { %718 = vmatpush1.bf16.msra.mxu0 %v4166_v29  ;;  %938 = vmatpush1.bf16.msra.mxu1 %v4167_v30  ;;  %v4202_v29 = vld [vmem:[%s5405_s1 + $0x40] sm:$0xff]   ;;  %v4203_v30 = vld [vmem:[%s5405_s1 + $0x108] sm:$0xff]  }
  0xa7   : >> { %719 = vmatprep.subr.bf16.mxu0 %v4374_v2  ;;  %939 = vmatprep.subr.bf16.mxu1 %v4374_v2 }
  0xaa   : >> { %720 = vmatpush1.bf16.msra.mxu0 %v4168_v31  ;;  %940 = vmatpush1.bf16.msra.mxu1 %v4169_v32  ;;  %v4132_v31 = vunpack.i.h.bf16 %v4130_v26  ;;  %v4131_v32 = vunpack.i.l.bf16 %v4130_v26 }
  0xab   : >> { %721 = vmatprep.subr.bf16.mxu0 %v4374_v2  ;;  %941 = vmatprep.subr.bf16.mxu1 %v4374_v2 }
  0xac   : >> { %v1111_v8 = vsel %vm265_vm2, %v4516_v42, %v4132_v31  ;;  %v1110_v9 = vsel %vm265_vm2, %v4514_v41, %v4131_v32 }
  0xae   : >> { %722 = vmatpush1.bf16.msra.mxu0 %v4170_v33  ;;  %942 = vmatpush1.bf16.msra.mxu1 %v4171_v34  ;;  %v780_v33 = vpack.c.bf16 %v779_v27, %v778_v28  ;;  %v4204_v34 = vld [vmem:[%s5405_s1 + $0x100] sm:$0xff]  }
  0xaf   : >> { %731 = vmatprep.subr.bf16.mxu0 %v4374_v2  ;;  %943 = vmatprep.subr.bf16.mxu1 %v4374_v2 }
  0xb2   : >> { %732 = vmatpush2.bf16.msra.mxu0 %v4172_v35  ;;  %944 = vmatpush1.bf16.msra.mxu1 %v4173_v37  ;;  %v1112_v35 = vpack.c.bf16 %v1111_v8, %v1110_v9 }
  0xb3   : >> { %733 = vmatprep.subr.bf16.mxu0 %v4374_v2  ;;  %953 = vmatprep.subr.bf16.mxu1 %v4374_v2 }
  0xb6   : >> { %734 = vmatpush2.bf16.msra.mxu0 %v4174_v39  ;;  %954 = vmatpush2.bf16.msra.mxu1 %v4175_v40 }
  0xb7   : >> { %735 = vmatprep.subr.bf16.mxu0 %v4374_v2  ;;  %955 = vmatprep.subr.bf16.mxu1 %v4374_v2 }
  0xba   : >> { %736 = vmatpush2.bf16.msra.mxu0 %v4176_v43  ;;  %956 = vmatpush2.bf16.msra.mxu1 %v4177_v44 }
  0xbb   : >> { %737 = vmatprep.subr.bf16.mxu0 %v4374_v2  ;;  %957 = vmatprep.subr.bf16.mxu1 %v4374_v2 }
  0xbe   : >> { %738 = vmatpush2.bf16.msra.mxu0 %v4178_v50  ;;  %958 = vmatpush2.bf16.msra.mxu1 %v4179_v51 }
  0xbf   : >> { %959 = vmatprep.subr.bf16.mxu1 %v4374_v2  ;;  %1045 = vmatprep.subr.bf16.mxu0 %v4374_v2 }
  0xc1   : >> { %740 = vmatmul.mubr.bf16.vlgmr.msra.gmra.mxu0 %v605_v54 }
  0xc2   : >> { %960 = vmatpush2.bf16.msra.mxu1 %v4180_v59  ;;  %1046 = vmatpush1.bf16.msra.mxu0 %v4181_v60 }
  0xc3   : >> { %1047 = vmatprep.subr.bf16.mxu0 %v4374_v2  ;;  %1213 = vmatprep.subr.bf16.mxu1 %v4374_v2 }
  0xc4   : >> { %3323 = vmatprep.mubr.msk.bf16.mxu0 %vm265_vm2, %v4502_v36  ;;  %v4186_v36 = vld [vmem:[%s5405_s1 + $0x20] sm:$0xff]  }
  0xc5   : >> { %962 = vmatmul.mubr.bf16.vlgmr.msra.gmra.mxu1 %v828_v61 }
  0xc6   : >> { %1048 = vmatpush1.bf16.msra.mxu0 %v4182_v13  ;;  %1214 = vmatpush1.bf16.msra.mxu1 %v4183_v14 }
  0xc7   : >> { %1049 = vmatprep.subr.bf16.mxu0 %v4374_v2  ;;  %1215 = vmatprep.subr.bf16.mxu1 %v4374_v2 }
  0xc8   : >> { %3364 = vmatprep.mubr.msk.bf16.mxu1 %vm265_vm2, %v1113_v63 }
  0xca   : >> { %1050 = vmatpush1.bf16.msra.mxu0 %v4184_v1  ;;  %1216 = vmatpush1.bf16.msra.mxu1 %v4185_v3 }
  0xcb   : >> { %1051 = vmatprep.subr.bf16.mxu0 %v4374_v2  ;;  %1217 = vmatprep.subr.bf16.mxu1 %v4374_v2 }
  0xce   : >> { %1052 = vmatpush1.bf16.msra.mxu0 %v4186_v36  ;;  %1218 = vmatpush1.bf16.msra.mxu1 %v4187_v4 }
  0xcf   : >> { %1053 = vmatprep.subr.bf16.mxu0 %v4374_v2  ;;  %1219 = vmatprep.subr.bf16.mxu1 %v4374_v2 }
  0xd2   : >> { %1054 = vmatpush1.bf16.msra.mxu0 %v4188_v5  ;;  %1220 = vmatpush1.bf16.msra.mxu1 %v4189_v6 }
  0xd3   : >> { %1055 = vmatprep.subr.bf16.mxu0 %v4374_v2  ;;  %1221 = vmatprep.subr.bf16.mxu1 %v4374_v2 }
  0xd6   : >> { %1056 = vmatpush1.bf16.msra.mxu0 %v4190_v7  ;;  %1222 = vmatpush1.bf16.msra.mxu1 %v4191_v12 }
  0xd7   : >> { %1057 = vmatprep.subr.bf16.mxu0 %v4374_v2  ;;  %1223 = vmatprep.subr.bf16.mxu1 %v4374_v2 }
  0xda   : >> { %1058 = vmatpush1.bf16.msra.mxu0 %v4192_v15  ;;  %1224 = vmatpush1.bf16.msra.mxu1 %v4193_v16 }
  0xdb   : >> { %1059 = vmatprep.subr.bf16.mxu0 %v4374_v2  ;;  %1225 = vmatprep.subr.bf16.mxu1 %v4374_v2 }
  0xde   : >> { %1060 = vmatpush1.bf16.msra.mxu0 %v4194_v17  ;;  %1226 = vmatpush1.bf16.msra.mxu1 %v4195_v18  ;;  %v4823_v17 = vld [vmem:[%s5408_s4] ss:$0 sm:$0xff] (%p235_p4) }
  0xdf   : >> { %1069 = vmatprep.subr.bf16.mxu0 %v4374_v2  ;;  %1227 = vmatprep.subr.bf16.mxu1 %v4374_v2 }
  0xe2   : >> { %1070 = vmatpush2.bf16.msra.mxu0 %v4196_v19  ;;  %1228 = vmatpush1.bf16.msra.mxu1 %v4197_v20 }
  0xe3   : >> { %1071 = vmatprep.subr.bf16.mxu0 %v4374_v2  ;;  %1237 = vmatprep.subr.bf16.mxu1 %v4374_v2 }
  0xe6   : >> { %1072 = vmatpush2.bf16.msra.mxu0 %v4198_v21  ;;  %1238 = vmatpush2.bf16.msra.mxu1 %v4199_v22 }
  0xe7   : >> { %1073 = vmatprep.subr.bf16.mxu0 %v4374_v2  ;;  %1239 = vmatprep.subr.bf16.mxu1 %v4374_v2 }
  0xea   : >> { %1074 = vmatpush2.bf16.msra.mxu0 %v4200_v24  ;;  %1240 = vmatpush2.bf16.msra.mxu1 %v4201_v10 }
  0xeb   : >> { %1075 = vmatprep.subr.bf16.mxu0 %v4374_v2  ;;  %1241 = vmatprep.subr.bf16.mxu1 %v4374_v2 }
  0xee   : >> { %1076 = vmatpush2.bf16.msra.mxu0 %v4202_v29  ;;  %1242 = vmatpush2.bf16.msra.mxu1 %v4203_v30 }
  0xef   : >> { %1243 = vmatprep.subr.bf16.mxu1 %v4374_v2 }
  0xf1   : >> { %1078 = vmatmul.mubr.bf16.vlgmr.msra.gmra.mxu0 %v780_v33 }
  0xf2   : >> { %1244 = vmatpush2.bf16.msra.mxu1 %v4204_v34 }
  0xf5   : >> { %1246 = vmatmul.mubr.bf16.vlgmr.msra.gmra.mxu1 %v1112_v35 }
 0x151   : >> { %v456_v37 = vpop.f32.mrf.mxu0 }
 0x153   : >> { %v458_v38 = vpop.f32.mrf.mxu0 }
 0x155   : >> { %v459_v39 = vpop.f32.mrf.mxu0  ;;  %v572_v40 = vpop.f32.mrf.mxu1 }
 0x156   : >> { %v573_v41 = vadd.f32 %v572_v40, %v456_v37 }
 0x157   : >> { %v461_v43 = vpop.f32.mrf.mxu0  ;;  %v574_v42 = vpop.f32.mrf.mxu1 }
 0x159   : >> { %v575_v44 = vpop.f32.mrf.mxu1 }
 0x15a   : >> { %v576_v49 = vadd.f32 %v575_v44, %v459_v39 }
 0x15b   : >> { %v577_v45 = vpop.f32.mrf.mxu1 }
 0x181   : >> { %v741_v46 = vpop.f32.mrf.mxu0 }
 0x182   : >> { %v748_v47 = vadd.f32 %v741_v46, %v573_v41 }
 0x183   : >> { %v743_v48 = vpop.f32.mrf.mxu0 }
 0x184   : >> { %v750_v2 = vadd.f32 %v4419_v0, %v748_v47 }
 0x185   : >> { %v744_v50 = vpop.f32.mrf.mxu0  ;;  %v963_v51 = vpop.f32.mrf.mxu1 }
 0x186   : >> { %v752_v52 = vmax.f32 %v750_v2, 0.0  ;;  %v749_v53 = vadd.f32 %v744_v50, %v576_v49 }
 0x187   : >> { %v746_v54 = vpop.f32.mrf.mxu0  ;;  %v965_v55 = vpop.f32.mrf.mxu1 }
 0x188   : >> { %756 = vst [vmem:[%s755_s7] sm:$0xff] %v752_v52  ;;  %v751_v56 = vadd.f32 %v4419_v0, %v749_v53 }
 0x189   : >> { %v966_v57 = vpop.f32.mrf.mxu1 }
 0x18a   : >> { %v753_v58 = vmax.f32 %v751_v56, 0.0 }
 0x18b   : >> { %v968_v59 = vpop.f32.mrf.mxu1 }
 0x18c   : >> { %757 = vst [vmem:[%s755_s7 + $0x8] sm:$0x3f] %v753_v58 }
 0x1b1   : >> { %v1079_v60 = vpop.f32.mrf.mxu0 }
 0x1b2   : >> { %v1080_v62 = vadd.f32 %v1079_v60, %v963_v51 }
 0x1b3   : >> { %v1081_v61 = vpop.f32.mrf.mxu0 }
 0x1b5   : >> { %v1082_v13 = vpop.f32.mrf.mxu0  ;;  %v1247_v14 = vpop.f32.mrf.mxu1 }
 0x1b6   : >> { %v1254_v63 = vadd.f32 %v1247_v14, %v1080_v62  ;;  %v1083_v36 = vadd.f32 %v1082_v13, %v966_v57 }
 0x1b7   : >> { %v1084_v1 = vpop.f32.mrf.mxu0  ;;  %v1249_v3 = vpop.f32.mrf.mxu1 }
 0x1b8   : >> { %v1256_v4 = vadd.f32 %v4419_v0, %v1254_v63 }
 0x1b9   : >> { %v1250_v5 = vpop.f32.mrf.mxu1 }
 0x1ba   : >> { %v1258_v6 = vmax.f32 %v1256_v4, 0.0  ;;  %v1255_v7 = vadd.f32 %v1250_v5, %v1083_v36 }
 0x1bb   : >> { %v1252_v12 = vpop.f32.mrf.mxu1 }
 0x1bc   : >> { %3367 = vst [vmem:[%s755_s7 + $0x10] sm:$0xff] %v1258_v6  ;;  %v1257_v15 = vadd.f32 %v4419_v0, %v1255_v7  ;;  %237 = sbr.rel (!%p235_p4) target bundleno = 15 (0xf), region = 100 }
 0x1be   : >> { %v1259_v16 = vmax.f32 %v1257_v15, 0.0 }
 0x1c0   : >> { %3368 = vst [vmem:[%s755_s7 + $0x18] sm:$0x3f] %v1259_v16 }
 0x1c1 LB: >> { %v4205_v18 = vld [vmem:[%s5407_s3 + $0x138] sm:$0xff]   ;;  %v4376_v19 = vmov 0.0   ;;  %vm4377_vm3 = vmmov 0   ;;  %v4208_v21 = vld [vmem:[%s5407_s3 + $0x130] sm:$0xff]   ;;  %v4211_v24 = vld [vmem:[%s5407_s3 + $0x128] sm:$0xff]   ;;  %s3735_s22 = sshll.u32 %s4372_s10, 5  ;;  %s4372_s10 = sphi %s4825_s10, %s1276_s10  }
 0x1c2   : >> { %3954 = vmatprep.subr.bf16.mxu1 %v4376_v19  ;;  %v4206_v0 = vld [vmem:[%s5407_s3 + $0x178] sm:$0xff]   ;;  %3768 = vmatprep.subr.bf16.mxu0 %v4205_v18  ;;  %v4209_v22 = vld [vmem:[%s5407_s3 + $0x170] sm:$0xff]   ;;  %v4212_v10 = vld [vmem:[%s5407_s3 + $0x168] sm:$0xff]   ;;  %s4906_s12 = scalar_lea.vmem [#allocation2], %s3735_s22  ;;  %s3724_s23 = sshll.u32 %s4372_s10, 2 }
 0x1c3   : >> { %v4207_v20 = vld [vmem:[%s5407_s3 + $0xf8] sm:$0xff]   ;;  %3970 = vmatprep.mubr.msk.bf16.mxu1 %vm4377_vm3, %v4376_v19  ;;  %3955 = vmatpush3.bf16.msra.mxu1 %v4206_v0  ;;  %v4210_v23 = vld [vmem:[%s5407_s3 + $0xf0] sm:$0xff]   ;;  %v4213_v11 = vld [vmem:[%s5407_s3 + $0xe8] sm:$0xff]   ;;  %s3059_s24 = scalar_lea.vmem %s4429_s29, %s3724_s23  ;;  %s1276_s10 = sadd.s32 1, %s4372_s10  }
 0x1c4   : >> { %3769 = vmatpush3.bf16.msra.mxu0 %v4207_v20  ;;  %3956 = vmatprep.subr.bf16.mxu1 %v4376_v19  ;;  %v4214_v25 = vld [vmem:[%s5407_s3 + $0x120] sm:$0xff]   ;;  %v4217_v28 = vld [vmem:[%s5407_s3 + $0x118] sm:$0xff]   ;;  %v4220_v31 = vld [vmem:[%s5407_s3 + $0x110] sm:$0xff]   ;;  %p1273_p5 = scmp.ge.s32.totalorder %s1276_s10, 6  }
 0x1c5   : >> { %3770 = vmatprep.subr.bf16.mxu0 %v4208_v21  ;;  %v4215_v26 = vld [vmem:[%s5407_s3 + $0x160] sm:$0xff]   ;;  %v4218_v29 = vld [vmem:[%s5407_s3 + $0x158] sm:$0xff]   ;;  %v4221_v32 = vld [vmem:[%s5407_s3 + $0x150] sm:$0xff]  }
 0x1c6   : >> { %v4216_v27 = vld [vmem:[%s5407_s3 + $0xe0] sm:$0xff]   ;;  %v4219_v30 = vld [vmem:[%s5407_s3 + $0xd8] sm:$0xff]   ;;  %v4222_v33 = vld [vmem:[%s5407_s3 + $0xd0] sm:$0xff]  }
 0x1c7   : >> { %3957 = vmatpush3.bf16.msra.mxu1 %v4209_v22  ;;  %v4223_v8 = vld [vmem:[%s5407_s3 + $0x108] sm:$0xff]   ;;  %v4226_v35 = vld [vmem:[%s5407_s3 + $0x100] sm:$0xff]   ;;  %v4909_v37 = vld [vmem:[%s4906_s12 + $0x10] sm:$0xff] }
 0x1c8   : >> { %3771 = vmatpush3.bf16.msra.mxu0 %v4210_v23  ;;  %3958 = vmatprep.subr.bf16.mxu1 %v4376_v19  ;;  %v4224_v9 = vld [vmem:[%s5407_s3 + $0x148] sm:$0xff]   ;;  %v3375_v38 = vld [vmem:[%s4906_s12 + $0x18] sm:$0x3f]  ;;  %v1354_v39 = vrot.slane %v4909_v37, 1  ;;  %v1359_v43 = vrot.slane %v4909_v37, 2  ;;  %v4227_v44 = vld [vmem:[%s5407_s3 + $0x140] sm:$0xff]  }
 0x1c9   : >> { %3772 = vmatprep.subr.bf16.mxu0 %v4211_v24  ;;  %v4225_v34 = vld [vmem:[%s5407_s3 + $0xc8] sm:$0xff]   ;;  %v1355_v40 = vrot.slane %v3375_v38, 1  ;;  %v1360_v42 = vrot.slane %v3375_v38, 2  ;;  %v4228_v46 = vld [vmem:[%s5407_s3 + $0xc0] sm:$0xff]   ;;  %v4229_v48 = vld [vmem:[%s5407_s3 + $0x78] sm:$0xff]   ;;  %v1364_v2 = vpack.c.bf16 %v3375_v38, %v4909_v37 }
 0x1ca   : >> { %v4230_v50 = vld [vmem:[%s5407_s3 + $0xb8] sm:$0xff]   ;;  %v4232_v52 = vld [vmem:[%s5407_s3 + $0x70] sm:$0xff]   ;;  %v4235_v55 = vld [vmem:[%s5407_s3 + $0x68] sm:$0xff]  }
 0x1cb   : >> { %3959 = vmatpush3.bf16.msra.mxu1 %v4212_v10  ;;  %v1356_v45 = vsel %vm249_vm0, %v1354_v39, %v1355_v40  ;;  %v1361_v41 = vsel %vm259_vm1, %v1359_v43, %v1360_v42  ;;  %v4231_v51 = vld [vmem:[%s5407_s3 + $0x38] sm:$0xff]   ;;  %v4233_v53 = vld [vmem:[%s5407_s3 + $0xb0] sm:$0xff]   ;;  %v4236_v56 = vld [vmem:[%s5407_s3 + $0xa8] sm:$0xff]  }
 0x1cc   : >> { %3773 = vmatpush3.bf16.msra.mxu0 %v4213_v11  ;;  %3960 = vmatprep.subr.bf16.mxu1 %v4376_v19  ;;  %v1365_v47 = vpack.c.bf16 %v1355_v40, %v1356_v45  ;;  %v1366_v49 = vpack.c.bf16 %v1360_v42, %v1361_v41  ;;  %v4234_v54 = vld [vmem:[%s5407_s3 + $0x30] sm:$0xff]   ;;  %v4237_v57 = vld [vmem:[%s5407_s3 + $0x28] sm:$0xff]   ;;  %v4238_v58 = vld [vmem:[%s5407_s3 + $0x60] sm:$0xff]  }
 0x1cd   : >> { %3774 = vmatprep.subr.bf16.mxu0 %v4214_v25  ;;  %v4239_v59 = vld [vmem:[%s5407_s3 + $0xa0] sm:$0xff]   ;;  %v4241_v61 = vld [vmem:[%s5407_s3 + $0x58] sm:$0xff]   ;;  %v4244_v14 = vld [vmem:[%s5407_s3 + $0x50] sm:$0xff]  }
 0x1ce   : >> { %1592 = vmatprep.mubr.bf16.mxu0 %v1365_v47  ;;  %v4240_v60 = vld [vmem:[%s5407_s3 + $0x20] sm:$0xff]   ;;  %v4242_v62 = vld [vmem:[%s5407_s3 + $0x98] sm:$0xff]   ;;  %v1281_v1 = vld [vmem:[%s4906_s12 + $0x8] sm:$0x3f] }
 0x1cf   : >> { %3961 = vmatpush3.bf16.msra.mxu1 %v4215_v26  ;;  %v4243_v13 = vld [vmem:[%s5407_s3 + $0x18] sm:$0xff]   ;;  %v1280_v63 = vld [vmem:[%s4906_s12] sm:$0xff]  ;;  %v1286_v36 = vrot.slane %v1281_v1, 1  ;;  %v4245_v4 = vld [vmem:[%s5407_s3 + $0x90] sm:$0xff]   ;;  %v1292_v18 = vrot.slane %v1281_v1, 2 }
 0x1d0   : >> { %3775 = vmatpush3.bf16.msra.mxu0 %v4216_v27  ;;  %3962 = vmatprep.subr.bf16.mxu1 %v4376_v19  ;;  %v1285_v3 = vrot.slane %v1280_v63, 1  ;;  %v4246_v5 = vld [vmem:[%s5407_s3 + $0x10] sm:$0xff]   ;;  %v4247_v7 = vld [vmem:[%s5407_s3 + $0x48] sm:$0xff]   ;;  %v1291_v16 = vrot.slane %v1280_v63, 2  ;;  %v4250_v20 = vld [vmem:[%s5407_s3 + $0x40] sm:$0xff]   ;;  %v1296_v11 = vpack.c.bf16 %v1281_v1, %v1280_v63 }
 0x1d1   : >> { %3776 = vmatprep.subr.bf16.mxu0 %v4217_v28  ;;  %v4248_v15 = vld [vmem:[%s5407_s3 + $0x88] sm:$0xff]   ;;  %v4251_v21 = vld [vmem:[%s5407_s3 + $0x80] sm:$0xff]   ;;  %v4253_v24 = vld [vmem:[%s5407_s3 + $0x1f8] sm:$0xff]  }
 0x1d2   : >> { %v1287_v6 = vsel %vm249_vm0, %v1285_v3, %v1286_v36  ;;  %v4249_v0 = vld [vmem:[%s5407_s3 + $0x8] sm:$0xff]   ;;  %v1293_v22 = vsel %vm259_vm1, %v1291_v16, %v1292_v18  ;;  %v4252_v23 = vld [vmem:[%s5407_s3] sm:$0xff]   ;;  %v4254_v25 = vld [vmem:[%s5407_s3 + $0x238] sm:$0xff]  }
 0x1d3   : >> { %3963 = vmatpush3.bf16.msra.mxu1 %v4218_v29  ;;  %v1297_v12 = vpack.c.bf16 %v1286_v36, %v1287_v6  ;;  %v1298_v10 = vpack.c.bf16 %v1292_v18, %v1293_v22  ;;  %v4255_v26 = vld [vmem:[%s5407_s3 + $0x1b8] sm:$0xff]   ;;  %v4256_v27 = vld [vmem:[%s5407_s3 + $0x1f0] sm:$0xff]   ;;  %v4264_v38 = vld [vmem:[%s5407_s3 + $0x1a0] sm:$0xff]  }
 0x1d4   : >> { %3777 = vmatpush3.bf16.msra.mxu0 %v4219_v30  ;;  %3964 = vmatprep.subr.bf16.mxu1 %v4376_v19  ;;  %v4257_v28 = vld [vmem:[%s5407_s3 + $0x230] sm:$0xff]   ;;  %v4259_v30 = vld [vmem:[%s5407_s3 + $0x1e8] sm:$0xff]   ;;  %v4265_v40 = vld [vmem:[%s5407_s3 + $0x1d8] sm:$0xff]  }
 0x1d5   : >> { %3778 = vmatprep.subr.bf16.mxu0 %v4220_v31  ;;  %v4258_v29 = vld [vmem:[%s5407_s3 + $0x1b0] sm:$0xff]   ;;  %v4260_v31 = vld [vmem:[%s5407_s3 + $0x228] sm:$0xff]   ;;  %v4266_v45 = vld [vmem:[%s5407_s3 + $0x218] sm:$0xff]  }
 0x1d6   : >> { %v4268_v47 = vld [vmem:[%s5407_s3 + $0x1d0] sm:$0xff]   ;;  %v5126_v63 = vld [vmem:[%s4906_s12 + $0x28] sm:$0x3f]  ;;  %v4288_v16 = vld [vmem:[%s5407_s3 + $0xe0] sm:$0xff]  }
 0x1d7   : >> { %3965 = vmatpush3.bf16.msra.mxu1 %v4221_v32  ;;  %v4261_v32 = vld [vmem:[%s5407_s3 + $0x1a8] sm:$0xff]   ;;  %v4282_v1 = vld [vmem:[%s5407_s3 + $0xf0] sm:$0xff]   ;;  %v2239_v3 = vrot.slane %v5126_v63, 1  ;;  %v4289_v18 = vld [vmem:[%s5407_s3 + $0x118] sm:$0xff]  }
 0x1d8   : >> { %3779 = vmatpush3.bf16.msra.mxu0 %v4222_v33  ;;  %3966 = vmatprep.subr.bf16.mxu1 %v4376_v19  ;;  %v4262_v33 = vld [vmem:[%s5407_s3 + $0x1e0] sm:$0xff]   ;;  %v4283_v36 = vld [vmem:[%s5407_s3 + $0x128] sm:$0xff]   ;;  %v4293_v22 = vld [vmem:[%s5407_s3 + $0x150] sm:$0xff]  }
 0x1d9   : >> { %3780 = vmatprep.subr.bf16.mxu0 %v4223_v8  ;;  %v5050_v8 = vld [vmem:[%s4906_s12 + $0x20] sm:$0xff]  ;;  %v4349_v37 = vld [vmem:[%s4906_s12 + $0x10] sm:$0xff] }
 0x1db   : >> { %3967 = vmatpush3.bf16.msra.mxu1 %v4224_v9  ;;  %v4263_v9 = vld [vmem:[%s5407_s3 + $0x220] sm:$0xff]  }
 0x1dc   : >> { %3781 = vmatpush3.bf16.msra.mxu0 %v4225_v34  ;;  %3968 = vmatprep.subr.bf16.mxu1 %v4376_v19  ;;  %v3475_v34 = vld [vmem:[%s4906_s12 + $0x28] sm:$0x3f] }
 0x1dd   : >> { %3782 = vmatprep.subr.bf16.mxu0 %v4226_v35  ;;  %v1875_v35 = vrot.slane %v5050_v8, 1  ;;  %v1876_v42 = vrot.slane %v3475_v34, 1 }
 0x1df   : >> { %3969 = vmatpush3.bf16.msra.mxu1 %v4227_v44  ;;  %v1877_v44 = vsel %vm249_vm0, %v1875_v35, %v1876_v42 }
 0x1e0   : >> { %3783 = vmatpush3.bf16.msra.mxu0 %v4228_v46  ;;  %3974 = vmatprep.subr.bf16.mxu1 %v4376_v19  ;;  %v1886_v41 = vpack.c.bf16 %v1876_v42, %v1877_v44  ;;  %v4267_v46 = vld [vmem:[%s5407_s3 + $0x198] sm:$0xff]   ;;  %v4306_v42 = vld [vmem:[%s5407_s3 + $0x30] sm:$0xff]   ;;  %v4307_v44 = vld [vmem:[%s5407_s3 + $0x68] sm:$0xff]  }
 0x1e1   : >> { %3799 = vmatprep.subr.bf16.mxu0 %v4229_v48  ;;  %v4269_v48 = vld [vmem:[%s5407_s3 + $0x210] sm:$0xff]  }
 0x1e2   : >> { %3971 = vmatmul.mubr.bf16.vlgmr.msra.gmra.mxu1 %v1366_v49  ;;  %v4270_v49 = vld [vmem:[%s5407_s3 + $0x190] sm:$0xff]  }
 0x1e3   : >> { %1593 = vmatmul.mubr.bf16.vlgmr.msra.gmra.mxu0 %v1364_v2  ;;  %3975 = vmatpush3.bf16.msra.mxu1 %v4230_v50  ;;  %v4271_v2 = vld [vmem:[%s5407_s3 + $0x1c8] sm:$0xff]  }
 0x1e4   : >> { %3800 = vmatpush3.bf16.msra.mxu0 %v4231_v51  ;;  %3976 = vmatprep.subr.bf16.mxu1 %v4376_v19  ;;  %v4272_v50 = vld [vmem:[%s5407_s3 + $0x208] sm:$0xff]   ;;  %v1880_v51 = vrot.slane %v5050_v8, 2 }
 0x1e5   : >> { %3801 = vmatprep.subr.bf16.mxu0 %v4232_v52  ;;  %3990 = vmatprep.mubr.msk.bf16.mxu1 %vm4377_vm3, %v4376_v19  ;;  %v1881_v52 = vrot.slane %v3475_v34, 2 }
 0x1e6   : >> { %1818 = vmatprep.mubr.bf16.mxu0 %v1297_v12  ;;  %v4286_v12 = vld [vmem:[%s5407_s3 + $0x120] sm:$0xff]  }
 0x1e7   : >> { %3977 = vmatpush3.bf16.msra.mxu1 %v4233_v53  ;;  %v4273_v53 = vld [vmem:[%s5407_s3 + $0x188] sm:$0xff]  }
 0x1e8   : >> { %3802 = vmatpush3.bf16.msra.mxu0 %v4234_v54  ;;  %3978 = vmatprep.subr.bf16.mxu1 %v4376_v19  ;;  %v4274_v54 = vld [vmem:[%s5407_s3 + $0x1c0] sm:$0xff]  }
 0x1e9   : >> { %3803 = vmatprep.subr.bf16.mxu0 %v4235_v55  ;;  %v4275_v55 = vld [vmem:[%s5407_s3 + $0x200] sm:$0xff]  }
 0x1eb   : >> { %3979 = vmatpush3.bf16.msra.mxu1 %v4236_v56  ;;  %v1882_v56 = vsel %vm259_vm1, %v1880_v51, %v1881_v52 }
 0x1ec   : >> { %3804 = vmatpush3.bf16.msra.mxu0 %v4237_v57  ;;  %3980 = vmatprep.subr.bf16.mxu1 %v4376_v19  ;;  %v4276_v57 = vld [vmem:[%s5407_s3 + $0x180] sm:$0xff]  }
 0x1ed   : >> { %3805 = vmatprep.subr.bf16.mxu0 %v4238_v58  ;;  %v4277_v58 = vld [vmem:[%s5407_s3 + $0x138] sm:$0xff]  }
 0x1ef   : >> { %3981 = vmatpush3.bf16.msra.mxu1 %v4239_v59  ;;  %v1887_v59 = vpack.c.bf16 %v1881_v52, %v1882_v56  ;;  %v4317_v52 = vld [vmem:[%s5407_s3 + $0x90] sm:$0xff]  }
 0x1f0   : >> { %3806 = vmatpush3.bf16.msra.mxu0 %v4240_v60  ;;  %3982 = vmatprep.subr.bf16.mxu1 %v4376_v19  ;;  %v1885_v60 = vpack.c.bf16 %v3475_v34, %v5050_v8  ;;  %v4302_v34 = vld [vmem:[%s5407_s3 + $0xb8] sm:$0xff]  }
 0x1f1   : >> { %3807 = vmatprep.subr.bf16.mxu0 %v4241_v61  ;;  %v4278_v61 = vld [vmem:[%s5407_s3 + $0x178] sm:$0xff]  }
 0x1f3   : >> { %3983 = vmatpush3.bf16.msra.mxu1 %v4242_v62  ;;  %v4279_v62 = vld [vmem:[%s5407_s3 + $0xf8] sm:$0xff]  }
 0x1f4   : >> { %3808 = vmatpush3.bf16.msra.mxu0 %v4243_v13  ;;  %3984 = vmatprep.subr.bf16.mxu1 %v4376_v19  ;;  %v4280_v13 = vld [vmem:[%s5407_s3 + $0x130] sm:$0xff]  }
 0x1f5   : >> { %3809 = vmatprep.subr.bf16.mxu0 %v4244_v14  ;;  %v4281_v14 = vld [vmem:[%s5407_s3 + $0x170] sm:$0xff]  }
 0x1f7   : >> { %3985 = vmatpush3.bf16.msra.mxu1 %v4245_v4  ;;  %v2240_v4 = vsel %vm249_vm0, %v1875_v35, %v2239_v3 }
 0x1f8   : >> { %3810 = vmatpush3.bf16.msra.mxu0 %v4246_v5  ;;  %3986 = vmatprep.subr.bf16.mxu1 %v4376_v19  ;;  %v4284_v5 = vld [vmem:[%s5407_s3 + $0x168] sm:$0xff]   ;;  %v2249_v6 = vpack.c.bf16 %v2239_v3, %v2240_v4 }
 0x1f9   : >> { %3811 = vmatprep.subr.bf16.mxu0 %v4247_v7  ;;  %v4285_v7 = vld [vmem:[%s5407_s3 + $0xe8] sm:$0xff]  }
 0x1fb   : >> { %3987 = vmatpush3.bf16.msra.mxu1 %v4248_v15  ;;  %v4287_v15 = vld [vmem:[%s5407_s3 + $0x160] sm:$0xff]  }
 0x1fc   : >> { %3812 = vmatpush3.bf16.msra.mxu0 %v4249_v0  ;;  %3988 = vmatprep.subr.bf16.mxu1 %v4376_v19  ;;  %v4290_v0 = vld [vmem:[%s5407_s3 + $0x158] sm:$0xff]  }
 0x1fd   : >> { %3813 = vmatprep.subr.bf16.mxu0 %v4250_v20  ;;  %v4291_v20 = vld [vmem:[%s5407_s3 + $0xd8] sm:$0xff]  }
 0x1ff   : >> { %3989 = vmatpush3.bf16.msra.mxu1 %v4251_v21  ;;  %v4292_v21 = vld [vmem:[%s5407_s3 + $0x110] sm:$0xff]  }
 0x200   : >> { %3814 = vmatpush3.bf16.msra.mxu0 %v4252_v23  ;;  %3994 = vmatprep.subr.bf16.mxu1 %v4376_v19  ;;  %v4294_v23 = vld [vmem:[%s5407_s3 + $0xd0] sm:$0xff]  }
 0x201   : >> { %3830 = vmatprep.subr.bf16.mxu0 %v4253_v24  ;;  %v4295_v24 = vld [vmem:[%s5407_s3 + $0x108] sm:$0xff]  }
 0x202   : >> { %3991 = vmatmul.mubr.bf16.vlgmr.msra.gmra.mxu1 %v1298_v10  ;;  %v4296_v10 = vld [vmem:[%s5407_s3 + $0x148] sm:$0xff]  }
 0x203   : >> { %1819 = vmatmul.mubr.bf16.vlgmr.msra.gmra.mxu0 %v1296_v11  ;;  %3995 = vmatpush3.bf16.msra.mxu1 %v4254_v25  ;;  %v2244_v11 = vrot.slane %v5126_v63, 2  ;;  %v4297_v25 = vld [vmem:[%s5407_s3 + $0xc8] sm:$0xff]  }
 0x204   : >> { %3831 = vmatpush3.bf16.msra.mxu0 %v4255_v26  ;;  %3996 = vmatprep.subr.bf16.mxu1 %v4376_v19  ;;  %v4298_v26 = vld [vmem:[%s5407_s3 + $0x100] sm:$0xff]  }
 0x205   : >> { %3832 = vmatprep.subr.bf16.mxu0 %v4256_v27  ;;  %4010 = vmatprep.mubr.msk.bf16.mxu1 %vm4377_vm3, %v4376_v19  ;;  %v4299_v27 = vld [vmem:[%s5407_s3 + $0x140] sm:$0xff]  }
 0x206   : >> { %2113 = vmatprep.mubr.bf16.mxu0 %v1886_v41  ;;  %v4309_v41 = vld [vmem:[%s5407_s3 + $0x28] sm:$0xff]  }
 0x207   : >> { %3997 = vmatpush3.bf16.msra.mxu1 %v4257_v28  ;;  %v2245_v28 = vsel %vm259_vm1, %v1880_v51, %v2244_v11  ;;  %v4316_v51 = vld [vmem:[%s5407_s3 + $0x50] sm:$0xff]  }
 0x208   : >> { %3833 = vmatpush3.bf16.msra.mxu0 %v4258_v29  ;;  %3998 = vmatprep.subr.bf16.mxu1 %v4376_v19  ;;  %v4300_v29 = vld [vmem:[%s5407_s3 + $0xc0] sm:$0xff]  }
 0x209   : >> { %3834 = vmatprep.subr.bf16.mxu0 %v4259_v30  ;;  %v5203_v30 = vld [vmem:[%s4906_s12 + $0x18] sm:$0x3f] }
 0x20a   : >> { %v2179_v56 = vrot.slane %v5203_v30, 2 }
 0x20b   : >> { %3999 = vmatpush3.bf16.msra.mxu1 %v4260_v31  ;;  %v4301_v31 = vld [vmem:[%s5407_s3 + $0x78] sm:$0xff]  }
 0x20c   : >> { %3835 = vmatpush3.bf16.msra.mxu0 %v4261_v32  ;;  %4000 = vmatprep.subr.bf16.mxu1 %v4376_v19  ;;  %v2174_v32 = vrot.slane %v5203_v30, 1 }
 0x20d   : >> { %3836 = vmatprep.subr.bf16.mxu0 %v4262_v33  ;;  %v2250_v33 = vpack.c.bf16 %v2244_v11, %v2245_v28  ;;  %v4340_v11 = vld [vmem:[%s5407_s3 + $0x1d0] sm:$0xff]   ;;  %v4344_v28 = vld [vmem:[%s5407_s3 + $0x208] sm:$0xff]  }
 0x20e   : >> { %v2175_v35 = vsel %vm249_vm0, %v1354_v39, %v2174_v32  ;;  %v4305_v39 = vld [vmem:[%s5407_s3 + $0xb0] sm:$0xff]  }
 0x20f   : >> { %4001 = vmatpush3.bf16.msra.mxu1 %v4263_v9  ;;  %v2248_v9 = vpack.c.bf16 %v5126_v63, %v5050_v8  ;;  %v4304_v8 = vld [vmem:[%s5407_s3 + $0x70] sm:$0xff]   ;;  %v4324_v63 = vld [vmem:[%s5407_s3] sm:$0xff]  }
 0x210   : >> { %3837 = vmatpush3.bf16.msra.mxu0 %v4264_v38  ;;  %4002 = vmatprep.subr.bf16.mxu1 %v4376_v19  ;;  %v4303_v38 = vld [vmem:[%s5407_s3 + $0x38] sm:$0xff]  }
 0x211   : >> { %3838 = vmatprep.subr.bf16.mxu0 %v4265_v40  ;;  %v2184_v40 = vpack.c.bf16 %v2174_v32, %v2175_v35  ;;  %v4346_v32 = vld [vmem:[%s5407_s3 + $0x1c0] sm:$0xff]  }
 0x213   : >> { %4003 = vmatpush3.bf16.msra.mxu1 %v4266_v45  ;;  %v4308_v45 = vld [vmem:[%s5407_s3 + $0xa8] sm:$0xff]  }
 0x214   : >> { %3839 = vmatpush3.bf16.msra.mxu0 %v4267_v46  ;;  %4004 = vmatprep.subr.bf16.mxu1 %v4376_v19  ;;  %v4310_v46 = vld [vmem:[%s5407_s3 + $0x60] sm:$0xff]  }
 0x215   : >> { %3840 = vmatprep.subr.bf16.mxu0 %v4268_v47  ;;  %v4311_v47 = vld [vmem:[%s5407_s3 + $0xa0] sm:$0xff]  }
 0x217   : >> { %4005 = vmatpush3.bf16.msra.mxu1 %v4269_v48  ;;  %v4312_v48 = vld [vmem:[%s5407_s3 + $0x20] sm:$0xff]  }
 0x218   : >> { %3841 = vmatpush3.bf16.msra.mxu0 %v4270_v49  ;;  %4006 = vmatprep.subr.bf16.mxu1 %v4376_v19  ;;  %v4313_v49 = vld [vmem:[%s5407_s3 + $0x58] sm:$0xff]  }
 0x219   : >> { %3842 = vmatprep.subr.bf16.mxu0 %v4271_v2  ;;  %v4314_v2 = vld [vmem:[%s5407_s3 + $0x98] sm:$0xff]  }
 0x21b   : >> { %4007 = vmatpush3.bf16.msra.mxu1 %v4272_v50  ;;  %v4315_v50 = vld [vmem:[%s5407_s3 + $0x18] sm:$0xff]  }
 0x21c   : >> { %3843 = vmatpush3.bf16.msra.mxu0 %v4273_v53  ;;  %4008 = vmatprep.subr.bf16.mxu1 %v4376_v19  ;;  %v4318_v53 = vld [vmem:[%s5407_s3 + $0x10] sm:$0xff]  }
 0x21d   : >> { %3844 = vmatprep.subr.bf16.mxu0 %v4274_v54  ;;  %v4319_v54 = vld [vmem:[%s5407_s3 + $0x48] sm:$0xff]  }
 0x21f   : >> { %4009 = vmatpush3.bf16.msra.mxu1 %v4275_v55  ;;  %v4320_v55 = vld [vmem:[%s5407_s3 + $0x88] sm:$0xff]  }
 0x220   : >> { %3845 = vmatpush3.bf16.msra.mxu0 %v4276_v57  ;;  %4014 = vmatprep.subr.bf16.mxu1 %v4376_v19  ;;  %v4321_v57 = vld [vmem:[%s5407_s3 + $0x8] sm:$0xff]  }
 0x221   : >> { %3861 = vmatprep.subr.bf16.mxu0 %v4277_v58  ;;  %v5285_v58 = vld [vmem:[%s4906_s12 + $0x30] sm:$0xff] }
 0x222   : >> { %4011 = vmatmul.mubr.bf16.vlgmr.msra.gmra.mxu1 %v1887_v59  ;;  %v5288_v59 = vld [vmem:[%s4906_s12 + $0x38] sm:$0x3f] }
 0x223   : >> { %2114 = vmatmul.mubr.bf16.vlgmr.msra.gmra.mxu0 %v1885_v60  ;;  %4015 = vmatpush3.bf16.msra.mxu1 %v4278_v61  ;;  %v4322_v60 = vld [vmem:[%s5407_s3 + $0x40] sm:$0xff]  }
 0x224   : >> { %3862 = vmatpush3.bf16.msra.mxu0 %v4279_v62  ;;  %4016 = vmatprep.subr.bf16.mxu1 %v4376_v19  ;;  %v4323_v61 = vld [vmem:[%s5407_s3 + $0x80] sm:$0xff]   ;;  %v2180_v62 = vsel %vm259_vm1, %v1359_v43, %v2179_v56  ;;  %v2183_v43 = vpack.c.bf16 %v5203_v30, %v4349_v37  ;;  %v2764_v30 = vrot.slane %v5288_v59, 2 }
 0x225   : >> { %3863 = vmatprep.subr.bf16.mxu0 %v4280_v13  ;;  %4030 = vmatprep.mubr.msk.bf16.mxu1 %vm4377_vm3, %v4376_v19  ;;  %v2758_v13 = vrot.slane %v5285_v58, 1  ;;  %v2185_v3 = vpack.c.bf16 %v2179_v56, %v2180_v62 }
 0x226   : >> { %2475 = vmatprep.mubr.bf16.mxu0 %v2249_v6  ;;  %v4328_v6 = vld [vmem:[%s5407_s3 + $0x1f0] sm:$0xff]  }
 0x227   : >> { %4017 = vmatpush3.bf16.msra.mxu1 %v4281_v14  ;;  %v2759_v14 = vrot.slane %v5288_v59, 1 }
 0x228   : >> { %3864 = vmatpush3.bf16.msra.mxu0 %v4282_v1  ;;  %4018 = vmatprep.subr.bf16.mxu1 %v4376_v19  ;;  %v4325_v1 = vld [vmem:[%s5407_s3 + $0x1f8] sm:$0xff]  }
 0x229   : >> { %3865 = vmatprep.subr.bf16.mxu0 %v4283_v36  ;;  %v4326_v36 = vld [vmem:[%s5407_s3 + $0x238] sm:$0xff]   ;;  %v2760_v4 = vsel %vm249_vm0, %v2758_v13, %v2759_v14 }
 0x22b   : >> { %4019 = vmatpush3.bf16.msra.mxu1 %v4284_v5  ;;  %v4327_v5 = vld [vmem:[%s5407_s3 + $0x1b8] sm:$0xff]  }
 0x22c   : >> { %3866 = vmatpush3.bf16.msra.mxu0 %v4285_v7  ;;  %4020 = vmatprep.subr.bf16.mxu1 %v4376_v19  ;;  %v2769_v7 = vpack.c.bf16 %v2759_v14, %v2760_v4 }
 0x22d   : >> { %3867 = vmatprep.subr.bf16.mxu0 %v4286_v12  ;;  %v4329_v12 = vld [vmem:[%s5407_s3 + $0x230] sm:$0xff]  }
 0x22f   : >> { %4021 = vmatpush3.bf16.msra.mxu1 %v4287_v15  ;;  %v4330_v15 = vld [vmem:[%s5407_s3 + $0x1b0] sm:$0xff]  }
 0x230   : >> { %3868 = vmatpush3.bf16.msra.mxu0 %v4288_v16  ;;  %4022 = vmatprep.subr.bf16.mxu1 %v4376_v19  ;;  %v4331_v16 = vld [vmem:[%s5407_s3 + $0x1e8] sm:$0xff]  }
 0x231   : >> { %3869 = vmatprep.subr.bf16.mxu0 %v4289_v18  ;;  %v4332_v18 = vld [vmem:[%s5407_s3 + $0x228] sm:$0xff]  }
 0x233   : >> { %4023 = vmatpush3.bf16.msra.mxu1 %v4290_v0  ;;  %v4333_v0 = vld [vmem:[%s5407_s3 + $0x1a8] sm:$0xff]  }
 0x234   : >> { %3870 = vmatpush3.bf16.msra.mxu0 %v4291_v20  ;;  %4024 = vmatprep.subr.bf16.mxu1 %v4376_v19  ;;  %v4334_v20 = vld [vmem:[%s5407_s3 + $0x1e0] sm:$0xff]  }
 0x235   : >> { %3871 = vmatprep.subr.bf16.mxu0 %v4292_v21  ;;  %v4335_v21 = vld [vmem:[%s5407_s3 + $0x220] sm:$0xff]  }
 0x237   : >> { %4025 = vmatpush3.bf16.msra.mxu1 %v4293_v22  ;;  %v4336_v22 = vld [vmem:[%s5407_s3 + $0x1a0] sm:$0xff]  }
 0x238   : >> { %3872 = vmatpush3.bf16.msra.mxu0 %v4294_v23  ;;  %4026 = vmatprep.subr.bf16.mxu1 %v4376_v19  ;;  %v4337_v23 = vld [vmem:[%s5407_s3 + $0x1d8] sm:$0xff]  }
 0x239   : >> { %3873 = vmatprep.subr.bf16.mxu0 %v4295_v24  ;;  %v4338_v24 = vld [vmem:[%s5407_s3 + $0x218] sm:$0xff]  }
 0x23b   : >> { %4027 = vmatpush3.bf16.msra.mxu1 %v4296_v10  ;;  %v4339_v10 = vld [vmem:[%s5407_s3 + $0x198] sm:$0xff]  }
 0x23c   : >> { %3874 = vmatpush3.bf16.msra.mxu0 %v4297_v25  ;;  %4028 = vmatprep.subr.bf16.mxu1 %v4376_v19  ;;  %v4341_v25 = vld [vmem:[%s5407_s3 + $0x210] sm:$0xff]  }
 0x23d   : >> { %3875 = vmatprep.subr.bf16.mxu0 %v4298_v26  ;;  %v4342_v26 = vld [vmem:[%s5407_s3 + $0x190] sm:$0xff]  }
 0x23f   : >> { %4029 = vmatpush3.bf16.msra.mxu1 %v4299_v27  ;;  %v4343_v27 = vld [vmem:[%s5407_s3 + $0x1c8] sm:$0xff]  }
 0x240   : >> { %3876 = vmatpush3.bf16.msra.mxu0 %v4300_v29  ;;  %4034 = vmatprep.subr.bf16.mxu1 %v4376_v19  ;;  %v2763_v29 = vrot.slane %v5285_v58, 2 }
 0x241   : >> { %3892 = vmatprep.subr.bf16.mxu0 %v4301_v31  ;;  %v4345_v31 = vld [vmem:[%s5407_s3 + $0x188] sm:$0xff]  }
 0x242   : >> { %4031 = vmatmul.mubr.bf16.vlgmr.msra.gmra.mxu1 %v2250_v33  ;;  %v4347_v33 = vld [vmem:[%s5407_s3 + $0x200] sm:$0xff]  }
 0x243   : >> { %2476 = vmatmul.mubr.bf16.vlgmr.msra.gmra.mxu0 %v2248_v9  ;;  %4035 = vmatpush3.bf16.msra.mxu1 %v4302_v34  ;;  %v2765_v9 = vsel %vm259_vm1, %v2763_v29, %v2764_v30  ;;  %v4348_v34 = vld [vmem:[%s5407_s3 + $0x180] sm:$0xff]  }
 0x244   : >> { %3893 = vmatpush3.bf16.msra.mxu0 %v4303_v38  ;;  %4036 = vmatprep.subr.bf16.mxu1 %v4376_v19  ;;  %v2770_v35 = vpack.c.bf16 %v2764_v30, %v2765_v9  ;;  %v2768_v38 = vpack.c.bf16 %v5288_v59, %v5285_v58 }
 0x245   : >> { %3894 = vmatprep.subr.bf16.mxu0 %v4304_v8  ;;  %4050 = vmatprep.mubr.msk.bf16.mxu1 %vm4377_vm3, %v4376_v19 }
 0x246   : >> { %2701 = vmatprep.mubr.bf16.mxu0 %v2184_v40 }
 0x247   : >> { %4037 = vmatpush3.bf16.msra.mxu1 %v4305_v39 }
 0x248   : >> { %3895 = vmatpush3.bf16.msra.mxu0 %v4306_v42  ;;  %4038 = vmatprep.subr.bf16.mxu1 %v4376_v19 }
 0x249   : >> { %3896 = vmatprep.subr.bf16.mxu0 %v4307_v44 }
 0x24b   : >> { %4039 = vmatpush3.bf16.msra.mxu1 %v4308_v45 }
 0x24c   : >> { %3897 = vmatpush3.bf16.msra.mxu0 %v4309_v41  ;;  %4040 = vmatprep.subr.bf16.mxu1 %v4376_v19 }
 0x24d   : >> { %3898 = vmatprep.subr.bf16.mxu0 %v4310_v46 }
 0x24f   : >> { %4041 = vmatpush3.bf16.msra.mxu1 %v4311_v47 }
 0x250   : >> { %3899 = vmatpush3.bf16.msra.mxu0 %v4312_v48  ;;  %4042 = vmatprep.subr.bf16.mxu1 %v4376_v19 }
 0x251   : >> { %3900 = vmatprep.subr.bf16.mxu0 %v4313_v49 }
 0x253   : >> { %4043 = vmatpush3.bf16.msra.mxu1 %v4314_v2 }
 0x254   : >> { %3901 = vmatpush3.bf16.msra.mxu0 %v4315_v50  ;;  %4044 = vmatprep.subr.bf16.mxu1 %v4376_v19 }
 0x255   : >> { %3902 = vmatprep.subr.bf16.mxu0 %v4316_v51 }
 0x257   : >> { %4045 = vmatpush3.bf16.msra.mxu1 %v4317_v52 }
 0x258   : >> { %3903 = vmatpush3.bf16.msra.mxu0 %v4318_v53  ;;  %4046 = vmatprep.subr.bf16.mxu1 %v4376_v19 }
 0x259   : >> { %3904 = vmatprep.subr.bf16.mxu0 %v4319_v54 }
 0x25b   : >> { %4047 = vmatpush3.bf16.msra.mxu1 %v4320_v55 }
 0x25c   : >> { %3905 = vmatpush3.bf16.msra.mxu0 %v4321_v57  ;;  %4048 = vmatprep.subr.bf16.mxu1 %v4376_v19 }
 0x25d   : >> { %3906 = vmatprep.subr.bf16.mxu0 %v4322_v60 }
 0x25f   : >> { %4049 = vmatpush3.bf16.msra.mxu1 %v4323_v61 }
 0x260   : >> { %3907 = vmatpush3.bf16.msra.mxu0 %v4324_v63  ;;  %4054 = vmatprep.subr.bf16.mxu1 %v4376_v19 }
 0x261   : >> { %3923 = vmatprep.subr.bf16.mxu0 %v4325_v1 }
 0x262   : >> { %4051 = vmatmul.mubr.bf16.vlgmr.msra.gmra.mxu1 %v2185_v3 }
 0x263   : >> { %2702 = vmatmul.mubr.bf16.vlgmr.msra.gmra.mxu0 %v2183_v43  ;;  %4055 = vmatpush3.bf16.msra.mxu1 %v4326_v36 }
 0x264   : >> { %3924 = vmatpush3.bf16.msra.mxu0 %v4327_v5  ;;  %4056 = vmatprep.subr.bf16.mxu1 %v4376_v19 }
 0x265   : >> { %3925 = vmatprep.subr.bf16.mxu0 %v4328_v6  ;;  %4070 = vmatprep.mubr.msk.bf16.mxu1 %vm4377_vm3, %v4376_v19 }
 0x266   : >> { %2995 = vmatprep.mubr.bf16.mxu0 %v2769_v7 }
 0x267   : >> { %4057 = vmatpush3.bf16.msra.mxu1 %v4329_v12 }
 0x268   : >> { %3926 = vmatpush3.bf16.msra.mxu0 %v4330_v15  ;;  %4058 = vmatprep.subr.bf16.mxu1 %v4376_v19 }
 0x269   : >> { %3927 = vmatprep.subr.bf16.mxu0 %v4331_v16 }
 0x26b   : >> { %4059 = vmatpush3.bf16.msra.mxu1 %v4332_v18 }
 0x26c   : >> { %3928 = vmatpush3.bf16.msra.mxu0 %v4333_v0  ;;  %4060 = vmatprep.subr.bf16.mxu1 %v4376_v19 }
 0x26d   : >> { %3929 = vmatprep.subr.bf16.mxu0 %v4334_v20 }
 0x26f   : >> { %4061 = vmatpush3.bf16.msra.mxu1 %v4335_v21 }
 0x270   : >> { %3930 = vmatpush3.bf16.msra.mxu0 %v4336_v22  ;;  %4062 = vmatprep.subr.bf16.mxu1 %v4376_v19 }
 0x271   : >> { %3931 = vmatprep.subr.bf16.mxu0 %v4337_v23 }
 0x273   : >> { %4063 = vmatpush3.bf16.msra.mxu1 %v4338_v24 }
 0x274   : >> { %3932 = vmatpush3.bf16.msra.mxu0 %v4339_v10  ;;  %4064 = vmatprep.subr.bf16.mxu1 %v4376_v19 }
 0x275   : >> { %3933 = vmatprep.subr.bf16.mxu0 %v4340_v11 }
 0x277   : >> { %4065 = vmatpush3.bf16.msra.mxu1 %v4341_v25 }
 0x278   : >> { %3934 = vmatpush3.bf16.msra.mxu0 %v4342_v26  ;;  %4066 = vmatprep.subr.bf16.mxu1 %v4376_v19 }
 0x279   : >> { %3935 = vmatprep.subr.bf16.mxu0 %v4343_v27 }
 0x27b   : >> { %4067 = vmatpush3.bf16.msra.mxu1 %v4344_v28 }
 0x27c   : >> { %3936 = vmatpush3.bf16.msra.mxu0 %v4345_v31  ;;  %4068 = vmatprep.subr.bf16.mxu1 %v4376_v19 }
 0x27d   : >> { %3937 = vmatprep.subr.bf16.mxu0 %v4346_v32 }
 0x27f   : >> { %4069 = vmatpush3.bf16.msra.mxu1 %v4347_v33 }
 0x280   : >> { %3938 = vmatpush3.bf16.msra.mxu0 %v4348_v34 }
 0x282   : >> { %4071 = vmatmul.mubr.bf16.vlgmr.msra.gmra.mxu1 %v2770_v35 }
 0x283   : >> { %2996 = vmatmul.mubr.bf16.vlgmr.msra.gmra.mxu0 %v2768_v38 }
 0x2a2   : >> { %v1635_v8 = vpop.f32.mrf.mxu1 }
 0x2a3   : >> { %v3784_v40 = vpop.f32.mrf.mxu0 }
 0x2a4   : >> { %v3972_v39 = vpop.f32.mrf.mxu1 }
 0x2a5   : >> { %v3785_v42 = vpop.f32.mrf.mxu0 }
 0x2a6   : >> { %v3786_v44 = vadd.f32 %v3785_v42, %v3784_v40  ;;  %v1638_v45 = vpop.f32.mrf.mxu1 }
 0x2a7   : >> { %v3787_v46 = vpop.f32.mrf.mxu0 }
 0x2a8   : >> { %v1636_v19 = vadd.f32 %v3786_v44, %v1635_v8  ;;  %v3973_v41 = vpop.f32.mrf.mxu1 }
 0x2a9   : >> { %v3788_v47 = vpop.f32.mrf.mxu0 }
 0x2aa   : >> { %v3789_v58 = vadd.f32 %v3788_v47, %v3787_v46 }
 0x2ac   : >> { %v1639_v14 = vadd.f32 %v3789_v58, %v1638_v45 }
 0x2c2   : >> { %v1861_v48 = vpop.f32.mrf.mxu1 }
 0x2c3   : >> { %v3815_v49 = vpop.f32.mrf.mxu0 }
 0x2c4   : >> { %v3992_v2 = vpop.f32.mrf.mxu1 }
 0x2c5   : >> { %v3816_v50 = vpop.f32.mrf.mxu0 }
 0x2c6   : >> { %v3817_v51 = vadd.f32 %v3816_v50, %v3815_v49  ;;  %v1864_v52 = vpop.f32.mrf.mxu1 }
 0x2c7   : >> { %v3818_v56 = vpop.f32.mrf.mxu0 }
 0x2c8   : >> { %v1821_v53 = vadd.f32 %v3817_v51, %v1636_v19  ;;  %v3993_v54 = vpop.f32.mrf.mxu1 }
 0x2c9   : >> { %v3819_v57 = vpop.f32.mrf.mxu0 }
 0x2ca   : >> { %v1862_v55 = vadd.f32 %v1861_v48, %v1821_v53  ;;  %v3820_v61 = vadd.f32 %v3819_v57, %v3818_v56 }
 0x2cc   : >> { %v1824_v37 = vadd.f32 %v3820_v61, %v1639_v14 }
 0x2ce   : >> { %v1865_v7 = vadd.f32 %v1864_v52, %v1824_v37 }
 0x2e2   : >> { %v2156_v59 = vpop.f32.mrf.mxu1 }
 0x2e3   : >> { %v3846_v60 = vpop.f32.mrf.mxu0 }
 0x2e4   : >> { %v4012_v62 = vpop.f32.mrf.mxu1 }
 0x2e5   : >> { %v3847_v13 = vpop.f32.mrf.mxu0 }
 0x2e6   : >> { %v3848_v63 = vadd.f32 %v3847_v13, %v3846_v60  ;;  %v2159_v1 = vpop.f32.mrf.mxu1 }
 0x2e7   : >> { %v3849_v3 = vpop.f32.mrf.mxu0 }
 0x2e8   : >> { %v2157_v43 = vadd.f32 %v3848_v63, %v2156_v59  ;;  %v4013_v36 = vpop.f32.mrf.mxu1 }
 0x2e9   : >> { %v3850_v4 = vpop.f32.mrf.mxu0 }
 0x2ea   : >> { %v2163_v5 = vadd.f32 %v2157_v43, %v1862_v55  ;;  %v3851_v6 = vadd.f32 %v3850_v4, %v3849_v3 }
 0x2ec   : >> { %v2160_v12 = vadd.f32 %v3851_v6, %v2159_v1 }
 0x2ee   : >> { %v2164_v15 = vadd.f32 %v2160_v12, %v1865_v7 }
 0x2f0   : >> { %2166 = vst [vmem:[#allocation3 + $0x8] sm:$0xf] %v2164_v15 }
 0x2f7   : >> { %v2168_v55 = vld [vmem:[#allocation3 + $0x8] sm:$0xf] }
 0x302   : >> { %v2518_v16 = vpop.f32.mrf.mxu1 }
 0x303   : >> { %v3877_v24 = vpop.f32.mrf.mxu0 }
 0x304   : >> { %v4032_v18 = vpop.f32.mrf.mxu1 }
 0x305   : >> { %v3878_v11 = vpop.f32.mrf.mxu0 }
 0x306   : >> { %v2521_v0 = vpop.f32.mrf.mxu1  ;;  %v3879_v30 = vadd.f32 %v3878_v11, %v3877_v24 }
 0x307   : >> { %v3880_v25 = vpop.f32.mrf.mxu0 }
 0x308   : >> { %v4033_v20 = vpop.f32.mrf.mxu1  ;;  %v2519_v33 = vadd.f32 %v3879_v30, %v2518_v16 }
 0x309   : >> { %v3881_v26 = vpop.f32.mrf.mxu0 }
 0x30a   : >> { %v3882_v9 = vadd.f32 %v3881_v26, %v3880_v25 }
 0x30c   : >> { %v2522_v42 = vadd.f32 %v3882_v9, %v2521_v0 }
 0x322   : >> { %v2744_v21 = vpop.f32.mrf.mxu1 }
 0x323   : >> { %v3908_v27 = vpop.f32.mrf.mxu0 }
 0x324   : >> { %v4052_v22 = vpop.f32.mrf.mxu1 }
 0x325   : >> { %v3909_v28 = vpop.f32.mrf.mxu0 }
 0x326   : >> { %v2747_v23 = vpop.f32.mrf.mxu1  ;;  %v3910_v31 = vadd.f32 %v3909_v28, %v3908_v27 }
 0x327   : >> { %v3911_v29 = vpop.f32.mrf.mxu0 }
 0x328   : >> { %v4053_v10 = vpop.f32.mrf.mxu1  ;;  %v2704_v38 = vadd.f32 %v3910_v31, %v2519_v33 }
 0x329   : >> { %v3912_v32 = vpop.f32.mrf.mxu0 }
 0x32a   : >> { %v3913_v8 = vadd.f32 %v3912_v32, %v3911_v29  ;;  %v2745_v41 = vadd.f32 %v2744_v21, %v2704_v38 }
 0x32c   : >> { %v2707_v46 = vadd.f32 %v3913_v8, %v2522_v42 }
 0x32e   : >> { %v2748_v51 = vadd.f32 %v2747_v23, %v2707_v46 }
 0x342   : >> { %v3038_v34 = vpop.f32.mrf.mxu1 }
 0x343   : >> { %v3939_v35 = vpop.f32.mrf.mxu0 }
 0x344   : >> { %v4072_v40 = vpop.f32.mrf.mxu1 }
 0x345   : >> { %v3940_v39 = vpop.f32.mrf.mxu0 }
 0x346   : >> { %v3941_v44 = vadd.f32 %v3940_v39, %v3939_v35  ;;  %v3041_v45 = vpop.f32.mrf.mxu1 }
 0x347   : >> { %v3942_v19 = vpop.f32.mrf.mxu0 }
 0x348   : >> { %v3039_v47 = vadd.f32 %v3941_v44, %v3038_v34  ;;  %v4073_v48 = vpop.f32.mrf.mxu1 }
 0x349   : >> { %v3943_v49 = vpop.f32.mrf.mxu0 }
 0x34a   : >> { %v3045_v2 = vadd.f32 %v3039_v47, %v2745_v41  ;;  %v3944_v50 = vadd.f32 %v3943_v49, %v3942_v19 }
 0x34c   : >> { %v3047_v52 = vmax.f32 %v2163_v5, %v3045_v2  ;;  %v3042_v53 = vadd.f32 %v3944_v50, %v3041_v45 }
 0x34e   : >> { %3049 = vst [vmem:[#allocation3] sm:$0xff] %v3047_v52  ;;  %v3046_v54 = vadd.f32 %v3042_v53, %v2748_v51 }
 0x350   : >> { %v3048_v56 = vmax.f32 %v2168_v55, %v3046_v54 }
 0x352   : >> { %3050 = vst [vmem:[#allocation3 + $0x8] sm:$0xf] %v3048_v56 }
 0x359   : >> { %v3051_v57 = vld [vmem:[#allocation3] ss:$2 sm:$0x3f]  ;;  %v3053_v58 = vld [vmem:[#allocation3 + $0x1] ss:$2 sm:$0x3f] }
 0x35a   : >> { %v3054_v59 = vmax.f32 %v3051_v57, %v3053_v58 }
 0x35c   : >> { %v3055_v60 = vadd.f32 %v4823_v17, %v3054_v59 }
 0x35e   : >> { %v3056_v61 = vmax.f32 %v3055_v60, 0.0  ;;  %1275 = sbr.rel (!%p1273_p5) target bundleno = 449 (0x1c1), region = 111 }
 0x360   : >> { %v3057_v62 = vpack.c.bf16 %v3056_v61, %v3056_v61 }
 0x362   : >> { %3060 = vst [vmem:[%s3059_s24] sm:$0x7] %v3057_v62 }
 0x363 PF: > { %s15_s18 = sadd.s32 1, %s4364_s18  }
 0x364   : > { %p12_p6 = scmp.ge.s32.totalorder %s15_s18, 4  }
 0x366   :  { %14 = sbr.rel (!%p12_p6) target bundleno = 1 (0x1), region = 122 }

// kernel: convnet_forward.9
= control target key start
LH: loop header
LB: loop body
LE: loop exit
PB: predicated region body
PF: predicated region fallthrough
CT: control target
= control target key end

     0   :  { %s6283_s20 = smov 0   ;;  %s7074_s0 = inlined_call_operand.vmem [shape: bf16[2,4608], index: 0, kind: input, shape index: {}]   ;;  %s7075_s1 = inlined_call_operand.vmem [shape: bf16[4608,512], index: 1, kind: input, shape index: {}]   ;;  %s7076_s2 = inlined_call_operand.vmem [shape: f32[1,512], index: 2, kind: input, shape index: {}]   ;;  %s7077_s3 = inlined_call_operand.vmem [shape: f32[1,512], index: 3, kind: input, shape index: {}]   ;;  %s7078_s4 = inlined_call_operand.<no memory space> [shape: f32[1,1], index: 4, kind: input, shape index: {}]   ;;  %s7079_s5 = inlined_call_operand.vmem [shape: f32[2,1], index: 5, kind: output, shape index: {}]  }
   0x1   :  { %v10_v0 = vstv %s7078_s4 }
   0x2   :  { %11 = vst [vmem:[#allocation3] sm:$0x1] %v10_v0 }
   0x3 LB: > { %s6289_s21 = sadd.s32 4294967295, %s6245_s20   ;;  %p4772_p0 = scmp.ge.s32.totalorder %s6245_s20, 1  ;;  %s6245_s20 = sphi %s6283_s20, %s17_s20  }
   0x4   : > { %p196_p1 = scmp.lt.s32.totalorder %s6245_s20, 3 }
   0x6   : > { %p197_p2 = pnand %p4772_p0, %p196_p1 }
   0x7   : > { %s224_s4 = smul.u32 (!%p197_p2), 18, %s6289_s21  ;;  %p4775_p5 = scmp.ne.s32.totalorder (!%p197_p2), %s6289_s21, 0 }
   0x8   : > { %200 = sbr.rel (%p197_p2) target bundleno = 1010 (0x3f2), region = 40 }
   0x9   : > { %s229_s22 = smul.u32 (!%p197_p2), 288, %s6289_s21  ;;  %p225_p3 = scmp.lt.s32.totalorder (!%p197_p2), %s224_s4, 35 }
   0xb   : > { %p230_p4 = scmp.lt.s32.totalorder (!%p197_p2), %s229_s22, 575 }
   0xd   : > { %s7081_s4 = smov (!%p225_p3, %s224_s4), 35  ;;  %s7083_s22 = smov (!%p230_p4, %s229_s22), 575 }
   0xe   : > { %s6298_s25 = scalar_lea.vmem %s7074_s0, %s7081_s4  ;;  %s5357_s26 = sshll.u32 %s7083_s22, 4 }
   0xf   : > { %s6303_s29 = scalar_lea.vmem %s7075_s1, %s5357_s26  ;;  %239 = sbr.rel (%p4775_p5) target bundleno = 22 (0x16), region = 44 }
  0x14   : > { %v6247_v1 = vmov 0.0  }
  0x15   : > { %240 = vst [vmem:[#allocation2] sm:$0xff] %v6247_v1 }
  0x16 PF: > { %v5369_v2 = vld [vmem:[%s6303_s29 + $0xe4] ss:$16 sps:$4 sm:$0xff]   ;;  %v5373_v4 = vld [vmem:[%s6303_s29 + $0xe0] ss:$16 sps:$4 sm:$0xff]   ;;  %v6248_v38 = vmov 1966171168   ;;  %v828_v40 = vlaneseq }
  0x17   : > { %v5371_v3 = vld [vmem:[%s6303_s29 + $0x2e4] ss:$16 sps:$4 sm:$0xff]   ;;  %3842 = vmatprep.subr.bf16.mxu0 %v5369_v2  ;;  %v5374_v5 = vld [vmem:[%s6303_s29 + $0x2e0] ss:$16 sps:$4 sm:$0xff]   ;;  %v826_v39 = vunpack.c.l.s4 %v6248_v38  ;;  %p5353_p6 = scmp.ne.s32.totalorder %s6289_s21, 1 }
  0x18   : > { %3883 = vmatprep.subr.bf16.mxu1 %v5371_v3  ;;  %v5375_v6 = vld [vmem:[%s6303_s29 + $0xc4] ss:$16 sps:$4 sm:$0xff]   ;;  %3843 = vmatpush1.bf16.msra.mxu0 %v5373_v4  ;;  %v5379_v8 = vld [vmem:[%s6303_s29 + $0xc0] ss:$16 sps:$4 sm:$0xff]   ;;  %v6345_v45 = vshrl.u32 %v828_v40, 7 }
  0x19   : > { %3884 = vmatpush1.bf16.msra.mxu1 %v5374_v5  ;;  %v5377_v7 = vld [vmem:[%s6303_s29 + $0x2c4] ss:$16 sps:$4 sm:$0xff]   ;;  %3844 = vmatprep.subr.bf16.mxu0 %v5375_v6  ;;  %v5380_v9 = vld [vmem:[%s6303_s29 + $0x2c0] ss:$16 sps:$4 sm:$0xff]   ;;  %v827_v44 = vunpack.c.0.s8 %v826_v39 }
  0x1a   : > { %3885 = vmatprep.subr.bf16.mxu1 %v5377_v7  ;;  %v5381_v10 = vld [vmem:[%s6303_s29 + $0xa4] ss:$16 sps:$4 sm:$0xff]   ;;  %v5385_v12 = vld [vmem:[%s6303_s29 + $0xa0] ss:$16 sps:$4 sm:$0xff]  }
  0x1b   : > { %v5383_v11 = vld [vmem:[%s6303_s29 + $0x2a4] ss:$16 sps:$4 sm:$0xff]   ;;  %v5386_v13 = vld [vmem:[%s6303_s29 + $0x2a0] ss:$16 sps:$4 sm:$0xff]   ;;  %v6353_v51 = vsub.s32 %v827_v44, %v6345_v45 }
  0x1c   : > { %3845 = vmatpush1.bf16.msra.mxu0 %v5379_v8  ;;  %v5387_v14 = vld [vmem:[%s6303_s29 + $0x84] ss:$16 sps:$4 sm:$0xff]   ;;  %v5391_v16 = vld [vmem:[%s6303_s29 + $0x80] ss:$16 sps:$4 sm:$0xff]  }
  0x1d   : > { %3886 = vmatpush1.bf16.msra.mxu1 %v5380_v9  ;;  %3846 = vmatprep.subr.bf16.mxu0 %v5381_v10  ;;  %v5389_v15 = vld [vmem:[%s6303_s29 + $0x284] ss:$16 sps:$4 sm:$0xff]   ;;  %v5392_v17 = vld [vmem:[%s6303_s29 + $0x280] ss:$16 sps:$4 sm:$0xff]  }
  0x1e   : > { %3887 = vmatprep.subr.bf16.mxu1 %v5383_v11  ;;  %v5393_v18 = vld [vmem:[%s6303_s29 + $0x64] ss:$16 sps:$4 sm:$0xff]   ;;  %v5397_v20 = vld [vmem:[%s6303_s29 + $0x60] ss:$16 sps:$4 sm:$0xff]  }
  0x1f   : > { %v5395_v19 = vld [vmem:[%s6303_s29 + $0x264] ss:$16 sps:$4 sm:$0xff]   ;;  %v5398_v21 = vld [vmem:[%s6303_s29 + $0x260] ss:$16 sps:$4 sm:$0xff]  }
  0x20   : > { %3847 = vmatpush1.bf16.msra.mxu0 %v5385_v12  ;;  %v5399_v22 = vld [vmem:[%s6303_s29 + $0x44] ss:$16 sps:$4 sm:$0xff]   ;;  %v5403_v24 = vld [vmem:[%s6303_s29 + $0x40] ss:$16 sps:$4 sm:$0xff]  }
  0x21   : > { %3888 = vmatpush1.bf16.msra.mxu1 %v5386_v13  ;;  %3848 = vmatprep.subr.bf16.mxu0 %v5387_v14  ;;  %v5401_v23 = vld [vmem:[%s6303_s29 + $0x244] ss:$16 sps:$4 sm:$0xff]   ;;  %v5404_v25 = vld [vmem:[%s6303_s29 + $0x240] ss:$16 sps:$4 sm:$0xff]  }
  0x22   : > { %3889 = vmatprep.subr.bf16.mxu1 %v5389_v15  ;;  %v5405_v26 = vld [vmem:[%s6303_s29 + $0x24] ss:$16 sps:$4 sm:$0xff]   ;;  %v5409_v28 = vld [vmem:[%s6303_s29 + $0x20] ss:$16 sps:$4 sm:$0xff]  }
  0x23   : > { %v5407_v27 = vld [vmem:[%s6303_s29 + $0x224] ss:$16 sps:$4 sm:$0xff]   ;;  %v5410_v29 = vld [vmem:[%s6303_s29 + $0x220] ss:$16 sps:$4 sm:$0xff]  }
  0x24   : > { %3849 = vmatpush1.bf16.msra.mxu0 %v5391_v16  ;;  %v5411_v30 = vld [vmem:[%s6303_s29 + $0x4] ss:$16 sps:$4 sm:$0xff]   ;;  %v5415_v32 = vld [vmem:[%s6303_s29] ss:$16 sps:$4 sm:$0xff]  }
  0x25   : > { %3890 = vmatpush1.bf16.msra.mxu1 %v5392_v17  ;;  %3850 = vmatprep.subr.bf16.mxu0 %v5393_v18  ;;  %v5413_v31 = vld [vmem:[%s6303_s29 + $0x204] ss:$16 sps:$4 sm:$0xff]   ;;  %v5416_v33 = vld [vmem:[%s6303_s29 + $0x200] ss:$16 sps:$4 sm:$0xff]  }
  0x26   : > { %3891 = vmatprep.subr.bf16.mxu1 %v5395_v19  ;;  %v5417_v34 = vld [vmem:[%s6303_s29 + $0x1e4] ss:$16 sps:$4 sm:$0xff]   ;;  %v5421_v36 = vld [vmem:[%s6303_s29 + $0x1e0] ss:$16 sps:$4 sm:$0xff]  }
  0x27   : > { %v5419_v35 = vld [vmem:[%s6303_s29 + $0x3e4] ss:$16 sps:$4 sm:$0xff]   ;;  %v5422_v37 = vld [vmem:[%s6303_s29 + $0x3e0] ss:$16 sps:$4 sm:$0xff]  }
  0x28   : > { %3851 = vmatpush1.bf16.msra.mxu0 %v5397_v20  ;;  %v5423_v41 = vld [vmem:[%s6303_s29 + $0x1c4] ss:$16 sps:$4 sm:$0xff]   ;;  %v5427_v43 = vld [vmem:[%s6303_s29 + $0x1c0] ss:$16 sps:$4 sm:$0xff]  }
  0x29   : > { %3892 = vmatpush1.bf16.msra.mxu1 %v5398_v21  ;;  %3852 = vmatprep.subr.bf16.mxu0 %v5399_v22  ;;  %v5425_v42 = vld [vmem:[%s6303_s29 + $0x3c4] ss:$16 sps:$4 sm:$0xff]   ;;  %v5428_v46 = vld [vmem:[%s6303_s29 + $0x3c0] ss:$16 sps:$4 sm:$0xff]  }
  0x2a   : > { %3893 = vmatprep.subr.bf16.mxu1 %v5401_v23  ;;  %v5429_v47 = vld [vmem:[%s6303_s29 + $0x1a4] ss:$16 sps:$4 sm:$0xff]   ;;  %v5433_v49 = vld [vmem:[%s6303_s29 + $0x1a0] ss:$16 sps:$4 sm:$0xff]  }
  0x2b   : > { %v5431_v48 = vld [vmem:[%s6303_s29 + $0x3a4] ss:$16 sps:$4 sm:$0xff]   ;;  %v5434_v50 = vld [vmem:[%s6303_s29 + $0x3a0] ss:$16 sps:$4 sm:$0xff]  }
  0x2c   : > { %3853 = vmatpush1.bf16.msra.mxu0 %v5403_v24  ;;  %v5435_v52 = vld [vmem:[%s6303_s29 + $0x184] ss:$16 sps:$4 sm:$0xff]   ;;  %v5439_v55 = vld [vmem:[%s6303_s29 + $0x180] ss:$16 sps:$4 sm:$0xff]  }
  0x2d   : > { %3894 = vmatpush1.bf16.msra.mxu1 %v5404_v25  ;;  %3854 = vmatprep.subr.bf16.mxu0 %v5405_v26  ;;  %v5437_v53 = vld [vmem:[%s6303_s29 + $0x384] ss:$16 sps:$4 sm:$0xff]   ;;  %v5440_v57 = vld [vmem:[%s6303_s29 + $0x380] ss:$16 sps:$4 sm:$0xff]  }
  0x2e   : > { %3895 = vmatprep.subr.bf16.mxu1 %v5407_v27  ;;  %v242_v54 = vld [vmem:[%s6298_s25] sm:$0xff] }
  0x2f   : > { %v831_v56 = vrot.slane %v242_v54, %v6353_v51  ;;  %v5441_v58 = vld [vmem:[%s6303_s29 + $0x164] ss:$16 sps:$4 sm:$0xff]   ;;  %v5445_v61 = vld [vmem:[%s6303_s29 + $0x160] ss:$16 sps:$4 sm:$0xff]   ;;  %v824_v3 = vcombine.high %v242_v54, %v242_v54 }
  0x30   : > { %3855 = vmatpush1.bf16.msra.mxu0 %v5409_v28  ;;  %v5443_v59 = vld [vmem:[%s6303_s29 + $0x364] ss:$16 sps:$4 sm:$0xff]   ;;  %v5446_v63 = vld [vmem:[%s6303_s29 + $0x360] ss:$16 sps:$4 sm:$0xff]  }
  0x31   : > { %3896 = vmatpush1.bf16.msra.mxu1 %v5410_v29  ;;  %3856 = vmatprep.subr.bf16.mxu0 %v5411_v30  ;;  %v839_v60 = vcombine.high %v831_v56, %v831_v56  ;;  %v5447_v0 = vld [vmem:[%s6303_s29 + $0x144] ss:$16 sps:$4 sm:$0xff]   ;;  %v5451_v4 = vld [vmem:[%s6303_s29 + $0x140] ss:$16 sps:$4 sm:$0xff]   ;;  %v6381_v8 = vrot.slane %v824_v3, %v6353_v51  ;;  %v6391_v15 = vrot.slane %v831_v56, %v6353_v51 }
  0x32   : > { %3897 = vmatprep.subr.bf16.mxu1 %v5413_v31  ;;  %v5449_v1 = vld [vmem:[%s6303_s29 + $0x344] ss:$16 sps:$4 sm:$0xff]   ;;  %v5452_v5 = vld [vmem:[%s6303_s29 + $0x340] ss:$16 sps:$4 sm:$0xff]  }
  0x33   : > { %v6365_v62 = vrot.slane %v839_v60, %v6353_v51  ;;  %v5453_v6 = vld [vmem:[%s6303_s29 + $0x124] ss:$16 sps:$4 sm:$0xff]   ;;  %v5457_v9 = vld [vmem:[%s6303_s29 + $0x120] ss:$16 sps:$4 sm:$0xff]   ;;  %v840_v13 = vcombine.high %v6381_v8, %v6381_v8  ;;  %v6401_v20 = vcombine.high %v6391_v15, %v6391_v15 }
  0x34   : > { %3857 = vmatpush1.bf16.msra.mxu0 %v5415_v32  ;;  %v5455_v7 = vld [vmem:[%s6303_s29 + $0x324] ss:$16 sps:$4 sm:$0xff]   ;;  %v5458_v10 = vld [vmem:[%s6303_s29 + $0x320] ss:$16 sps:$4 sm:$0xff]  }
  0x35   : > { %3898 = vmatpush1.bf16.msra.mxu1 %v5416_v33  ;;  %3858 = vmatprep.subr.bf16.mxu0 %v5417_v34  ;;  %v6372_v2 = vcombine.high %v6365_v62, %v6365_v62  ;;  %v5459_v11 = vld [vmem:[%s6303_s29 + $0x104] ss:$16 sps:$4 sm:$0xff]   ;;  %v5463_v14 = vld [vmem:[%s6303_s29 + $0x100] ss:$16 sps:$4 sm:$0xff]   ;;  %v6397_v19 = vrot.slane %v840_v13, %v6353_v51 }
  0x36   : > { %3899 = vmatprep.subr.bf16.mxu1 %v5419_v35  ;;  %3874 = vmatprep.mubr.bf16.mxu0 %v6365_v62  ;;  %v5461_v12 = vld [vmem:[%s6303_s29 + $0x304] ss:$16 sps:$4 sm:$0xff]   ;;  %v5464_v16 = vld [vmem:[%s6303_s29 + $0x300] ss:$16 sps:$4 sm:$0xff]  }
  0x37   : > { %3915 = vmatprep.mubr.bf16.mxu1 %v6372_v2  ;;  %v5467_v17 = vld [vmem:[%s6303_s29 + $0x4e4] ss:$16 sps:$4 sm:$0xff]   ;;  %v5465_v21 = vld [vmem:[%s6303_s29 + $0x4e0] ss:$16 sps:$4 sm:$0xff]   ;;  %v6409_v25 = vcombine.high %v6397_v19, %v6397_v19 }
  0x38   : > { %3859 = vmatpush2.bf16.msra.mxu0 %v5421_v36  ;;  %v5470_v18 = vld [vmem:[%s6303_s29 + $0x6e4] ss:$16 sps:$4 sm:$0xff]   ;;  %v5468_v22 = vld [vmem:[%s6303_s29 + $0x6e0] ss:$16 sps:$4 sm:$0xff]  }
  0x39   : > { %3900 = vmatpush2.bf16.msra.mxu1 %v5422_v37  ;;  %3860 = vmatprep.subr.bf16.mxu0 %v5423_v41  ;;  %v5473_v23 = vld [vmem:[%s6303_s29 + $0x4c4] ss:$16 sps:$4 sm:$0xff]   ;;  %v5471_v26 = vld [vmem:[%s6303_s29 + $0x4c0] ss:$16 sps:$4 sm:$0xff]  }
  0x3a   : > { %3901 = vmatprep.subr.bf16.mxu1 %v5425_v42  ;;  %v5476_v24 = vld [vmem:[%s6303_s29 + $0x6c4] ss:$16 sps:$4 sm:$0xff]   ;;  %v5474_v27 = vld [vmem:[%s6303_s29 + $0x6c0] ss:$16 sps:$4 sm:$0xff]  }
  0x3b   : > { %v5479_v28 = vld [vmem:[%s6303_s29 + $0x4a4] ss:$16 sps:$4 sm:$0xff]   ;;  %v5477_v30 = vld [vmem:[%s6303_s29 + $0x4a0] ss:$16 sps:$4 sm:$0xff]  }
  0x3c   : > { %3861 = vmatpush2.bf16.msra.mxu0 %v5427_v43  ;;  %v5482_v29 = vld [vmem:[%s6303_s29 + $0x6a4] ss:$16 sps:$4 sm:$0xff]   ;;  %v5480_v31 = vld [vmem:[%s6303_s29 + $0x6a0] ss:$16 sps:$4 sm:$0xff]  }
  0x3d   : > { %3902 = vmatpush2.bf16.msra.mxu1 %v5428_v46  ;;  %3862 = vmatprep.subr.bf16.mxu0 %v5429_v47  ;;  %v5485_v32 = vld [vmem:[%s6303_s29 + $0x484] ss:$16 sps:$4 sm:$0xff]   ;;  %v5483_v34 = vld [vmem:[%s6303_s29 + $0x480] ss:$16 sps:$4 sm:$0xff]  }
  0x3e   : > { %3903 = vmatprep.subr.bf16.mxu1 %v5431_v48  ;;  %v5488_v33 = vld [vmem:[%s6303_s29 + $0x684] ss:$16 sps:$4 sm:$0xff]   ;;  %v5486_v35 = vld [vmem:[%s6303_s29 + $0x680] ss:$16 sps:$4 sm:$0xff]  }
  0x3f   : > { %v5491_v36 = vld [vmem:[%s6303_s29 + $0x464] ss:$16 sps:$4 sm:$0xff]   ;;  %v5489_v38 = vld [vmem:[%s6303_s29 + $0x460] ss:$16 sps:$4 sm:$0xff]  }
  0x40   : > { %3863 = vmatpush2.bf16.msra.mxu0 %v5433_v49  ;;  %v5494_v37 = vld [vmem:[%s6303_s29 + $0x664] ss:$16 sps:$4 sm:$0xff]   ;;  %v5492_v39 = vld [vmem:[%s6303_s29 + $0x660] ss:$16 sps:$4 sm:$0xff]  }
  0x41   : > { %3904 = vmatpush2.bf16.msra.mxu1 %v5434_v50  ;;  %3864 = vmatprep.subr.bf16.mxu0 %v5435_v52  ;;  %v5497_v40 = vld [vmem:[%s6303_s29 + $0x444] ss:$16 sps:$4 sm:$0xff]   ;;  %v5495_v42 = vld [vmem:[%s6303_s29 + $0x440] ss:$16 sps:$4 sm:$0xff]  }
  0x42   : > { %3905 = vmatprep.subr.bf16.mxu1 %v5437_v53  ;;  %v5500_v41 = vld [vmem:[%s6303_s29 + $0x644] ss:$16 sps:$4 sm:$0xff]   ;;  %v5498_v43 = vld [vmem:[%s6303_s29 + $0x640] ss:$16 sps:$4 sm:$0xff]  }
  0x43   : > { %v5503_v44 = vld [vmem:[%s6303_s29 + $0x424] ss:$16 sps:$4 sm:$0xff]   ;;  %v5501_v47 = vld [vmem:[%s6303_s29 + $0x420] ss:$16 sps:$4 sm:$0xff]  }
  0x44   : > { %3865 = vmatpush2.bf16.msra.mxu0 %v5439_v55  ;;  %v5506_v46 = vld [vmem:[%s6303_s29 + $0x624] ss:$16 sps:$4 sm:$0xff]   ;;  %v5504_v48 = vld [vmem:[%s6303_s29 + $0x620] ss:$16 sps:$4 sm:$0xff]  }
  0x45   : > { %3906 = vmatpush2.bf16.msra.mxu1 %v5440_v57  ;;  %3866 = vmatprep.subr.bf16.mxu0 %v5441_v58  ;;  %v5509_v49 = vld [vmem:[%s6303_s29 + $0x404] ss:$16 sps:$4 sm:$0xff]   ;;  %v5507_v52 = vld [vmem:[%s6303_s29 + $0x400] ss:$16 sps:$4 sm:$0xff]  }
  0x46   : > { %3907 = vmatprep.subr.bf16.mxu1 %v5443_v59  ;;  %v5512_v50 = vld [vmem:[%s6303_s29 + $0x604] ss:$16 sps:$4 sm:$0xff]   ;;  %v5510_v53 = vld [vmem:[%s6303_s29 + $0x600] ss:$16 sps:$4 sm:$0xff]  }
  0x47   : > { %v5515_v54 = vld [vmem:[%s6303_s29 + $0x5e4] ss:$16 sps:$4 sm:$0xff]   ;;  %v5513_v56 = vld [vmem:[%s6303_s29 + $0x5e0] ss:$16 sps:$4 sm:$0xff]  }
  0x48   : > { %3867 = vmatpush2.bf16.msra.mxu0 %v5445_v61  ;;  %v5518_v55 = vld [vmem:[%s6303_s29 + $0x7e4] ss:$16 sps:$4 sm:$0xff]   ;;  %v5516_v57 = vld [vmem:[%s6303_s29 + $0x7e0] ss:$16 sps:$4 sm:$0xff]  }
  0x49   : > { %3908 = vmatpush2.bf16.msra.mxu1 %v5446_v63  ;;  %3868 = vmatprep.subr.bf16.mxu0 %v5447_v0  ;;  %v5521_v58 = vld [vmem:[%s6303_s29 + $0x5c4] ss:$16 sps:$4 sm:$0xff]   ;;  %v5519_v60 = vld [vmem:[%s6303_s29 + $0x5c0] ss:$16 sps:$4 sm:$0xff]  }
  0x4a   : > { %3909 = vmatprep.subr.bf16.mxu1 %v5449_v1  ;;  %v5524_v59 = vld [vmem:[%s6303_s29 + $0x7c4] ss:$16 sps:$4 sm:$0xff]   ;;  %v5522_v61 = vld [vmem:[%s6303_s29 + $0x7c0] ss:$16 sps:$4 sm:$0xff]  }
  0x4b   : > { %v5527_v63 = vld [vmem:[%s6303_s29 + $0x5a4] ss:$16 sps:$4 sm:$0xff]   ;;  %v5525_v1 = vld [vmem:[%s6303_s29 + $0x5a0] ss:$16 sps:$4 sm:$0xff]  }
  0x4c   : > { %3869 = vmatpush2.bf16.msra.mxu0 %v5451_v4  ;;  %v5530_v0 = vld [vmem:[%s6303_s29 + $0x7a4] ss:$16 sps:$4 sm:$0xff]   ;;  %v5528_v3 = vld [vmem:[%s6303_s29 + $0x7a0] ss:$16 sps:$4 sm:$0xff]  }
  0x4d   : > { %3910 = vmatpush2.bf16.msra.mxu1 %v5452_v5  ;;  %3870 = vmatprep.subr.bf16.mxu0 %v5453_v6  ;;  %v5533_v4 = vld [vmem:[%s6303_s29 + $0x584] ss:$16 sps:$4 sm:$0xff]   ;;  %v5531_v6 = vld [vmem:[%s6303_s29 + $0x580] ss:$16 sps:$4 sm:$0xff]  }
  0x4e   : > { %3911 = vmatprep.subr.bf16.mxu1 %v5455_v7  ;;  %v5536_v5 = vld [vmem:[%s6303_s29 + $0x784] ss:$16 sps:$4 sm:$0xff]   ;;  %v5534_v7 = vld [vmem:[%s6303_s29 + $0x780] ss:$16 sps:$4 sm:$0xff]  }
  0x4f   : > { %v5545_v13 = vld [vmem:[%s6303_s29 + $0x544] ss:$16 sps:$4 sm:$0xff]  }
  0x50   : > { %3871 = vmatpush2.bf16.msra.mxu0 %v5457_v9  ;;  %v5539_v9 = vld [vmem:[%s6303_s29 + $0x564] ss:$16 sps:$4 sm:$0xff]  }
  0x51   : > { %3912 = vmatpush2.bf16.msra.mxu1 %v5458_v10  ;;  %3872 = vmatprep.subr.bf16.mxu0 %v5459_v11  ;;  %v5542_v10 = vld [vmem:[%s6303_s29 + $0x764] ss:$16 sps:$4 sm:$0xff]   ;;  %v5537_v11 = vld [vmem:[%s6303_s29 + $0x560] ss:$16 sps:$4 sm:$0xff]  }
  0x52   : > { %3913 = vmatprep.subr.bf16.mxu1 %v5461_v12  ;;  %v5540_v12 = vld [vmem:[%s6303_s29 + $0x760] ss:$16 sps:$4 sm:$0xff]  }
  0x54   : > { %3873 = vmatpush2.bf16.msra.mxu0 %v5463_v14  ;;  %v5548_v14 = vld [vmem:[%s6303_s29 + $0x744] ss:$16 sps:$4 sm:$0xff]  }
  0x55   : > { %3914 = vmatpush2.bf16.msra.mxu1 %v5464_v16  ;;  %3924 = vmatprep.subr.bf16.mxu0 %v5467_v17  ;;  %v5543_v16 = vld [vmem:[%s6303_s29 + $0x540] ss:$16 sps:$4 sm:$0xff]  }
  0x56   : > { %3965 = vmatprep.subr.bf16.mxu1 %v5470_v18  ;;  %v5546_v17 = vld [vmem:[%s6303_s29 + $0x740] ss:$16 sps:$4 sm:$0xff]   ;;  %v5551_v18 = vld [vmem:[%s6303_s29 + $0x524] ss:$16 sps:$4 sm:$0xff]  }
  0x57   : > { %3875 = vmatmul.mubr.bf16.vlgmr.msra.gmra.mxu0 %v6391_v15 }
  0x58   : > { %3916 = vmatmul.mubr.bf16.vlgmr.msra.gmra.mxu1 %v6401_v20  ;;  %3925 = vmatpush1.bf16.msra.mxu0 %v5465_v21  ;;  %v5554_v21 = vld [vmem:[%s6303_s29 + $0x724] ss:$16 sps:$4 sm:$0xff]  }
  0x59   : > { %3966 = vmatpush1.bf16.msra.mxu1 %v5468_v22  ;;  %3926 = vmatprep.subr.bf16.mxu0 %v5473_v23  ;;  %v5549_v22 = vld [vmem:[%s6303_s29 + $0x520] ss:$16 sps:$4 sm:$0xff]  }
  0x5a   : > { %3967 = vmatprep.subr.bf16.mxu1 %v5476_v24  ;;  %3956 = vmatprep.mubr.bf16.mxu0 %v6397_v19  ;;  %v5552_v23 = vld [vmem:[%s6303_s29 + $0x720] ss:$16 sps:$4 sm:$0xff]   ;;  %v5557_v24 = vld [vmem:[%s6303_s29 + $0x504] ss:$16 sps:$4 sm:$0xff]  }
  0x5b   : > { %3997 = vmatprep.mubr.bf16.mxu1 %v6409_v25 }
  0x5c   : > { %3927 = vmatpush1.bf16.msra.mxu0 %v5471_v26  ;;  %v5560_v26 = vld [vmem:[%s6303_s29 + $0x704] ss:$16 sps:$4 sm:$0xff]  }
  0x5d   : > { %3968 = vmatpush1.bf16.msra.mxu1 %v5474_v27  ;;  %3928 = vmatprep.subr.bf16.mxu0 %v5479_v28  ;;  %v5555_v27 = vld [vmem:[%s6303_s29 + $0x500] ss:$16 sps:$4 sm:$0xff]   ;;  %v6474_v28 = vrot.slane %v6381_v8, %v6353_v51 }
  0x5e   : > { %3969 = vmatprep.subr.bf16.mxu1 %v5482_v29  ;;  %v5558_v29 = vld [vmem:[%s6303_s29 + $0x700] ss:$16 sps:$4 sm:$0xff]  }
  0x5f   : > { %v5565_v8 = vld [vmem:[%s6303_s29 + $0xae0] ss:$16 sps:$4 sm:$0xff]  }
  0x60   : > { %3929 = vmatpush1.bf16.msra.mxu0 %v5477_v30  ;;  %v5564_v30 = vld [vmem:[%s6303_s29 + $0x8e4] ss:$16 sps:$4 sm:$0xff]  }
  0x61   : > { %3970 = vmatpush1.bf16.msra.mxu1 %v5480_v31  ;;  %3930 = vmatprep.subr.bf16.mxu0 %v5485_v32  ;;  %v5567_v31 = vld [vmem:[%s6303_s29 + $0xae4] ss:$16 sps:$4 sm:$0xff]   ;;  %v6481_v32 = vcombine.high %v6474_v28, %v6474_v28 }
  0x62   : > { %3971 = vmatprep.subr.bf16.mxu1 %v5488_v33  ;;  %v5562_v33 = vld [vmem:[%s6303_s29 + $0x8e0] ss:$16 sps:$4 sm:$0xff]  }
  0x64   : > { %3931 = vmatpush1.bf16.msra.mxu0 %v5483_v34  ;;  %v6486_v34 = vld [vmem:[%s6298_s25 + $0x8] sm:$0xff] }
  0x65   : > { %3972 = vmatpush1.bf16.msra.mxu1 %v5486_v35  ;;  %3932 = vmatprep.subr.bf16.mxu0 %v5491_v36  ;;  %v5570_v35 = vld [vmem:[%s6303_s29 + $0x8c4] ss:$16 sps:$4 sm:$0xff]  }
  0x66   : > { %3973 = vmatprep.subr.bf16.mxu1 %v5494_v37  ;;  %v5573_v36 = vld [vmem:[%s6303_s29 + $0xac4] ss:$16 sps:$4 sm:$0xff]   ;;  %v6492_v37 = vrot.slane %v6486_v34, %v6353_v51 }
  0x68   : > { %3933 = vmatpush1.bf16.msra.mxu0 %v5489_v38  ;;  %v888_v38 = vcombine.high %v6492_v37, %v6492_v37 }
  0x69   : > { %3974 = vmatpush1.bf16.msra.mxu1 %v5492_v39  ;;  %3934 = vmatprep.subr.bf16.mxu0 %v5497_v40  ;;  %v5568_v39 = vld [vmem:[%s6303_s29 + $0x8c0] ss:$16 sps:$4 sm:$0xff]  }
  0x6a   : > { %3975 = vmatprep.subr.bf16.mxu1 %v5500_v41  ;;  %v5571_v40 = vld [vmem:[%s6303_s29 + $0xac0] ss:$16 sps:$4 sm:$0xff]   ;;  %v5576_v41 = vld [vmem:[%s6303_s29 + $0x8a4] ss:$16 sps:$4 sm:$0xff]  }
  0x6c   : > { %3935 = vmatpush1.bf16.msra.mxu0 %v5495_v42  ;;  %v5579_v42 = vld [vmem:[%s6303_s29 + $0xaa4] ss:$16 sps:$4 sm:$0xff]  }
  0x6d   : > { %3976 = vmatpush1.bf16.msra.mxu1 %v5498_v43  ;;  %3936 = vmatprep.subr.bf16.mxu0 %v5503_v44  ;;  %v6503_v43 = vrot.slane %v888_v38, %v6353_v51  ;;  %v5640_v38 = vld [vmem:[%s6303_s29 + $0x940] ss:$16 sps:$4 sm:$0xff]  }
  0x6e   : > { %3977 = vmatprep.subr.bf16.mxu1 %v5506_v46  ;;  %v5574_v46 = vld [vmem:[%s6303_s29 + $0x8a0] ss:$16 sps:$4 sm:$0xff]  }
  0x6f   : > { %v6508_v44 = vcombine.high %v6503_v43, %v6503_v43 }
  0x70   : > { %3937 = vmatpush1.bf16.msra.mxu0 %v5501_v47  ;;  %v5577_v47 = vld [vmem:[%s6303_s29 + $0xaa0] ss:$16 sps:$4 sm:$0xff]  }
  0x71   : > { %3978 = vmatpush1.bf16.msra.mxu1 %v5504_v48  ;;  %3938 = vmatprep.subr.bf16.mxu0 %v5509_v49  ;;  %v5582_v48 = vld [vmem:[%s6303_s29 + $0x884] ss:$16 sps:$4 sm:$0xff]  }
  0x72   : > { %3979 = vmatprep.subr.bf16.mxu1 %v5512_v50  ;;  %v5585_v49 = vld [vmem:[%s6303_s29 + $0xa84] ss:$16 sps:$4 sm:$0xff]   ;;  %v5580_v50 = vld [vmem:[%s6303_s29 + $0x880] ss:$16 sps:$4 sm:$0xff]  }
  0x74   : > { %3939 = vmatpush1.bf16.msra.mxu0 %v5507_v52  ;;  %v5583_v52 = vld [vmem:[%s6303_s29 + $0xa80] ss:$16 sps:$4 sm:$0xff]  }
  0x75   : > { %3980 = vmatpush1.bf16.msra.mxu1 %v5510_v53  ;;  %3940 = vmatprep.subr.bf16.mxu0 %v5515_v54  ;;  %v5588_v53 = vld [vmem:[%s6303_s29 + $0x864] ss:$16 sps:$4 sm:$0xff]  }
  0x76   : > { %3981 = vmatprep.subr.bf16.mxu1 %v5518_v55  ;;  %v5591_v54 = vld [vmem:[%s6303_s29 + $0xa64] ss:$16 sps:$4 sm:$0xff]   ;;  %v5586_v55 = vld [vmem:[%s6303_s29 + $0x860] ss:$16 sps:$4 sm:$0xff]  }
  0x78   : > { %3941 = vmatpush2.bf16.msra.mxu0 %v5513_v56  ;;  %v5589_v56 = vld [vmem:[%s6303_s29 + $0xa60] ss:$16 sps:$4 sm:$0xff]  }
  0x79   : > { %3982 = vmatpush2.bf16.msra.mxu1 %v5516_v57  ;;  %3942 = vmatprep.subr.bf16.mxu0 %v5521_v58  ;;  %v5594_v57 = vld [vmem:[%s6303_s29 + $0x844] ss:$16 sps:$4 sm:$0xff]  }
  0x7a   : > { %3983 = vmatprep.subr.bf16.mxu1 %v5524_v59  ;;  %v5597_v58 = vld [vmem:[%s6303_s29 + $0xa44] ss:$16 sps:$4 sm:$0xff]   ;;  %v5592_v59 = vld [vmem:[%s6303_s29 + $0x840] ss:$16 sps:$4 sm:$0xff]  }
  0x7c   : > { %3943 = vmatpush2.bf16.msra.mxu0 %v5519_v60  ;;  %v5595_v60 = vld [vmem:[%s6303_s29 + $0xa40] ss:$16 sps:$4 sm:$0xff]  }
  0x7d   : > { %3984 = vmatpush2.bf16.msra.mxu1 %v5522_v61  ;;  %3944 = vmatprep.subr.bf16.mxu0 %v5527_v63  ;;  %v5600_v61 = vld [vmem:[%s6303_s29 + $0x824] ss:$16 sps:$4 sm:$0xff]  }
  0x7e   : > { %3985 = vmatprep.subr.bf16.mxu1 %v5530_v0  ;;  %v5603_v63 = vld [vmem:[%s6303_s29 + $0xa24] ss:$16 sps:$4 sm:$0xff]   ;;  %v5598_v0 = vld [vmem:[%s6303_s29 + $0x820] ss:$16 sps:$4 sm:$0xff]  }
  0x80   : > { %3945 = vmatpush2.bf16.msra.mxu0 %v5525_v1  ;;  %v5601_v1 = vld [vmem:[%s6303_s29 + $0xa20] ss:$16 sps:$4 sm:$0xff]  }
  0x81   : > { %3986 = vmatpush2.bf16.msra.mxu1 %v5528_v3  ;;  %3946 = vmatprep.subr.bf16.mxu0 %v5533_v4  ;;  %v5606_v3 = vld [vmem:[%s6303_s29 + $0x804] ss:$16 sps:$4 sm:$0xff]  }
  0x82   : > { %3987 = vmatprep.subr.bf16.mxu1 %v5536_v5  ;;  %v5609_v4 = vld [vmem:[%s6303_s29 + $0xa04] ss:$16 sps:$4 sm:$0xff]   ;;  %v5604_v5 = vld [vmem:[%s6303_s29 + $0x800] ss:$16 sps:$4 sm:$0xff]  }
  0x84   : > { %3947 = vmatpush2.bf16.msra.mxu0 %v5531_v6  ;;  %v5607_v6 = vld [vmem:[%s6303_s29 + $0xa00] ss:$16 sps:$4 sm:$0xff]  }
  0x85   : > { %3988 = vmatpush2.bf16.msra.mxu1 %v5534_v7  ;;  %3948 = vmatprep.subr.bf16.mxu0 %v5539_v9  ;;  %v5612_v7 = vld [vmem:[%s6303_s29 + $0x9e4] ss:$16 sps:$4 sm:$0xff]  }
  0x86   : > { %3989 = vmatprep.subr.bf16.mxu1 %v5542_v10  ;;  %v5615_v9 = vld [vmem:[%s6303_s29 + $0xbe4] ss:$16 sps:$4 sm:$0xff]   ;;  %v5610_v10 = vld [vmem:[%s6303_s29 + $0x9e0] ss:$16 sps:$4 sm:$0xff]  }
  0x88   : > { %3949 = vmatpush2.bf16.msra.mxu0 %v5537_v11  ;;  %v5613_v11 = vld [vmem:[%s6303_s29 + $0xbe0] ss:$16 sps:$4 sm:$0xff]  }
  0x89   : > { %3990 = vmatpush2.bf16.msra.mxu1 %v5540_v12  ;;  %3950 = vmatprep.subr.bf16.mxu0 %v5545_v13  ;;  %v5618_v12 = vld [vmem:[%s6303_s29 + $0x9c4] ss:$16 sps:$4 sm:$0xff]  }
  0x8a   : > { %3991 = vmatprep.subr.bf16.mxu1 %v5548_v14  ;;  %v5621_v13 = vld [vmem:[%s6303_s29 + $0xbc4] ss:$16 sps:$4 sm:$0xff]   ;;  %v5616_v14 = vld [vmem:[%s6303_s29 + $0x9c0] ss:$16 sps:$4 sm:$0xff]  }
  0x8c   : > { %3951 = vmatpush2.bf16.msra.mxu0 %v5543_v16  ;;  %v5619_v16 = vld [vmem:[%s6303_s29 + $0xbc0] ss:$16 sps:$4 sm:$0xff]  }
  0x8d   : > { %3992 = vmatpush2.bf16.msra.mxu1 %v5546_v17  ;;  %3952 = vmatprep.subr.bf16.mxu0 %v5551_v18  ;;  %v5624_v17 = vld [vmem:[%s6303_s29 + $0x9a4] ss:$16 sps:$4 sm:$0xff]  }
  0x8e   : > { %3993 = vmatprep.subr.bf16.mxu1 %v5554_v21  ;;  %v5627_v18 = vld [vmem:[%s6303_s29 + $0xba4] ss:$16 sps:$4 sm:$0xff]   ;;  %v5622_v21 = vld [vmem:[%s6303_s29 + $0x9a0] ss:$16 sps:$4 sm:$0xff]  }
  0x90   : > { %3953 = vmatpush2.bf16.msra.mxu0 %v5549_v22  ;;  %v5625_v22 = vld [vmem:[%s6303_s29 + $0xba0] ss:$16 sps:$4 sm:$0xff]  }
  0x91   : > { %3994 = vmatpush2.bf16.msra.mxu1 %v5552_v23  ;;  %3954 = vmatprep.subr.bf16.mxu0 %v5557_v24  ;;  %v5630_v23 = vld [vmem:[%s6303_s29 + $0x984] ss:$16 sps:$4 sm:$0xff]  }
  0x92   : > { %3995 = vmatprep.subr.bf16.mxu1 %v5560_v26  ;;  %v5633_v24 = vld [vmem:[%s6303_s29 + $0xb84] ss:$16 sps:$4 sm:$0xff]   ;;  %v5628_v26 = vld [vmem:[%s6303_s29 + $0x980] ss:$16 sps:$4 sm:$0xff]  }
  0x94   : > { %3955 = vmatpush2.bf16.msra.mxu0 %v5555_v27  ;;  %v5631_v27 = vld [vmem:[%s6303_s29 + $0xb80] ss:$16 sps:$4 sm:$0xff]  }
  0x95   : > { %3996 = vmatpush2.bf16.msra.mxu1 %v5558_v29  ;;  %4006 = vmatprep.subr.bf16.mxu0 %v5564_v30  ;;  %v5636_v29 = vld [vmem:[%s6303_s29 + $0x964] ss:$16 sps:$4 sm:$0xff]  }
  0x96   : > { %4047 = vmatprep.subr.bf16.mxu1 %v5567_v31  ;;  %v5639_v30 = vld [vmem:[%s6303_s29 + $0xb64] ss:$16 sps:$4 sm:$0xff]   ;;  %v5634_v31 = vld [vmem:[%s6303_s29 + $0x960] ss:$16 sps:$4 sm:$0xff]  }
  0x97   : > { %3957 = vmatmul.mubr.bf16.vlgmr.msra.gmra.mxu0 %v6474_v28 }
  0x98   : > { %3998 = vmatmul.mubr.bf16.vlgmr.msra.gmra.mxu1 %v6481_v32  ;;  %4007 = vmatpush1.bf16.msra.mxu0 %v5562_v33  ;;  %v5637_v33 = vld [vmem:[%s6303_s29 + $0xb60] ss:$16 sps:$4 sm:$0xff]  }
  0x99   : > { %4048 = vmatpush1.bf16.msra.mxu1 %v5565_v8  ;;  %4008 = vmatprep.subr.bf16.mxu0 %v5570_v35  ;;  %v5642_v8 = vld [vmem:[%s6303_s29 + $0x944] ss:$16 sps:$4 sm:$0xff]  }
  0x9a   : > { %4049 = vmatprep.subr.bf16.mxu1 %v5573_v36  ;;  %4038 = vmatprep.mubr.bf16.mxu0 %v6503_v43  ;;  %v5645_v35 = vld [vmem:[%s6303_s29 + $0xb44] ss:$16 sps:$4 sm:$0xff]   ;;  %v873_v36 = vcombine.high %v6486_v34, %v6486_v34  ;;  %v5646_v34 = vld [vmem:[%s6303_s29 + $0x920] ss:$16 sps:$4 sm:$0xff]  }
  0x9b   : > { %4079 = vmatprep.mubr.bf16.mxu1 %v6508_v44 }
  0x9c   : > { %4009 = vmatpush1.bf16.msra.mxu0 %v5568_v39  ;;  %v5643_v39 = vld [vmem:[%s6303_s29 + $0xb40] ss:$16 sps:$4 sm:$0xff]  }
  0x9d   : > { %4050 = vmatpush1.bf16.msra.mxu1 %v5571_v40  ;;  %4010 = vmatprep.subr.bf16.mxu0 %v5576_v41  ;;  %v5648_v40 = vld [vmem:[%s6303_s29 + $0x924] ss:$16 sps:$4 sm:$0xff]  }
  0x9e   : > { %4051 = vmatprep.subr.bf16.mxu1 %v5579_v42  ;;  %v5651_v41 = vld [vmem:[%s6303_s29 + $0xb24] ss:$16 sps:$4 sm:$0xff]   ;;  %v6562_v42 = vrot.slane %v873_v36, %v6353_v51  ;;  %v5709_v36 = vld [vmem:[%s6303_s29 + $0xfe0] ss:$16 sps:$4 sm:$0xff]  }
  0xa0   : > { %4011 = vmatpush1.bf16.msra.mxu0 %v5574_v46  ;;  %v5649_v46 = vld [vmem:[%s6303_s29 + $0xb20] ss:$16 sps:$4 sm:$0xff]  }
  0xa1   : > { %4052 = vmatpush1.bf16.msra.mxu1 %v5577_v47  ;;  %4012 = vmatprep.subr.bf16.mxu0 %v5582_v48  ;;  %v5654_v47 = vld [vmem:[%s6303_s29 + $0x904] ss:$16 sps:$4 sm:$0xff]  }
  0xa2   : > { %4053 = vmatprep.subr.bf16.mxu1 %v5585_v49  ;;  %v5657_v48 = vld [vmem:[%s6303_s29 + $0xb04] ss:$16 sps:$4 sm:$0xff]   ;;  %v889_v49 = vcombine.high %v6562_v42, %v6562_v42 }
  0xa4   : > { %4013 = vmatpush1.bf16.msra.mxu0 %v5580_v50  ;;  %v6572_v50 = vrot.slane %v6492_v37, %v6353_v51  ;;  %v5658_v37 = vld [vmem:[%s6303_s29 + $0xce0] ss:$16 sps:$4 sm:$0xff]  }
  0xa5   : > { %4054 = vmatpush1.bf16.msra.mxu1 %v5583_v52  ;;  %4014 = vmatprep.subr.bf16.mxu0 %v5588_v53  ;;  %v5652_v52 = vld [vmem:[%s6303_s29 + $0x900] ss:$16 sps:$4 sm:$0xff]  }
  0xa6   : > { %4055 = vmatprep.subr.bf16.mxu1 %v5591_v54  ;;  %v5655_v53 = vld [vmem:[%s6303_s29 + $0xb00] ss:$16 sps:$4 sm:$0xff]   ;;  %v5660_v54 = vld [vmem:[%s6303_s29 + $0xce4] ss:$16 sps:$4 sm:$0xff]  }
  0xa8   : > { %4015 = vmatpush1.bf16.msra.mxu0 %v5586_v55  ;;  %v5663_v55 = vld [vmem:[%s6303_s29 + $0xee4] ss:$16 sps:$4 sm:$0xff]  }
  0xa9   : > { %4056 = vmatpush1.bf16.msra.mxu1 %v5589_v56  ;;  %4016 = vmatprep.subr.bf16.mxu0 %v5594_v57  ;;  %v6579_v56 = vrot.slane %v889_v49, %v6353_v51  ;;  %v6583_v57 = vcombine.high %v6572_v50, %v6572_v50  ;;  %v5726_v49 = vld [vmem:[%s6303_s29 + $0xd84] ss:$16 sps:$4 sm:$0xff]  }
  0xaa   : > { %4057 = vmatprep.subr.bf16.mxu1 %v5597_v58  ;;  %v5661_v58 = vld [vmem:[%s6303_s29 + $0xee0] ss:$16 sps:$4 sm:$0xff]  }
  0xac   : > { %4017 = vmatpush1.bf16.msra.mxu0 %v5592_v59  ;;  %v5666_v59 = vld [vmem:[%s6303_s29 + $0xcc4] ss:$16 sps:$4 sm:$0xff]  }
  0xad   : > { %4058 = vmatpush1.bf16.msra.mxu1 %v5595_v60  ;;  %4018 = vmatprep.subr.bf16.mxu0 %v5600_v61  ;;  %v5669_v60 = vld [vmem:[%s6303_s29 + $0xec4] ss:$16 sps:$4 sm:$0xff]   ;;  %v6591_v61 = vcombine.high %v6579_v56, %v6579_v56 }
  0xae   : > { %4059 = vmatprep.subr.bf16.mxu1 %v5603_v63  ;;  %v5664_v63 = vld [vmem:[%s6303_s29 + $0xcc0] ss:$16 sps:$4 sm:$0xff]  }
  0xb0   : > { %4019 = vmatpush1.bf16.msra.mxu0 %v5598_v0  ;;  %v5667_v0 = vld [vmem:[%s6303_s29 + $0xec0] ss:$16 sps:$4 sm:$0xff]  }
  0xb1   : > { %4060 = vmatpush1.bf16.msra.mxu1 %v5601_v1  ;;  %4020 = vmatprep.subr.bf16.mxu0 %v5606_v3  ;;  %v5672_v1 = vld [vmem:[%s6303_s29 + $0xca4] ss:$16 sps:$4 sm:$0xff]  }
  0xb2   : > { %4061 = vmatprep.subr.bf16.mxu1 %v5609_v4  ;;  %v5675_v3 = vld [vmem:[%s6303_s29 + $0xea4] ss:$16 sps:$4 sm:$0xff]   ;;  %v5670_v4 = vld [vmem:[%s6303_s29 + $0xca0] ss:$16 sps:$4 sm:$0xff]  }
  0xb4   : > { %4021 = vmatpush1.bf16.msra.mxu0 %v5604_v5  ;;  %v5673_v5 = vld [vmem:[%s6303_s29 + $0xea0] ss:$16 sps:$4 sm:$0xff]  }
  0xb5   : > { %4062 = vmatpush1.bf16.msra.mxu1 %v5607_v6  ;;  %4022 = vmatprep.subr.bf16.mxu0 %v5612_v7  ;;  %v5678_v6 = vld [vmem:[%s6303_s29 + $0xc84] ss:$16 sps:$4 sm:$0xff]  }
  0xb6   : > { %4063 = vmatprep.subr.bf16.mxu1 %v5615_v9  ;;  %v5681_v7 = vld [vmem:[%s6303_s29 + $0xe84] ss:$16 sps:$4 sm:$0xff]   ;;  %v5676_v9 = vld [vmem:[%s6303_s29 + $0xc80] ss:$16 sps:$4 sm:$0xff]  }
  0xb8   : > { %4023 = vmatpush2.bf16.msra.mxu0 %v5610_v10  ;;  %v5679_v10 = vld [vmem:[%s6303_s29 + $0xe80] ss:$16 sps:$4 sm:$0xff]  }
  0xb9   : > { %4064 = vmatpush2.bf16.msra.mxu1 %v5613_v11  ;;  %4024 = vmatprep.subr.bf16.mxu0 %v5618_v12  ;;  %v5684_v11 = vld [vmem:[%s6303_s29 + $0xc64] ss:$16 sps:$4 sm:$0xff]  }
  0xba   : > { %4065 = vmatprep.subr.bf16.mxu1 %v5621_v13  ;;  %v5687_v12 = vld [vmem:[%s6303_s29 + $0xe64] ss:$16 sps:$4 sm:$0xff]   ;;  %v5682_v13 = vld [vmem:[%s6303_s29 + $0xc60] ss:$16 sps:$4 sm:$0xff]  }
  0xbc   : > { %4025 = vmatpush2.bf16.msra.mxu0 %v5616_v14  ;;  %v5685_v14 = vld [vmem:[%s6303_s29 + $0xe60] ss:$16 sps:$4 sm:$0xff]  }
  0xbd   : > { %4066 = vmatpush2.bf16.msra.mxu1 %v5619_v16  ;;  %4026 = vmatprep.subr.bf16.mxu0 %v5624_v17  ;;  %v5690_v16 = vld [vmem:[%s6303_s29 + $0xc44] ss:$16 sps:$4 sm:$0xff]  }
  0xbe   : > { %4067 = vmatprep.subr.bf16.mxu1 %v5627_v18  ;;  %v5693_v17 = vld [vmem:[%s6303_s29 + $0xe44] ss:$16 sps:$4 sm:$0xff]   ;;  %v5688_v18 = vld [vmem:[%s6303_s29 + $0xc40] ss:$16 sps:$4 sm:$0xff]  }
  0xc0   : > { %4027 = vmatpush2.bf16.msra.mxu0 %v5622_v21  ;;  %v5691_v21 = vld [vmem:[%s6303_s29 + $0xe40] ss:$16 sps:$4 sm:$0xff]  }
  0xc1   : > { %4068 = vmatpush2.bf16.msra.mxu1 %v5625_v22  ;;  %4028 = vmatprep.subr.bf16.mxu0 %v5630_v23  ;;  %v5696_v22 = vld [vmem:[%s6303_s29 + $0xc24] ss:$16 sps:$4 sm:$0xff]  }
  0xc2   : > { %4069 = vmatprep.subr.bf16.mxu1 %v5633_v24  ;;  %v5699_v23 = vld [vmem:[%s6303_s29 + $0xe24] ss:$16 sps:$4 sm:$0xff]   ;;  %v5694_v24 = vld [vmem:[%s6303_s29 + $0xc20] ss:$16 sps:$4 sm:$0xff]  }
  0xc4   : > { %4029 = vmatpush2.bf16.msra.mxu0 %v5628_v26  ;;  %v5697_v26 = vld [vmem:[%s6303_s29 + $0xe20] ss:$16 sps:$4 sm:$0xff]  }
  0xc5   : > { %4070 = vmatpush2.bf16.msra.mxu1 %v5631_v27  ;;  %4030 = vmatprep.subr.bf16.mxu0 %v5636_v29  ;;  %v5702_v27 = vld [vmem:[%s6303_s29 + $0xc04] ss:$16 sps:$4 sm:$0xff]  }
  0xc6   : > { %4071 = vmatprep.subr.bf16.mxu1 %v5639_v30  ;;  %v5705_v29 = vld [vmem:[%s6303_s29 + $0xe04] ss:$16 sps:$4 sm:$0xff]   ;;  %v5700_v30 = vld [vmem:[%s6303_s29 + $0xc00] ss:$16 sps:$4 sm:$0xff]  }
  0xc8   : > { %4031 = vmatpush2.bf16.msra.mxu0 %v5634_v31  ;;  %v5703_v31 = vld [vmem:[%s6303_s29 + $0xe00] ss:$16 sps:$4 sm:$0xff]  }
  0xc9   : > { %4072 = vmatpush2.bf16.msra.mxu1 %v5637_v33  ;;  %4032 = vmatprep.subr.bf16.mxu0 %v5642_v8  ;;  %v5708_v33 = vld [vmem:[%s6303_s29 + $0xde4] ss:$16 sps:$4 sm:$0xff]  }
  0xca   : > { %4073 = vmatprep.subr.bf16.mxu1 %v5645_v35  ;;  %v5711_v8 = vld [vmem:[%s6303_s29 + $0xfe4] ss:$16 sps:$4 sm:$0xff]   ;;  %v5706_v35 = vld [vmem:[%s6303_s29 + $0xde0] ss:$16 sps:$4 sm:$0xff]  }
  0xcc   : > { %4033 = vmatpush2.bf16.msra.mxu0 %v5640_v38  ;;  %v5714_v38 = vld [vmem:[%s6303_s29 + $0xdc4] ss:$16 sps:$4 sm:$0xff]  }
  0xcd   : > { %4074 = vmatpush2.bf16.msra.mxu1 %v5643_v39  ;;  %4034 = vmatprep.subr.bf16.mxu0 %v5648_v40  ;;  %v5717_v39 = vld [vmem:[%s6303_s29 + $0xfc4] ss:$16 sps:$4 sm:$0xff]   ;;  %v5712_v40 = vld [vmem:[%s6303_s29 + $0xdc0] ss:$16 sps:$4 sm:$0xff]  }
  0xce   : > { %4075 = vmatprep.subr.bf16.mxu1 %v5651_v41  ;;  %v5715_v41 = vld [vmem:[%s6303_s29 + $0xfc0] ss:$16 sps:$4 sm:$0xff]  }
  0xd0   : > { %4035 = vmatpush2.bf16.msra.mxu0 %v5646_v34  ;;  %v5720_v34 = vld [vmem:[%s6303_s29 + $0xda4] ss:$16 sps:$4 sm:$0xff]  }
  0xd1   : > { %4076 = vmatpush2.bf16.msra.mxu1 %v5649_v46  ;;  %4036 = vmatprep.subr.bf16.mxu0 %v5654_v47  ;;  %v5723_v46 = vld [vmem:[%s6303_s29 + $0xfa4] ss:$16 sps:$4 sm:$0xff]   ;;  %v5718_v47 = vld [vmem:[%s6303_s29 + $0xda0] ss:$16 sps:$4 sm:$0xff]  }
  0xd2   : > { %4077 = vmatprep.subr.bf16.mxu1 %v5657_v48  ;;  %v5721_v48 = vld [vmem:[%s6303_s29 + $0xfa0] ss:$16 sps:$4 sm:$0xff]  }
  0xd4   : > { %4037 = vmatpush2.bf16.msra.mxu0 %v5652_v52  ;;  %v5729_v52 = vld [vmem:[%s6303_s29 + $0xf84] ss:$16 sps:$4 sm:$0xff]  }
  0xd5   : > { %4078 = vmatpush2.bf16.msra.mxu1 %v5655_v53  ;;  %4088 = vmatprep.subr.bf16.mxu0 %v5660_v54  ;;  %v5724_v53 = vld [vmem:[%s6303_s29 + $0xd80] ss:$16 sps:$4 sm:$0xff]  }
  0xd6   : > { %4129 = vmatprep.subr.bf16.mxu1 %v5663_v55  ;;  %v5727_v54 = vld [vmem:[%s6303_s29 + $0xf80] ss:$16 sps:$4 sm:$0xff]   ;;  %v5732_v55 = vld [vmem:[%s6303_s29 + $0xd64] ss:$16 sps:$4 sm:$0xff]  }
  0xd7   : > { %4039 = vmatmul.mubr.bf16.vlgmr.msra.gmra.mxu0 %v6572_v50 }
  0xd8   : > { %4080 = vmatmul.mubr.bf16.vlgmr.msra.gmra.mxu1 %v6583_v57  ;;  %4089 = vmatpush1.bf16.msra.mxu0 %v5658_v37  ;;  %v5735_v37 = vld [vmem:[%s6303_s29 + $0xf64] ss:$16 sps:$4 sm:$0xff]  }
  0xd9   : > { %4130 = vmatpush1.bf16.msra.mxu1 %v5661_v58  ;;  %4090 = vmatprep.subr.bf16.mxu0 %v5666_v59  ;;  %v5730_v58 = vld [vmem:[%s6303_s29 + $0xd60] ss:$16 sps:$4 sm:$0xff]  }
  0xda   : > { %4131 = vmatprep.subr.bf16.mxu1 %v5669_v60  ;;  %4120 = vmatprep.mubr.bf16.mxu0 %v6579_v56  ;;  %v5733_v59 = vld [vmem:[%s6303_s29 + $0xf60] ss:$16 sps:$4 sm:$0xff]   ;;  %v5738_v60 = vld [vmem:[%s6303_s29 + $0xd44] ss:$16 sps:$4 sm:$0xff]  }
  0xdb   : > { %4161 = vmatprep.mubr.bf16.mxu1 %v6591_v61 }
  0xdc   : > { %4091 = vmatpush1.bf16.msra.mxu0 %v5664_v63  ;;  %v5741_v63 = vld [vmem:[%s6303_s29 + $0xf44] ss:$16 sps:$4 sm:$0xff]  }
  0xdd   : > { %4132 = vmatpush1.bf16.msra.mxu1 %v5667_v0  ;;  %4092 = vmatprep.subr.bf16.mxu0 %v5672_v1  ;;  %v5736_v0 = vld [vmem:[%s6303_s29 + $0xd40] ss:$16 sps:$4 sm:$0xff]  }
  0xde   : > { %4133 = vmatprep.subr.bf16.mxu1 %v5675_v3  ;;  %v5739_v1 = vld [vmem:[%s6303_s29 + $0xf40] ss:$16 sps:$4 sm:$0xff]   ;;  %v5744_v3 = vld [vmem:[%s6303_s29 + $0xd24] ss:$16 sps:$4 sm:$0xff]  }
  0xe0   : > { %4093 = vmatpush1.bf16.msra.mxu0 %v5670_v4  ;;  %v5747_v4 = vld [vmem:[%s6303_s29 + $0xf24] ss:$16 sps:$4 sm:$0xff]  }
  0xe1   : > { %4134 = vmatpush1.bf16.msra.mxu1 %v5673_v5  ;;  %4094 = vmatprep.subr.bf16.mxu0 %v5678_v6  ;;  %v5742_v5 = vld [vmem:[%s6303_s29 + $0xd20] ss:$16 sps:$4 sm:$0xff]  }
  0xe2   : > { %4135 = vmatprep.subr.bf16.mxu1 %v5681_v7  ;;  %v5745_v6 = vld [vmem:[%s6303_s29 + $0xf20] ss:$16 sps:$4 sm:$0xff]   ;;  %v5750_v7 = vld [vmem:[%s6303_s29 + $0xd04] ss:$16 sps:$4 sm:$0xff]  }
  0xe4   : > { %4095 = vmatpush1.bf16.msra.mxu0 %v5676_v9  ;;  %v5753_v9 = vld [vmem:[%s6303_s29 + $0xf04] ss:$16 sps:$4 sm:$0xff]  }
  0xe5   : > { %4136 = vmatpush1.bf16.msra.mxu1 %v5679_v10  ;;  %4096 = vmatprep.subr.bf16.mxu0 %v5684_v11  ;;  %v5748_v10 = vld [vmem:[%s6303_s29 + $0xd00] ss:$16 sps:$4 sm:$0xff]   ;;  %v6656_v11 = vrot.slane %v6562_v42, %v6353_v51 }
  0xe6   : > { %4137 = vmatprep.subr.bf16.mxu1 %v5687_v12  ;;  %v6659_v12 = vld.sshfl [vmem:[%s6298_s25 + $0x10] sm:$0x11 pattern:$0x75316420] }
  0xe7   : > { %v5755_v42 = vld [vmem:[%s6303_s29 + $0x10e0] ss:$16 sps:$4 sm:$0xff]  }
  0xe8   : > { %4097 = vmatpush1.bf16.msra.mxu0 %v5682_v13  ;;  %v5751_v13 = vld [vmem:[%s6303_s29 + $0xf00] ss:$16 sps:$4 sm:$0xff]  }
  0xe9   : > { %4138 = vmatpush1.bf16.msra.mxu1 %v5685_v14  ;;  %4098 = vmatprep.subr.bf16.mxu0 %v5690_v16  ;;  %v5757_v14 = vld [vmem:[%s6303_s29 + $0x10e4] ss:$16 sps:$4 sm:$0xff]   ;;  %v5760_v16 = vld [vmem:[%s6303_s29 + $0xec] ss:$16 sps:$4 sm:$0xff]  }
  0xea   : > { %4139 = vmatprep.subr.bf16.mxu1 %v5693_v17  ;;  %v929_v17 = vcombine.high %v6659_v12, %v6659_v12 }
  0xec   : > { %4099 = vmatpush1.bf16.msra.mxu0 %v5688_v18  ;;  %v6668_v18 = vcombine.high %v6656_v11, %v6656_v11 }
  0xed   : > { %4140 = vmatpush1.bf16.msra.mxu1 %v5691_v21  ;;  %4100 = vmatprep.subr.bf16.mxu0 %v5696_v22  ;;  %v5758_v21 = vld [vmem:[%s6303_s29 + $0xe8] ss:$16 sps:$4 sm:$0xff]   ;;  %v5763_v22 = vld [vmem:[%s6303_s29 + $0x10c4] ss:$16 sps:$4 sm:$0xff]  }
  0xee   : > { %4141 = vmatprep.subr.bf16.mxu1 %v5699_v23  ;;  %v5766_v23 = vld [vmem:[%s6303_s29 + $0xcc] ss:$16 sps:$4 sm:$0xff]  }
  0xf0   : > { %4101 = vmatpush1.bf16.msra.mxu0 %v5694_v24  ;;  %v6675_v24 = vrot.slane %v929_v17, %v6353_v51  ;;  %v5811_v17 = vld [vmem:[%s6303_s29 + $0x11c4] ss:$16 sps:$4 sm:$0xff]  }
  0xf1   : > { %4142 = vmatpush1.bf16.msra.mxu1 %v5697_v26  ;;  %4102 = vmatprep.subr.bf16.mxu0 %v5702_v27 }
  0xf2   : > { %4143 = vmatprep.subr.bf16.mxu1 %v5705_v29  ;;  %v5761_v29 = vld [vmem:[%s6303_s29 + $0x10c0] ss:$16 sps:$4 sm:$0xff]  }
  0xf4   : > { %4103 = vmatpush1.bf16.msra.mxu0 %v5700_v30  ;;  %v5764_v30 = vld [vmem:[%s6303_s29 + $0xc8] ss:$16 sps:$4 sm:$0xff]  }
  0xf5   : > { %4144 = vmatpush1.bf16.msra.mxu1 %v5703_v31  ;;  %4104 = vmatprep.subr.bf16.mxu0 %v5708_v33 }
  0xf6   : > { %4145 = vmatprep.subr.bf16.mxu1 %v5711_v8 }
  0xf8   : > { %4105 = vmatpush2.bf16.msra.mxu0 %v5706_v35  ;;  %v5769_v35 = vld [vmem:[%s6303_s29 + $0x10a4] ss:$16 sps:$4 sm:$0xff]  }
  0xf9   : > { %4146 = vmatpush2.bf16.msra.mxu1 %v5709_v36  ;;  %4106 = vmatprep.subr.bf16.mxu0 %v5714_v38  ;;  %v5772_v36 = vld [vmem:[%s6303_s29 + $0xac] ss:$16 sps:$4 sm:$0xff]  }
  0xfa   : > { %4147 = vmatprep.subr.bf16.mxu1 %v5717_v39  ;;  %v5767_v39 = vld [vmem:[%s6303_s29 + $0x10a0] ss:$16 sps:$4 sm:$0xff]  }
  0xfc   : > { %4107 = vmatpush2.bf16.msra.mxu0 %v5712_v40  ;;  %v5770_v40 = vld [vmem:[%s6303_s29 + $0xa8] ss:$16 sps:$4 sm:$0xff]  }
  0xfd   : > { %4148 = vmatpush2.bf16.msra.mxu1 %v5715_v41  ;;  %4108 = vmatprep.subr.bf16.mxu0 %v5720_v34 }
  0xfe   : > { %4149 = vmatprep.subr.bf16.mxu1 %v5723_v46 }
 0x100   : > { %4109 = vmatpush2.bf16.msra.mxu0 %v5718_v47 }
 0x101   : > { %4150 = vmatpush2.bf16.msra.mxu1 %v5721_v48  ;;  %4110 = vmatprep.subr.bf16.mxu0 %v5726_v49  ;;  %v5775_v48 = vld [vmem:[%s6303_s29 + $0x1084] ss:$16 sps:$4 sm:$0xff]   ;;  %v5778_v49 = vld [vmem:[%s6303_s29 + $0x8c] ss:$16 sps:$4 sm:$0xff]  }
 0x102   : > { %4151 = vmatprep.subr.bf16.mxu1 %v5729_v52  ;;  %v5773_v52 = vld [vmem:[%s6303_s29 + $0x1080] ss:$16 sps:$4 sm:$0xff]  }
 0x104   : > { %4111 = vmatpush2.bf16.msra.mxu0 %v5724_v53  ;;  %v5781_v53 = vld [vmem:[%s6303_s29 + $0x1064] ss:$16 sps:$4 sm:$0xff]  }
 0x105   : > { %4152 = vmatpush2.bf16.msra.mxu1 %v5727_v54  ;;  %4112 = vmatprep.subr.bf16.mxu0 %v5732_v55  ;;  %v5784_v54 = vld [vmem:[%s6303_s29 + $0x6c] ss:$16 sps:$4 sm:$0xff]   ;;  %v5779_v55 = vld [vmem:[%s6303_s29 + $0x1060] ss:$16 sps:$4 sm:$0xff]  }
 0x106   : > { %4153 = vmatprep.subr.bf16.mxu1 %v5735_v37  ;;  %v5782_v37 = vld [vmem:[%s6303_s29 + $0x68] ss:$16 sps:$4 sm:$0xff]  }
 0x108   : > { %4113 = vmatpush2.bf16.msra.mxu0 %v5730_v58  ;;  %v5787_v58 = vld [vmem:[%s6303_s29 + $0x1044] ss:$16 sps:$4 sm:$0xff]  }
 0x109   : > { %4154 = vmatpush2.bf16.msra.mxu1 %v5733_v59  ;;  %4114 = vmatprep.subr.bf16.mxu0 %v5738_v60  ;;  %v5790_v59 = vld [vmem:[%s6303_s29 + $0x4c] ss:$16 sps:$4 sm:$0xff]   ;;  %v5785_v60 = vld [vmem:[%s6303_s29 + $0x1040] ss:$16 sps:$4 sm:$0xff]  }
 0x10a   : > { %4155 = vmatprep.subr.bf16.mxu1 %v5741_v63  ;;  %v5788_v63 = vld [vmem:[%s6303_s29 + $0x48] ss:$16 sps:$4 sm:$0xff]  }
 0x10c   : > { %4115 = vmatpush2.bf16.msra.mxu0 %v5736_v0  ;;  %v5793_v0 = vld [vmem:[%s6303_s29 + $0x1024] ss:$16 sps:$4 sm:$0xff]  }
 0x10d   : > { %4156 = vmatpush2.bf16.msra.mxu1 %v5739_v1  ;;  %4116 = vmatprep.subr.bf16.mxu0 %v5744_v3  ;;  %v5796_v1 = vld [vmem:[%s6303_s29 + $0x2c] ss:$16 sps:$4 sm:$0xff]   ;;  %v5791_v3 = vld [vmem:[%s6303_s29 + $0x1020] ss:$16 sps:$4 sm:$0xff]  }
 0x10e   : > { %4157 = vmatprep.subr.bf16.mxu1 %v5747_v4  ;;  %v5794_v4 = vld [vmem:[%s6303_s29 + $0x28] ss:$16 sps:$4 sm:$0xff]  }
 0x110   : > { %4117 = vmatpush2.bf16.msra.mxu0 %v5742_v5  ;;  %v5799_v5 = vld [vmem:[%s6303_s29 + $0x1004] ss:$16 sps:$4 sm:$0xff]  }
 0x111   : > { %4158 = vmatpush2.bf16.msra.mxu1 %v5745_v6  ;;  %4118 = vmatprep.subr.bf16.mxu0 %v5750_v7  ;;  %v5802_v6 = vld [vmem:[%s6303_s29 + $0xc] ss:$16 sps:$4 sm:$0xff]   ;;  %v5797_v7 = vld [vmem:[%s6303_s29 + $0x1000] ss:$16 sps:$4 sm:$0xff]  }
 0x112   : > { %4159 = vmatprep.subr.bf16.mxu1 %v5753_v9  ;;  %v5800_v9 = vld [vmem:[%s6303_s29 + $0x8] ss:$16 sps:$4 sm:$0xff]  }
 0x114   : > { %4119 = vmatpush2.bf16.msra.mxu0 %v5748_v10  ;;  %v5805_v10 = vld [vmem:[%s6303_s29 + $0x11e4] ss:$16 sps:$4 sm:$0xff]  }
 0x115   : > { %4160 = vmatpush2.bf16.msra.mxu1 %v5751_v13  ;;  %4170 = vmatprep.subr.bf16.mxu0 %v5757_v14  ;;  %v5808_v13 = vld [vmem:[%s6303_s29 + $0x1ec] ss:$16 sps:$4 sm:$0xff]   ;;  %v5803_v14 = vld [vmem:[%s6303_s29 + $0x11e0] ss:$16 sps:$4 sm:$0xff]  }
 0x116   : > { %4211 = vmatprep.subr.bf16.mxu1 %v5760_v16  ;;  %v5806_v16 = vld [vmem:[%s6303_s29 + $0x1e8] ss:$16 sps:$4 sm:$0xff]  }
 0x117   : > { %v3876_v26 = vpop.f32.mrf.mxu0  ;;  %4121 = vmatmul.mubr.bf16.vlgmr.msra.gmra.mxu0 %v6656_v11 }
 0x118   : > { %v3917_v27 = vpop.f32.mrf.mxu1  ;;  %4162 = vmatmul.mubr.bf16.vlgmr.msra.gmra.mxu1 %v6668_v18  ;;  %4171 = vmatpush1.bf16.msra.mxu0 %v5755_v42  ;;  %v5814_v42 = vld [vmem:[%s6303_s29 + $0x1cc] ss:$16 sps:$4 sm:$0xff]  }
 0x119   : > { %v6681_v31 = vadd.f32 %v3917_v27, %v3876_v26  ;;  %4212 = vmatpush1.bf16.msra.mxu1 %v5758_v21  ;;  %v3878_v33 = vpop.f32.mrf.mxu0  ;;  %4172 = vmatprep.subr.bf16.mxu0 %v5763_v22  ;;  %v5809_v21 = vld [vmem:[%s6303_s29 + $0x11c0] ss:$16 sps:$4 sm:$0xff]   ;;  %v5812_v22 = vld [vmem:[%s6303_s29 + $0x1c8] ss:$16 sps:$4 sm:$0xff]   ;;  %v5820_v26 = vld [vmem:[%s6303_s29 + $0x1ac] ss:$16 sps:$4 sm:$0xff]  }
 0x11a   : > { %v3919_v8 = vpop.f32.mrf.mxu1  ;;  %4213 = vmatprep.subr.bf16.mxu1 %v5766_v23  ;;  %4202 = vmatprep.mubr.bf16.mxu0 %v6675_v24  ;;  %v5817_v23 = vld [vmem:[%s6303_s29 + $0x11a4] ss:$16 sps:$4 sm:$0xff]   ;;  %v5815_v27 = vld [vmem:[%s6303_s29 + $0x11a0] ss:$16 sps:$4 sm:$0xff]  }
 0x11b   : > { %v6685_v38 = vadd.f32 %v3919_v8, %v3878_v33  ;;  %4243 = vmatprep.mubr.bf16.mxu1 %v6365_v62  ;;  %v3880_v41 = vpop.f32.mrf.mxu0  ;;  %v5776_v62 = vld [vmem:[%s6303_s29 + $0x88] ss:$16 sps:$4 sm:$0xff]   ;;  %v5826_v33 = vld [vmem:[%s6303_s29 + $0x18c] ss:$16 sps:$4 sm:$0xff]   ;;  %v5821_v8 = vld [vmem:[%s6303_s29 + $0x1180] ss:$16 sps:$4 sm:$0xff]  }
 0x11c   : > { %v3921_v34 = vpop.f32.mrf.mxu1  ;;  %4173 = vmatpush1.bf16.msra.mxu0 %v5761_v29  ;;  %v5818_v29 = vld [vmem:[%s6303_s29 + $0x1a8] ss:$16 sps:$4 sm:$0xff]  }
 0x11d   : > { %4214 = vmatpush1.bf16.msra.mxu1 %v5764_v30  ;;  %v3881_v46 = vpop.f32.mrf.mxu0  ;;  %4174 = vmatprep.subr.bf16.mxu0 %v5769_v35  ;;  %v5823_v30 = vld [vmem:[%s6303_s29 + $0x1184] ss:$16 sps:$4 sm:$0xff]   ;;  %v5824_v35 = vld [vmem:[%s6303_s29 + $0x188] ss:$16 sps:$4 sm:$0xff]  }
 0x11e   : > { %v3922_v47 = vpop.f32.mrf.mxu1  ;;  %4215 = vmatprep.subr.bf16.mxu1 %v5772_v36  ;;  %v5829_v36 = vld [vmem:[%s6303_s29 + $0x1164] ss:$16 sps:$4 sm:$0xff]   ;;  %v5830_v41 = vld [vmem:[%s6303_s29 + $0x168] ss:$16 sps:$4 sm:$0xff]   ;;  %v5838_v46 = vld [vmem:[%s6303_s29 + $0x14c] ss:$16 sps:$4 sm:$0xff]  }
 0x11f   : > { %v5835_v34 = vld [vmem:[%s6303_s29 + $0x1144] ss:$16 sps:$4 sm:$0xff]   ;;  %v5833_v47 = vld [vmem:[%s6303_s29 + $0x1140] ss:$16 sps:$4 sm:$0xff]  }
 0x120   : > { %4175 = vmatpush1.bf16.msra.mxu0 %v5767_v39  ;;  %v5832_v39 = vld [vmem:[%s6303_s29 + $0x16c] ss:$16 sps:$4 sm:$0xff]  }
 0x121   : > { %4216 = vmatpush1.bf16.msra.mxu1 %v5770_v40  ;;  %4176 = vmatprep.subr.bf16.mxu0 %v5775_v48  ;;  %v5827_v40 = vld [vmem:[%s6303_s29 + $0x1160] ss:$16 sps:$4 sm:$0xff]   ;;  %v5836_v48 = vld [vmem:[%s6303_s29 + $0x148] ss:$16 sps:$4 sm:$0xff]  }
 0x122   : > { %4217 = vmatprep.subr.bf16.mxu1 %v5778_v49  ;;  %v5841_v49 = vld [vmem:[%s6303_s29 + $0x1124] ss:$16 sps:$4 sm:$0xff]  }
 0x124   : > { %4177 = vmatpush1.bf16.msra.mxu0 %v5773_v52  ;;  %v5844_v52 = vld [vmem:[%s6303_s29 + $0x12c] ss:$16 sps:$4 sm:$0xff]  }
 0x125   : > { %4218 = vmatpush1.bf16.msra.mxu1 %v5776_v62  ;;  %4178 = vmatprep.subr.bf16.mxu0 %v5781_v53  ;;  %v5839_v62 = vld [vmem:[%s6303_s29 + $0x1120] ss:$16 sps:$4 sm:$0xff]   ;;  %v5842_v53 = vld [vmem:[%s6303_s29 + $0x128] ss:$16 sps:$4 sm:$0xff]  }
 0x126   : > { %4219 = vmatprep.subr.bf16.mxu1 %v5784_v54  ;;  %v5847_v54 = vld [vmem:[%s6303_s29 + $0x1104] ss:$16 sps:$4 sm:$0xff]  }
 0x128   : > { %4179 = vmatpush1.bf16.msra.mxu0 %v5779_v55  ;;  %v5850_v55 = vld [vmem:[%s6303_s29 + $0x10c] ss:$16 sps:$4 sm:$0xff]  }
 0x129   : > { %4220 = vmatpush1.bf16.msra.mxu1 %v5782_v37  ;;  %4180 = vmatprep.subr.bf16.mxu0 %v5787_v58  ;;  %v5845_v37 = vld [vmem:[%s6303_s29 + $0x1100] ss:$16 sps:$4 sm:$0xff]   ;;  %v5848_v58 = vld [vmem:[%s6303_s29 + $0x108] ss:$16 sps:$4 sm:$0xff]  }
 0x12a   : > { %4221 = vmatprep.subr.bf16.mxu1 %v5790_v59  ;;  %v5853_v59 = vld [vmem:[%s6303_s29 + $0x2ec] ss:$16 sps:$4 sm:$0xff]  }
 0x12c   : > { %4181 = vmatpush1.bf16.msra.mxu0 %v5785_v60  ;;  %v5856_v60 = vld [vmem:[%s6303_s29 + $0x4ec] ss:$16 sps:$4 sm:$0xff]  }
 0x12d   : > { %4222 = vmatpush1.bf16.msra.mxu1 %v5788_v63  ;;  %4182 = vmatprep.subr.bf16.mxu0 %v5793_v0  ;;  %v5851_v63 = vld [vmem:[%s6303_s29 + $0x2e8] ss:$16 sps:$4 sm:$0xff]  }
 0x12e   : > { %4223 = vmatprep.subr.bf16.mxu1 %v5796_v1  ;;  %v5854_v0 = vld [vmem:[%s6303_s29 + $0x4e8] ss:$16 sps:$4 sm:$0xff]   ;;  %v6749_v1 = vrot.slane %v6659_v12, %v6353_v51 }
 0x130   : > { %4183 = vmatpush1.bf16.msra.mxu0 %v5791_v3  ;;  %v5859_v3 = vld [vmem:[%s6303_s29 + $0x2cc] ss:$16 sps:$4 sm:$0xff]  }
 0x131   : > { %4224 = vmatpush1.bf16.msra.mxu1 %v5794_v4  ;;  %4184 = vmatprep.subr.bf16.mxu0 %v5799_v5  ;;  %v5862_v4 = vld [vmem:[%s6303_s29 + $0x4cc] ss:$16 sps:$4 sm:$0xff]   ;;  %v5857_v5 = vld [vmem:[%s6303_s29 + $0x2c8] ss:$16 sps:$4 sm:$0xff]  }
 0x132   : > { %4225 = vmatprep.subr.bf16.mxu1 %v5802_v6  ;;  %v5860_v6 = vld [vmem:[%s6303_s29 + $0x4c8] ss:$16 sps:$4 sm:$0xff]  }
 0x134   : > { %4185 = vmatpush1.bf16.msra.mxu0 %v5797_v7 }
 0x135   : > { %4226 = vmatpush1.bf16.msra.mxu1 %v5800_v9  ;;  %4186 = vmatprep.subr.bf16.mxu0 %v5805_v10 }
 0x136   : > { %4227 = vmatprep.subr.bf16.mxu1 %v5808_v13  ;;  %v5865_v13 = vld [vmem:[%s6303_s29 + $0x2ac] ss:$16 sps:$4 sm:$0xff]  }
 0x138   : > { %4187 = vmatpush2.bf16.msra.mxu0 %v5803_v14  ;;  %v5868_v14 = vld [vmem:[%s6303_s29 + $0x4ac] ss:$16 sps:$4 sm:$0xff]  }
 0x139   : > { %4228 = vmatpush2.bf16.msra.mxu1 %v5806_v16  ;;  %4188 = vmatprep.subr.bf16.mxu0 %v5811_v17 }
 0x13a   : > { %4229 = vmatprep.subr.bf16.mxu1 %v5814_v42  ;;  %v5863_v42 = vld [vmem:[%s6303_s29 + $0x2a8] ss:$16 sps:$4 sm:$0xff]  }
 0x13c   : > { %4189 = vmatpush2.bf16.msra.mxu0 %v5809_v21  ;;  %v5866_v21 = vld [vmem:[%s6303_s29 + $0x4a8] ss:$16 sps:$4 sm:$0xff]  }
 0x13d   : > { %4230 = vmatpush2.bf16.msra.mxu1 %v5812_v22  ;;  %4190 = vmatprep.subr.bf16.mxu0 %v5817_v23 }
 0x13e   : > { %4231 = vmatprep.subr.bf16.mxu1 %v5820_v26 }
 0x140   : > { %4191 = vmatpush2.bf16.msra.mxu0 %v5815_v27  ;;  %v5872_v27 = vld [vmem:[%s6303_s29 + $0x488] ss:$16 sps:$4 sm:$0xff]  }
 0x141   : > { %4232 = vmatpush2.bf16.msra.mxu1 %v5818_v29  ;;  %4192 = vmatprep.subr.bf16.mxu0 %v5823_v30  ;;  %v5877_v29 = vld [vmem:[%s6303_s29 + $0x26c] ss:$16 sps:$4 sm:$0xff]  }
 0x142   : > { %4233 = vmatprep.subr.bf16.mxu1 %v5826_v33  ;;  %v5880_v30 = vld [vmem:[%s6303_s29 + $0x46c] ss:$16 sps:$4 sm:$0xff]   ;;  %v5875_v33 = vld [vmem:[%s6303_s29 + $0x268] ss:$16 sps:$4 sm:$0xff]  }
 0x144   : > { %4193 = vmatpush2.bf16.msra.mxu0 %v5821_v8  ;;  %v5878_v8 = vld [vmem:[%s6303_s29 + $0x468] ss:$16 sps:$4 sm:$0xff]  }
 0x145   : > { %4234 = vmatpush2.bf16.msra.mxu1 %v5824_v35  ;;  %4194 = vmatprep.subr.bf16.mxu0 %v5829_v36  ;;  %v5883_v35 = vld [vmem:[%s6303_s29 + $0x24c] ss:$16 sps:$4 sm:$0xff]  }
 0x146   : > { %4235 = vmatprep.subr.bf16.mxu1 %v5832_v39  ;;  %v5886_v36 = vld [vmem:[%s6303_s29 + $0x44c] ss:$16 sps:$4 sm:$0xff]   ;;  %v5881_v39 = vld [vmem:[%s6303_s29 + $0x248] ss:$16 sps:$4 sm:$0xff]  }
 0x148   : > { %4195 = vmatpush2.bf16.msra.mxu0 %v5827_v40  ;;  %v5884_v40 = vld [vmem:[%s6303_s29 + $0x448] ss:$16 sps:$4 sm:$0xff]  }
 0x149   : > { %4236 = vmatpush2.bf16.msra.mxu1 %v5830_v41  ;;  %4196 = vmatprep.subr.bf16.mxu0 %v5835_v34  ;;  %v5889_v41 = vld [vmem:[%s6303_s29 + $0x22c] ss:$16 sps:$4 sm:$0xff]  }
 0x14a   : > { %4237 = vmatprep.subr.bf16.mxu1 %v5838_v46  ;;  %v5892_v34 = vld [vmem:[%s6303_s29 + $0x42c] ss:$16 sps:$4 sm:$0xff]   ;;  %v5887_v46 = vld [vmem:[%s6303_s29 + $0x228] ss:$16 sps:$4 sm:$0xff]  }
 0x14c   : > { %4197 = vmatpush2.bf16.msra.mxu0 %v5833_v47  ;;  %v5890_v47 = vld [vmem:[%s6303_s29 + $0x428] ss:$16 sps:$4 sm:$0xff]  }
 0x14d   : > { %4238 = vmatpush2.bf16.msra.mxu1 %v5836_v48  ;;  %4198 = vmatprep.subr.bf16.mxu0 %v5841_v49  ;;  %v5895_v48 = vld [vmem:[%s6303_s29 + $0x20c] ss:$16 sps:$4 sm:$0xff]  }
 0x14e   : > { %4239 = vmatprep.subr.bf16.mxu1 %v5844_v52  ;;  %v5898_v49 = vld [vmem:[%s6303_s29 + $0x40c] ss:$16 sps:$4 sm:$0xff]   ;;  %v5893_v52 = vld [vmem:[%s6303_s29 + $0x208] ss:$16 sps:$4 sm:$0xff]  }
 0x150   : > { %4199 = vmatpush2.bf16.msra.mxu0 %v5839_v62  ;;  %v5896_v62 = vld [vmem:[%s6303_s29 + $0x408] ss:$16 sps:$4 sm:$0xff]  }
 0x151   : > { %4240 = vmatpush2.bf16.msra.mxu1 %v5842_v53  ;;  %4200 = vmatprep.subr.bf16.mxu0 %v5847_v54  ;;  %v5901_v53 = vld [vmem:[%s6303_s29 + $0x3ec] ss:$16 sps:$4 sm:$0xff]  }
 0x152   : > { %4241 = vmatprep.subr.bf16.mxu1 %v5850_v55  ;;  %v5904_v54 = vld [vmem:[%s6303_s29 + $0x5ec] ss:$16 sps:$4 sm:$0xff]   ;;  %v5899_v55 = vld [vmem:[%s6303_s29 + $0x3e8] ss:$16 sps:$4 sm:$0xff]  }
 0x154   : > { %4201 = vmatpush2.bf16.msra.mxu0 %v5845_v37  ;;  %v5902_v37 = vld [vmem:[%s6303_s29 + $0x5e8] ss:$16 sps:$4 sm:$0xff]  }
 0x155   : > { %4242 = vmatpush2.bf16.msra.mxu1 %v5848_v58  ;;  %4252 = vmatprep.subr.bf16.mxu0 %v5853_v59  ;;  %v5907_v58 = vld [vmem:[%s6303_s29 + $0x3cc] ss:$16 sps:$4 sm:$0xff]  }
 0x156   : > { %4293 = vmatprep.subr.bf16.mxu1 %v5856_v60  ;;  %v5910_v59 = vld [vmem:[%s6303_s29 + $0x5cc] ss:$16 sps:$4 sm:$0xff]   ;;  %v5905_v60 = vld [vmem:[%s6303_s29 + $0x3c8] ss:$16 sps:$4 sm:$0xff]  }
 0x157   : > { %v3958_v7 = vpop.f32.mrf.mxu0  ;;  %4203 = vmatmul.mubr.bf16.vlgmr.msra.gmra.mxu0 %v6749_v1 }
 0x158   : > { %v3999_v9 = vpop.f32.mrf.mxu1  ;;  %4244 = vmatmul.mubr.bf16.vlgmr.msra.gmra.mxu1 %v6391_v15  ;;  %v3959_v51 = vadd.f32 %v3958_v7, %v6681_v31  ;;  %4253 = vmatpush1.bf16.msra.mxu0 %v5851_v63  ;;  %v5908_v63 = vld [vmem:[%s6303_s29 + $0x5c8] ss:$16 sps:$4 sm:$0xff]   ;;  %v5922_v7 = vld [vmem:[%s6303_s29 + $0x58c] ss:$16 sps:$4 sm:$0xff]  }
 0x159   : > { %4294 = vmatpush1.bf16.msra.mxu1 %v5854_v0  ;;  %v3960_v12 = vpop.f32.mrf.mxu0  ;;  %4254 = vmatprep.subr.bf16.mxu0 %v5859_v3  ;;  %v5913_v0 = vld [vmem:[%s6303_s29 + $0x3ac] ss:$16 sps:$4 sm:$0xff]  }
 0x15a   : > { %v4001_v10 = vpop.f32.mrf.mxu1  ;;  %4295 = vmatprep.subr.bf16.mxu1 %v5862_v4  ;;  %v6760_v16 = vadd.f32 %v3999_v9, %v3959_v51  ;;  %v3961_v17 = vadd.f32 %v3960_v12, %v6685_v38  ;;  %4284 = vmatprep.mubr.bf16.mxu0 %v6372_v2  ;;  %v5871_v38 = vld [vmem:[%s6303_s29 + $0x28c] ss:$16 sps:$4 sm:$0xff]   ;;  %v5911_v4 = vld [vmem:[%s6303_s29 + $0x3a8] ss:$16 sps:$4 sm:$0xff]  }
 0x15b   : > { %4325 = vmatprep.mubr.bf16.mxu1 %v6397_v19  ;;  %v3962_v15 = vpop.f32.mrf.mxu0  ;;  %v5874_v2 = vld [vmem:[%s6303_s29 + $0x48c] ss:$16 sps:$4 sm:$0xff]   ;;  %v5869_v19 = vld [vmem:[%s6303_s29 + $0x288] ss:$16 sps:$4 sm:$0xff]  }
 0x15c   : > { %v4003_v31 = vpop.f32.mrf.mxu1  ;;  %v6767_v22 = vadd.f32 %v4001_v10, %v3961_v17  ;;  %4255 = vmatpush1.bf16.msra.mxu0 %v5857_v5  ;;  %v5916_v3 = vld [vmem:[%s6303_s29 + $0x5ac] ss:$16 sps:$4 sm:$0xff]   ;;  %v5914_v5 = vld [vmem:[%s6303_s29 + $0x5a8] ss:$16 sps:$4 sm:$0xff]  }
 0x15d   : > { %4296 = vmatpush1.bf16.msra.mxu1 %v5860_v6  ;;  %v3963_v23 = vpop.f32.mrf.mxu0  ;;  %4256 = vmatprep.subr.bf16.mxu0 %v5865_v13  ;;  %v5919_v6 = vld [vmem:[%s6303_s29 + $0x38c] ss:$16 sps:$4 sm:$0xff]   ;;  %v5917_v9 = vld [vmem:[%s6303_s29 + $0x388] ss:$16 sps:$4 sm:$0xff]  }
 0x15e   : > { %v4004_v26 = vpop.f32.mrf.mxu1  ;;  %4297 = vmatprep.subr.bf16.mxu1 %v5868_v14  ;;  %v5920_v51 = vld [vmem:[%s6303_s29 + $0x588] ss:$16 sps:$4 sm:$0xff]   ;;  %v5925_v12 = vld [vmem:[%s6303_s29 + $0x36c] ss:$16 sps:$4 sm:$0xff]  }
 0x15f   : > { %v5928_v10 = vld [vmem:[%s6303_s29 + $0x56c] ss:$16 sps:$4 sm:$0xff]   ;;  %v5923_v13 = vld [vmem:[%s6303_s29 + $0x368] ss:$16 sps:$4 sm:$0xff]  }
 0x160   : > { %4257 = vmatpush1.bf16.msra.mxu0 %v5863_v42  ;;  %v5926_v14 = vld [vmem:[%s6303_s29 + $0x568] ss:$16 sps:$4 sm:$0xff]   ;;  %v5931_v17 = vld [vmem:[%s6303_s29 + $0x34c] ss:$16 sps:$4 sm:$0xff]  }
 0x161   : > { %4298 = vmatpush1.bf16.msra.mxu1 %v5866_v21  ;;  %4258 = vmatprep.subr.bf16.mxu0 %v5871_v38  ;;  %v5934_v42 = vld [vmem:[%s6303_s29 + $0x54c] ss:$16 sps:$4 sm:$0xff]   ;;  %v5929_v21 = vld [vmem:[%s6303_s29 + $0x348] ss:$16 sps:$4 sm:$0xff]  }
 0x162   : > { %4299 = vmatprep.subr.bf16.mxu1 %v5874_v2  ;;  %v5932_v15 = vld [vmem:[%s6303_s29 + $0x548] ss:$16 sps:$4 sm:$0xff]   ;;  %v5937_v31 = vld [vmem:[%s6303_s29 + $0x32c] ss:$16 sps:$4 sm:$0xff]  }
 0x163   : > { %v5940_v23 = vld [vmem:[%s6303_s29 + $0x52c] ss:$16 sps:$4 sm:$0xff]   ;;  %v5935_v26 = vld [vmem:[%s6303_s29 + $0x328] ss:$16 sps:$4 sm:$0xff]  }
 0x164   : > { %4259 = vmatpush1.bf16.msra.mxu0 %v5869_v19  ;;  %v5938_v38 = vld [vmem:[%s6303_s29 + $0x528] ss:$16 sps:$4 sm:$0xff]   ;;  %v5943_v2 = vld [vmem:[%s6303_s29 + $0x30c] ss:$16 sps:$4 sm:$0xff]  }
 0x165   : > { %4300 = vmatpush1.bf16.msra.mxu1 %v5872_v27  ;;  %4260 = vmatprep.subr.bf16.mxu0 %v5877_v29  ;;  %v5946_v19 = vld [vmem:[%s6303_s29 + $0x50c] ss:$16 sps:$4 sm:$0xff]   ;;  %v5941_v27 = vld [vmem:[%s6303_s29 + $0x308] ss:$16 sps:$4 sm:$0xff]  }
 0x166   : > { %4301 = vmatprep.subr.bf16.mxu1 %v5880_v30  ;;  %v5944_v29 = vld [vmem:[%s6303_s29 + $0x508] ss:$16 sps:$4 sm:$0xff]   ;;  %v5949_v30 = vld [vmem:[%s6303_s29 + $0x6ec] ss:$16 sps:$4 sm:$0xff]  }
 0x168   : > { %4261 = vmatpush1.bf16.msra.mxu0 %v5875_v33  ;;  %v5952_v33 = vld [vmem:[%s6303_s29 + $0x8ec] ss:$16 sps:$4 sm:$0xff]  }
 0x169   : > { %4302 = vmatpush1.bf16.msra.mxu1 %v5878_v8  ;;  %4262 = vmatprep.subr.bf16.mxu0 %v5883_v35  ;;  %v5947_v8 = vld [vmem:[%s6303_s29 + $0x6e8] ss:$16 sps:$4 sm:$0xff]  }
 0x16a   : > { %4303 = vmatprep.subr.bf16.mxu1 %v5886_v36  ;;  %v5950_v35 = vld [vmem:[%s6303_s29 + $0x8e8] ss:$16 sps:$4 sm:$0xff]   ;;  %v5955_v36 = vld [vmem:[%s6303_s29 + $0x6cc] ss:$16 sps:$4 sm:$0xff]  }
 0x16c   : > { %4263 = vmatpush1.bf16.msra.mxu0 %v5881_v39  ;;  %v5958_v39 = vld [vmem:[%s6303_s29 + $0x8cc] ss:$16 sps:$4 sm:$0xff]  }
 0x16d   : > { %4304 = vmatpush1.bf16.msra.mxu1 %v5884_v40  ;;  %4264 = vmatprep.subr.bf16.mxu0 %v5889_v41 }
 0x16e   : > { %4305 = vmatprep.subr.bf16.mxu1 %v5892_v34 }
 0x170   : > { %4265 = vmatpush1.bf16.msra.mxu0 %v5887_v46  ;;  %v5953_v46 = vld [vmem:[%s6303_s29 + $0x6c8] ss:$16 sps:$4 sm:$0xff]  }
 0x171   : > { %4306 = vmatpush1.bf16.msra.mxu1 %v5890_v47  ;;  %4266 = vmatprep.subr.bf16.mxu0 %v5895_v48  ;;  %v5956_v47 = vld [vmem:[%s6303_s29 + $0x8c8] ss:$16 sps:$4 sm:$0xff]  }
 0x172   : > { %4307 = vmatprep.subr.bf16.mxu1 %v5898_v49 }
 0x174   : > { %4267 = vmatpush1.bf16.msra.mxu0 %v5893_v52  ;;  %v5961_v52 = vld [vmem:[%s6303_s29 + $0x6ac] ss:$16 sps:$4 sm:$0xff]  }
 0x175   : > { %4308 = vmatpush1.bf16.msra.mxu1 %v5896_v62  ;;  %4268 = vmatprep.subr.bf16.mxu0 %v5901_v53  ;;  %v5964_v62 = vld [vmem:[%s6303_s29 + $0x8ac] ss:$16 sps:$4 sm:$0xff]  }
 0x176   : > { %4309 = vmatprep.subr.bf16.mxu1 %v5904_v54 }
 0x178   : > { %4269 = vmatpush2.bf16.msra.mxu0 %v5899_v55  ;;  %v5959_v55 = vld [vmem:[%s6303_s29 + $0x6a8] ss:$16 sps:$4 sm:$0xff]  }
 0x179   : > { %4310 = vmatpush2.bf16.msra.mxu1 %v5902_v37  ;;  %4270 = vmatprep.subr.bf16.mxu0 %v5907_v58  ;;  %v5962_v37 = vld [vmem:[%s6303_s29 + $0x8a8] ss:$16 sps:$4 sm:$0xff]  }
 0x17a   : > { %4311 = vmatprep.subr.bf16.mxu1 %v5910_v59 }
 0x17c   : > { %4271 = vmatpush2.bf16.msra.mxu0 %v5905_v60  ;;  %v5968_v60 = vld [vmem:[%s6303_s29 + $0x888] ss:$16 sps:$4 sm:$0xff]  }
 0x17d   : > { %4312 = vmatpush2.bf16.msra.mxu1 %v5908_v63  ;;  %4272 = vmatprep.subr.bf16.mxu0 %v5913_v0  ;;  %v5973_v63 = vld [vmem:[%s6303_s29 + $0x66c] ss:$16 sps:$4 sm:$0xff]  }
 0x17e   : > { %4313 = vmatprep.subr.bf16.mxu1 %v5916_v3  ;;  %v5976_v0 = vld [vmem:[%s6303_s29 + $0x86c] ss:$16 sps:$4 sm:$0xff]   ;;  %v5971_v3 = vld [vmem:[%s6303_s29 + $0x668] ss:$16 sps:$4 sm:$0xff]  }
 0x180   : > { %4273 = vmatpush2.bf16.msra.mxu0 %v5911_v4  ;;  %v5974_v4 = vld [vmem:[%s6303_s29 + $0x868] ss:$16 sps:$4 sm:$0xff]  }
 0x181   : > { %4314 = vmatpush2.bf16.msra.mxu1 %v5914_v5  ;;  %4274 = vmatprep.subr.bf16.mxu0 %v5919_v6  ;;  %v5979_v5 = vld [vmem:[%s6303_s29 + $0x64c] ss:$16 sps:$4 sm:$0xff]  }
 0x182   : > { %4315 = vmatprep.subr.bf16.mxu1 %v5922_v7  ;;  %v5982_v6 = vld [vmem:[%s6303_s29 + $0x84c] ss:$16 sps:$4 sm:$0xff]   ;;  %v5977_v7 = vld [vmem:[%s6303_s29 + $0x648] ss:$16 sps:$4 sm:$0xff]  }
 0x184   : > { %4275 = vmatpush2.bf16.msra.mxu0 %v5917_v9  ;;  %v5980_v9 = vld [vmem:[%s6303_s29 + $0x848] ss:$16 sps:$4 sm:$0xff]  }
 0x185   : > { %4316 = vmatpush2.bf16.msra.mxu1 %v5920_v51  ;;  %4276 = vmatprep.subr.bf16.mxu0 %v5925_v12  ;;  %v5985_v51 = vld [vmem:[%s6303_s29 + $0x62c] ss:$16 sps:$4 sm:$0xff]  }
 0x186   : > { %4317 = vmatprep.subr.bf16.mxu1 %v5928_v10  ;;  %v5988_v12 = vld [vmem:[%s6303_s29 + $0x82c] ss:$16 sps:$4 sm:$0xff]   ;;  %v5983_v10 = vld [vmem:[%s6303_s29 + $0x628] ss:$16 sps:$4 sm:$0xff]  }
 0x188   : > { %4277 = vmatpush2.bf16.msra.mxu0 %v5923_v13  ;;  %v5986_v13 = vld [vmem:[%s6303_s29 + $0x828] ss:$16 sps:$4 sm:$0xff]  }
 0x189   : > { %4318 = vmatpush2.bf16.msra.mxu1 %v5926_v14  ;;  %4278 = vmatprep.subr.bf16.mxu0 %v5931_v17  ;;  %v5991_v14 = vld [vmem:[%s6303_s29 + $0x60c] ss:$16 sps:$4 sm:$0xff]  }
 0x18a   : > { %4319 = vmatprep.subr.bf16.mxu1 %v5934_v42  ;;  %v5994_v17 = vld [vmem:[%s6303_s29 + $0x80c] ss:$16 sps:$4 sm:$0xff]   ;;  %v5989_v42 = vld [vmem:[%s6303_s29 + $0x608] ss:$16 sps:$4 sm:$0xff]  }
 0x18c   : > { %4279 = vmatpush2.bf16.msra.mxu0 %v5929_v21  ;;  %v5992_v21 = vld [vmem:[%s6303_s29 + $0x808] ss:$16 sps:$4 sm:$0xff]  }
 0x18d   : > { %4320 = vmatpush2.bf16.msra.mxu1 %v5932_v15  ;;  %4280 = vmatprep.subr.bf16.mxu0 %v5937_v31  ;;  %v5997_v15 = vld [vmem:[%s6303_s29 + $0x7ec] ss:$16 sps:$4 sm:$0xff]  }
 0x18e   : > { %4321 = vmatprep.subr.bf16.mxu1 %v5940_v23  ;;  %v6000_v31 = vld [vmem:[%s6303_s29 + $0x9ec] ss:$16 sps:$4 sm:$0xff]   ;;  %v5995_v23 = vld [vmem:[%s6303_s29 + $0x7e8] ss:$16 sps:$4 sm:$0xff]  }
 0x190   : > { %4281 = vmatpush2.bf16.msra.mxu0 %v5935_v26  ;;  %v5998_v26 = vld [vmem:[%s6303_s29 + $0x9e8] ss:$16 sps:$4 sm:$0xff]  }
 0x191   : > { %4322 = vmatpush2.bf16.msra.mxu1 %v5938_v38  ;;  %4282 = vmatprep.subr.bf16.mxu0 %v5943_v2  ;;  %v6003_v38 = vld [vmem:[%s6303_s29 + $0x7cc] ss:$16 sps:$4 sm:$0xff]  }
 0x192   : > { %4323 = vmatprep.subr.bf16.mxu1 %v5946_v19  ;;  %v6006_v2 = vld [vmem:[%s6303_s29 + $0x9cc] ss:$16 sps:$4 sm:$0xff]   ;;  %v6001_v19 = vld [vmem:[%s6303_s29 + $0x7c8] ss:$16 sps:$4 sm:$0xff]  }
 0x194   : > { %4283 = vmatpush2.bf16.msra.mxu0 %v5941_v27  ;;  %v6004_v27 = vld [vmem:[%s6303_s29 + $0x9c8] ss:$16 sps:$4 sm:$0xff]  }
 0x195   : > { %4324 = vmatpush2.bf16.msra.mxu1 %v5944_v29  ;;  %4334 = vmatprep.subr.bf16.mxu0 %v5949_v30  ;;  %v6009_v29 = vld [vmem:[%s6303_s29 + $0x7ac] ss:$16 sps:$4 sm:$0xff]  }
 0x196   : > { %4375 = vmatprep.subr.bf16.mxu1 %v5952_v33  ;;  %v6012_v30 = vld [vmem:[%s6303_s29 + $0x9ac] ss:$16 sps:$4 sm:$0xff]   ;;  %v6007_v33 = vld [vmem:[%s6303_s29 + $0x7a8] ss:$16 sps:$4 sm:$0xff]  }
 0x197   : > { %v4040_v40 = vpop.f32.mrf.mxu0  ;;  %4285 = vmatmul.mubr.bf16.vlgmr.msra.gmra.mxu0 %v6401_v20 }
 0x198   : > { %v4081_v41 = vpop.f32.mrf.mxu1  ;;  %4326 = vmatmul.mubr.bf16.vlgmr.msra.gmra.mxu1 %v6474_v28  ;;  %v4041_v34 = vadd.f32 %v4040_v40, %v6760_v16  ;;  %4335 = vmatpush1.bf16.msra.mxu0 %v5947_v8  ;;  %v6010_v8 = vld [vmem:[%s6303_s29 + $0x9a8] ss:$16 sps:$4 sm:$0xff]  }
 0x199   : > { %4376 = vmatpush1.bf16.msra.mxu1 %v5950_v35  ;;  %v4042_v48 = vpop.f32.mrf.mxu0  ;;  %4336 = vmatprep.subr.bf16.mxu0 %v5955_v36  ;;  %v6015_v35 = vld [vmem:[%s6303_s29 + $0x78c] ss:$16 sps:$4 sm:$0xff]   ;;  %v6016_v40 = vld [vmem:[%s6303_s29 + $0x988] ss:$16 sps:$4 sm:$0xff]  }
 0x19a   : > { %v4083_v49 = vpop.f32.mrf.mxu1  ;;  %4377 = vmatprep.subr.bf16.mxu1 %v5958_v39  ;;  %v6834_v53 = vadd.f32 %v4081_v41, %v4041_v34  ;;  %v4043_v20 = vadd.f32 %v4042_v48, %v6767_v22  ;;  %4366 = vmatprep.mubr.bf16.mxu0 %v6409_v25  ;;  %v5967_v25 = vld [vmem:[%s6303_s29 + $0x68c] ss:$16 sps:$4 sm:$0xff]   ;;  %v5965_v22 = vld [vmem:[%s6303_s29 + $0x688] ss:$16 sps:$4 sm:$0xff]  }
 0x19b   : > { %4407 = vmatprep.mubr.bf16.mxu1 %v6503_v43  ;;  %v4044_v28 = vpop.f32.mrf.mxu0  ;;  %v5970_v43 = vld [vmem:[%s6303_s29 + $0x88c] ss:$16 sps:$4 sm:$0xff]   ;;  %v6013_v39 = vld [vmem:[%s6303_s29 + $0x788] ss:$16 sps:$4 sm:$0xff]  }
 0x19c   : > { %v4085_v16 = vpop.f32.mrf.mxu1  ;;  %v6839_v54 = vadd.f32 %v4083_v49, %v4043_v20  ;;  %4337 = vmatpush1.bf16.msra.mxu0 %v5953_v46  ;;  %v6018_v36 = vld [vmem:[%s6303_s29 + $0x98c] ss:$16 sps:$4 sm:$0xff]   ;;  %v6019_v46 = vld [vmem:[%s6303_s29 + $0x768] ss:$16 sps:$4 sm:$0xff]  }
 0x19d   : > { %4378 = vmatpush1.bf16.msra.mxu1 %v5956_v47  ;;  %v4045_v58 = vpop.f32.mrf.mxu0  ;;  %4338 = vmatprep.subr.bf16.mxu0 %v5961_v52  ;;  %v6021_v41 = vld [vmem:[%s6303_s29 + $0x76c] ss:$16 sps:$4 sm:$0xff]   ;;  %v6022_v47 = vld [vmem:[%s6303_s29 + $0x968] ss:$16 sps:$4 sm:$0xff]  }
 0x19e   : > { %v4086_v59 = vpop.f32.mrf.mxu1  ;;  %4379 = vmatprep.subr.bf16.mxu1 %v5964_v62  ;;  %v6024_v34 = vld [vmem:[%s6303_s29 + $0x96c] ss:$16 sps:$4 sm:$0xff]   ;;  %v6025_v52 = vld [vmem:[%s6303_s29 + $0x748] ss:$16 sps:$4 sm:$0xff]  }
 0x19f   : > { %v6027_v48 = vld [vmem:[%s6303_s29 + $0x74c] ss:$16 sps:$4 sm:$0xff]   ;;  %v6028_v62 = vld [vmem:[%s6303_s29 + $0x948] ss:$16 sps:$4 sm:$0xff]  }
 0x1a0   : > { %4339 = vmatpush1.bf16.msra.mxu0 %v5959_v55  ;;  %v6030_v49 = vld [vmem:[%s6303_s29 + $0x94c] ss:$16 sps:$4 sm:$0xff]   ;;  %v6031_v16 = vld [vmem:[%s6303_s29 + $0x728] ss:$16 sps:$4 sm:$0xff]  }
 0x1a1   : > { %4380 = vmatpush1.bf16.msra.mxu1 %v5962_v37  ;;  %4340 = vmatprep.subr.bf16.mxu0 %v5967_v25  ;;  %v6033_v20 = vld [vmem:[%s6303_s29 + $0x72c] ss:$16 sps:$4 sm:$0xff]   ;;  %v6034_v55 = vld [vmem:[%s6303_s29 + $0x928] ss:$16 sps:$4 sm:$0xff]  }
 0x1a2   : > { %4381 = vmatprep.subr.bf16.mxu1 %v5970_v43  ;;  %v6036_v28 = vld [vmem:[%s6303_s29 + $0x92c] ss:$16 sps:$4 sm:$0xff]   ;;  %v6037_v59 = vld [vmem:[%s6303_s29 + $0x708] ss:$16 sps:$4 sm:$0xff]  }
 0x1a3   : > { %v6039_v37 = vld [vmem:[%s6303_s29 + $0x70c] ss:$16 sps:$4 sm:$0xff]   ;;  %v6040_v25 = vld [vmem:[%s6303_s29 + $0x908] ss:$16 sps:$4 sm:$0xff]  }
 0x1a4   : > { %4341 = vmatpush1.bf16.msra.mxu0 %v5965_v22  ;;  %v6042_v58 = vld [vmem:[%s6303_s29 + $0x90c] ss:$16 sps:$4 sm:$0xff]  }
 0x1a5   : > { %4382 = vmatpush1.bf16.msra.mxu1 %v5968_v60  ;;  %4342 = vmatprep.subr.bf16.mxu0 %v5973_v63  ;;  %v6045_v43 = vld [vmem:[%s6303_s29 + $0xaec] ss:$16 sps:$4 sm:$0xff]   ;;  %v6043_v60 = vld [vmem:[%s6303_s29 + $0xae8] ss:$16 sps:$4 sm:$0xff]  }
 0x1a6   : > { %4383 = vmatprep.subr.bf16.mxu1 %v5976_v0  ;;  %v6048_v22 = vld [vmem:[%s6303_s29 + $0xcec] ss:$16 sps:$4 sm:$0xff]   ;;  %v6046_v63 = vld [vmem:[%s6303_s29 + $0xce8] ss:$16 sps:$4 sm:$0xff]  }
 0x1a7   : > { %v6051_v0 = vld [vmem:[%s6303_s29 + $0xacc] ss:$16 sps:$4 sm:$0xff]  }
 0x1a8   : > { %4343 = vmatpush1.bf16.msra.mxu0 %v5971_v3  ;;  %v6054_v3 = vld [vmem:[%s6303_s29 + $0xccc] ss:$16 sps:$4 sm:$0xff]  }
 0x1a9   : > { %4384 = vmatpush1.bf16.msra.mxu1 %v5974_v4  ;;  %4344 = vmatprep.subr.bf16.mxu0 %v5979_v5 }
 0x1aa   : > { %4385 = vmatprep.subr.bf16.mxu1 %v5982_v6 }
 0x1ac   : > { %4345 = vmatpush1.bf16.msra.mxu0 %v5977_v7  ;;  %v6049_v7 = vld [vmem:[%s6303_s29 + $0xac8] ss:$16 sps:$4 sm:$0xff]  }
 0x1ad   : > { %4386 = vmatpush1.bf16.msra.mxu1 %v5980_v9  ;;  %4346 = vmatprep.subr.bf16.mxu0 %v5985_v51  ;;  %v6052_v9 = vld [vmem:[%s6303_s29 + $0xcc8] ss:$16 sps:$4 sm:$0xff]  }
 0x1ae   : > { %4387 = vmatprep.subr.bf16.mxu1 %v5988_v12 }
 0x1b0   : > { %4347 = vmatpush1.bf16.msra.mxu0 %v5983_v10  ;;  %v6057_v10 = vld [vmem:[%s6303_s29 + $0xaac] ss:$16 sps:$4 sm:$0xff]  }
 0x1b1   : > { %4388 = vmatpush1.bf16.msra.mxu1 %v5986_v13  ;;  %4348 = vmatprep.subr.bf16.mxu0 %v5991_v14  ;;  %v6060_v13 = vld [vmem:[%s6303_s29 + $0xcac] ss:$16 sps:$4 sm:$0xff]  }
 0x1b2   : > { %4389 = vmatprep.subr.bf16.mxu1 %v5994_v17 }
 0x1b4   : > { %4349 = vmatpush1.bf16.msra.mxu0 %v5989_v42  ;;  %v6055_v42 = vld [vmem:[%s6303_s29 + $0xaa8] ss:$16 sps:$4 sm:$0xff]  }
 0x1b5   : > { %4390 = vmatpush1.bf16.msra.mxu1 %v5992_v21  ;;  %4350 = vmatprep.subr.bf16.mxu0 %v5997_v15  ;;  %v6058_v21 = vld [vmem:[%s6303_s29 + $0xca8] ss:$16 sps:$4 sm:$0xff]  }
 0x1b6   : > { %4391 = vmatprep.subr.bf16.mxu1 %v6000_v31 }
 0x1b8   : > { %4351 = vmatpush2.bf16.msra.mxu0 %v5995_v23  ;;  %v6064_v23 = vld [vmem:[%s6303_s29 + $0xc88] ss:$16 sps:$4 sm:$0xff]  }
 0x1b9   : > { %4392 = vmatpush2.bf16.msra.mxu1 %v5998_v26  ;;  %4352 = vmatprep.subr.bf16.mxu0 %v6003_v38  ;;  %v6069_v26 = vld [vmem:[%s6303_s29 + $0xa6c] ss:$16 sps:$4 sm:$0xff]  }
 0x1ba   : > { %4393 = vmatprep.subr.bf16.mxu1 %v6006_v2  ;;  %v6072_v38 = vld [vmem:[%s6303_s29 + $0xc6c] ss:$16 sps:$4 sm:$0xff]   ;;  %v6067_v2 = vld [vmem:[%s6303_s29 + $0xa68] ss:$16 sps:$4 sm:$0xff]  }
 0x1bc   : > { %4353 = vmatpush2.bf16.msra.mxu0 %v6001_v19  ;;  %v6070_v19 = vld [vmem:[%s6303_s29 + $0xc68] ss:$16 sps:$4 sm:$0xff]  }
 0x1bd   : > { %4394 = vmatpush2.bf16.msra.mxu1 %v6004_v27  ;;  %4354 = vmatprep.subr.bf16.mxu0 %v6009_v29  ;;  %v6075_v27 = vld [vmem:[%s6303_s29 + $0xa4c] ss:$16 sps:$4 sm:$0xff]  }
 0x1be   : > { %4395 = vmatprep.subr.bf16.mxu1 %v6012_v30  ;;  %v6078_v29 = vld [vmem:[%s6303_s29 + $0xc4c] ss:$16 sps:$4 sm:$0xff]   ;;  %v6073_v30 = vld [vmem:[%s6303_s29 + $0xa48] ss:$16 sps:$4 sm:$0xff]  }
 0x1c0   : > { %4355 = vmatpush2.bf16.msra.mxu0 %v6007_v33  ;;  %v6076_v33 = vld [vmem:[%s6303_s29 + $0xc48] ss:$16 sps:$4 sm:$0xff]  }
 0x1c1   : > { %4396 = vmatpush2.bf16.msra.mxu1 %v6010_v8  ;;  %4356 = vmatprep.subr.bf16.mxu0 %v6015_v35  ;;  %v6081_v8 = vld [vmem:[%s6303_s29 + $0xa2c] ss:$16 sps:$4 sm:$0xff]  }
 0x1c2   : > { %4397 = vmatprep.subr.bf16.mxu1 %v6018_v36  ;;  %v6084_v35 = vld [vmem:[%s6303_s29 + $0xc2c] ss:$16 sps:$4 sm:$0xff]   ;;  %v6079_v36 = vld [vmem:[%s6303_s29 + $0xa28] ss:$16 sps:$4 sm:$0xff]  }
 0x1c4   : > { %4357 = vmatpush2.bf16.msra.mxu0 %v6013_v39  ;;  %v6082_v39 = vld [vmem:[%s6303_s29 + $0xc28] ss:$16 sps:$4 sm:$0xff]  }
 0x1c5   : > { %4398 = vmatpush2.bf16.msra.mxu1 %v6016_v40  ;;  %4358 = vmatprep.subr.bf16.mxu0 %v6021_v41  ;;  %v6087_v40 = vld [vmem:[%s6303_s29 + $0xa0c] ss:$16 sps:$4 sm:$0xff]  }
 0x1c6   : > { %4399 = vmatprep.subr.bf16.mxu1 %v6024_v34  ;;  %v6090_v41 = vld [vmem:[%s6303_s29 + $0xc0c] ss:$16 sps:$4 sm:$0xff]   ;;  %v6085_v34 = vld [vmem:[%s6303_s29 + $0xa08] ss:$16 sps:$4 sm:$0xff]  }
 0x1c8   : > { %4359 = vmatpush2.bf16.msra.mxu0 %v6019_v46  ;;  %v6088_v46 = vld [vmem:[%s6303_s29 + $0xc08] ss:$16 sps:$4 sm:$0xff]  }
 0x1c9   : > { %4400 = vmatpush2.bf16.msra.mxu1 %v6022_v47  ;;  %4360 = vmatprep.subr.bf16.mxu0 %v6027_v48  ;;  %v6093_v47 = vld [vmem:[%s6303_s29 + $0xbec] ss:$16 sps:$4 sm:$0xff]  }
 0x1ca   : > { %4401 = vmatprep.subr.bf16.mxu1 %v6030_v49  ;;  %v6096_v48 = vld [vmem:[%s6303_s29 + $0xdec] ss:$16 sps:$4 sm:$0xff]   ;;  %v6091_v49 = vld [vmem:[%s6303_s29 + $0xbe8] ss:$16 sps:$4 sm:$0xff]  }
 0x1cc   : > { %4361 = vmatpush2.bf16.msra.mxu0 %v6025_v52  ;;  %v6094_v52 = vld [vmem:[%s6303_s29 + $0xde8] ss:$16 sps:$4 sm:$0xff]  }
 0x1cd   : > { %4402 = vmatpush2.bf16.msra.mxu1 %v6028_v62  ;;  %4362 = vmatprep.subr.bf16.mxu0 %v6033_v20  ;;  %v6099_v62 = vld [vmem:[%s6303_s29 + $0xbcc] ss:$16 sps:$4 sm:$0xff]  }
 0x1ce   : > { %4403 = vmatprep.subr.bf16.mxu1 %v6036_v28  ;;  %v6102_v20 = vld [vmem:[%s6303_s29 + $0xdcc] ss:$16 sps:$4 sm:$0xff]   ;;  %v6097_v28 = vld [vmem:[%s6303_s29 + $0xbc8] ss:$16 sps:$4 sm:$0xff]  }
 0x1d0   : > { %4363 = vmatpush2.bf16.msra.mxu0 %v6031_v16  ;;  %v6100_v16 = vld [vmem:[%s6303_s29 + $0xdc8] ss:$16 sps:$4 sm:$0xff]  }
 0x1d1   : > { %4404 = vmatpush2.bf16.msra.mxu1 %v6034_v55  ;;  %4364 = vmatprep.subr.bf16.mxu0 %v6039_v37  ;;  %v6105_v55 = vld [vmem:[%s6303_s29 + $0xbac] ss:$16 sps:$4 sm:$0xff]  }
 0x1d2   : > { %4405 = vmatprep.subr.bf16.mxu1 %v6042_v58  ;;  %v6108_v37 = vld [vmem:[%s6303_s29 + $0xdac] ss:$16 sps:$4 sm:$0xff]   ;;  %v6103_v58 = vld [vmem:[%s6303_s29 + $0xba8] ss:$16 sps:$4 sm:$0xff]  }
 0x1d4   : > { %4365 = vmatpush2.bf16.msra.mxu0 %v6037_v59  ;;  %v6106_v59 = vld [vmem:[%s6303_s29 + $0xda8] ss:$16 sps:$4 sm:$0xff]  }
 0x1d5   : > { %4406 = vmatpush2.bf16.msra.mxu1 %v6040_v25  ;;  %4416 = vmatprep.subr.bf16.mxu0 %v6045_v43  ;;  %v6111_v25 = vld [vmem:[%s6303_s29 + $0xb8c] ss:$16 sps:$4 sm:$0xff]  }
 0x1d6   : > { %4457 = vmatprep.subr.bf16.mxu1 %v6048_v22  ;;  %v6114_v43 = vld [vmem:[%s6303_s29 + $0xd8c] ss:$16 sps:$4 sm:$0xff]   ;;  %v6109_v22 = vld [vmem:[%s6303_s29 + $0xb88] ss:$16 sps:$4 sm:$0xff]  }
 0x1d7   : > { %v4122_v4 = vpop.f32.mrf.mxu0  ;;  %4367 = vmatmul.mubr.bf16.vlgmr.msra.gmra.mxu0 %v6481_v32 }
 0x1d8   : > { %v4163_v5 = vpop.f32.mrf.mxu1  ;;  %4408 = vmatmul.mubr.bf16.vlgmr.msra.gmra.mxu1 %v6572_v50  ;;  %v4123_v6 = vadd.f32 %v4122_v4, %v6834_v53  ;;  %4417 = vmatpush1.bf16.msra.mxu0 %v6043_v60  ;;  %v6112_v60 = vld [vmem:[%s6303_s29 + $0xd88] ss:$16 sps:$4 sm:$0xff]  }
 0x1d9   : > { %4458 = vmatpush1.bf16.msra.mxu1 %v6046_v63  ;;  %v4124_v51 = vpop.f32.mrf.mxu0  ;;  %4418 = vmatprep.subr.bf16.mxu0 %v6051_v0  ;;  %v6117_v63 = vld [vmem:[%s6303_s29 + $0xb6c] ss:$16 sps:$4 sm:$0xff]   ;;  %v6118_v4 = vld [vmem:[%s6303_s29 + $0xd68] ss:$16 sps:$4 sm:$0xff]  }
 0x1da   : > { %v4165_v12 = vpop.f32.mrf.mxu1  ;;  %4459 = vmatprep.subr.bf16.mxu1 %v6054_v3  ;;  %v6908_v14 = vadd.f32 %v4163_v5, %v4123_v6  ;;  %v4125_v32 = vadd.f32 %v4124_v51, %v6839_v54  ;;  %4448 = vmatprep.mubr.bf16.mxu0 %v6508_v44  ;;  %v6063_v44 = vld [vmem:[%s6303_s29 + $0xa8c] ss:$16 sps:$4 sm:$0xff]   ;;  %v6061_v54 = vld [vmem:[%s6303_s29 + $0xa88] ss:$16 sps:$4 sm:$0xff]  }
 0x1db   : > { %4489 = vmatprep.mubr.bf16.mxu1 %v6579_v56  ;;  %v4126_v50 = vpop.f32.mrf.mxu0  ;;  %v6066_v56 = vld [vmem:[%s6303_s29 + $0xc8c] ss:$16 sps:$4 sm:$0xff]   ;;  %v6115_v3 = vld [vmem:[%s6303_s29 + $0xb68] ss:$16 sps:$4 sm:$0xff]  }
 0x1dc   : > { %v4167_v53 = vpop.f32.mrf.mxu1  ;;  %v6913_v17 = vadd.f32 %v4165_v12, %v4125_v32  ;;  %4419 = vmatpush1.bf16.msra.mxu0 %v6049_v7  ;;  %v6120_v0 = vld [vmem:[%s6303_s29 + $0xd6c] ss:$16 sps:$4 sm:$0xff]   ;;  %v6121_v7 = vld [vmem:[%s6303_s29 + $0xb48] ss:$16 sps:$4 sm:$0xff]  }
 0x1dd   : > { %4460 = vmatpush1.bf16.msra.mxu1 %v6052_v9  ;;  %v4127_v15 = vpop.f32.mrf.mxu0  ;;  %4420 = vmatprep.subr.bf16.mxu0 %v6057_v10  ;;  %v6123_v5 = vld [vmem:[%s6303_s29 + $0xb4c] ss:$16 sps:$4 sm:$0xff]   ;;  %v6124_v9 = vld [vmem:[%s6303_s29 + $0xd48] ss:$16 sps:$4 sm:$0xff]  }
 0x1de   : > { %v4168_v31 = vpop.f32.mrf.mxu1  ;;  %4461 = vmatprep.subr.bf16.mxu1 %v6060_v13  ;;  %v6126_v6 = vld [vmem:[%s6303_s29 + $0xd4c] ss:$16 sps:$4 sm:$0xff]   ;;  %v6127_v10 = vld [vmem:[%s6303_s29 + $0xb28] ss:$16 sps:$4 sm:$0xff]  }
 0x1df   : > { %v6129_v51 = vld [vmem:[%s6303_s29 + $0xb2c] ss:$16 sps:$4 sm:$0xff]   ;;  %v6130_v13 = vld [vmem:[%s6303_s29 + $0xd28] ss:$16 sps:$4 sm:$0xff]  }
 0x1e0   : > { %4421 = vmatpush1.bf16.msra.mxu0 %v6055_v42  ;;  %v6132_v12 = vld [vmem:[%s6303_s29 + $0xd2c] ss:$16 sps:$4 sm:$0xff]   ;;  %v6133_v53 = vld [vmem:[%s6303_s29 + $0xb08] ss:$16 sps:$4 sm:$0xff]  }
 0x1e1   : > { %4462 = vmatpush1.bf16.msra.mxu1 %v6058_v21  ;;  %4422 = vmatprep.subr.bf16.mxu0 %v6063_v44  ;;  %v6135_v32 = vld [vmem:[%s6303_s29 + $0xb0c] ss:$16 sps:$4 sm:$0xff]   ;;  %v6136_v42 = vld [vmem:[%s6303_s29 + $0xd08] ss:$16 sps:$4 sm:$0xff]  }
 0x1e2   : > { %4463 = vmatprep.subr.bf16.mxu1 %v6066_v56  ;;  %v6138_v50 = vld [vmem:[%s6303_s29 + $0xd0c] ss:$16 sps:$4 sm:$0xff]   ;;  %v6139_v31 = vld [vmem:[%s6303_s29 + $0xee8] ss:$16 sps:$4 sm:$0xff]  }
 0x1e3   : > { %v6141_v21 = vld [vmem:[%s6303_s29 + $0xeec] ss:$16 sps:$4 sm:$0xff]   ;;  %v6142_v44 = vld [vmem:[%s6303_s29 + $0x10e8] ss:$16 sps:$4 sm:$0xff]  }
 0x1e4   : > { %4423 = vmatpush1.bf16.msra.mxu0 %v6061_v54  ;;  %v6144_v15 = vld [vmem:[%s6303_s29 + $0x10ec] ss:$16 sps:$4 sm:$0xff]  }
 0x1e5   : > { %4464 = vmatpush1.bf16.msra.mxu1 %v6064_v23  ;;  %4424 = vmatprep.subr.bf16.mxu0 %v6069_v26  ;;  %v6147_v56 = vld [vmem:[%s6303_s29 + $0xecc] ss:$16 sps:$4 sm:$0xff]  }
 0x1e6   : > { %4465 = vmatprep.subr.bf16.mxu1 %v6072_v38  ;;  %v6150_v54 = vld [vmem:[%s6303_s29 + $0x10cc] ss:$16 sps:$4 sm:$0xff]  }
 0x1e8   : > { %4425 = vmatpush1.bf16.msra.mxu0 %v6067_v2  ;;  %v6145_v2 = vld [vmem:[%s6303_s29 + $0xec8] ss:$16 sps:$4 sm:$0xff]  }
 0x1e9   : > { %4466 = vmatpush1.bf16.msra.mxu1 %v6070_v19  ;;  %4426 = vmatprep.subr.bf16.mxu0 %v6075_v27  ;;  %v6148_v19 = vld [vmem:[%s6303_s29 + $0x10c8] ss:$16 sps:$4 sm:$0xff]  }
 0x1ea   : > { %4467 = vmatprep.subr.bf16.mxu1 %v6078_v29 }
 0x1ec   : > { %4427 = vmatpush1.bf16.msra.mxu0 %v6073_v30  ;;  %v6153_v30 = vld [vmem:[%s6303_s29 + $0xeac] ss:$16 sps:$4 sm:$0xff]  }
 0x1ed   : > { %4468 = vmatpush1.bf16.msra.mxu1 %v6076_v33  ;;  %4428 = vmatprep.subr.bf16.mxu0 %v6081_v8  ;;  %v6156_v33 = vld [vmem:[%s6303_s29 + $0x10ac] ss:$16 sps:$4 sm:$0xff]  }
 0x1ee   : > { %4469 = vmatprep.subr.bf16.mxu1 %v6084_v35  ;;  %v6151_v35 = vld [vmem:[%s6303_s29 + $0xea8] ss:$16 sps:$4 sm:$0xff]  }
 0x1f0   : > { %4429 = vmatpush1.bf16.msra.mxu0 %v6079_v36  ;;  %v6154_v36 = vld [vmem:[%s6303_s29 + $0x10a8] ss:$16 sps:$4 sm:$0xff]  }
 0x1f1   : > { %4470 = vmatpush1.bf16.msra.mxu1 %v6082_v39  ;;  %4430 = vmatprep.subr.bf16.mxu0 %v6087_v40  ;;  %v6157_v40 = vld [vmem:[%s6303_s29 + $0xe88] ss:$16 sps:$4 sm:$0xff]  }
 0x1f2   : > { %4471 = vmatprep.subr.bf16.mxu1 %v6090_v41  ;;  %v6160_v41 = vld [vmem:[%s6303_s29 + $0x1088] ss:$16 sps:$4 sm:$0xff]  }
 0x1f4   : > { %4431 = vmatpush1.bf16.msra.mxu0 %v6085_v34  ;;  %v6165_v34 = vld [vmem:[%s6303_s29 + $0xe6c] ss:$16 sps:$4 sm:$0xff]  }
 0x1f5   : > { %4472 = vmatpush1.bf16.msra.mxu1 %v6088_v46  ;;  %4432 = vmatprep.subr.bf16.mxu0 %v6093_v47  ;;  %v6168_v46 = vld [vmem:[%s6303_s29 + $0x106c] ss:$16 sps:$4 sm:$0xff]   ;;  %v6163_v47 = vld [vmem:[%s6303_s29 + $0xe68] ss:$16 sps:$4 sm:$0xff]  }
 0x1f6   : > { %4473 = vmatprep.subr.bf16.mxu1 %v6096_v48  ;;  %v6166_v48 = vld [vmem:[%s6303_s29 + $0x1068] ss:$16 sps:$4 sm:$0xff]  }
 0x1f8   : > { %4433 = vmatpush2.bf16.msra.mxu0 %v6091_v49  ;;  %v6171_v49 = vld [vmem:[%s6303_s29 + $0xe4c] ss:$16 sps:$4 sm:$0xff]  }
 0x1f9   : > { %4474 = vmatpush2.bf16.msra.mxu1 %v6094_v52  ;;  %4434 = vmatprep.subr.bf16.mxu0 %v6099_v62  ;;  %v6174_v52 = vld [vmem:[%s6303_s29 + $0x104c] ss:$16 sps:$4 sm:$0xff]   ;;  %v6169_v62 = vld [vmem:[%s6303_s29 + $0xe48] ss:$16 sps:$4 sm:$0xff]  }
 0x1fa   : > { %4475 = vmatprep.subr.bf16.mxu1 %v6102_v20  ;;  %v6172_v20 = vld [vmem:[%s6303_s29 + $0x1048] ss:$16 sps:$4 sm:$0xff]  }
 0x1fc   : > { %4435 = vmatpush2.bf16.msra.mxu0 %v6097_v28  ;;  %v6177_v28 = vld [vmem:[%s6303_s29 + $0xe2c] ss:$16 sps:$4 sm:$0xff]  }
 0x1fd   : > { %4476 = vmatpush2.bf16.msra.mxu1 %v6100_v16  ;;  %4436 = vmatprep.subr.bf16.mxu0 %v6105_v55  ;;  %v6180_v16 = vld [vmem:[%s6303_s29 + $0x102c] ss:$16 sps:$4 sm:$0xff]   ;;  %v6175_v55 = vld [vmem:[%s6303_s29 + $0xe28] ss:$16 sps:$4 sm:$0xff]  }
 0x1fe   : > { %4477 = vmatprep.subr.bf16.mxu1 %v6108_v37  ;;  %v6178_v37 = vld [vmem:[%s6303_s29 + $0x1028] ss:$16 sps:$4 sm:$0xff]  }
 0x200   : > { %4437 = vmatpush2.bf16.msra.mxu0 %v6103_v58  ;;  %v6183_v58 = vld [vmem:[%s6303_s29 + $0xe0c] ss:$16 sps:$4 sm:$0xff]  }
 0x201   : > { %4478 = vmatpush2.bf16.msra.mxu1 %v6106_v59  ;;  %4438 = vmatprep.subr.bf16.mxu0 %v6111_v25  ;;  %v6186_v59 = vld [vmem:[%s6303_s29 + $0x100c] ss:$16 sps:$4 sm:$0xff]   ;;  %v6181_v25 = vld [vmem:[%s6303_s29 + $0xe08] ss:$16 sps:$4 sm:$0xff]  }
 0x202   : > { %4479 = vmatprep.subr.bf16.mxu1 %v6114_v43  ;;  %v6184_v43 = vld [vmem:[%s6303_s29 + $0x1008] ss:$16 sps:$4 sm:$0xff]  }
 0x204   : > { %4439 = vmatpush2.bf16.msra.mxu0 %v6109_v22  ;;  %v6189_v22 = vld [vmem:[%s6303_s29 + $0xfec] ss:$16 sps:$4 sm:$0xff]  }
 0x205   : > { %4480 = vmatpush2.bf16.msra.mxu1 %v6112_v60  ;;  %4440 = vmatprep.subr.bf16.mxu0 %v6117_v63  ;;  %v6192_v60 = vld [vmem:[%s6303_s29 + $0x11ec] ss:$16 sps:$4 sm:$0xff]   ;;  %v6187_v63 = vld [vmem:[%s6303_s29 + $0xfe8] ss:$16 sps:$4 sm:$0xff]  }
 0x206   : > { %4481 = vmatprep.subr.bf16.mxu1 %v6120_v0  ;;  %v6190_v0 = vld [vmem:[%s6303_s29 + $0x11e8] ss:$16 sps:$4 sm:$0xff]  }
 0x208   : > { %4441 = vmatpush2.bf16.msra.mxu0 %v6115_v3  ;;  %v6195_v3 = vld [vmem:[%s6303_s29 + $0xfcc] ss:$16 sps:$4 sm:$0xff]  }
 0x209   : > { %4482 = vmatpush2.bf16.msra.mxu1 %v6118_v4  ;;  %4442 = vmatprep.subr.bf16.mxu0 %v6123_v5  ;;  %v6198_v4 = vld [vmem:[%s6303_s29 + $0x11cc] ss:$16 sps:$4 sm:$0xff]   ;;  %v6193_v5 = vld [vmem:[%s6303_s29 + $0xfc8] ss:$16 sps:$4 sm:$0xff]  }
 0x20a   : > { %4483 = vmatprep.subr.bf16.mxu1 %v6126_v6  ;;  %v6196_v6 = vld [vmem:[%s6303_s29 + $0x11c8] ss:$16 sps:$4 sm:$0xff]  }
 0x20c   : > { %4443 = vmatpush2.bf16.msra.mxu0 %v6121_v7  ;;  %v6201_v7 = vld [vmem:[%s6303_s29 + $0xfac] ss:$16 sps:$4 sm:$0xff]  }
 0x20d   : > { %4484 = vmatpush2.bf16.msra.mxu1 %v6124_v9  ;;  %4444 = vmatprep.subr.bf16.mxu0 %v6129_v51  ;;  %v6204_v9 = vld [vmem:[%s6303_s29 + $0x11ac] ss:$16 sps:$4 sm:$0xff]   ;;  %v6199_v51 = vld [vmem:[%s6303_s29 + $0xfa8] ss:$16 sps:$4 sm:$0xff]  }
 0x20e   : > { %4485 = vmatprep.subr.bf16.mxu1 %v6132_v12  ;;  %v6202_v12 = vld [vmem:[%s6303_s29 + $0x11a8] ss:$16 sps:$4 sm:$0xff]  }
 0x210   : > { %4445 = vmatpush2.bf16.msra.mxu0 %v6127_v10  ;;  %v6207_v10 = vld [vmem:[%s6303_s29 + $0xf8c] ss:$16 sps:$4 sm:$0xff]  }
 0x211   : > { %4486 = vmatpush2.bf16.msra.mxu1 %v6130_v13  ;;  %4446 = vmatprep.subr.bf16.mxu0 %v6135_v32  ;;  %v6210_v13 = vld [vmem:[%s6303_s29 + $0x118c] ss:$16 sps:$4 sm:$0xff]   ;;  %v6205_v32 = vld [vmem:[%s6303_s29 + $0xf88] ss:$16 sps:$4 sm:$0xff]  }
 0x212   : > { %4487 = vmatprep.subr.bf16.mxu1 %v6138_v50  ;;  %v6208_v50 = vld [vmem:[%s6303_s29 + $0x1188] ss:$16 sps:$4 sm:$0xff]  }
 0x214   : > { %4447 = vmatpush2.bf16.msra.mxu0 %v6133_v53  ;;  %v6213_v53 = vld [vmem:[%s6303_s29 + $0xf6c] ss:$16 sps:$4 sm:$0xff]  }
 0x215   : > { %4488 = vmatpush2.bf16.msra.mxu1 %v6136_v42  ;;  %4498 = vmatprep.subr.bf16.mxu0 %v6141_v21  ;;  %v6216_v42 = vld [vmem:[%s6303_s29 + $0x116c] ss:$16 sps:$4 sm:$0xff]   ;;  %v6211_v21 = vld [vmem:[%s6303_s29 + $0xf68] ss:$16 sps:$4 sm:$0xff]  }
 0x216   : > { %4539 = vmatprep.subr.bf16.mxu1 %v6144_v15  ;;  %v6214_v15 = vld [vmem:[%s6303_s29 + $0x1168] ss:$16 sps:$4 sm:$0xff]  }
 0x217   : > { %v4204_v23 = vpop.f32.mrf.mxu0  ;;  %4449 = vmatmul.mubr.bf16.vlgmr.msra.gmra.mxu0 %v6583_v57 }
 0x218   : > { %v6975_v26 = vpop.f32.mrf.mxu1  ;;  %4490 = vmatmul.mubr.bf16.vlgmr.msra.gmra.mxu1 %v6656_v11  ;;  %v6980_v38 = vadd.f32 %v4204_v23, %v6908_v14  ;;  %4499 = vmatpush1.bf16.msra.mxu0 %v6139_v31  ;;  %v6219_v31 = vld [vmem:[%s6303_s29 + $0xf4c] ss:$16 sps:$4 sm:$0xff]  }
 0x219   : > { %4540 = vmatpush1.bf16.msra.mxu1 %v6142_v44  ;;  %v4206_v27 = vpop.f32.mrf.mxu0  ;;  %4500 = vmatprep.subr.bf16.mxu0 %v6147_v56  ;;  %v6222_v44 = vld [vmem:[%s6303_s29 + $0x114c] ss:$16 sps:$4 sm:$0xff]   ;;  %v6217_v56 = vld [vmem:[%s6303_s29 + $0xf48] ss:$16 sps:$4 sm:$0xff]  }
 0x21a   : > { %v6984_v29 = vpop.f32.mrf.mxu1  ;;  %4541 = vmatprep.subr.bf16.mxu1 %v6150_v54  ;;  %v6989_v57 = vadd.f32 %v4206_v27, %v6913_v17  ;;  %4530 = vmatprep.mubr.bf16.mxu0 %v6591_v61  ;;  %v6159_v61 = vld [vmem:[%s6303_s29 + $0xe8c] ss:$16 sps:$4 sm:$0xff]   ;;  %v6220_v54 = vld [vmem:[%s6303_s29 + $0x1148] ss:$16 sps:$4 sm:$0xff]  }
 0x21b   : > { %4571 = vmatprep.mubr.bf16.mxu1 %v6675_v24  ;;  %v4208_v11 = vpop.f32.mrf.mxu0  ;;  %v6162_v24 = vld [vmem:[%s6303_s29 + $0x108c] ss:$16 sps:$4 sm:$0xff]   ;;  %v6226_v27 = vld [vmem:[%s6303_s29 + $0x1128] ss:$16 sps:$4 sm:$0xff]  }
 0x21c   : > { %v4249_v14 = vpop.f32.mrf.mxu1  ;;  %v4584_v8 = vcombine.low %v6980_v38, %v6989_v57  ;;  %4501 = vmatpush1.bf16.msra.mxu0 %v6145_v2  ;;  %v6225_v23 = vld [vmem:[%s6303_s29 + $0xf2c] ss:$16 sps:$4 sm:$0xff]   ;;  %v6229_v11 = vld [vmem:[%s6303_s29 + $0xf08] ss:$16 sps:$4 sm:$0xff]  }
 0x21d   : > { %4542 = vmatpush1.bf16.msra.mxu1 %v6148_v19  ;;  %v4209_v39 = vpop.f32.mrf.mxu0  ;;  %4502 = vmatprep.subr.bf16.mxu0 %v6153_v30  ;;  %v6228_v2 = vld [vmem:[%s6303_s29 + $0x112c] ss:$16 sps:$4 sm:$0xff]   ;;  %v6223_v19 = vld [vmem:[%s6303_s29 + $0xf28] ss:$16 sps:$4 sm:$0xff]  }
 0x21e   : > { %v4250_v17 = vpop.f32.mrf.mxu1  ;;  %4543 = vmatprep.subr.bf16.mxu1 %v6156_v33  ;;  %v6231_v30 = vld [vmem:[%s6303_s29 + $0xf0c] ss:$16 sps:$4 sm:$0xff]   ;;  %v6232_v14 = vld [vmem:[%s6303_s29 + $0x1108] ss:$16 sps:$4 sm:$0xff]  }
 0x21f   : > { %v6234_v33 = vld [vmem:[%s6303_s29 + $0x110c] ss:$16 sps:$4 sm:$0xff]  }
 0x220   : > { %4503 = vmatpush1.bf16.msra.mxu0 %v6151_v35 }
 0x221   : > { %4544 = vmatpush1.bf16.msra.mxu1 %v6154_v36  ;;  %4504 = vmatprep.subr.bf16.mxu0 %v6159_v61 }
 0x222   : > { %4545 = vmatprep.subr.bf16.mxu1 %v6162_v24 }
 0x224   : > { %4505 = vmatpush1.bf16.msra.mxu0 %v6157_v40 }
 0x225   : > { %4546 = vmatpush1.bf16.msra.mxu1 %v6160_v41  ;;  %4506 = vmatprep.subr.bf16.mxu0 %v6165_v34 }
 0x226   : > { %4547 = vmatprep.subr.bf16.mxu1 %v6168_v46 }
 0x228   : > { %4507 = vmatpush1.bf16.msra.mxu0 %v6163_v47 }
 0x229   : > { %4548 = vmatpush1.bf16.msra.mxu1 %v6166_v48  ;;  %4508 = vmatprep.subr.bf16.mxu0 %v6171_v49 }
 0x22a   : > { %4549 = vmatprep.subr.bf16.mxu1 %v6174_v52 }
 0x22c   : > { %4509 = vmatpush1.bf16.msra.mxu0 %v6169_v62 }
 0x22d   : > { %4550 = vmatpush1.bf16.msra.mxu1 %v6172_v20  ;;  %4510 = vmatprep.subr.bf16.mxu0 %v6177_v28 }
 0x22e   : > { %4551 = vmatprep.subr.bf16.mxu1 %v6180_v16 }
 0x230   : > { %4511 = vmatpush1.bf16.msra.mxu0 %v6175_v55 }
 0x231   : > { %4552 = vmatpush1.bf16.msra.mxu1 %v6178_v37  ;;  %4512 = vmatprep.subr.bf16.mxu0 %v6183_v58 }
 0x232   : > { %4553 = vmatprep.subr.bf16.mxu1 %v6186_v59 }
 0x234   : > { %4513 = vmatpush1.bf16.msra.mxu0 %v6181_v25 }
 0x235   : > { %4554 = vmatpush1.bf16.msra.mxu1 %v6184_v43  ;;  %4514 = vmatprep.subr.bf16.mxu0 %v6189_v22 }
 0x236   : > { %4555 = vmatprep.subr.bf16.mxu1 %v6192_v60 }
 0x238   : > { %4515 = vmatpush2.bf16.msra.mxu0 %v6187_v63 }
 0x239   : > { %4556 = vmatpush2.bf16.msra.mxu1 %v6190_v0  ;;  %4516 = vmatprep.subr.bf16.mxu0 %v6195_v3 }
 0x23a   : > { %4557 = vmatprep.subr.bf16.mxu1 %v6198_v4 }
 0x23c   : > { %4517 = vmatpush2.bf16.msra.mxu0 %v6193_v5  ;;  %v6249_v5 = vmov 1983009808  }
 0x23d   : > { %4558 = vmatpush2.bf16.msra.mxu1 %v6196_v6  ;;  %4518 = vmatprep.subr.bf16.mxu0 %v6201_v7  ;;  %v4587_v6 = vunpack.c.l.s4 %v6249_v5 }
 0x23e   : > { %4559 = vmatprep.subr.bf16.mxu1 %v6204_v9 }
 0x240   : > { %4519 = vmatpush2.bf16.msra.mxu0 %v6199_v51 }
 0x241   : > { %4560 = vmatpush2.bf16.msra.mxu1 %v6202_v12  ;;  %4520 = vmatprep.subr.bf16.mxu0 %v6207_v10  ;;  %v4588_v12 = vunpack.c.0.s8 %v4587_v6 }
 0x242   : > { %4561 = vmatprep.subr.bf16.mxu1 %v6210_v13 }
 0x244   : > { %4521 = vmatpush2.bf16.msra.mxu0 %v6205_v32 }
 0x245   : > { %4562 = vmatpush2.bf16.msra.mxu1 %v6208_v50  ;;  %4522 = vmatprep.subr.bf16.mxu0 %v6213_v53 }
 0x246   : > { %4563 = vmatprep.subr.bf16.mxu1 %v6216_v42 }
 0x248   : > { %4523 = vmatpush2.bf16.msra.mxu0 %v6211_v21 }
 0x249   : > { %4564 = vmatpush2.bf16.msra.mxu1 %v6214_v15  ;;  %4524 = vmatprep.subr.bf16.mxu0 %v6219_v31  ;;  %v4591_v15 = vsub.s32 %v4588_v12, %v6345_v45 }
 0x24a   : > { %4565 = vmatprep.subr.bf16.mxu1 %v6222_v44 }
 0x24c   : > { %4525 = vmatpush2.bf16.msra.mxu0 %v6217_v56 }
 0x24d   : > { %4566 = vmatpush2.bf16.msra.mxu1 %v6220_v54  ;;  %4526 = vmatprep.subr.bf16.mxu0 %v6225_v23 }
 0x24e   : > { %4567 = vmatprep.subr.bf16.mxu1 %v6228_v2  ;;  %v4592_v2 = vrot.slane %v4584_v8, %v4591_v15 }
 0x250   : > { %4527 = vmatpush2.bf16.msra.mxu0 %v6223_v19 }
 0x251   : > { %4568 = vmatpush2.bf16.msra.mxu1 %v6226_v27  ;;  %4528 = vmatprep.subr.bf16.mxu0 %v6231_v30  ;;  %v241_v27 = vld [vmem:[#allocation2] sm:$0xff] }
 0x252   : > { %4569 = vmatprep.subr.bf16.mxu1 %v6234_v33 }
 0x254   : > { %4529 = vmatpush2.bf16.msra.mxu0 %v6229_v11 }
 0x255   : > { %4570 = vmatpush2.bf16.msra.mxu1 %v6232_v14 }
 0x257   : > { %v4286_v35 = vpop.f32.mrf.mxu0  ;;  %4531 = vmatmul.mubr.bf16.vlgmr.msra.gmra.mxu0 %v6668_v18 }
 0x258   : > { %v4327_v36 = vpop.f32.mrf.mxu1  ;;  %4572 = vmatmul.mubr.bf16.vlgmr.msra.gmra.mxu1 %v6749_v1  ;;  %v4287_v39 = vadd.f32 %v4286_v35, %v6975_v26 }
 0x259   : > { %v4288_v17 = vpop.f32.mrf.mxu0 }
 0x25a   : > { %v4329_v61 = vpop.f32.mrf.mxu1  ;;  %v4328_v24 = vadd.f32 %v4327_v36, %v4287_v39  ;;  %v4289_v40 = vadd.f32 %v4288_v17, %v6984_v29 }
 0x25b   : > { %v4290_v41 = vpop.f32.mrf.mxu0 }
 0x25c   : > { %v4331_v34 = vpop.f32.mrf.mxu1  ;;  %v4330_v46 = vadd.f32 %v4329_v61, %v4289_v40 }
 0x25d   : > { %v4291_v47 = vpop.f32.mrf.mxu0 }
 0x25e   : > { %v4332_v48 = vpop.f32.mrf.mxu1 }
 0x297   : > { %v4368_v49 = vpop.f32.mrf.mxu0 }
 0x298   : > { %v4409_v52 = vpop.f32.mrf.mxu1  ;;  %v4369_v62 = vadd.f32 %v4368_v49, %v4328_v24 }
 0x299   : > { %v4370_v20 = vpop.f32.mrf.mxu0 }
 0x29a   : > { %v4411_v28 = vpop.f32.mrf.mxu1  ;;  %v4410_v18 = vadd.f32 %v4409_v52, %v4369_v62  ;;  %v4371_v16 = vadd.f32 %v4370_v20, %v4330_v46 }
 0x29b   : > { %v4372_v1 = vpop.f32.mrf.mxu0 }
 0x29c   : > { %v4413_v55 = vpop.f32.mrf.mxu1  ;;  %v4412_v26 = vadd.f32 %v4411_v28, %v4371_v16 }
 0x29d   : > { %v4373_v37 = vpop.f32.mrf.mxu0 }
 0x29e   : > { %v4414_v58 = vpop.f32.mrf.mxu1 }
 0x2d7   : > { %v4450_v59 = vpop.f32.mrf.mxu0 }
 0x2d8   : > { %v4491_v25 = vpop.f32.mrf.mxu1  ;;  %v4451_v29 = vadd.f32 %v4450_v59, %v4410_v18 }
 0x2d9   : > { %v4452_v43 = vpop.f32.mrf.mxu0 }
 0x2da   : > { %v4493_v22 = vpop.f32.mrf.mxu1  ;;  %v4492_v60 = vadd.f32 %v4491_v25, %v4451_v29  ;;  %v4453_v7 = vadd.f32 %v4452_v43, %v4412_v26 }
 0x2db   : > { %v4454_v63 = vpop.f32.mrf.mxu0 }
 0x2dc   : > { %v4495_v0 = vpop.f32.mrf.mxu1  ;;  %v4494_v10 = vadd.f32 %v4493_v22, %v4453_v7 }
 0x2dd   : > { %v4455_v3 = vpop.f32.mrf.mxu0 }
 0x2de   : > { %v4496_v4 = vpop.f32.mrf.mxu1 }
 0x317   : > { %v4532_v9 = vpop.f32.mrf.mxu0 }
 0x318   : > { %v4573_v51 = vpop.f32.mrf.mxu1  ;;  %v4533_v13 = vadd.f32 %v4532_v9, %v4492_v60 }
 0x319   : > { %v4534_v32 = vpop.f32.mrf.mxu0 }
 0x31a   : > { %v4575_v50 = vpop.f32.mrf.mxu1  ;;  %v4535_v53 = vadd.f32 %v4534_v32, %v4494_v10  ;;  %v4574_v31 = vadd.f32 %v4573_v51, %v4533_v13 }
 0x31b   : > { %v4536_v42 = vpop.f32.mrf.mxu0 }
 0x31c   : > { %v4577_v21 = vpop.f32.mrf.mxu1  ;;  %v4576_v44 = vadd.f32 %v4575_v50, %v4535_v53 }
 0x31d   : > { %v4537_v56 = vpop.f32.mrf.mxu0 }
 0x31e   : > { %v4578_v54 = vpop.f32.mrf.mxu1  ;;  %v4585_v23 = vcombine.low %v4574_v31, %v4576_v44 }
 0x320   : > { %v4599_v19 = vrot.slane %v4585_v23, %v4591_v15 }
 0x322   : > { %v4600_v30 = vcombine.low %v4592_v2, %v4599_v19  ;;  %4607 = sbr.rel (%p5353_p6) target bundleno = 1010 (0x3f2), region = 48 }
 0x324   : > { %v4602_v33 = vadd.f32 %v4600_v30, %v241_v27 }
 0x326   : > { %4603 = vst [vmem:[#allocation2] sm:$0xff] %v4602_v33 }
 0x327   : > { %v4609_v11 = vld [vmem:[%s7076_s2] sm:$0xf]  ;;  %v4613_v14 = vsub.s32 0, %v6345_v45  ;;  %v4617_v35 = vsub.s32 1, %v6345_v45  ;;  %v4621_v36 = vsub.s32 2, %v6345_v45  ;;  %v4625_v38 = vsub.s32 3, %v6345_v45 }
 0x328   : > { %v4647_v57 = vld [vmem:[%s7077_s3] sm:$0xf]  ;;  %vm4706_vm0 = vcmask 1041408   ;;  %v5354_v5 = vld [vmem:[#allocation3] ss:$0 sm:$0xff]  ;;  %vm4730_vm1 = vcmask 1024  }
 0x329   : > { %v4614_v8 = vrot.slane %v4609_v11, %v4613_v14  ;;  %v4618_v39 = vrot.slane %v4609_v11, %v4617_v35  ;;  %v4622_v17 = vrot.slane %v4609_v11, %v4621_v36  ;;  %v4652_v61 = vrot.slane %v4647_v57, %v4613_v14 }
 0x32a   : > { %v4626_v24 = vrot.slane %v4609_v11, %v4625_v38  ;;  %v4656_v40 = vrot.slane %v4647_v57, %v4617_v35  ;;  %v4660_v41 = vrot.slane %v4647_v57, %v4621_v36  ;;  %v4664_v34 = vrot.slane %v4647_v57, %v4625_v38 }
 0x32b   : > { %v4627_v46 = vcombine.low %v4614_v8, %v4618_v39 }
 0x32c   : > { %v4628_v47 = vcombine.low %v4622_v17, %v4626_v24  ;;  %v4665_v48 = vcombine.low %v4652_v61, %v4656_v40  ;;  %v4666_v49 = vcombine.low %v4660_v41, %v4664_v34 }
 0x32d   : > { %v4635_v52 = vrot.slane %v4627_v46, %v4591_v15  ;;  %v4608_v28 = vld [vmem:[#allocation2] sm:$0xff] }
 0x32e   : > { %v4642_v62 = vrot.slane %v4628_v47, %v4591_v15  ;;  %v4673_v20 = vrot.slane %v4665_v48, %v4591_v15  ;;  %v4680_v45 = vrot.slane %v4666_v49, %v4591_v15 }
 0x330   : > { %v4643_v18 = vcombine.low %v4635_v52, %v4642_v62  ;;  %v4681_v1 = vcombine.low %v4673_v20, %v4680_v45 }
 0x332   : > { %v4645_v16 = vadd.f32 %v4643_v18, %v4608_v28 }
 0x334   : > { %v4646_v55 = vmax.f32 %v4645_v16, 0.0 }
 0x336   : > { %v4683_v26 = vmul.f32 %v4681_v1, %v4646_v55 }
 0x338   : > { %v4685_v37 = vcombine.high %v4683_v26, %v4683_v26  ;;  %v4692_v58 = vrot.slane %v4683_v26, %v4591_v15 }
 0x33a   : > { %v4699_v59 = vrot.slane %v4685_v37, %v4591_v15  ;;  %v4700_v25 = vcombine.high %v4692_v58, %v4692_v58  ;;  %v4707_v29 = vsel %vm4706_vm0, %v4692_v58, 0.0 }
 0x33c   : > { %v4701_v43 = vcombine.high %v4699_v59, %v4699_v59  ;;  %v4708_v22 = vsel %vm4706_vm0, %v4700_v25, 0.0  ;;  %v4710_v60 = vsel %vm4706_vm0, %v4699_v59, 0.0 }
 0x33d   : > { %v4709_v63 = vadd.f32 %v4708_v22, %v4707_v29 }
 0x33e   : > { %v4712_v0 = vsel %vm4706_vm0, %v4701_v43, 0.0 }
 0x33f   : > { %v4711_v3 = vadd.f32 %v4710_v60, %v4709_v63 }
 0x341   : > { %v4713_v4 = vadd.f32 %v4712_v0, %v4711_v3 }
 0x343   : > { %4714 = vadd.xlane.f32.xlu0 %v4713_v4 }
 0x3cc   : > { %v4715_v6 = vpop.xlane.xlu0 %4714 }
 0x3cd   : > { %v4723_v7 = vadd.f32 %v5354_v5, %v4715_v6 }
 0x3cf   : > { %v4724_v9 = vsub.f32 0.0, %v4723_v7 }
 0x3d1   : > { %v4725_v51 = vmul.f32 1.442695, %v4724_v9 }
 0x3d3   : > { %6235 = vpow2.f32 %v4725_v51 }
 0x3e0   : > { %v6236_v12 = vpop.eup %6235 }
 0x3e1   : > { %v4727_v10 = vadd.f32 1.0, %v6236_v12 }
 0x3e3   : > { %6237 = vrcp.f32 %v4727_v10 }
 0x3f0   : > { %v6238_v13 = vpop.eup %6237 }
 0x3f1   : > { %4731 = vst.msk [vmem:[%s7079_s5] sm:$0x3] %vm4730_vm1, %v6238_v13 }
 0x3f2 PF: > { %s17_s20 = sadd.s32 1, %s6245_s20  }
 0x3f3   : > { %p14_p7 = scmp.ge.s32.totalorder %s17_s20, 4  }
 0x3f5   :  { %16 = sbr.rel (!%p14_p7) target bundleno = 3 (0x3), region = 77 }

</bundles_post_ra>
